<compile_context>
chip_gen: v6e
topology: v6e:2x2x1
jax: 0.10.0
libtpu: 0.0.40
codegen_flags: <defaults>
</compile_context>

<pallas_src>
import functools

import jax
import jax.numpy as jnp
import numpy as np
from jax import lax
from jax.experimental import pallas as pl
from jax.experimental.pallas import tpu as pltpu


# ---------------------------------------------------------------------------
# Kernel: one batch sample per grid step.  All tensors are (C_pad, H*W) slabs.
# ---------------------------------------------------------------------------
def fusion_kernel(col_ref, s_ref, s0_ref,
                  w1_ref, b1_ref, w2_ref, b2_ref, w3_ref, b3_ref, w4_ref, b4_ref,
                  w5a_ref, w5b_ref, b5_ref, w6a_ref, w6b_ref, b6_ref,
                  w7a_ref, w7b_ref, b7_ref,
                  out_ref, *, W, n_split):
    HW = col_ref.shape[-1]
    col = col_ref[...]                      # (1, HW) int32, col[0, i] = i % W
    S = s_ref[0]                            # (Cin1_pad, HW)  full U-Net input
    x0 = s0_ref[0]                          # (8, HW)         s[0] (first 3 channels)

    def shift(x, s, sx):
        # out[:, h*W+w] = x at spatial (h + sy, w + sx), zero outside the image.
        c = x.shape[0]
        if s > 0:
            xs = jnp.concatenate([x[:, s:], jnp.zeros((c, s), jnp.float32)], axis=1)
        elif s < 0:
            xs = jnp.concatenate([jnp.zeros((c, -s), jnp.float32), x[:, :HW + s]], axis=1)
        else:
            xs = x
        if sx == 1:
            xs = jnp.where(col < W - 1, xs, 0.0)
        elif sx == -1:
            xs = jnp.where(col >= 1, xs, 0.0)
        return xs

    def shifted_taps(parts):
        # For each of the 9 conv taps, the shifted version of every input part.
        taps = []
        for kh in range(3):
            for kw in range(3):
                s = (kh - 1) * W + (kw - 1)
                taps.append([shift(p, s, kw - 1) for p in parts])
        return taps

    def conv3x3(parts, w_refs, b_ref):
        # parts: list of (Cin_pad, HW) slabs whose channel-concat is the conv input.
        # w_refs[p][k] is the (Co_pad, Cin_pad) tap matrix for tap k of part p.
        taps = shifted_taps(parts)
        acc = jnp.zeros((b_ref.shape[0], HW), jnp.float32)
        for k in range(9):
            for patch, wr in zip(taps[k], w_refs):
                acc = acc + jnp.dot(wr[k], patch, preferred_element_type=jnp.float32)
        return acc + b_ref[...]             # bias (Co_pad, 1) broadcasts over lanes

    relu = lambda v: jnp.maximum(v, 0.0)

    e1 = relu(conv3x3([S], [w1_ref], b1_ref))
    e2 = relu(conv3x3([e1], [w2_ref], b2_ref))
    e3 = relu(conv3x3([e2], [w3_ref], b3_ref))
    e4 = relu(conv3x3([e3], [w4_ref], b4_ref))
    d1 = relu(conv3x3([e3, e4], [w5a_ref, w5b_ref], b5_ref))
    d2 = relu(conv3x3([e2, d1], [w6a_ref, w6b_ref], b6_ref))

    # d_conv7 -> tanh, computed per 3-channel output group (r_0 .. r_factors),
    # sharing the shifted input slabs across groups.
    taps7 = shifted_taps([e1, d2])
    rs = []
    for g in range(n_split):
        acc = jnp.zeros((b7_ref.shape[1], HW), jnp.float32)
        for k in range(9):
            acc = acc + jnp.dot(w7a_ref[g, k], taps7[k][0],
                                preferred_element_type=jnp.float32)
            acc = acc + jnp.dot(w7b_ref[g, k], taps7[k][1],
                                preferred_element_type=jnp.float32)
        rs.append(jnp.tanh(acc + b7_ref[g]))

    # Curve-enhancement loop: x = x + r_j * (x^2 - x), 5 * (factors+1) times.
    x = x0
    for _ in range(5):
        for j in range(n_split):
            x = x + rs[j] * (x * x - x)

    out_ref[0] = x


# ---------------------------------------------------------------------------
# Wrapper: layout plumbing (pad channels to 8 sublanes, flatten HW to lanes,
# reshuffle conv weights into per-tap matrices) + pallas_call.
# ---------------------------------------------------------------------------
def fusion_forward(S, params, *, factors):
    B, C, H, W = S.shape
    n_split = factors + 1
    assert C == 3 * n_split
    HW = H * W
    CPAD = 8                                   # padded channel count (one sublane tile)
    CIN1 = ((C + 7) // 8) * 8                  # padded input-channel count for e_conv1
    f32 = jnp.float32

    def prep_w(w, ci_pad):
        # torch (Co, Ci, 3, 3) -> (9, Co_pad, Ci_pad), tap-major (kh*3 + kw).
        co, ci = w.shape[0], w.shape[1]
        wt = jnp.transpose(w, (2, 3, 0, 1)).reshape(9, co, ci)
        return jnp.pad(wt, ((0, 0), (0, CPAD - co), (0, ci_pad - ci))).astype(f32)

    def prep_b(b):
        return jnp.pad(b, (0, CPAD - b.shape[0])).reshape(CPAD, 1).astype(f32)

    w1 = prep_w(params["w1"], CIN1); b1 = prep_b(params["b1"])
    w2 = prep_w(params["w2"], CPAD); b2 = prep_b(params["b2"])
    w3 = prep_w(params["w3"], CPAD); b3 = prep_b(params["b3"])
    w4 = prep_w(params["w4"], CPAD); b4 = prep_b(params["b4"])
    w5a = prep_w(params["w5"][:, :3], CPAD); w5b = prep_w(params["w5"][:, 3:], CPAD)
    b5 = prep_b(params["b5"])
    w6a = prep_w(params["w6"][:, :3], CPAD); w6b = prep_w(params["w6"][:, 3:], CPAD)
    b6 = prep_b(params["b6"])
    w7a = jnp.stack([prep_w(params["w7"][3 * g:3 * g + 3, :3], CPAD) for g in range(n_split)])
    w7b = jnp.stack([prep_w(params["w7"][3 * g:3 * g + 3, 3:], CPAD) for g in range(n_split)])
    b7 = jnp.stack([prep_b(params["b7"][3 * g:3 * g + 3]) for g in range(n_split)])

    Sf = S.reshape(B, C, HW).astype(f32)
    S_in = jnp.pad(Sf, ((0, 0), (0, CIN1 - C), (0, 0)))            # (B, CIN1, HW)
    S0_in = jnp.pad(Sf[:, :3], ((0, 0), (0, CPAD - 3), (0, 0)))    # (B, 8, HW)
    col = (jnp.arange(HW, dtype=jnp.int32) % W).reshape(1, HW)

    kernel = functools.partial(fusion_kernel, W=W, n_split=n_split)

    def full(shape):
        return pl.BlockSpec(shape, lambda b, _s=shape: (0,) * len(_s))

    def per_b(shape):
        return pl.BlockSpec((1,) + shape, lambda b, _s=shape: (b,) + (0,) * len(_s))

    out = pl.pallas_call(
        kernel,
        grid=(B,),
        in_specs=[
            full((1, HW)),                       # col indices
            per_b((CIN1, HW)),                   # S  (full U-Net input)
            per_b((CPAD, HW)),                   # s[0]
            full((9, CPAD, CIN1)), full((CPAD, 1)),                           # e_conv1
            full((9, CPAD, CPAD)), full((CPAD, 1)),                           # e_conv2
            full((9, CPAD, CPAD)), full((CPAD, 1)),                           # e_conv3
            full((9, CPAD, CPAD)), full((CPAD, 1)),                           # e_conv4
            full((9, CPAD, CPAD)), full((9, CPAD, CPAD)), full((CPAD, 1)),    # d_conv5
            full((9, CPAD, CPAD)), full((9, CPAD, CPAD)), full((CPAD, 1)),    # d_conv6
            full((n_split, 9, CPAD, CPAD)), full((n_split, 9, CPAD, CPAD)),
            full((n_split, CPAD, 1)),                                         # d_conv7
        ],
        out_specs=per_b((CPAD, HW)),
        out_shape=jax.ShapeDtypeStruct((B, CPAD, HW), f32),
        compiler_params=pltpu.CompilerParams(dimension_semantics=("parallel",)),
    )(col, S_in, S0_in, w1, b1, w2, b2, w3, b3, w4, b4,
      w5a, w5b, b5, w6a, w6b, b6, w7a, w7b, b7)

    # Output is already in the final channel layout; drop the padded rows.
    return out[:, :3, :].reshape(B, 3, H, W)


# ---------------------------------------------------------------------------
# Pure-JAX reference (mirrors the torch code, NCHW) for a correctness check.
# ---------------------------------------------------------------------------
def reference_forward(S, params, factors):
    def conv(x, w, b):
        y = lax.conv_general_dilated(
            x, w, window_strides=(1, 1), padding=((1, 1), (1, 1)),
            dimension_numbers=("NCHW", "OIHW", "NCHW"),
            precision=lax.Precision.HIGHEST)
        return y + b[None, :, None, None]

    relu = lambda v: jnp.maximum(v, 0.0)
    s = [S[:, 3 * i:3 * (i + 1)] for i in range(factors + 1)]
    w_list = [1, 1, 1, 1, 1, 1]
    s = [s[i] * w_list[i] for i in range(len(s))]
    Sc = jnp.concatenate(s, axis=1)
    e1 = relu(conv(Sc, params["w1"], params["b1"]))
    e2 = relu(conv(e1, params["w2"], params["b2"]))
    e3 = relu(conv(e2, params["w3"], params["b3"]))
    e4 = relu(conv(e3, params["w4"], params["b4"]))
    d1 = relu(conv(jnp.concatenate([e3, e4], 1), params["w5"], params["b5"]))
    d2 = relu(conv(jnp.concatenate([e2, d1], 1), params["w6"], params["b6"]))
    O = jnp.tanh(conv(jnp.concatenate([e1, d2], 1), params["w7"], params["b7"]))
    r = [O[:, 3 * j:3 * (j + 1)] for j in range(factors + 1)]
    x = s[0]
    for _ in range(5):
        for j in range(factors + 1):
            x = x + r[j] * (x * x - x)
    return x


# ---------------------------------------------------------------------------
if __name__ == "__main__":
    FACTORS = 3                       # config.factors
    B, H, W = 2, 16, 16
    C = 3 * (FACTORS + 1)             # = 12 input / output channels of the U-Net

    key = jax.random.PRNGKey(0)
    ks = jax.random.split(key, 16)

    def init_conv(kw, kb, co, ci):
        fan_in = ci * 9
        bound = 0.5 / np.sqrt(fan_in)
        w = jax.random.uniform(kw, (co, ci, 3, 3), jnp.float32, -bound, bound)
        b = jax.random.uniform(kb, (co,), jnp.float32, -bound, bound)
        return w, b

    params = {}
    conv_specs = [("1", 3, C), ("2", 3, 3), ("3", 3, 3), ("4", 3, 3),
                  ("5", 3, 6), ("6", 3, 6), ("7", C, 6)]
    for idx, (name, co, ci) in enumerate(conv_specs):
        w, b = init_conv(ks[2 * idx], ks[2 * idx + 1], co, ci)
        params[f"w{name}"] = w
        params[f"b{name}"] = b

    S = jax.random.uniform(ks[14], (B, C, H, W), dtype=jnp.float32)

    out = fusion_forward(S, params, factors=FACTORS)
    out = jax.block_until_ready(out)

    out_ref = reference_forward(S, params, FACTORS)
    out_ref = jax.block_until_ready(out_ref)

    assert out.shape == (B, 3, H, W)
    np.testing.assert_allclose(np.asarray(out), np.asarray(out_ref),
                               rtol=5e-3, atol=5e-3)
    print("KERNEL_OK")
</pallas_src>

<mosaic_0001>
module attributes {stable_mosaic.version = 11 : i64} {
  func.func @fusion_kernel(%arg0: i32, %arg1: memref<1x256xi32, #tpu.memory_space<vmem>>, %arg2: memref<1x16x256xf32, #tpu.memory_space<vmem>>, %arg3: memref<1x8x256xf32, #tpu.memory_space<vmem>>, %arg4: memref<9x8x16xf32, #tpu.memory_space<vmem>>, %arg5: memref<8x1xf32, #tpu.memory_space<vmem>>, %arg6: memref<9x8x8xf32, #tpu.memory_space<vmem>>, %arg7: memref<8x1xf32, #tpu.memory_space<vmem>>, %arg8: memref<9x8x8xf32, #tpu.memory_space<vmem>>, %arg9: memref<8x1xf32, #tpu.memory_space<vmem>>, %arg10: memref<9x8x8xf32, #tpu.memory_space<vmem>>, %arg11: memref<8x1xf32, #tpu.memory_space<vmem>>, %arg12: memref<9x8x8xf32, #tpu.memory_space<vmem>>, %arg13: memref<9x8x8xf32, #tpu.memory_space<vmem>>, %arg14: memref<8x1xf32, #tpu.memory_space<vmem>>, %arg15: memref<9x8x8xf32, #tpu.memory_space<vmem>>, %arg16: memref<9x8x8xf32, #tpu.memory_space<vmem>>, %arg17: memref<8x1xf32, #tpu.memory_space<vmem>>, %arg18: memref<4x9x8x8xf32, #tpu.memory_space<vmem>>, %arg19: memref<4x9x8x8xf32, #tpu.memory_space<vmem>>, %arg20: memref<4x8x1xf32, #tpu.memory_space<vmem>>, %arg21: memref<1x8x256xf32, #tpu.memory_space<vmem>>) attributes {dimension_semantics = [#tpu.dimension_semantics<parallel>], iteration_bounds = array<i64: 2>, scalar_prefetch = 0 : i64, scratch_operands = 0 : i64, tpu.core_type = #tpu.core_type<tc>, window_params = [{pipeline_mode = #tpu.pipeline_mode<synchronous>, transform_indices = @transform_0, window_bounds = array<i64: 1, 256>}, {transform_indices = @transform_1, window_bounds = array<i64: 1, 16, 256>}, {transform_indices = @transform_2, window_bounds = array<i64: 1, 8, 256>}, {pipeline_mode = #tpu.pipeline_mode<synchronous>, transform_indices = @transform_3, window_bounds = array<i64: 9, 8, 16>}, {pipeline_mode = #tpu.pipeline_mode<synchronous>, transform_indices = @transform_4, window_bounds = array<i64: 8, 1>}, {pipeline_mode = #tpu.pipeline_mode<synchronous>, transform_indices = @transform_5, window_bounds = array<i64: 9, 8, 8>}, {pipeline_mode = #tpu.pipeline_mode<synchronous>, transform_indices = @transform_6, window_bounds = array<i64: 8, 1>}, {pipeline_mode = #tpu.pipeline_mode<synchronous>, transform_indices = @transform_7, window_bounds = array<i64: 9, 8, 8>}, {pipeline_mode = #tpu.pipeline_mode<synchronous>, transform_indices = @transform_8, window_bounds = array<i64: 8, 1>}, {pipeline_mode = #tpu.pipeline_mode<synchronous>, transform_indices = @transform_9, window_bounds = array<i64: 9, 8, 8>}, {pipeline_mode = #tpu.pipeline_mode<synchronous>, transform_indices = @transform_10, window_bounds = array<i64: 8, 1>}, {pipeline_mode = #tpu.pipeline_mode<synchronous>, transform_indices = @transform_11, window_bounds = array<i64: 9, 8, 8>}, {pipeline_mode = #tpu.pipeline_mode<synchronous>, transform_indices = @transform_12, window_bounds = array<i64: 9, 8, 8>}, {pipeline_mode = #tpu.pipeline_mode<synchronous>, transform_indices = @transform_13, window_bounds = array<i64: 8, 1>}, {pipeline_mode = #tpu.pipeline_mode<synchronous>, transform_indices = @transform_14, window_bounds = array<i64: 9, 8, 8>}, {pipeline_mode = #tpu.pipeline_mode<synchronous>, transform_indices = @transform_15, window_bounds = array<i64: 9, 8, 8>}, {pipeline_mode = #tpu.pipeline_mode<synchronous>, transform_indices = @transform_16, window_bounds = array<i64: 8, 1>}, {pipeline_mode = #tpu.pipeline_mode<synchronous>, transform_indices = @transform_17, window_bounds = array<i64: 4, 9, 8, 8>}, {pipeline_mode = #tpu.pipeline_mode<synchronous>, transform_indices = @transform_18, window_bounds = array<i64: 4, 9, 8, 8>}, {pipeline_mode = #tpu.pipeline_mode<synchronous>, transform_indices = @transform_19, window_bounds = array<i64: 4, 8, 1>}, {transform_indices = @transform_20, window_bounds = array<i64: 1, 8, 256>}]} {
    %c0 = arith.constant 0 : index
    %c0_0 = arith.constant 0 : index
    %0 = vector.load %arg1[%c0, %c0_0] : memref<1x256xi32, #tpu.memory_space<vmem>>, vector<1x256xi32>
    %c0_1 = arith.constant 0 : index
    %c0_2 = arith.constant 0 : index
    %c0_3 = arith.constant 0 : index
    %1 = vector.load %arg2[%c0_1, %c0_2, %c0_3] : memref<1x16x256xf32, #tpu.memory_space<vmem>>, vector<1x16x256xf32>
    %2 = vector.shape_cast %1 : vector<1x16x256xf32> to vector<16x256xf32>
    %c0_4 = arith.constant 0 : index
    %c0_5 = arith.constant 0 : index
    %c0_6 = arith.constant 0 : index
    %3 = vector.load %arg3[%c0_4, %c0_5, %c0_6] : memref<1x8x256xf32, #tpu.memory_space<vmem>>, vector<1x8x256xf32>
    %4 = vector.shape_cast %3 : vector<1x8x256xf32> to vector<8x256xf32>
    %cst = arith.constant 0.000000e+00 : f32
    %5 = vector.broadcast %cst : f32 to vector<16x17xf32>
    %6 = vector.extract_strided_slice %2 {offsets = [0, 0], sizes = [16, 239], strides = [1, 1]} : vector<16x256xf32> to vector<16x239xf32>
    %7 = tpu.concatenate %5, %6 in 1 : vector<16x17xf32>, vector<16x239xf32> -> vector<16x256xf32>
    %c1_i32 = arith.constant 1 : i32
    %8 = vector.broadcast %c1_i32 : i32 to vector<1x256xi32>
    %9 = arith.cmpi sge, %0, %8 : vector<1x256xi32>
    %cst_7 = arith.constant 0.000000e+00 : f32
    %10 = vector.shape_cast %9 : vector<1x256xi1> to vector<1x256xi1>
    %11 = vector.broadcast %10 : vector<1x256xi1> to vector<16x256xi1>
    %12 = vector.broadcast %cst_7 : f32 to vector<16x256xf32>
    %13 = arith.select %11, %7, %12 : vector<16x256xi1>, vector<16x256xf32>
    %cst_8 = arith.constant 0.000000e+00 : f32
    %14 = vector.broadcast %cst_8 : f32 to vector<16x16xf32>
    %15 = vector.extract_strided_slice %2 {offsets = [0, 0], sizes = [16, 240], strides = [1, 1]} : vector<16x256xf32> to vector<16x240xf32>
    %16 = tpu.concatenate %14, %15 in 1 : vector<16x16xf32>, vector<16x240xf32> -> vector<16x256xf32>
    %cst_9 = arith.constant 0.000000e+00 : f32
    %17 = vector.broadcast %cst_9 : f32 to vector<16x15xf32>
    %18 = vector.extract_strided_slice %2 {offsets = [0, 0], sizes = [16, 241], strides = [1, 1]} : vector<16x256xf32> to vector<16x241xf32>
    %19 = tpu.concatenate %17, %18 in 1 : vector<16x15xf32>, vector<16x241xf32> -> vector<16x256xf32>
    %c15_i32 = arith.constant 15 : i32
    %20 = vector.broadcast %c15_i32 : i32 to vector<1x256xi32>
    %21 = arith.cmpi slt, %0, %20 : vector<1x256xi32>
    %cst_10 = arith.constant 0.000000e+00 : f32
    %22 = vector.shape_cast %21 : vector<1x256xi1> to vector<1x256xi1>
    %23 = vector.broadcast %22 : vector<1x256xi1> to vector<16x256xi1>
    %24 = vector.broadcast %cst_10 : f32 to vector<16x256xf32>
    %25 = arith.select %23, %19, %24 : vector<16x256xi1>, vector<16x256xf32>
    %cst_11 = arith.constant 0.000000e+00 : f32
    %26 = vector.broadcast %cst_11 : f32 to vector<16x1xf32>
    %27 = vector.extract_strided_slice %2 {offsets = [0, 0], sizes = [16, 255], strides = [1, 1]} : vector<16x256xf32> to vector<16x255xf32>
    %28 = tpu.concatenate %26, %27 in 1 : vector<16x1xf32>, vector<16x255xf32> -> vector<16x256xf32>
    %c1_i32_12 = arith.constant 1 : i32
    %29 = vector.broadcast %c1_i32_12 : i32 to vector<1x256xi32>
    %30 = arith.cmpi sge, %0, %29 : vector<1x256xi32>
    %cst_13 = arith.constant 0.000000e+00 : f32
    %31 = vector.shape_cast %30 : vector<1x256xi1> to vector<1x256xi1>
    %32 = vector.broadcast %31 : vector<1x256xi1> to vector<16x256xi1>
    %33 = vector.broadcast %cst_13 : f32 to vector<16x256xf32>
    %34 = arith.select %32, %28, %33 : vector<16x256xi1>, vector<16x256xf32>
    %35 = vector.extract_strided_slice %2 {offsets = [0, 1], sizes = [16, 255], strides = [1, 1]} : vector<16x256xf32> to vector<16x255xf32>
    %cst_14 = arith.constant 0.000000e+00 : f32
    %36 = vector.broadcast %cst_14 : f32 to vector<16x1xf32>
    %37 = tpu.concatenate %35, %36 in 1 : vector<16x255xf32>, vector<16x1xf32> -> vector<16x256xf32>
    %c15_i32_15 = arith.constant 15 : i32
    %38 = vector.broadcast %c15_i32_15 : i32 to vector<1x256xi32>
    %39 = arith.cmpi slt, %0, %38 : vector<1x256xi32>
    %cst_16 = arith.constant 0.000000e+00 : f32
    %40 = vector.shape_cast %39 : vector<1x256xi1> to vector<1x256xi1>
    %41 = vector.broadcast %40 : vector<1x256xi1> to vector<16x256xi1>
    %42 = vector.broadcast %cst_16 : f32 to vector<16x256xf32>
    %43 = arith.select %41, %37, %42 : vector<16x256xi1>, vector<16x256xf32>
    %44 = vector.extract_strided_slice %2 {offsets = [0, 15], sizes = [16, 241], strides = [1, 1]} : vector<16x256xf32> to vector<16x241xf32>
    %cst_17 = arith.constant 0.000000e+00 : f32
    %45 = vector.broadcast %cst_17 : f32 to vector<16x15xf32>
    %46 = tpu.concatenate %44, %45 in 1 : vector<16x241xf32>, vector<16x15xf32> -> vector<16x256xf32>
    %c1_i32_18 = arith.constant 1 : i32
    %47 = vector.broadcast %c1_i32_18 : i32 to vector<1x256xi32>
    %48 = arith.cmpi sge, %0, %47 : vector<1x256xi32>
    %cst_19 = arith.constant 0.000000e+00 : f32
    %49 = vector.shape_cast %48 : vector<1x256xi1> to vector<1x256xi1>
    %50 = vector.broadcast %49 : vector<1x256xi1> to vector<16x256xi1>
    %51 = vector.broadcast %cst_19 : f32 to vector<16x256xf32>
    %52 = arith.select %50, %46, %51 : vector<16x256xi1>, vector<16x256xf32>
    %53 = vector.extract_strided_slice %2 {offsets = [0, 16], sizes = [16, 240], strides = [1, 1]} : vector<16x256xf32> to vector<16x240xf32>
    %cst_20 = arith.constant 0.000000e+00 : f32
    %54 = vector.broadcast %cst_20 : f32 to vector<16x16xf32>
    %55 = tpu.concatenate %53, %54 in 1 : vector<16x240xf32>, vector<16x16xf32> -> vector<16x256xf32>
    %56 = vector.extract_strided_slice %2 {offsets = [0, 17], sizes = [16, 239], strides = [1, 1]} : vector<16x256xf32> to vector<16x239xf32>
    %cst_21 = arith.constant 0.000000e+00 : f32
    %57 = vector.broadcast %cst_21 : f32 to vector<16x17xf32>
    %58 = tpu.concatenate %56, %57 in 1 : vector<16x239xf32>, vector<16x17xf32> -> vector<16x256xf32>
    %c15_i32_22 = arith.constant 15 : i32
    %59 = vector.broadcast %c15_i32_22 : i32 to vector<1x256xi32>
    %60 = arith.cmpi slt, %0, %59 : vector<1x256xi32>
    %cst_23 = arith.constant 0.000000e+00 : f32
    %61 = vector.shape_cast %60 : vector<1x256xi1> to vector<1x256xi1>
    %62 = vector.broadcast %61 : vector<1x256xi1> to vector<16x256xi1>
    %63 = vector.broadcast %cst_23 : f32 to vector<16x256xf32>
    %64 = arith.select %62, %58, %63 : vector<16x256xi1>, vector<16x256xf32>
    %cst_24 = arith.constant 0.000000e+00 : f32
    %65 = vector.broadcast %cst_24 : f32 to vector<8x256xf32>
    %c0_25 = arith.constant 0 : index
    %c0_26 = arith.constant 0 : index
    %c0_27 = arith.constant 0 : index
    %66 = vector.load %arg4[%c0_25, %c0_26, %c0_27] : memref<9x8x16xf32, #tpu.memory_space<vmem>>, vector<1x8x16xf32>
    %67 = vector.shape_cast %66 : vector<1x8x16xf32> to vector<8x16xf32>
    %cst_28 = arith.constant dense<0.000000e+00> : vector<8x256xf32>
    %68 = tpu.matmul %67, %13, %cst_28 {dimension_numbers = #tpu.dot_dimension_numbers<[1], [0], [0], [1], [0, 0, 1, 1], [], []>} : vector<8x16xf32>, vector<16x256xf32>, vector<8x256xf32> -> vector<8x256xf32>
    %69 = arith.addf %65, %68 : vector<8x256xf32>
    %c1 = arith.constant 1 : index
    %c0_29 = arith.constant 0 : index
    %c0_30 = arith.constant 0 : index
    %70 = vector.load %arg4[%c1, %c0_29, %c0_30] : memref<9x8x16xf32, #tpu.memory_space<vmem>>, vector<1x8x16xf32>
    %71 = vector.shape_cast %70 : vector<1x8x16xf32> to vector<8x16xf32>
    %cst_31 = arith.constant dense<0.000000e+00> : vector<8x256xf32>
    %72 = tpu.matmul %71, %16, %cst_31 {dimension_numbers = #tpu.dot_dimension_numbers<[1], [0], [0], [1], [0, 0, 1, 1], [], []>} : vector<8x16xf32>, vector<16x256xf32>, vector<8x256xf32> -> vector<8x256xf32>
    %73 = arith.addf %69, %72 : vector<8x256xf32>
    %c2 = arith.constant 2 : index
    %c0_32 = arith.constant 0 : index
    %c0_33 = arith.constant 0 : index
    %74 = vector.load %arg4[%c2, %c0_32, %c0_33] : memref<9x8x16xf32, #tpu.memory_space<vmem>>, vector<1x8x16xf32>
    %75 = vector.shape_cast %74 : vector<1x8x16xf32> to vector<8x16xf32>
    %cst_34 = arith.constant dense<0.000000e+00> : vector<8x256xf32>
    %76 = tpu.matmul %75, %25, %cst_34 {dimension_numbers = #tpu.dot_dimension_numbers<[1], [0], [0], [1], [0, 0, 1, 1], [], []>} : vector<8x16xf32>, vector<16x256xf32>, vector<8x256xf32> -> vector<8x256xf32>
    %77 = arith.addf %73, %76 : vector<8x256xf32>
    %c3 = arith.constant 3 : index
    %c0_35 = arith.constant 0 : index
    %c0_36 = arith.constant 0 : index
    %78 = vector.load %arg4[%c3, %c0_35, %c0_36] : memref<9x8x16xf32, #tpu.memory_space<vmem>>, vector<1x8x16xf32>
    %79 = vector.shape_cast %78 : vector<1x8x16xf32> to vector<8x16xf32>
    %cst_37 = arith.constant dense<0.000000e+00> : vector<8x256xf32>
    %80 = tpu.matmul %79, %34, %cst_37 {dimension_numbers = #tpu.dot_dimension_numbers<[1], [0], [0], [1], [0, 0, 1, 1], [], []>} : vector<8x16xf32>, vector<16x256xf32>, vector<8x256xf32> -> vector<8x256xf32>
    %81 = arith.addf %77, %80 : vector<8x256xf32>
    %c4 = arith.constant 4 : index
    %c0_38 = arith.constant 0 : index
    %c0_39 = arith.constant 0 : index
    %82 = vector.load %arg4[%c4, %c0_38, %c0_39] : memref<9x8x16xf32, #tpu.memory_space<vmem>>, vector<1x8x16xf32>
    %83 = vector.shape_cast %82 : vector<1x8x16xf32> to vector<8x16xf32>
    %cst_40 = arith.constant dense<0.000000e+00> : vector<8x256xf32>
    %84 = tpu.matmul %83, %2, %cst_40 {dimension_numbers = #tpu.dot_dimension_numbers<[1], [0], [0], [1], [0, 0, 1, 1], [], []>} : vector<8x16xf32>, vector<16x256xf32>, vector<8x256xf32> -> vector<8x256xf32>
    %85 = arith.addf %81, %84 : vector<8x256xf32>
    %c5 = arith.constant 5 : index
    %c0_41 = arith.constant 0 : index
    %c0_42 = arith.constant 0 : index
    %86 = vector.load %arg4[%c5, %c0_41, %c0_42] : memref<9x8x16xf32, #tpu.memory_space<vmem>>, vector<1x8x16xf32>
    %87 = vector.shape_cast %86 : vector<1x8x16xf32> to vector<8x16xf32>
    %cst_43 = arith.constant dense<0.000000e+00> : vector<8x256xf32>
    %88 = tpu.matmul %87, %43, %cst_43 {dimension_numbers = #tpu.dot_dimension_numbers<[1], [0], [0], [1], [0, 0, 1, 1], [], []>} : vector<8x16xf32>, vector<16x256xf32>, vector<8x256xf32> -> vector<8x256xf32>
    %89 = arith.addf %85, %88 : vector<8x256xf32>
    %c6 = arith.constant 6 : index
    %c0_44 = arith.constant 0 : index
    %c0_45 = arith.constant 0 : index
    %90 = vector.load %arg4[%c6, %c0_44, %c0_45] : memref<9x8x16xf32, #tpu.memory_space<vmem>>, vector<1x8x16xf32>
    %91 = vector.shape_cast %90 : vector<1x8x16xf32> to vector<8x16xf32>
    %cst_46 = arith.constant dense<0.000000e+00> : vector<8x256xf32>
    %92 = tpu.matmul %91, %52, %cst_46 {dimension_numbers = #tpu.dot_dimension_numbers<[1], [0], [0], [1], [0, 0, 1, 1], [], []>} : vector<8x16xf32>, vector<16x256xf32>, vector<8x256xf32> -> vector<8x256xf32>
    %93 = arith.addf %89, %92 : vector<8x256xf32>
    %c7 = arith.constant 7 : index
    %c0_47 = arith.constant 0 : index
    %c0_48 = arith.constant 0 : index
    %94 = vector.load %arg4[%c7, %c0_47, %c0_48] : memref<9x8x16xf32, #tpu.memory_space<vmem>>, vector<1x8x16xf32>
    %95 = vector.shape_cast %94 : vector<1x8x16xf32> to vector<8x16xf32>
    %cst_49 = arith.constant dense<0.000000e+00> : vector<8x256xf32>
    %96 = tpu.matmul %95, %55, %cst_49 {dimension_numbers = #tpu.dot_dimension_numbers<[1], [0], [0], [1], [0, 0, 1, 1], [], []>} : vector<8x16xf32>, vector<16x256xf32>, vector<8x256xf32> -> vector<8x256xf32>
    %97 = arith.addf %93, %96 : vector<8x256xf32>
    %c8 = arith.constant 8 : index
    %c0_50 = arith.constant 0 : index
    %c0_51 = arith.constant 0 : index
    %98 = vector.load %arg4[%c8, %c0_50, %c0_51] : memref<9x8x16xf32, #tpu.memory_space<vmem>>, vector<1x8x16xf32>
    %99 = vector.shape_cast %98 : vector<1x8x16xf32> to vector<8x16xf32>
    %cst_52 = arith.constant dense<0.000000e+00> : vector<8x256xf32>
    %100 = tpu.matmul %99, %64, %cst_52 {dimension_numbers = #tpu.dot_dimension_numbers<[1], [0], [0], [1], [0, 0, 1, 1], [], []>} : vector<8x16xf32>, vector<16x256xf32>, vector<8x256xf32> -> vector<8x256xf32>
    %101 = arith.addf %97, %100 : vector<8x256xf32>
    %c0_53 = arith.constant 0 : index
    %c0_54 = arith.constant 0 : index
    %102 = vector.load %arg5[%c0_53, %c0_54] : memref<8x1xf32, #tpu.memory_space<vmem>>, vector<8x1xf32>
    %103 = vector.broadcast %102 : vector<8x1xf32> to vector<8x256xf32>
    %104 = arith.addf %101, %103 : vector<8x256xf32>
    %cst_55 = arith.constant 0.000000e+00 : f32
    %105 = vector.broadcast %cst_55 : f32 to vector<8x256xf32>
    %106 = arith.maximumf %104, %105 : vector<8x256xf32>
    %cst_56 = arith.constant 0.000000e+00 : f32
    %107 = vector.broadcast %cst_56 : f32 to vector<8x17xf32>
    %108 = vector.extract_strided_slice %106 {offsets = [0, 0], sizes = [8, 239], strides = [1, 1]} : vector<8x256xf32> to vector<8x239xf32>
    %109 = tpu.concatenate %107, %108 in 1 : vector<8x17xf32>, vector<8x239xf32> -> vector<8x256xf32>
    %c1_i32_57 = arith.constant 1 : i32
    %110 = vector.broadcast %c1_i32_57 : i32 to vector<1x256xi32>
    %111 = arith.cmpi sge, %0, %110 : vector<1x256xi32>
    %cst_58 = arith.constant 0.000000e+00 : f32
    %112 = vector.shape_cast %111 : vector<1x256xi1> to vector<1x256xi1>
    %113 = vector.broadcast %112 : vector<1x256xi1> to vector<8x256xi1>
    %114 = vector.broadcast %cst_58 : f32 to vector<8x256xf32>
    %115 = arith.select %113, %109, %114 : vector<8x256xi1>, vector<8x256xf32>
    %cst_59 = arith.constant 0.000000e+00 : f32
    %116 = vector.broadcast %cst_59 : f32 to vector<8x16xf32>
    %117 = vector.extract_strided_slice %106 {offsets = [0, 0], sizes = [8, 240], strides = [1, 1]} : vector<8x256xf32> to vector<8x240xf32>
    %118 = tpu.concatenate %116, %117 in 1 : vector<8x16xf32>, vector<8x240xf32> -> vector<8x256xf32>
    %cst_60 = arith.constant 0.000000e+00 : f32
    %119 = vector.broadcast %cst_60 : f32 to vector<8x15xf32>
    %120 = vector.extract_strided_slice %106 {offsets = [0, 0], sizes = [8, 241], strides = [1, 1]} : vector<8x256xf32> to vector<8x241xf32>
    %121 = tpu.concatenate %119, %120 in 1 : vector<8x15xf32>, vector<8x241xf32> -> vector<8x256xf32>
    %c15_i32_61 = arith.constant 15 : i32
    %122 = vector.broadcast %c15_i32_61 : i32 to vector<1x256xi32>
    %123 = arith.cmpi slt, %0, %122 : vector<1x256xi32>
    %cst_62 = arith.constant 0.000000e+00 : f32
    %124 = vector.shape_cast %123 : vector<1x256xi1> to vector<1x256xi1>
    %125 = vector.broadcast %124 : vector<1x256xi1> to vector<8x256xi1>
    %126 = vector.broadcast %cst_62 : f32 to vector<8x256xf32>
    %127 = arith.select %125, %121, %126 : vector<8x256xi1>, vector<8x256xf32>
    %cst_63 = arith.constant 0.000000e+00 : f32
    %128 = vector.broadcast %cst_63 : f32 to vector<8x1xf32>
    %129 = vector.extract_strided_slice %106 {offsets = [0, 0], sizes = [8, 255], strides = [1, 1]} : vector<8x256xf32> to vector<8x255xf32>
    %130 = tpu.concatenate %128, %129 in 1 : vector<8x1xf32>, vector<8x255xf32> -> vector<8x256xf32>
    %c1_i32_64 = arith.constant 1 : i32
    %131 = vector.broadcast %c1_i32_64 : i32 to vector<1x256xi32>
    %132 = arith.cmpi sge, %0, %131 : vector<1x256xi32>
    %cst_65 = arith.constant 0.000000e+00 : f32
    %133 = vector.shape_cast %132 : vector<1x256xi1> to vector<1x256xi1>
    %134 = vector.broadcast %133 : vector<1x256xi1> to vector<8x256xi1>
    %135 = vector.broadcast %cst_65 : f32 to vector<8x256xf32>
    %136 = arith.select %134, %130, %135 : vector<8x256xi1>, vector<8x256xf32>
    %137 = vector.extract_strided_slice %106 {offsets = [0, 1], sizes = [8, 255], strides = [1, 1]} : vector<8x256xf32> to vector<8x255xf32>
    %cst_66 = arith.constant 0.000000e+00 : f32
    %138 = vector.broadcast %cst_66 : f32 to vector<8x1xf32>
    %139 = tpu.concatenate %137, %138 in 1 : vector<8x255xf32>, vector<8x1xf32> -> vector<8x256xf32>
    %c15_i32_67 = arith.constant 15 : i32
    %140 = vector.broadcast %c15_i32_67 : i32 to vector<1x256xi32>
    %141 = arith.cmpi slt, %0, %140 : vector<1x256xi32>
    %cst_68 = arith.constant 0.000000e+00 : f32
    %142 = vector.shape_cast %141 : vector<1x256xi1> to vector<1x256xi1>
    %143 = vector.broadcast %142 : vector<1x256xi1> to vector<8x256xi1>
    %144 = vector.broadcast %cst_68 : f32 to vector<8x256xf32>
    %145 = arith.select %143, %139, %144 : vector<8x256xi1>, vector<8x256xf32>
    %146 = vector.extract_strided_slice %106 {offsets = [0, 15], sizes = [8, 241], strides = [1, 1]} : vector<8x256xf32> to vector<8x241xf32>
    %cst_69 = arith.constant 0.000000e+00 : f32
    %147 = vector.broadcast %cst_69 : f32 to vector<8x15xf32>
    %148 = tpu.concatenate %146, %147 in 1 : vector<8x241xf32>, vector<8x15xf32> -> vector<8x256xf32>
    %c1_i32_70 = arith.constant 1 : i32
    %149 = vector.broadcast %c1_i32_70 : i32 to vector<1x256xi32>
    %150 = arith.cmpi sge, %0, %149 : vector<1x256xi32>
    %cst_71 = arith.constant 0.000000e+00 : f32
    %151 = vector.shape_cast %150 : vector<1x256xi1> to vector<1x256xi1>
    %152 = vector.broadcast %151 : vector<1x256xi1> to vector<8x256xi1>
    %153 = vector.broadcast %cst_71 : f32 to vector<8x256xf32>
    %154 = arith.select %152, %148, %153 : vector<8x256xi1>, vector<8x256xf32>
    %155 = vector.extract_strided_slice %106 {offsets = [0, 16], sizes = [8, 240], strides = [1, 1]} : vector<8x256xf32> to vector<8x240xf32>
    %cst_72 = arith.constant 0.000000e+00 : f32
    %156 = vector.broadcast %cst_72 : f32 to vector<8x16xf32>
    %157 = tpu.concatenate %155, %156 in 1 : vector<8x240xf32>, vector<8x16xf32> -> vector<8x256xf32>
    %158 = vector.extract_strided_slice %106 {offsets = [0, 17], sizes = [8, 239], strides = [1, 1]} : vector<8x256xf32> to vector<8x239xf32>
    %cst_73 = arith.constant 0.000000e+00 : f32
    %159 = vector.broadcast %cst_73 : f32 to vector<8x17xf32>
    %160 = tpu.concatenate %158, %159 in 1 : vector<8x239xf32>, vector<8x17xf32> -> vector<8x256xf32>
    %c15_i32_74 = arith.constant 15 : i32
    %161 = vector.broadcast %c15_i32_74 : i32 to vector<1x256xi32>
    %162 = arith.cmpi slt, %0, %161 : vector<1x256xi32>
    %cst_75 = arith.constant 0.000000e+00 : f32
    %163 = vector.shape_cast %162 : vector<1x256xi1> to vector<1x256xi1>
    %164 = vector.broadcast %163 : vector<1x256xi1> to vector<8x256xi1>
    %165 = vector.broadcast %cst_75 : f32 to vector<8x256xf32>
    %166 = arith.select %164, %160, %165 : vector<8x256xi1>, vector<8x256xf32>
    %cst_76 = arith.constant 0.000000e+00 : f32
    %167 = vector.broadcast %cst_76 : f32 to vector<8x256xf32>
    %c0_77 = arith.constant 0 : index
    %c0_78 = arith.constant 0 : index
    %c0_79 = arith.constant 0 : index
    %168 = vector.load %arg6[%c0_77, %c0_78, %c0_79] : memref<9x8x8xf32, #tpu.memory_space<vmem>>, vector<1x8x8xf32>
    %169 = vector.shape_cast %168 : vector<1x8x8xf32> to vector<8x8xf32>
    %cst_80 = arith.constant dense<0.000000e+00> : vector<8x256xf32>
    %170 = tpu.matmul %169, %115, %cst_80 {dimension_numbers = #tpu.dot_dimension_numbers<[1], [0], [0], [1], [0, 0, 1, 1], [], []>} : vector<8x8xf32>, vector<8x256xf32>, vector<8x256xf32> -> vector<8x256xf32>
    %171 = arith.addf %167, %170 : vector<8x256xf32>
    %c1_81 = arith.constant 1 : index
    %c0_82 = arith.constant 0 : index
    %c0_83 = arith.constant 0 : index
    %172 = vector.load %arg6[%c1_81, %c0_82, %c0_83] : memref<9x8x8xf32, #tpu.memory_space<vmem>>, vector<1x8x8xf32>
    %173 = vector.shape_cast %172 : vector<1x8x8xf32> to vector<8x8xf32>
    %cst_84 = arith.constant dense<0.000000e+00> : vector<8x256xf32>
    %174 = tpu.matmul %173, %118, %cst_84 {dimension_numbers = #tpu.dot_dimension_numbers<[1], [0], [0], [1], [0, 0, 1, 1], [], []>} : vector<8x8xf32>, vector<8x256xf32>, vector<8x256xf32> -> vector<8x256xf32>
    %175 = arith.addf %171, %174 : vector<8x256xf32>
    %c2_85 = arith.constant 2 : index
    %c0_86 = arith.constant 0 : index
    %c0_87 = arith.constant 0 : index
    %176 = vector.load %arg6[%c2_85, %c0_86, %c0_87] : memref<9x8x8xf32, #tpu.memory_space<vmem>>, vector<1x8x8xf32>
    %177 = vector.shape_cast %176 : vector<1x8x8xf32> to vector<8x8xf32>
    %cst_88 = arith.constant dense<0.000000e+00> : vector<8x256xf32>
    %178 = tpu.matmul %177, %127, %cst_88 {dimension_numbers = #tpu.dot_dimension_numbers<[1], [0], [0], [1], [0, 0, 1, 1], [], []>} : vector<8x8xf32>, vector<8x256xf32>, vector<8x256xf32> -> vector<8x256xf32>
    %179 = arith.addf %175, %178 : vector<8x256xf32>
    %c3_89 = arith.constant 3 : index
    %c0_90 = arith.constant 0 : index
    %c0_91 = arith.constant 0 : index
    %180 = vector.load %arg6[%c3_89, %c0_90, %c0_91] : memref<9x8x8xf32, #tpu.memory_space<vmem>>, vector<1x8x8xf32>
    %181 = vector.shape_cast %180 : vector<1x8x8xf32> to vector<8x8xf32>
    %cst_92 = arith.constant dense<0.000000e+00> : vector<8x256xf32>
    %182 = tpu.matmul %181, %136, %cst_92 {dimension_numbers = #tpu.dot_dimension_numbers<[1], [0], [0], [1], [0, 0, 1, 1], [], []>} : vector<8x8xf32>, vector<8x256xf32>, vector<8x256xf32> -> vector<8x256xf32>
    %183 = arith.addf %179, %182 : vector<8x256xf32>
    %c4_93 = arith.constant 4 : index
    %c0_94 = arith.constant 0 : index
    %c0_95 = arith.constant 0 : index
    %184 = vector.load %arg6[%c4_93, %c0_94, %c0_95] : memref<9x8x8xf32, #tpu.memory_space<vmem>>, vector<1x8x8xf32>
    %185 = vector.shape_cast %184 : vector<1x8x8xf32> to vector<8x8xf32>
    %cst_96 = arith.constant dense<0.000000e+00> : vector<8x256xf32>
    %186 = tpu.matmul %185, %106, %cst_96 {dimension_numbers = #tpu.dot_dimension_numbers<[1], [0], [0], [1], [0, 0, 1, 1], [], []>} : vector<8x8xf32>, vector<8x256xf32>, vector<8x256xf32> -> vector<8x256xf32>
    %187 = arith.addf %183, %186 : vector<8x256xf32>
    %c5_97 = arith.constant 5 : index
    %c0_98 = arith.constant 0 : index
    %c0_99 = arith.constant 0 : index
    %188 = vector.load %arg6[%c5_97, %c0_98, %c0_99] : memref<9x8x8xf32, #tpu.memory_space<vmem>>, vector<1x8x8xf32>
    %189 = vector.shape_cast %188 : vector<1x8x8xf32> to vector<8x8xf32>
    %cst_100 = arith.constant dense<0.000000e+00> : vector<8x256xf32>
    %190 = tpu.matmul %189, %145, %cst_100 {dimension_numbers = #tpu.dot_dimension_numbers<[1], [0], [0], [1], [0, 0, 1, 1], [], []>} : vector<8x8xf32>, vector<8x256xf32>, vector<8x256xf32> -> vector<8x256xf32>
    %191 = arith.addf %187, %190 : vector<8x256xf32>
    %c6_101 = arith.constant 6 : index
    %c0_102 = arith.constant 0 : index
    %c0_103 = arith.constant 0 : index
    %192 = vector.load %arg6[%c6_101, %c0_102, %c0_103] : memref<9x8x8xf32, #tpu.memory_space<vmem>>, vector<1x8x8xf32>
    %193 = vector.shape_cast %192 : vector<1x8x8xf32> to vector<8x8xf32>
    %cst_104 = arith.constant dense<0.000000e+00> : vector<8x256xf32>
    %194 = tpu.matmul %193, %154, %cst_104 {dimension_numbers = #tpu.dot_dimension_numbers<[1], [0], [0], [1], [0, 0, 1, 1], [], []>} : vector<8x8xf32>, vector<8x256xf32>, vector<8x256xf32> -> vector<8x256xf32>
    %195 = arith.addf %191, %194 : vector<8x256xf32>
    %c7_105 = arith.constant 7 : index
    %c0_106 = arith.constant 0 : index
    %c0_107 = arith.constant 0 : index
    %196 = vector.load %arg6[%c7_105, %c0_106, %c0_107] : memref<9x8x8xf32, #tpu.memory_space<vmem>>, vector<1x8x8xf32>
    %197 = vector.shape_cast %196 : vector<1x8x8xf32> to vector<8x8xf32>
    %cst_108 = arith.constant dense<0.000000e+00> : vector<8x256xf32>
    %198 = tpu.matmul %197, %157, %cst_108 {dimension_numbers = #tpu.dot_dimension_numbers<[1], [0], [0], [1], [0, 0, 1, 1], [], []>} : vector<8x8xf32>, vector<8x256xf32>, vector<8x256xf32> -> vector<8x256xf32>
    %199 = arith.addf %195, %198 : vector<8x256xf32>
    %c8_109 = arith.constant 8 : index
    %c0_110 = arith.constant 0 : index
    %c0_111 = arith.constant 0 : index
    %200 = vector.load %arg6[%c8_109, %c0_110, %c0_111] : memref<9x8x8xf32, #tpu.memory_space<vmem>>, vector<1x8x8xf32>
    %201 = vector.shape_cast %200 : vector<1x8x8xf32> to vector<8x8xf32>
    %cst_112 = arith.constant dense<0.000000e+00> : vector<8x256xf32>
    %202 = tpu.matmul %201, %166, %cst_112 {dimension_numbers = #tpu.dot_dimension_numbers<[1], [0], [0], [1], [0, 0, 1, 1], [], []>} : vector<8x8xf32>, vector<8x256xf32>, vector<8x256xf32> -> vector<8x256xf32>
    %203 = arith.addf %199, %202 : vector<8x256xf32>
    %c0_113 = arith.constant 0 : index
    %c0_114 = arith.constant 0 : index
    %204 = vector.load %arg7[%c0_113, %c0_114] : memref<8x1xf32, #tpu.memory_space<vmem>>, vector<8x1xf32>
    %205 = vector.broadcast %204 : vector<8x1xf32> to vector<8x256xf32>
    %206 = arith.addf %203, %205 : vector<8x256xf32>
    %cst_115 = arith.constant 0.000000e+00 : f32
    %207 = vector.broadcast %cst_115 : f32 to vector<8x256xf32>
    %208 = arith.maximumf %206, %207 : vector<8x256xf32>
    %cst_116 = arith.constant 0.000000e+00 : f32
    %209 = vector.broadcast %cst_116 : f32 to vector<8x17xf32>
    %210 = vector.extract_strided_slice %208 {offsets = [0, 0], sizes = [8, 239], strides = [1, 1]} : vector<8x256xf32> to vector<8x239xf32>
    %211 = tpu.concatenate %209, %210 in 1 : vector<8x17xf32>, vector<8x239xf32> -> vector<8x256xf32>
    %c1_i32_117 = arith.constant 1 : i32
    %212 = vector.broadcast %c1_i32_117 : i32 to vector<1x256xi32>
    %213 = arith.cmpi sge, %0, %212 : vector<1x256xi32>
    %cst_118 = arith.constant 0.000000e+00 : f32
    %214 = vector.shape_cast %213 : vector<1x256xi1> to vector<1x256xi1>
    %215 = vector.broadcast %214 : vector<1x256xi1> to vector<8x256xi1>
    %216 = vector.broadcast %cst_118 : f32 to vector<8x256xf32>
    %217 = arith.select %215, %211, %216 : vector<8x256xi1>, vector<8x256xf32>
    %cst_119 = arith.constant 0.000000e+00 : f32
    %218 = vector.broadcast %cst_119 : f32 to vector<8x16xf32>
    %219 = vector.extract_strided_slice %208 {offsets = [0, 0], sizes = [8, 240], strides = [1, 1]} : vector<8x256xf32> to vector<8x240xf32>
    %220 = tpu.concatenate %218, %219 in 1 : vector<8x16xf32>, vector<8x240xf32> -> vector<8x256xf32>
    %cst_120 = arith.constant 0.000000e+00 : f32
    %221 = vector.broadcast %cst_120 : f32 to vector<8x15xf32>
    %222 = vector.extract_strided_slice %208 {offsets = [0, 0], sizes = [8, 241], strides = [1, 1]} : vector<8x256xf32> to vector<8x241xf32>
    %223 = tpu.concatenate %221, %222 in 1 : vector<8x15xf32>, vector<8x241xf32> -> vector<8x256xf32>
    %c15_i32_121 = arith.constant 15 : i32
    %224 = vector.broadcast %c15_i32_121 : i32 to vector<1x256xi32>
    %225 = arith.cmpi slt, %0, %224 : vector<1x256xi32>
    %cst_122 = arith.constant 0.000000e+00 : f32
    %226 = vector.shape_cast %225 : vector<1x256xi1> to vector<1x256xi1>
    %227 = vector.broadcast %226 : vector<1x256xi1> to vector<8x256xi1>
    %228 = vector.broadcast %cst_122 : f32 to vector<8x256xf32>
    %229 = arith.select %227, %223, %228 : vector<8x256xi1>, vector<8x256xf32>
    %cst_123 = arith.constant 0.000000e+00 : f32
    %230 = vector.broadcast %cst_123 : f32 to vector<8x1xf32>
    %231 = vector.extract_strided_slice %208 {offsets = [0, 0], sizes = [8, 255], strides = [1, 1]} : vector<8x256xf32> to vector<8x255xf32>
    %232 = tpu.concatenate %230, %231 in 1 : vector<8x1xf32>, vector<8x255xf32> -> vector<8x256xf32>
    %c1_i32_124 = arith.constant 1 : i32
    %233 = vector.broadcast %c1_i32_124 : i32 to vector<1x256xi32>
    %234 = arith.cmpi sge, %0, %233 : vector<1x256xi32>
    %cst_125 = arith.constant 0.000000e+00 : f32
    %235 = vector.shape_cast %234 : vector<1x256xi1> to vector<1x256xi1>
    %236 = vector.broadcast %235 : vector<1x256xi1> to vector<8x256xi1>
    %237 = vector.broadcast %cst_125 : f32 to vector<8x256xf32>
    %238 = arith.select %236, %232, %237 : vector<8x256xi1>, vector<8x256xf32>
    %239 = vector.extract_strided_slice %208 {offsets = [0, 1], sizes = [8, 255], strides = [1, 1]} : vector<8x256xf32> to vector<8x255xf32>
    %cst_126 = arith.constant 0.000000e+00 : f32
    %240 = vector.broadcast %cst_126 : f32 to vector<8x1xf32>
    %241 = tpu.concatenate %239, %240 in 1 : vector<8x255xf32>, vector<8x1xf32> -> vector<8x256xf32>
    %c15_i32_127 = arith.constant 15 : i32
    %242 = vector.broadcast %c15_i32_127 : i32 to vector<1x256xi32>
    %243 = arith.cmpi slt, %0, %242 : vector<1x256xi32>
    %cst_128 = arith.constant 0.000000e+00 : f32
    %244 = vector.shape_cast %243 : vector<1x256xi1> to vector<1x256xi1>
    %245 = vector.broadcast %244 : vector<1x256xi1> to vector<8x256xi1>
    %246 = vector.broadcast %cst_128 : f32 to vector<8x256xf32>
    %247 = arith.select %245, %241, %246 : vector<8x256xi1>, vector<8x256xf32>
    %248 = vector.extract_strided_slice %208 {offsets = [0, 15], sizes = [8, 241], strides = [1, 1]} : vector<8x256xf32> to vector<8x241xf32>
    %cst_129 = arith.constant 0.000000e+00 : f32
    %249 = vector.broadcast %cst_129 : f32 to vector<8x15xf32>
    %250 = tpu.concatenate %248, %249 in 1 : vector<8x241xf32>, vector<8x15xf32> -> vector<8x256xf32>
    %c1_i32_130 = arith.constant 1 : i32
    %251 = vector.broadcast %c1_i32_130 : i32 to vector<1x256xi32>
    %252 = arith.cmpi sge, %0, %251 : vector<1x256xi32>
    %cst_131 = arith.constant 0.000000e+00 : f32
    %253 = vector.shape_cast %252 : vector<1x256xi1> to vector<1x256xi1>
    %254 = vector.broadcast %253 : vector<1x256xi1> to vector<8x256xi1>
    %255 = vector.broadcast %cst_131 : f32 to vector<8x256xf32>
    %256 = arith.select %254, %250, %255 : vector<8x256xi1>, vector<8x256xf32>
    %257 = vector.extract_strided_slice %208 {offsets = [0, 16], sizes = [8, 240], strides = [1, 1]} : vector<8x256xf32> to vector<8x240xf32>
    %cst_132 = arith.constant 0.000000e+00 : f32
    %258 = vector.broadcast %cst_132 : f32 to vector<8x16xf32>
    %259 = tpu.concatenate %257, %258 in 1 : vector<8x240xf32>, vector<8x16xf32> -> vector<8x256xf32>
    %260 = vector.extract_strided_slice %208 {offsets = [0, 17], sizes = [8, 239], strides = [1, 1]} : vector<8x256xf32> to vector<8x239xf32>
    %cst_133 = arith.constant 0.000000e+00 : f32
    %261 = vector.broadcast %cst_133 : f32 to vector<8x17xf32>
    %262 = tpu.concatenate %260, %261 in 1 : vector<8x239xf32>, vector<8x17xf32> -> vector<8x256xf32>
    %c15_i32_134 = arith.constant 15 : i32
    %263 = vector.broadcast %c15_i32_134 : i32 to vector<1x256xi32>
    %264 = arith.cmpi slt, %0, %263 : vector<1x256xi32>
    %cst_135 = arith.constant 0.000000e+00 : f32
    %265 = vector.shape_cast %264 : vector<1x256xi1> to vector<1x256xi1>
    %266 = vector.broadcast %265 : vector<1x256xi1> to vector<8x256xi1>
    %267 = vector.broadcast %cst_135 : f32 to vector<8x256xf32>
    %268 = arith.select %266, %262, %267 : vector<8x256xi1>, vector<8x256xf32>
    %cst_136 = arith.constant 0.000000e+00 : f32
    %269 = vector.broadcast %cst_136 : f32 to vector<8x256xf32>
    %c0_137 = arith.constant 0 : index
    %c0_138 = arith.constant 0 : index
    %c0_139 = arith.constant 0 : index
    %270 = vector.load %arg8[%c0_137, %c0_138, %c0_139] : memref<9x8x8xf32, #tpu.memory_space<vmem>>, vector<1x8x8xf32>
    %271 = vector.shape_cast %270 : vector<1x8x8xf32> to vector<8x8xf32>
    %cst_140 = arith.constant dense<0.000000e+00> : vector<8x256xf32>
    %272 = tpu.matmul %271, %217, %cst_140 {dimension_numbers = #tpu.dot_dimension_numbers<[1], [0], [0], [1], [0, 0, 1, 1], [], []>} : vector<8x8xf32>, vector<8x256xf32>, vector<8x256xf32> -> vector<8x256xf32>
    %273 = arith.addf %269, %272 : vector<8x256xf32>
    %c1_141 = arith.constant 1 : index
    %c0_142 = arith.constant 0 : index
    %c0_143 = arith.constant 0 : index
    %274 = vector.load %arg8[%c1_141, %c0_142, %c0_143] : memref<9x8x8xf32, #tpu.memory_space<vmem>>, vector<1x8x8xf32>
    %275 = vector.shape_cast %274 : vector<1x8x8xf32> to vector<8x8xf32>
    %cst_144 = arith.constant dense<0.000000e+00> : vector<8x256xf32>
    %276 = tpu.matmul %275, %220, %cst_144 {dimension_numbers = #tpu.dot_dimension_numbers<[1], [0], [0], [1], [0, 0, 1, 1], [], []>} : vector<8x8xf32>, vector<8x256xf32>, vector<8x256xf32> -> vector<8x256xf32>
    %277 = arith.addf %273, %276 : vector<8x256xf32>
    %c2_145 = arith.constant 2 : index
    %c0_146 = arith.constant 0 : index
    %c0_147 = arith.constant 0 : index
    %278 = vector.load %arg8[%c2_145, %c0_146, %c0_147] : memref<9x8x8xf32, #tpu.memory_space<vmem>>, vector<1x8x8xf32>
    %279 = vector.shape_cast %278 : vector<1x8x8xf32> to vector<8x8xf32>
    %cst_148 = arith.constant dense<0.000000e+00> : vector<8x256xf32>
    %280 = tpu.matmul %279, %229, %cst_148 {dimension_numbers = #tpu.dot_dimension_numbers<[1], [0], [0], [1], [0, 0, 1, 1], [], []>} : vector<8x8xf32>, vector<8x256xf32>, vector<8x256xf32> -> vector<8x256xf32>
    %281 = arith.addf %277, %280 : vector<8x256xf32>
    %c3_149 = arith.constant 3 : index
    %c0_150 = arith.constant 0 : index
    %c0_151 = arith.constant 0 : index
    %282 = vector.load %arg8[%c3_149, %c0_150, %c0_151] : memref<9x8x8xf32, #tpu.memory_space<vmem>>, vector<1x8x8xf32>
    %283 = vector.shape_cast %282 : vector<1x8x8xf32> to vector<8x8xf32>
    %cst_152 = arith.constant dense<0.000000e+00> : vector<8x256xf32>
    %284 = tpu.matmul %283, %238, %cst_152 {dimension_numbers = #tpu.dot_dimension_numbers<[1], [0], [0], [1], [0, 0, 1, 1], [], []>} : vector<8x8xf32>, vector<8x256xf32>, vector<8x256xf32> -> vector<8x256xf32>
    %285 = arith.addf %281, %284 : vector<8x256xf32>
    %c4_153 = arith.constant 4 : index
    %c0_154 = arith.constant 0 : index
    %c0_155 = arith.constant 0 : index
    %286 = vector.load %arg8[%c4_153, %c0_154, %c0_155] : memref<9x8x8xf32, #tpu.memory_space<vmem>>, vector<1x8x8xf32>
    %287 = vector.shape_cast %286 : vector<1x8x8xf32> to vector<8x8xf32>
    %cst_156 = arith.constant dense<0.000000e+00> : vector<8x256xf32>
    %288 = tpu.matmul %287, %208, %cst_156 {dimension_numbers = #tpu.dot_dimension_numbers<[1], [0], [0], [1], [0, 0, 1, 1], [], []>} : vector<8x8xf32>, vector<8x256xf32>, vector<8x256xf32> -> vector<8x256xf32>
    %289 = arith.addf %285, %288 : vector<8x256xf32>
    %c5_157 = arith.constant 5 : index
    %c0_158 = arith.constant 0 : index
    %c0_159 = arith.constant 0 : index
    %290 = vector.load %arg8[%c5_157, %c0_158, %c0_159] : memref<9x8x8xf32, #tpu.memory_space<vmem>>, vector<1x8x8xf32>
    %291 = vector.shape_cast %290 : vector<1x8x8xf32> to vector<8x8xf32>
    %cst_160 = arith.constant dense<0.000000e+00> : vector<8x256xf32>
    %292 = tpu.matmul %291, %247, %cst_160 {dimension_numbers = #tpu.dot_dimension_numbers<[1], [0], [0], [1], [0, 0, 1, 1], [], []>} : vector<8x8xf32>, vector<8x256xf32>, vector<8x256xf32> -> vector<8x256xf32>
    %293 = arith.addf %289, %292 : vector<8x256xf32>
    %c6_161 = arith.constant 6 : index
    %c0_162 = arith.constant 0 : index
    %c0_163 = arith.constant 0 : index
    %294 = vector.load %arg8[%c6_161, %c0_162, %c0_163] : memref<9x8x8xf32, #tpu.memory_space<vmem>>, vector<1x8x8xf32>
    %295 = vector.shape_cast %294 : vector<1x8x8xf32> to vector<8x8xf32>
    %cst_164 = arith.constant dense<0.000000e+00> : vector<8x256xf32>
    %296 = tpu.matmul %295, %256, %cst_164 {dimension_numbers = #tpu.dot_dimension_numbers<[1], [0], [0], [1], [0, 0, 1, 1], [], []>} : vector<8x8xf32>, vector<8x256xf32>, vector<8x256xf32> -> vector<8x256xf32>
    %297 = arith.addf %293, %296 : vector<8x256xf32>
    %c7_165 = arith.constant 7 : index
    %c0_166 = arith.constant 0 : index
    %c0_167 = arith.constant 0 : index
    %298 = vector.load %arg8[%c7_165, %c0_166, %c0_167] : memref<9x8x8xf32, #tpu.memory_space<vmem>>, vector<1x8x8xf32>
    %299 = vector.shape_cast %298 : vector<1x8x8xf32> to vector<8x8xf32>
    %cst_168 = arith.constant dense<0.000000e+00> : vector<8x256xf32>
    %300 = tpu.matmul %299, %259, %cst_168 {dimension_numbers = #tpu.dot_dimension_numbers<[1], [0], [0], [1], [0, 0, 1, 1], [], []>} : vector<8x8xf32>, vector<8x256xf32>, vector<8x256xf32> -> vector<8x256xf32>
    %301 = arith.addf %297, %300 : vector<8x256xf32>
    %c8_169 = arith.constant 8 : index
    %c0_170 = arith.constant 0 : index
    %c0_171 = arith.constant 0 : index
    %302 = vector.load %arg8[%c8_169, %c0_170, %c0_171] : memref<9x8x8xf32, #tpu.memory_space<vmem>>, vector<1x8x8xf32>
    %303 = vector.shape_cast %302 : vector<1x8x8xf32> to vector<8x8xf32>
    %cst_172 = arith.constant dense<0.000000e+00> : vector<8x256xf32>
    %304 = tpu.matmul %303, %268, %cst_172 {dimension_numbers = #tpu.dot_dimension_numbers<[1], [0], [0], [1], [0, 0, 1, 1], [], []>} : vector<8x8xf32>, vector<8x256xf32>, vector<8x256xf32> -> vector<8x256xf32>
    %305 = arith.addf %301, %304 : vector<8x256xf32>
    %c0_173 = arith.constant 0 : index
    %c0_174 = arith.constant 0 : index
    %306 = vector.load %arg9[%c0_173, %c0_174] : memref<8x1xf32, #tpu.memory_space<vmem>>, vector<8x1xf32>
    %307 = vector.broadcast %306 : vector<8x1xf32> to vector<8x256xf32>
    %308 = arith.addf %305, %307 : vector<8x256xf32>
    %cst_175 = arith.constant 0.000000e+00 : f32
    %309 = vector.broadcast %cst_175 : f32 to vector<8x256xf32>
    %310 = arith.maximumf %308, %309 : vector<8x256xf32>
    %cst_176 = arith.constant 0.000000e+00 : f32
    %311 = vector.broadcast %cst_176 : f32 to vector<8x17xf32>
    %312 = vector.extract_strided_slice %310 {offsets = [0, 0], sizes = [8, 239], strides = [1, 1]} : vector<8x256xf32> to vector<8x239xf32>
    %313 = tpu.concatenate %311, %312 in 1 : vector<8x17xf32>, vector<8x239xf32> -> vector<8x256xf32>
    %c1_i32_177 = arith.constant 1 : i32
    %314 = vector.broadcast %c1_i32_177 : i32 to vector<1x256xi32>
    %315 = arith.cmpi sge, %0, %314 : vector<1x256xi32>
    %cst_178 = arith.constant 0.000000e+00 : f32
    %316 = vector.shape_cast %315 : vector<1x256xi1> to vector<1x256xi1>
    %317 = vector.broadcast %316 : vector<1x256xi1> to vector<8x256xi1>
    %318 = vector.broadcast %cst_178 : f32 to vector<8x256xf32>
    %319 = arith.select %317, %313, %318 : vector<8x256xi1>, vector<8x256xf32>
    %cst_179 = arith.constant 0.000000e+00 : f32
    %320 = vector.broadcast %cst_179 : f32 to vector<8x16xf32>
    %321 = vector.extract_strided_slice %310 {offsets = [0, 0], sizes = [8, 240], strides = [1, 1]} : vector<8x256xf32> to vector<8x240xf32>
    %322 = tpu.concatenate %320, %321 in 1 : vector<8x16xf32>, vector<8x240xf32> -> vector<8x256xf32>
    %cst_180 = arith.constant 0.000000e+00 : f32
    %323 = vector.broadcast %cst_180 : f32 to vector<8x15xf32>
    %324 = vector.extract_strided_slice %310 {offsets = [0, 0], sizes = [8, 241], strides = [1, 1]} : vector<8x256xf32> to vector<8x241xf32>
    %325 = tpu.concatenate %323, %324 in 1 : vector<8x15xf32>, vector<8x241xf32> -> vector<8x256xf32>
    %c15_i32_181 = arith.constant 15 : i32
    %326 = vector.broadcast %c15_i32_181 : i32 to vector<1x256xi32>
    %327 = arith.cmpi slt, %0, %326 : vector<1x256xi32>
    %cst_182 = arith.constant 0.000000e+00 : f32
    %328 = vector.shape_cast %327 : vector<1x256xi1> to vector<1x256xi1>
    %329 = vector.broadcast %328 : vector<1x256xi1> to vector<8x256xi1>
    %330 = vector.broadcast %cst_182 : f32 to vector<8x256xf32>
    %331 = arith.select %329, %325, %330 : vector<8x256xi1>, vector<8x256xf32>
    %cst_183 = arith.constant 0.000000e+00 : f32
    %332 = vector.broadcast %cst_183 : f32 to vector<8x1xf32>
    %333 = vector.extract_strided_slice %310 {offsets = [0, 0], sizes = [8, 255], strides = [1, 1]} : vector<8x256xf32> to vector<8x255xf32>
    %334 = tpu.concatenate %332, %333 in 1 : vector<8x1xf32>, vector<8x255xf32> -> vector<8x256xf32>
    %c1_i32_184 = arith.constant 1 : i32
    %335 = vector.broadcast %c1_i32_184 : i32 to vector<1x256xi32>
    %336 = arith.cmpi sge, %0, %335 : vector<1x256xi32>
    %cst_185 = arith.constant 0.000000e+00 : f32
    %337 = vector.shape_cast %336 : vector<1x256xi1> to vector<1x256xi1>
    %338 = vector.broadcast %337 : vector<1x256xi1> to vector<8x256xi1>
    %339 = vector.broadcast %cst_185 : f32 to vector<8x256xf32>
    %340 = arith.select %338, %334, %339 : vector<8x256xi1>, vector<8x256xf32>
    %341 = vector.extract_strided_slice %310 {offsets = [0, 1], sizes = [8, 255], strides = [1, 1]} : vector<8x256xf32> to vector<8x255xf32>
    %cst_186 = arith.constant 0.000000e+00 : f32
    %342 = vector.broadcast %cst_186 : f32 to vector<8x1xf32>
    %343 = tpu.concatenate %341, %342 in 1 : vector<8x255xf32>, vector<8x1xf32> -> vector<8x256xf32>
    %c15_i32_187 = arith.constant 15 : i32
    %344 = vector.broadcast %c15_i32_187 : i32 to vector<1x256xi32>
    %345 = arith.cmpi slt, %0, %344 : vector<1x256xi32>
    %cst_188 = arith.constant 0.000000e+00 : f32
    %346 = vector.shape_cast %345 : vector<1x256xi1> to vector<1x256xi1>
    %347 = vector.broadcast %346 : vector<1x256xi1> to vector<8x256xi1>
    %348 = vector.broadcast %cst_188 : f32 to vector<8x256xf32>
    %349 = arith.select %347, %343, %348 : vector<8x256xi1>, vector<8x256xf32>
    %350 = vector.extract_strided_slice %310 {offsets = [0, 15], sizes = [8, 241], strides = [1, 1]} : vector<8x256xf32> to vector<8x241xf32>
    %cst_189 = arith.constant 0.000000e+00 : f32
    %351 = vector.broadcast %cst_189 : f32 to vector<8x15xf32>
    %352 = tpu.concatenate %350, %351 in 1 : vector<8x241xf32>, vector<8x15xf32> -> vector<8x256xf32>
    %c1_i32_190 = arith.constant 1 : i32
    %353 = vector.broadcast %c1_i32_190 : i32 to vector<1x256xi32>
    %354 = arith.cmpi sge, %0, %353 : vector<1x256xi32>
    %cst_191 = arith.constant 0.000000e+00 : f32
    %355 = vector.shape_cast %354 : vector<1x256xi1> to vector<1x256xi1>
    %356 = vector.broadcast %355 : vector<1x256xi1> to vector<8x256xi1>
    %357 = vector.broadcast %cst_191 : f32 to vector<8x256xf32>
    %358 = arith.select %356, %352, %357 : vector<8x256xi1>, vector<8x256xf32>
    %359 = vector.extract_strided_slice %310 {offsets = [0, 16], sizes = [8, 240], strides = [1, 1]} : vector<8x256xf32> to vector<8x240xf32>
    %cst_192 = arith.constant 0.000000e+00 : f32
    %360 = vector.broadcast %cst_192 : f32 to vector<8x16xf32>
    %361 = tpu.concatenate %359, %360 in 1 : vector<8x240xf32>, vector<8x16xf32> -> vector<8x256xf32>
    %362 = vector.extract_strided_slice %310 {offsets = [0, 17], sizes = [8, 239], strides = [1, 1]} : vector<8x256xf32> to vector<8x239xf32>
    %cst_193 = arith.constant 0.000000e+00 : f32
    %363 = vector.broadcast %cst_193 : f32 to vector<8x17xf32>
    %364 = tpu.concatenate %362, %363 in 1 : vector<8x239xf32>, vector<8x17xf32> -> vector<8x256xf32>
    %c15_i32_194 = arith.constant 15 : i32
    %365 = vector.broadcast %c15_i32_194 : i32 to vector<1x256xi32>
    %366 = arith.cmpi slt, %0, %365 : vector<1x256xi32>
    %cst_195 = arith.constant 0.000000e+00 : f32
    %367 = vector.shape_cast %366 : vector<1x256xi1> to vector<1x256xi1>
    %368 = vector.broadcast %367 : vector<1x256xi1> to vector<8x256xi1>
    %369 = vector.broadcast %cst_195 : f32 to vector<8x256xf32>
    %370 = arith.select %368, %364, %369 : vector<8x256xi1>, vector<8x256xf32>
    %cst_196 = arith.constant 0.000000e+00 : f32
    %371 = vector.broadcast %cst_196 : f32 to vector<8x256xf32>
    %c0_197 = arith.constant 0 : index
    %c0_198 = arith.constant 0 : index
    %c0_199 = arith.constant 0 : index
    %372 = vector.load %arg10[%c0_197, %c0_198, %c0_199] : memref<9x8x8xf32, #tpu.memory_space<vmem>>, vector<1x8x8xf32>
    %373 = vector.shape_cast %372 : vector<1x8x8xf32> to vector<8x8xf32>
    %cst_200 = arith.constant dense<0.000000e+00> : vector<8x256xf32>
    %374 = tpu.matmul %373, %319, %cst_200 {dimension_numbers = #tpu.dot_dimension_numbers<[1], [0], [0], [1], [0, 0, 1, 1], [], []>} : vector<8x8xf32>, vector<8x256xf32>, vector<8x256xf32> -> vector<8x256xf32>
    %375 = arith.addf %371, %374 : vector<8x256xf32>
    %c1_201 = arith.constant 1 : index
    %c0_202 = arith.constant 0 : index
    %c0_203 = arith.constant 0 : index
    %376 = vector.load %arg10[%c1_201, %c0_202, %c0_203] : memref<9x8x8xf32, #tpu.memory_space<vmem>>, vector<1x8x8xf32>
    %377 = vector.shape_cast %376 : vector<1x8x8xf32> to vector<8x8xf32>
    %cst_204 = arith.constant dense<0.000000e+00> : vector<8x256xf32>
    %378 = tpu.matmul %377, %322, %cst_204 {dimension_numbers = #tpu.dot_dimension_numbers<[1], [0], [0], [1], [0, 0, 1, 1], [], []>} : vector<8x8xf32>, vector<8x256xf32>, vector<8x256xf32> -> vector<8x256xf32>
    %379 = arith.addf %375, %378 : vector<8x256xf32>
    %c2_205 = arith.constant 2 : index
    %c0_206 = arith.constant 0 : index
    %c0_207 = arith.constant 0 : index
    %380 = vector.load %arg10[%c2_205, %c0_206, %c0_207] : memref<9x8x8xf32, #tpu.memory_space<vmem>>, vector<1x8x8xf32>
    %381 = vector.shape_cast %380 : vector<1x8x8xf32> to vector<8x8xf32>
    %cst_208 = arith.constant dense<0.000000e+00> : vector<8x256xf32>
    %382 = tpu.matmul %381, %331, %cst_208 {dimension_numbers = #tpu.dot_dimension_numbers<[1], [0], [0], [1], [0, 0, 1, 1], [], []>} : vector<8x8xf32>, vector<8x256xf32>, vector<8x256xf32> -> vector<8x256xf32>
    %383 = arith.addf %379, %382 : vector<8x256xf32>
    %c3_209 = arith.constant 3 : index
    %c0_210 = arith.constant 0 : index
    %c0_211 = arith.constant 0 : index
    %384 = vector.load %arg10[%c3_209, %c0_210, %c0_211] : memref<9x8x8xf32, #tpu.memory_space<vmem>>, vector<1x8x8xf32>
    %385 = vector.shape_cast %384 : vector<1x8x8xf32> to vector<8x8xf32>
    %cst_212 = arith.constant dense<0.000000e+00> : vector<8x256xf32>
    %386 = tpu.matmul %385, %340, %cst_212 {dimension_numbers = #tpu.dot_dimension_numbers<[1], [0], [0], [1], [0, 0, 1, 1], [], []>} : vector<8x8xf32>, vector<8x256xf32>, vector<8x256xf32> -> vector<8x256xf32>
    %387 = arith.addf %383, %386 : vector<8x256xf32>
    %c4_213 = arith.constant 4 : index
    %c0_214 = arith.constant 0 : index
    %c0_215 = arith.constant 0 : index
    %388 = vector.load %arg10[%c4_213, %c0_214, %c0_215] : memref<9x8x8xf32, #tpu.memory_space<vmem>>, vector<1x8x8xf32>
    %389 = vector.shape_cast %388 : vector<1x8x8xf32> to vector<8x8xf32>
    %cst_216 = arith.constant dense<0.000000e+00> : vector<8x256xf32>
    %390 = tpu.matmul %389, %310, %cst_216 {dimension_numbers = #tpu.dot_dimension_numbers<[1], [0], [0], [1], [0, 0, 1, 1], [], []>} : vector<8x8xf32>, vector<8x256xf32>, vector<8x256xf32> -> vector<8x256xf32>
    %391 = arith.addf %387, %390 : vector<8x256xf32>
    %c5_217 = arith.constant 5 : index
    %c0_218 = arith.constant 0 : index
    %c0_219 = arith.constant 0 : index
    %392 = vector.load %arg10[%c5_217, %c0_218, %c0_219] : memref<9x8x8xf32, #tpu.memory_space<vmem>>, vector<1x8x8xf32>
    %393 = vector.shape_cast %392 : vector<1x8x8xf32> to vector<8x8xf32>
    %cst_220 = arith.constant dense<0.000000e+00> : vector<8x256xf32>
    %394 = tpu.matmul %393, %349, %cst_220 {dimension_numbers = #tpu.dot_dimension_numbers<[1], [0], [0], [1], [0, 0, 1, 1], [], []>} : vector<8x8xf32>, vector<8x256xf32>, vector<8x256xf32> -> vector<8x256xf32>
    %395 = arith.addf %391, %394 : vector<8x256xf32>
    %c6_221 = arith.constant 6 : index
    %c0_222 = arith.constant 0 : index
    %c0_223 = arith.constant 0 : index
    %396 = vector.load %arg10[%c6_221, %c0_222, %c0_223] : memref<9x8x8xf32, #tpu.memory_space<vmem>>, vector<1x8x8xf32>
    %397 = vector.shape_cast %396 : vector<1x8x8xf32> to vector<8x8xf32>
    %cst_224 = arith.constant dense<0.000000e+00> : vector<8x256xf32>
    %398 = tpu.matmul %397, %358, %cst_224 {dimension_numbers = #tpu.dot_dimension_numbers<[1], [0], [0], [1], [0, 0, 1, 1], [], []>} : vector<8x8xf32>, vector<8x256xf32>, vector<8x256xf32> -> vector<8x256xf32>
    %399 = arith.addf %395, %398 : vector<8x256xf32>
    %c7_225 = arith.constant 7 : index
    %c0_226 = arith.constant 0 : index
    %c0_227 = arith.constant 0 : index
    %400 = vector.load %arg10[%c7_225, %c0_226, %c0_227] : memref<9x8x8xf32, #tpu.memory_space<vmem>>, vector<1x8x8xf32>
    %401 = vector.shape_cast %400 : vector<1x8x8xf32> to vector<8x8xf32>
    %cst_228 = arith.constant dense<0.000000e+00> : vector<8x256xf32>
    %402 = tpu.matmul %401, %361, %cst_228 {dimension_numbers = #tpu.dot_dimension_numbers<[1], [0], [0], [1], [0, 0, 1, 1], [], []>} : vector<8x8xf32>, vector<8x256xf32>, vector<8x256xf32> -> vector<8x256xf32>
    %403 = arith.addf %399, %402 : vector<8x256xf32>
    %c8_229 = arith.constant 8 : index
    %c0_230 = arith.constant 0 : index
    %c0_231 = arith.constant 0 : index
    %404 = vector.load %arg10[%c8_229, %c0_230, %c0_231] : memref<9x8x8xf32, #tpu.memory_space<vmem>>, vector<1x8x8xf32>
    %405 = vector.shape_cast %404 : vector<1x8x8xf32> to vector<8x8xf32>
    %cst_232 = arith.constant dense<0.000000e+00> : vector<8x256xf32>
    %406 = tpu.matmul %405, %370, %cst_232 {dimension_numbers = #tpu.dot_dimension_numbers<[1], [0], [0], [1], [0, 0, 1, 1], [], []>} : vector<8x8xf32>, vector<8x256xf32>, vector<8x256xf32> -> vector<8x256xf32>
    %407 = arith.addf %403, %406 : vector<8x256xf32>
    %c0_233 = arith.constant 0 : index
    %c0_234 = arith.constant 0 : index
    %408 = vector.load %arg11[%c0_233, %c0_234] : memref<8x1xf32, #tpu.memory_space<vmem>>, vector<8x1xf32>
    %409 = vector.broadcast %408 : vector<8x1xf32> to vector<8x256xf32>
    %410 = arith.addf %407, %409 : vector<8x256xf32>
    %cst_235 = arith.constant 0.000000e+00 : f32
    %411 = vector.broadcast %cst_235 : f32 to vector<8x256xf32>
    %412 = arith.maximumf %410, %411 : vector<8x256xf32>
    %cst_236 = arith.constant 0.000000e+00 : f32
    %413 = vector.broadcast %cst_236 : f32 to vector<8x17xf32>
    %414 = vector.extract_strided_slice %310 {offsets = [0, 0], sizes = [8, 239], strides = [1, 1]} : vector<8x256xf32> to vector<8x239xf32>
    %415 = tpu.concatenate %413, %414 in 1 : vector<8x17xf32>, vector<8x239xf32> -> vector<8x256xf32>
    %c1_i32_237 = arith.constant 1 : i32
    %416 = vector.broadcast %c1_i32_237 : i32 to vector<1x256xi32>
    %417 = arith.cmpi sge, %0, %416 : vector<1x256xi32>
    %cst_238 = arith.constant 0.000000e+00 : f32
    %418 = vector.shape_cast %417 : vector<1x256xi1> to vector<1x256xi1>
    %419 = vector.broadcast %418 : vector<1x256xi1> to vector<8x256xi1>
    %420 = vector.broadcast %cst_238 : f32 to vector<8x256xf32>
    %421 = arith.select %419, %415, %420 : vector<8x256xi1>, vector<8x256xf32>
    %cst_239 = arith.constant 0.000000e+00 : f32
    %422 = vector.broadcast %cst_239 : f32 to vector<8x17xf32>
    %423 = vector.extract_strided_slice %412 {offsets = [0, 0], sizes = [8, 239], strides = [1, 1]} : vector<8x256xf32> to vector<8x239xf32>
    %424 = tpu.concatenate %422, %423 in 1 : vector<8x17xf32>, vector<8x239xf32> -> vector<8x256xf32>
    %c1_i32_240 = arith.constant 1 : i32
    %425 = vector.broadcast %c1_i32_240 : i32 to vector<1x256xi32>
    %426 = arith.cmpi sge, %0, %425 : vector<1x256xi32>
    %cst_241 = arith.constant 0.000000e+00 : f32
    %427 = vector.shape_cast %426 : vector<1x256xi1> to vector<1x256xi1>
    %428 = vector.broadcast %427 : vector<1x256xi1> to vector<8x256xi1>
    %429 = vector.broadcast %cst_241 : f32 to vector<8x256xf32>
    %430 = arith.select %428, %424, %429 : vector<8x256xi1>, vector<8x256xf32>
    %cst_242 = arith.constant 0.000000e+00 : f32
    %431 = vector.broadcast %cst_242 : f32 to vector<8x16xf32>
    %432 = vector.extract_strided_slice %310 {offsets = [0, 0], sizes = [8, 240], strides = [1, 1]} : vector<8x256xf32> to vector<8x240xf32>
    %433 = tpu.concatenate %431, %432 in 1 : vector<8x16xf32>, vector<8x240xf32> -> vector<8x256xf32>
    %cst_243 = arith.constant 0.000000e+00 : f32
    %434 = vector.broadcast %cst_243 : f32 to vector<8x16xf32>
    %435 = vector.extract_strided_slice %412 {offsets = [0, 0], sizes = [8, 240], strides = [1, 1]} : vector<8x256xf32> to vector<8x240xf32>
    %436 = tpu.concatenate %434, %435 in 1 : vector<8x16xf32>, vector<8x240xf32> -> vector<8x256xf32>
    %cst_244 = arith.constant 0.000000e+00 : f32
    %437 = vector.broadcast %cst_244 : f32 to vector<8x15xf32>
    %438 = vector.extract_strided_slice %310 {offsets = [0, 0], sizes = [8, 241], strides = [1, 1]} : vector<8x256xf32> to vector<8x241xf32>
    %439 = tpu.concatenate %437, %438 in 1 : vector<8x15xf32>, vector<8x241xf32> -> vector<8x256xf32>
    %c15_i32_245 = arith.constant 15 : i32
    %440 = vector.broadcast %c15_i32_245 : i32 to vector<1x256xi32>
    %441 = arith.cmpi slt, %0, %440 : vector<1x256xi32>
    %cst_246 = arith.constant 0.000000e+00 : f32
    %442 = vector.shape_cast %441 : vector<1x256xi1> to vector<1x256xi1>
    %443 = vector.broadcast %442 : vector<1x256xi1> to vector<8x256xi1>
    %444 = vector.broadcast %cst_246 : f32 to vector<8x256xf32>
    %445 = arith.select %443, %439, %444 : vector<8x256xi1>, vector<8x256xf32>
    %cst_247 = arith.constant 0.000000e+00 : f32
    %446 = vector.broadcast %cst_247 : f32 to vector<8x15xf32>
    %447 = vector.extract_strided_slice %412 {offsets = [0, 0], sizes = [8, 241], strides = [1, 1]} : vector<8x256xf32> to vector<8x241xf32>
    %448 = tpu.concatenate %446, %447 in 1 : vector<8x15xf32>, vector<8x241xf32> -> vector<8x256xf32>
    %c15_i32_248 = arith.constant 15 : i32
    %449 = vector.broadcast %c15_i32_248 : i32 to vector<1x256xi32>
    %450 = arith.cmpi slt, %0, %449 : vector<1x256xi32>
    %cst_249 = arith.constant 0.000000e+00 : f32
    %451 = vector.shape_cast %450 : vector<1x256xi1> to vector<1x256xi1>
    %452 = vector.broadcast %451 : vector<1x256xi1> to vector<8x256xi1>
    %453 = vector.broadcast %cst_249 : f32 to vector<8x256xf32>
    %454 = arith.select %452, %448, %453 : vector<8x256xi1>, vector<8x256xf32>
    %cst_250 = arith.constant 0.000000e+00 : f32
    %455 = vector.broadcast %cst_250 : f32 to vector<8x1xf32>
    %456 = vector.extract_strided_slice %310 {offsets = [0, 0], sizes = [8, 255], strides = [1, 1]} : vector<8x256xf32> to vector<8x255xf32>
    %457 = tpu.concatenate %455, %456 in 1 : vector<8x1xf32>, vector<8x255xf32> -> vector<8x256xf32>
    %c1_i32_251 = arith.constant 1 : i32
    %458 = vector.broadcast %c1_i32_251 : i32 to vector<1x256xi32>
    %459 = arith.cmpi sge, %0, %458 : vector<1x256xi32>
    %cst_252 = arith.constant 0.000000e+00 : f32
    %460 = vector.shape_cast %459 : vector<1x256xi1> to vector<1x256xi1>
    %461 = vector.broadcast %460 : vector<1x256xi1> to vector<8x256xi1>
    %462 = vector.broadcast %cst_252 : f32 to vector<8x256xf32>
    %463 = arith.select %461, %457, %462 : vector<8x256xi1>, vector<8x256xf32>
    %cst_253 = arith.constant 0.000000e+00 : f32
    %464 = vector.broadcast %cst_253 : f32 to vector<8x1xf32>
    %465 = vector.extract_strided_slice %412 {offsets = [0, 0], sizes = [8, 255], strides = [1, 1]} : vector<8x256xf32> to vector<8x255xf32>
    %466 = tpu.concatenate %464, %465 in 1 : vector<8x1xf32>, vector<8x255xf32> -> vector<8x256xf32>
    %c1_i32_254 = arith.constant 1 : i32
    %467 = vector.broadcast %c1_i32_254 : i32 to vector<1x256xi32>
    %468 = arith.cmpi sge, %0, %467 : vector<1x256xi32>
    %cst_255 = arith.constant 0.000000e+00 : f32
    %469 = vector.shape_cast %468 : vector<1x256xi1> to vector<1x256xi1>
    %470 = vector.broadcast %469 : vector<1x256xi1> to vector<8x256xi1>
    %471 = vector.broadcast %cst_255 : f32 to vector<8x256xf32>
    %472 = arith.select %470, %466, %471 : vector<8x256xi1>, vector<8x256xf32>
    %473 = vector.extract_strided_slice %310 {offsets = [0, 1], sizes = [8, 255], strides = [1, 1]} : vector<8x256xf32> to vector<8x255xf32>
    %cst_256 = arith.constant 0.000000e+00 : f32
    %474 = vector.broadcast %cst_256 : f32 to vector<8x1xf32>
    %475 = tpu.concatenate %473, %474 in 1 : vector<8x255xf32>, vector<8x1xf32> -> vector<8x256xf32>
    %c15_i32_257 = arith.constant 15 : i32
    %476 = vector.broadcast %c15_i32_257 : i32 to vector<1x256xi32>
    %477 = arith.cmpi slt, %0, %476 : vector<1x256xi32>
    %cst_258 = arith.constant 0.000000e+00 : f32
    %478 = vector.shape_cast %477 : vector<1x256xi1> to vector<1x256xi1>
    %479 = vector.broadcast %478 : vector<1x256xi1> to vector<8x256xi1>
    %480 = vector.broadcast %cst_258 : f32 to vector<8x256xf32>
    %481 = arith.select %479, %475, %480 : vector<8x256xi1>, vector<8x256xf32>
    %482 = vector.extract_strided_slice %412 {offsets = [0, 1], sizes = [8, 255], strides = [1, 1]} : vector<8x256xf32> to vector<8x255xf32>
    %cst_259 = arith.constant 0.000000e+00 : f32
    %483 = vector.broadcast %cst_259 : f32 to vector<8x1xf32>
    %484 = tpu.concatenate %482, %483 in 1 : vector<8x255xf32>, vector<8x1xf32> -> vector<8x256xf32>
    %c15_i32_260 = arith.constant 15 : i32
    %485 = vector.broadcast %c15_i32_260 : i32 to vector<1x256xi32>
    %486 = arith.cmpi slt, %0, %485 : vector<1x256xi32>
    %cst_261 = arith.constant 0.000000e+00 : f32
    %487 = vector.shape_cast %486 : vector<1x256xi1> to vector<1x256xi1>
    %488 = vector.broadcast %487 : vector<1x256xi1> to vector<8x256xi1>
    %489 = vector.broadcast %cst_261 : f32 to vector<8x256xf32>
    %490 = arith.select %488, %484, %489 : vector<8x256xi1>, vector<8x256xf32>
    %491 = vector.extract_strided_slice %310 {offsets = [0, 15], sizes = [8, 241], strides = [1, 1]} : vector<8x256xf32> to vector<8x241xf32>
    %cst_262 = arith.constant 0.000000e+00 : f32
    %492 = vector.broadcast %cst_262 : f32 to vector<8x15xf32>
    %493 = tpu.concatenate %491, %492 in 1 : vector<8x241xf32>, vector<8x15xf32> -> vector<8x256xf32>
    %c1_i32_263 = arith.constant 1 : i32
    %494 = vector.broadcast %c1_i32_263 : i32 to vector<1x256xi32>
    %495 = arith.cmpi sge, %0, %494 : vector<1x256xi32>
    %cst_264 = arith.constant 0.000000e+00 : f32
    %496 = vector.shape_cast %495 : vector<1x256xi1> to vector<1x256xi1>
    %497 = vector.broadcast %496 : vector<1x256xi1> to vector<8x256xi1>
    %498 = vector.broadcast %cst_264 : f32 to vector<8x256xf32>
    %499 = arith.select %497, %493, %498 : vector<8x256xi1>, vector<8x256xf32>
    %500 = vector.extract_strided_slice %412 {offsets = [0, 15], sizes = [8, 241], strides = [1, 1]} : vector<8x256xf32> to vector<8x241xf32>
    %cst_265 = arith.constant 0.000000e+00 : f32
    %501 = vector.broadcast %cst_265 : f32 to vector<8x15xf32>
    %502 = tpu.concatenate %500, %501 in 1 : vector<8x241xf32>, vector<8x15xf32> -> vector<8x256xf32>
    %c1_i32_266 = arith.constant 1 : i32
    %503 = vector.broadcast %c1_i32_266 : i32 to vector<1x256xi32>
    %504 = arith.cmpi sge, %0, %503 : vector<1x256xi32>
    %cst_267 = arith.constant 0.000000e+00 : f32
    %505 = vector.shape_cast %504 : vector<1x256xi1> to vector<1x256xi1>
    %506 = vector.broadcast %505 : vector<1x256xi1> to vector<8x256xi1>
    %507 = vector.broadcast %cst_267 : f32 to vector<8x256xf32>
    %508 = arith.select %506, %502, %507 : vector<8x256xi1>, vector<8x256xf32>
    %509 = vector.extract_strided_slice %310 {offsets = [0, 16], sizes = [8, 240], strides = [1, 1]} : vector<8x256xf32> to vector<8x240xf32>
    %cst_268 = arith.constant 0.000000e+00 : f32
    %510 = vector.broadcast %cst_268 : f32 to vector<8x16xf32>
    %511 = tpu.concatenate %509, %510 in 1 : vector<8x240xf32>, vector<8x16xf32> -> vector<8x256xf32>
    %512 = vector.extract_strided_slice %412 {offsets = [0, 16], sizes = [8, 240], strides = [1, 1]} : vector<8x256xf32> to vector<8x240xf32>
    %cst_269 = arith.constant 0.000000e+00 : f32
    %513 = vector.broadcast %cst_269 : f32 to vector<8x16xf32>
    %514 = tpu.concatenate %512, %513 in 1 : vector<8x240xf32>, vector<8x16xf32> -> vector<8x256xf32>
    %515 = vector.extract_strided_slice %310 {offsets = [0, 17], sizes = [8, 239], strides = [1, 1]} : vector<8x256xf32> to vector<8x239xf32>
    %cst_270 = arith.constant 0.000000e+00 : f32
    %516 = vector.broadcast %cst_270 : f32 to vector<8x17xf32>
    %517 = tpu.concatenate %515, %516 in 1 : vector<8x239xf32>, vector<8x17xf32> -> vector<8x256xf32>
    %c15_i32_271 = arith.constant 15 : i32
    %518 = vector.broadcast %c15_i32_271 : i32 to vector<1x256xi32>
    %519 = arith.cmpi slt, %0, %518 : vector<1x256xi32>
    %cst_272 = arith.constant 0.000000e+00 : f32
    %520 = vector.shape_cast %519 : vector<1x256xi1> to vector<1x256xi1>
    %521 = vector.broadcast %520 : vector<1x256xi1> to vector<8x256xi1>
    %522 = vector.broadcast %cst_272 : f32 to vector<8x256xf32>
    %523 = arith.select %521, %517, %522 : vector<8x256xi1>, vector<8x256xf32>
    %524 = vector.extract_strided_slice %412 {offsets = [0, 17], sizes = [8, 239], strides = [1, 1]} : vector<8x256xf32> to vector<8x239xf32>
    %cst_273 = arith.constant 0.000000e+00 : f32
    %525 = vector.broadcast %cst_273 : f32 to vector<8x17xf32>
    %526 = tpu.concatenate %524, %525 in 1 : vector<8x239xf32>, vector<8x17xf32> -> vector<8x256xf32>
    %c15_i32_274 = arith.constant 15 : i32
    %527 = vector.broadcast %c15_i32_274 : i32 to vector<1x256xi32>
    %528 = arith.cmpi slt, %0, %527 : vector<1x256xi32>
    %cst_275 = arith.constant 0.000000e+00 : f32
    %529 = vector.shape_cast %528 : vector<1x256xi1> to vector<1x256xi1>
    %530 = vector.broadcast %529 : vector<1x256xi1> to vector<8x256xi1>
    %531 = vector.broadcast %cst_275 : f32 to vector<8x256xf32>
    %532 = arith.select %530, %526, %531 : vector<8x256xi1>, vector<8x256xf32>
    %cst_276 = arith.constant 0.000000e+00 : f32
    %533 = vector.broadcast %cst_276 : f32 to vector<8x256xf32>
    %c0_277 = arith.constant 0 : index
    %c0_278 = arith.constant 0 : index
    %c0_279 = arith.constant 0 : index
    %534 = vector.load %arg12[%c0_277, %c0_278, %c0_279] : memref<9x8x8xf32, #tpu.memory_space<vmem>>, vector<1x8x8xf32>
    %535 = vector.shape_cast %534 : vector<1x8x8xf32> to vector<8x8xf32>
    %cst_280 = arith.constant dense<0.000000e+00> : vector<8x256xf32>
    %536 = tpu.matmul %535, %421, %cst_280 {dimension_numbers = #tpu.dot_dimension_numbers<[1], [0], [0], [1], [0, 0, 1, 1], [], []>} : vector<8x8xf32>, vector<8x256xf32>, vector<8x256xf32> -> vector<8x256xf32>
    %537 = arith.addf %533, %536 : vector<8x256xf32>
    %c0_281 = arith.constant 0 : index
    %c0_282 = arith.constant 0 : index
    %c0_283 = arith.constant 0 : index
    %538 = vector.load %arg13[%c0_281, %c0_282, %c0_283] : memref<9x8x8xf32, #tpu.memory_space<vmem>>, vector<1x8x8xf32>
    %539 = vector.shape_cast %538 : vector<1x8x8xf32> to vector<8x8xf32>
    %cst_284 = arith.constant dense<0.000000e+00> : vector<8x256xf32>
    %540 = tpu.matmul %539, %430, %cst_284 {dimension_numbers = #tpu.dot_dimension_numbers<[1], [0], [0], [1], [0, 0, 1, 1], [], []>} : vector<8x8xf32>, vector<8x256xf32>, vector<8x256xf32> -> vector<8x256xf32>
    %541 = arith.addf %537, %540 : vector<8x256xf32>
    %c1_285 = arith.constant 1 : index
    %c0_286 = arith.constant 0 : index
    %c0_287 = arith.constant 0 : index
    %542 = vector.load %arg12[%c1_285, %c0_286, %c0_287] : memref<9x8x8xf32, #tpu.memory_space<vmem>>, vector<1x8x8xf32>
    %543 = vector.shape_cast %542 : vector<1x8x8xf32> to vector<8x8xf32>
    %cst_288 = arith.constant dense<0.000000e+00> : vector<8x256xf32>
    %544 = tpu.matmul %543, %433, %cst_288 {dimension_numbers = #tpu.dot_dimension_numbers<[1], [0], [0], [1], [0, 0, 1, 1], [], []>} : vector<8x8xf32>, vector<8x256xf32>, vector<8x256xf32> -> vector<8x256xf32>
    %545 = arith.addf %541, %544 : vector<8x256xf32>
    %c1_289 = arith.constant 1 : index
    %c0_290 = arith.constant 0 : index
    %c0_291 = arith.constant 0 : index
    %546 = vector.load %arg13[%c1_289, %c0_290, %c0_291] : memref<9x8x8xf32, #tpu.memory_space<vmem>>, vector<1x8x8xf32>
    %547 = vector.shape_cast %546 : vector<1x8x8xf32> to vector<8x8xf32>
    %cst_292 = arith.constant dense<0.000000e+00> : vector<8x256xf32>
    %548 = tpu.matmul %547, %436, %cst_292 {dimension_numbers = #tpu.dot_dimension_numbers<[1], [0], [0], [1], [0, 0, 1, 1], [], []>} : vector<8x8xf32>, vector<8x256xf32>, vector<8x256xf32> -> vector<8x256xf32>
    %549 = arith.addf %545, %548 : vector<8x256xf32>
    %c2_293 = arith.constant 2 : index
    %c0_294 = arith.constant 0 : index
    %c0_295 = arith.constant 0 : index
    %550 = vector.load %arg12[%c2_293, %c0_294, %c0_295] : memref<9x8x8xf32, #tpu.memory_space<vmem>>, vector<1x8x8xf32>
    %551 = vector.shape_cast %550 : vector<1x8x8xf32> to vector<8x8xf32>
    %cst_296 = arith.constant dense<0.000000e+00> : vector<8x256xf32>
    %552 = tpu.matmul %551, %445, %cst_296 {dimension_numbers = #tpu.dot_dimension_numbers<[1], [0], [0], [1], [0, 0, 1, 1], [], []>} : vector<8x8xf32>, vector<8x256xf32>, vector<8x256xf32> -> vector<8x256xf32>
    %553 = arith.addf %549, %552 : vector<8x256xf32>
    %c2_297 = arith.constant 2 : index
    %c0_298 = arith.constant 0 : index
    %c0_299 = arith.constant 0 : index
    %554 = vector.load %arg13[%c2_297, %c0_298, %c0_299] : memref<9x8x8xf32, #tpu.memory_space<vmem>>, vector<1x8x8xf32>
    %555 = vector.shape_cast %554 : vector<1x8x8xf32> to vector<8x8xf32>
    %cst_300 = arith.constant dense<0.000000e+00> : vector<8x256xf32>
    %556 = tpu.matmul %555, %454, %cst_300 {dimension_numbers = #tpu.dot_dimension_numbers<[1], [0], [0], [1], [0, 0, 1, 1], [], []>} : vector<8x8xf32>, vector<8x256xf32>, vector<8x256xf32> -> vector<8x256xf32>
    %557 = arith.addf %553, %556 : vector<8x256xf32>
    %c3_301 = arith.constant 3 : index
    %c0_302 = arith.constant 0 : index
    %c0_303 = arith.constant 0 : index
    %558 = vector.load %arg12[%c3_301, %c0_302, %c0_303] : memref<9x8x8xf32, #tpu.memory_space<vmem>>, vector<1x8x8xf32>
    %559 = vector.shape_cast %558 : vector<1x8x8xf32> to vector<8x8xf32>
    %cst_304 = arith.constant dense<0.000000e+00> : vector<8x256xf32>
    %560 = tpu.matmul %559, %463, %cst_304 {dimension_numbers = #tpu.dot_dimension_numbers<[1], [0], [0], [1], [0, 0, 1, 1], [], []>} : vector<8x8xf32>, vector<8x256xf32>, vector<8x256xf32> -> vector<8x256xf32>
    %561 = arith.addf %557, %560 : vector<8x256xf32>
    %c3_305 = arith.constant 3 : index
    %c0_306 = arith.constant 0 : index
    %c0_307 = arith.constant 0 : index
    %562 = vector.load %arg13[%c3_305, %c0_306, %c0_307] : memref<9x8x8xf32, #tpu.memory_space<vmem>>, vector<1x8x8xf32>
    %563 = vector.shape_cast %562 : vector<1x8x8xf32> to vector<8x8xf32>
    %cst_308 = arith.constant dense<0.000000e+00> : vector<8x256xf32>
    %564 = tpu.matmul %563, %472, %cst_308 {dimension_numbers = #tpu.dot_dimension_numbers<[1], [0], [0], [1], [0, 0, 1, 1], [], []>} : vector<8x8xf32>, vector<8x256xf32>, vector<8x256xf32> -> vector<8x256xf32>
    %565 = arith.addf %561, %564 : vector<8x256xf32>
    %c4_309 = arith.constant 4 : index
    %c0_310 = arith.constant 0 : index
    %c0_311 = arith.constant 0 : index
    %566 = vector.load %arg12[%c4_309, %c0_310, %c0_311] : memref<9x8x8xf32, #tpu.memory_space<vmem>>, vector<1x8x8xf32>
    %567 = vector.shape_cast %566 : vector<1x8x8xf32> to vector<8x8xf32>
    %cst_312 = arith.constant dense<0.000000e+00> : vector<8x256xf32>
    %568 = tpu.matmul %567, %310, %cst_312 {dimension_numbers = #tpu.dot_dimension_numbers<[1], [0], [0], [1], [0, 0, 1, 1], [], []>} : vector<8x8xf32>, vector<8x256xf32>, vector<8x256xf32> -> vector<8x256xf32>
    %569 = arith.addf %565, %568 : vector<8x256xf32>
    %c4_313 = arith.constant 4 : index
    %c0_314 = arith.constant 0 : index
    %c0_315 = arith.constant 0 : index
    %570 = vector.load %arg13[%c4_313, %c0_314, %c0_315] : memref<9x8x8xf32, #tpu.memory_space<vmem>>, vector<1x8x8xf32>
    %571 = vector.shape_cast %570 : vector<1x8x8xf32> to vector<8x8xf32>
    %cst_316 = arith.constant dense<0.000000e+00> : vector<8x256xf32>
    %572 = tpu.matmul %571, %412, %cst_316 {dimension_numbers = #tpu.dot_dimension_numbers<[1], [0], [0], [1], [0, 0, 1, 1], [], []>} : vector<8x8xf32>, vector<8x256xf32>, vector<8x256xf32> -> vector<8x256xf32>
    %573 = arith.addf %569, %572 : vector<8x256xf32>
    %c5_317 = arith.constant 5 : index
    %c0_318 = arith.constant 0 : index
    %c0_319 = arith.constant 0 : index
    %574 = vector.load %arg12[%c5_317, %c0_318, %c0_319] : memref<9x8x8xf32, #tpu.memory_space<vmem>>, vector<1x8x8xf32>
    %575 = vector.shape_cast %574 : vector<1x8x8xf32> to vector<8x8xf32>
    %cst_320 = arith.constant dense<0.000000e+00> : vector<8x256xf32>
    %576 = tpu.matmul %575, %481, %cst_320 {dimension_numbers = #tpu.dot_dimension_numbers<[1], [0], [0], [1], [0, 0, 1, 1], [], []>} : vector<8x8xf32>, vector<8x256xf32>, vector<8x256xf32> -> vector<8x256xf32>
    %577 = arith.addf %573, %576 : vector<8x256xf32>
    %c5_321 = arith.constant 5 : index
    %c0_322 = arith.constant 0 : index
    %c0_323 = arith.constant 0 : index
    %578 = vector.load %arg13[%c5_321, %c0_322, %c0_323] : memref<9x8x8xf32, #tpu.memory_space<vmem>>, vector<1x8x8xf32>
    %579 = vector.shape_cast %578 : vector<1x8x8xf32> to vector<8x8xf32>
    %cst_324 = arith.constant dense<0.000000e+00> : vector<8x256xf32>
    %580 = tpu.matmul %579, %490, %cst_324 {dimension_numbers = #tpu.dot_dimension_numbers<[1], [0], [0], [1], [0, 0, 1, 1], [], []>} : vector<8x8xf32>, vector<8x256xf32>, vector<8x256xf32> -> vector<8x256xf32>
    %581 = arith.addf %577, %580 : vector<8x256xf32>
    %c6_325 = arith.constant 6 : index
    %c0_326 = arith.constant 0 : index
    %c0_327 = arith.constant 0 : index
    %582 = vector.load %arg12[%c6_325, %c0_326, %c0_327] : memref<9x8x8xf32, #tpu.memory_space<vmem>>, vector<1x8x8xf32>
    %583 = vector.shape_cast %582 : vector<1x8x8xf32> to vector<8x8xf32>
    %cst_328 = arith.constant dense<0.000000e+00> : vector<8x256xf32>
    %584 = tpu.matmul %583, %499, %cst_328 {dimension_numbers = #tpu.dot_dimension_numbers<[1], [0], [0], [1], [0, 0, 1, 1], [], []>} : vector<8x8xf32>, vector<8x256xf32>, vector<8x256xf32> -> vector<8x256xf32>
    %585 = arith.addf %581, %584 : vector<8x256xf32>
    %c6_329 = arith.constant 6 : index
    %c0_330 = arith.constant 0 : index
    %c0_331 = arith.constant 0 : index
    %586 = vector.load %arg13[%c6_329, %c0_330, %c0_331] : memref<9x8x8xf32, #tpu.memory_space<vmem>>, vector<1x8x8xf32>
    %587 = vector.shape_cast %586 : vector<1x8x8xf32> to vector<8x8xf32>
    %cst_332 = arith.constant dense<0.000000e+00> : vector<8x256xf32>
    %588 = tpu.matmul %587, %508, %cst_332 {dimension_numbers = #tpu.dot_dimension_numbers<[1], [0], [0], [1], [0, 0, 1, 1], [], []>} : vector<8x8xf32>, vector<8x256xf32>, vector<8x256xf32> -> vector<8x256xf32>
    %589 = arith.addf %585, %588 : vector<8x256xf32>
    %c7_333 = arith.constant 7 : index
    %c0_334 = arith.constant 0 : index
    %c0_335 = arith.constant 0 : index
    %590 = vector.load %arg12[%c7_333, %c0_334, %c0_335] : memref<9x8x8xf32, #tpu.memory_space<vmem>>, vector<1x8x8xf32>
    %591 = vector.shape_cast %590 : vector<1x8x8xf32> to vector<8x8xf32>
    %cst_336 = arith.constant dense<0.000000e+00> : vector<8x256xf32>
    %592 = tpu.matmul %591, %511, %cst_336 {dimension_numbers = #tpu.dot_dimension_numbers<[1], [0], [0], [1], [0, 0, 1, 1], [], []>} : vector<8x8xf32>, vector<8x256xf32>, vector<8x256xf32> -> vector<8x256xf32>
    %593 = arith.addf %589, %592 : vector<8x256xf32>
    %c7_337 = arith.constant 7 : index
    %c0_338 = arith.constant 0 : index
    %c0_339 = arith.constant 0 : index
    %594 = vector.load %arg13[%c7_337, %c0_338, %c0_339] : memref<9x8x8xf32, #tpu.memory_space<vmem>>, vector<1x8x8xf32>
    %595 = vector.shape_cast %594 : vector<1x8x8xf32> to vector<8x8xf32>
    %cst_340 = arith.constant dense<0.000000e+00> : vector<8x256xf32>
    %596 = tpu.matmul %595, %514, %cst_340 {dimension_numbers = #tpu.dot_dimension_numbers<[1], [0], [0], [1], [0, 0, 1, 1], [], []>} : vector<8x8xf32>, vector<8x256xf32>, vector<8x256xf32> -> vector<8x256xf32>
    %597 = arith.addf %593, %596 : vector<8x256xf32>
    %c8_341 = arith.constant 8 : index
    %c0_342 = arith.constant 0 : index
    %c0_343 = arith.constant 0 : index
    %598 = vector.load %arg12[%c8_341, %c0_342, %c0_343] : memref<9x8x8xf32, #tpu.memory_space<vmem>>, vector<1x8x8xf32>
    %599 = vector.shape_cast %598 : vector<1x8x8xf32> to vector<8x8xf32>
    %cst_344 = arith.constant dense<0.000000e+00> : vector<8x256xf32>
    %600 = tpu.matmul %599, %523, %cst_344 {dimension_numbers = #tpu.dot_dimension_numbers<[1], [0], [0], [1], [0, 0, 1, 1], [], []>} : vector<8x8xf32>, vector<8x256xf32>, vector<8x256xf32> -> vector<8x256xf32>
    %601 = arith.addf %597, %600 : vector<8x256xf32>
    %c8_345 = arith.constant 8 : index
    %c0_346 = arith.constant 0 : index
    %c0_347 = arith.constant 0 : index
    %602 = vector.load %arg13[%c8_345, %c0_346, %c0_347] : memref<9x8x8xf32, #tpu.memory_space<vmem>>, vector<1x8x8xf32>
    %603 = vector.shape_cast %602 : vector<1x8x8xf32> to vector<8x8xf32>
    %cst_348 = arith.constant dense<0.000000e+00> : vector<8x256xf32>
    %604 = tpu.matmul %603, %532, %cst_348 {dimension_numbers = #tpu.dot_dimension_numbers<[1], [0], [0], [1], [0, 0, 1, 1], [], []>} : vector<8x8xf32>, vector<8x256xf32>, vector<8x256xf32> -> vector<8x256xf32>
    %605 = arith.addf %601, %604 : vector<8x256xf32>
    %c0_349 = arith.constant 0 : index
    %c0_350 = arith.constant 0 : index
    %606 = vector.load %arg14[%c0_349, %c0_350] : memref<8x1xf32, #tpu.memory_space<vmem>>, vector<8x1xf32>
    %607 = vector.broadcast %606 : vector<8x1xf32> to vector<8x256xf32>
    %608 = arith.addf %605, %607 : vector<8x256xf32>
    %cst_351 = arith.constant 0.000000e+00 : f32
    %609 = vector.broadcast %cst_351 : f32 to vector<8x256xf32>
    %610 = arith.maximumf %608, %609 : vector<8x256xf32>
    %cst_352 = arith.constant 0.000000e+00 : f32
    %611 = vector.broadcast %cst_352 : f32 to vector<8x17xf32>
    %612 = vector.extract_strided_slice %208 {offsets = [0, 0], sizes = [8, 239], strides = [1, 1]} : vector<8x256xf32> to vector<8x239xf32>
    %613 = tpu.concatenate %611, %612 in 1 : vector<8x17xf32>, vector<8x239xf32> -> vector<8x256xf32>
    %c1_i32_353 = arith.constant 1 : i32
    %614 = vector.broadcast %c1_i32_353 : i32 to vector<1x256xi32>
    %615 = arith.cmpi sge, %0, %614 : vector<1x256xi32>
    %cst_354 = arith.constant 0.000000e+00 : f32
    %616 = vector.shape_cast %615 : vector<1x256xi1> to vector<1x256xi1>
    %617 = vector.broadcast %616 : vector<1x256xi1> to vector<8x256xi1>
    %618 = vector.broadcast %cst_354 : f32 to vector<8x256xf32>
    %619 = arith.select %617, %613, %618 : vector<8x256xi1>, vector<8x256xf32>
    %cst_355 = arith.constant 0.000000e+00 : f32
    %620 = vector.broadcast %cst_355 : f32 to vector<8x17xf32>
    %621 = vector.extract_strided_slice %610 {offsets = [0, 0], sizes = [8, 239], strides = [1, 1]} : vector<8x256xf32> to vector<8x239xf32>
    %622 = tpu.concatenate %620, %621 in 1 : vector<8x17xf32>, vector<8x239xf32> -> vector<8x256xf32>
    %c1_i32_356 = arith.constant 1 : i32
    %623 = vector.broadcast %c1_i32_356 : i32 to vector<1x256xi32>
    %624 = arith.cmpi sge, %0, %623 : vector<1x256xi32>
    %cst_357 = arith.constant 0.000000e+00 : f32
    %625 = vector.shape_cast %624 : vector<1x256xi1> to vector<1x256xi1>
    %626 = vector.broadcast %625 : vector<1x256xi1> to vector<8x256xi1>
    %627 = vector.broadcast %cst_357 : f32 to vector<8x256xf32>
    %628 = arith.select %626, %622, %627 : vector<8x256xi1>, vector<8x256xf32>
    %cst_358 = arith.constant 0.000000e+00 : f32
    %629 = vector.broadcast %cst_358 : f32 to vector<8x16xf32>
    %630 = vector.extract_strided_slice %208 {offsets = [0, 0], sizes = [8, 240], strides = [1, 1]} : vector<8x256xf32> to vector<8x240xf32>
    %631 = tpu.concatenate %629, %630 in 1 : vector<8x16xf32>, vector<8x240xf32> -> vector<8x256xf32>
    %cst_359 = arith.constant 0.000000e+00 : f32
    %632 = vector.broadcast %cst_359 : f32 to vector<8x16xf32>
    %633 = vector.extract_strided_slice %610 {offsets = [0, 0], sizes = [8, 240], strides = [1, 1]} : vector<8x256xf32> to vector<8x240xf32>
    %634 = tpu.concatenate %632, %633 in 1 : vector<8x16xf32>, vector<8x240xf32> -> vector<8x256xf32>
    %cst_360 = arith.constant 0.000000e+00 : f32
    %635 = vector.broadcast %cst_360 : f32 to vector<8x15xf32>
    %636 = vector.extract_strided_slice %208 {offsets = [0, 0], sizes = [8, 241], strides = [1, 1]} : vector<8x256xf32> to vector<8x241xf32>
    %637 = tpu.concatenate %635, %636 in 1 : vector<8x15xf32>, vector<8x241xf32> -> vector<8x256xf32>
    %c15_i32_361 = arith.constant 15 : i32
    %638 = vector.broadcast %c15_i32_361 : i32 to vector<1x256xi32>
    %639 = arith.cmpi slt, %0, %638 : vector<1x256xi32>
    %cst_362 = arith.constant 0.000000e+00 : f32
    %640 = vector.shape_cast %639 : vector<1x256xi1> to vector<1x256xi1>
    %641 = vector.broadcast %640 : vector<1x256xi1> to vector<8x256xi1>
    %642 = vector.broadcast %cst_362 : f32 to vector<8x256xf32>
    %643 = arith.select %641, %637, %642 : vector<8x256xi1>, vector<8x256xf32>
    %cst_363 = arith.constant 0.000000e+00 : f32
    %644 = vector.broadcast %cst_363 : f32 to vector<8x15xf32>
    %645 = vector.extract_strided_slice %610 {offsets = [0, 0], sizes = [8, 241], strides = [1, 1]} : vector<8x256xf32> to vector<8x241xf32>
    %646 = tpu.concatenate %644, %645 in 1 : vector<8x15xf32>, vector<8x241xf32> -> vector<8x256xf32>
    %c15_i32_364 = arith.constant 15 : i32
    %647 = vector.broadcast %c15_i32_364 : i32 to vector<1x256xi32>
    %648 = arith.cmpi slt, %0, %647 : vector<1x256xi32>
    %cst_365 = arith.constant 0.000000e+00 : f32
    %649 = vector.shape_cast %648 : vector<1x256xi1> to vector<1x256xi1>
    %650 = vector.broadcast %649 : vector<1x256xi1> to vector<8x256xi1>
    %651 = vector.broadcast %cst_365 : f32 to vector<8x256xf32>
    %652 = arith.select %650, %646, %651 : vector<8x256xi1>, vector<8x256xf32>
    %cst_366 = arith.constant 0.000000e+00 : f32
    %653 = vector.broadcast %cst_366 : f32 to vector<8x1xf32>
    %654 = vector.extract_strided_slice %208 {offsets = [0, 0], sizes = [8, 255], strides = [1, 1]} : vector<8x256xf32> to vector<8x255xf32>
    %655 = tpu.concatenate %653, %654 in 1 : vector<8x1xf32>, vector<8x255xf32> -> vector<8x256xf32>
    %c1_i32_367 = arith.constant 1 : i32
    %656 = vector.broadcast %c1_i32_367 : i32 to vector<1x256xi32>
    %657 = arith.cmpi sge, %0, %656 : vector<1x256xi32>
    %cst_368 = arith.constant 0.000000e+00 : f32
    %658 = vector.shape_cast %657 : vector<1x256xi1> to vector<1x256xi1>
    %659 = vector.broadcast %658 : vector<1x256xi1> to vector<8x256xi1>
    %660 = vector.broadcast %cst_368 : f32 to vector<8x256xf32>
    %661 = arith.select %659, %655, %660 : vector<8x256xi1>, vector<8x256xf32>
    %cst_369 = arith.constant 0.000000e+00 : f32
    %662 = vector.broadcast %cst_369 : f32 to vector<8x1xf32>
    %663 = vector.extract_strided_slice %610 {offsets = [0, 0], sizes = [8, 255], strides = [1, 1]} : vector<8x256xf32> to vector<8x255xf32>
    %664 = tpu.concatenate %662, %663 in 1 : vector<8x1xf32>, vector<8x255xf32> -> vector<8x256xf32>
    %c1_i32_370 = arith.constant 1 : i32
    %665 = vector.broadcast %c1_i32_370 : i32 to vector<1x256xi32>
    %666 = arith.cmpi sge, %0, %665 : vector<1x256xi32>
    %cst_371 = arith.constant 0.000000e+00 : f32
    %667 = vector.shape_cast %666 : vector<1x256xi1> to vector<1x256xi1>
    %668 = vector.broadcast %667 : vector<1x256xi1> to vector<8x256xi1>
    %669 = vector.broadcast %cst_371 : f32 to vector<8x256xf32>
    %670 = arith.select %668, %664, %669 : vector<8x256xi1>, vector<8x256xf32>
    %671 = vector.extract_strided_slice %208 {offsets = [0, 1], sizes = [8, 255], strides = [1, 1]} : vector<8x256xf32> to vector<8x255xf32>
    %cst_372 = arith.constant 0.000000e+00 : f32
    %672 = vector.broadcast %cst_372 : f32 to vector<8x1xf32>
    %673 = tpu.concatenate %671, %672 in 1 : vector<8x255xf32>, vector<8x1xf32> -> vector<8x256xf32>
    %c15_i32_373 = arith.constant 15 : i32
    %674 = vector.broadcast %c15_i32_373 : i32 to vector<1x256xi32>
    %675 = arith.cmpi slt, %0, %674 : vector<1x256xi32>
    %cst_374 = arith.constant 0.000000e+00 : f32
    %676 = vector.shape_cast %675 : vector<1x256xi1> to vector<1x256xi1>
    %677 = vector.broadcast %676 : vector<1x256xi1> to vector<8x256xi1>
    %678 = vector.broadcast %cst_374 : f32 to vector<8x256xf32>
    %679 = arith.select %677, %673, %678 : vector<8x256xi1>, vector<8x256xf32>
    %680 = vector.extract_strided_slice %610 {offsets = [0, 1], sizes = [8, 255], strides = [1, 1]} : vector<8x256xf32> to vector<8x255xf32>
    %cst_375 = arith.constant 0.000000e+00 : f32
    %681 = vector.broadcast %cst_375 : f32 to vector<8x1xf32>
    %682 = tpu.concatenate %680, %681 in 1 : vector<8x255xf32>, vector<8x1xf32> -> vector<8x256xf32>
    %c15_i32_376 = arith.constant 15 : i32
    %683 = vector.broadcast %c15_i32_376 : i32 to vector<1x256xi32>
    %684 = arith.cmpi slt, %0, %683 : vector<1x256xi32>
    %cst_377 = arith.constant 0.000000e+00 : f32
    %685 = vector.shape_cast %684 : vector<1x256xi1> to vector<1x256xi1>
    %686 = vector.broadcast %685 : vector<1x256xi1> to vector<8x256xi1>
    %687 = vector.broadcast %cst_377 : f32 to vector<8x256xf32>
    %688 = arith.select %686, %682, %687 : vector<8x256xi1>, vector<8x256xf32>
    %689 = vector.extract_strided_slice %208 {offsets = [0, 15], sizes = [8, 241], strides = [1, 1]} : vector<8x256xf32> to vector<8x241xf32>
    %cst_378 = arith.constant 0.000000e+00 : f32
    %690 = vector.broadcast %cst_378 : f32 to vector<8x15xf32>
    %691 = tpu.concatenate %689, %690 in 1 : vector<8x241xf32>, vector<8x15xf32> -> vector<8x256xf32>
    %c1_i32_379 = arith.constant 1 : i32
    %692 = vector.broadcast %c1_i32_379 : i32 to vector<1x256xi32>
    %693 = arith.cmpi sge, %0, %692 : vector<1x256xi32>
    %cst_380 = arith.constant 0.000000e+00 : f32
    %694 = vector.shape_cast %693 : vector<1x256xi1> to vector<1x256xi1>
    %695 = vector.broadcast %694 : vector<1x256xi1> to vector<8x256xi1>
    %696 = vector.broadcast %cst_380 : f32 to vector<8x256xf32>
    %697 = arith.select %695, %691, %696 : vector<8x256xi1>, vector<8x256xf32>
    %698 = vector.extract_strided_slice %610 {offsets = [0, 15], sizes = [8, 241], strides = [1, 1]} : vector<8x256xf32> to vector<8x241xf32>
    %cst_381 = arith.constant 0.000000e+00 : f32
    %699 = vector.broadcast %cst_381 : f32 to vector<8x15xf32>
    %700 = tpu.concatenate %698, %699 in 1 : vector<8x241xf32>, vector<8x15xf32> -> vector<8x256xf32>
    %c1_i32_382 = arith.constant 1 : i32
    %701 = vector.broadcast %c1_i32_382 : i32 to vector<1x256xi32>
    %702 = arith.cmpi sge, %0, %701 : vector<1x256xi32>
    %cst_383 = arith.constant 0.000000e+00 : f32
    %703 = vector.shape_cast %702 : vector<1x256xi1> to vector<1x256xi1>
    %704 = vector.broadcast %703 : vector<1x256xi1> to vector<8x256xi1>
    %705 = vector.broadcast %cst_383 : f32 to vector<8x256xf32>
    %706 = arith.select %704, %700, %705 : vector<8x256xi1>, vector<8x256xf32>
    %707 = vector.extract_strided_slice %208 {offsets = [0, 16], sizes = [8, 240], strides = [1, 1]} : vector<8x256xf32> to vector<8x240xf32>
    %cst_384 = arith.constant 0.000000e+00 : f32
    %708 = vector.broadcast %cst_384 : f32 to vector<8x16xf32>
    %709 = tpu.concatenate %707, %708 in 1 : vector<8x240xf32>, vector<8x16xf32> -> vector<8x256xf32>
    %710 = vector.extract_strided_slice %610 {offsets = [0, 16], sizes = [8, 240], strides = [1, 1]} : vector<8x256xf32> to vector<8x240xf32>
    %cst_385 = arith.constant 0.000000e+00 : f32
    %711 = vector.broadcast %cst_385 : f32 to vector<8x16xf32>
    %712 = tpu.concatenate %710, %711 in 1 : vector<8x240xf32>, vector<8x16xf32> -> vector<8x256xf32>
    %713 = vector.extract_strided_slice %208 {offsets = [0, 17], sizes = [8, 239], strides = [1, 1]} : vector<8x256xf32> to vector<8x239xf32>
    %cst_386 = arith.constant 0.000000e+00 : f32
    %714 = vector.broadcast %cst_386 : f32 to vector<8x17xf32>
    %715 = tpu.concatenate %713, %714 in 1 : vector<8x239xf32>, vector<8x17xf32> -> vector<8x256xf32>
    %c15_i32_387 = arith.constant 15 : i32
    %716 = vector.broadcast %c15_i32_387 : i32 to vector<1x256xi32>
    %717 = arith.cmpi slt, %0, %716 : vector<1x256xi32>
    %cst_388 = arith.constant 0.000000e+00 : f32
    %718 = vector.shape_cast %717 : vector<1x256xi1> to vector<1x256xi1>
    %719 = vector.broadcast %718 : vector<1x256xi1> to vector<8x256xi1>
    %720 = vector.broadcast %cst_388 : f32 to vector<8x256xf32>
    %721 = arith.select %719, %715, %720 : vector<8x256xi1>, vector<8x256xf32>
    %722 = vector.extract_strided_slice %610 {offsets = [0, 17], sizes = [8, 239], strides = [1, 1]} : vector<8x256xf32> to vector<8x239xf32>
    %cst_389 = arith.constant 0.000000e+00 : f32
    %723 = vector.broadcast %cst_389 : f32 to vector<8x17xf32>
    %724 = tpu.concatenate %722, %723 in 1 : vector<8x239xf32>, vector<8x17xf32> -> vector<8x256xf32>
    %c15_i32_390 = arith.constant 15 : i32
    %725 = vector.broadcast %c15_i32_390 : i32 to vector<1x256xi32>
    %726 = arith.cmpi slt, %0, %725 : vector<1x256xi32>
    %cst_391 = arith.constant 0.000000e+00 : f32
    %727 = vector.shape_cast %726 : vector<1x256xi1> to vector<1x256xi1>
    %728 = vector.broadcast %727 : vector<1x256xi1> to vector<8x256xi1>
    %729 = vector.broadcast %cst_391 : f32 to vector<8x256xf32>
    %730 = arith.select %728, %724, %729 : vector<8x256xi1>, vector<8x256xf32>
    %cst_392 = arith.constant 0.000000e+00 : f32
    %731 = vector.broadcast %cst_392 : f32 to vector<8x256xf32>
    %c0_393 = arith.constant 0 : index
    %c0_394 = arith.constant 0 : index
    %c0_395 = arith.constant 0 : index
    %732 = vector.load %arg15[%c0_393, %c0_394, %c0_395] : memref<9x8x8xf32, #tpu.memory_space<vmem>>, vector<1x8x8xf32>
    %733 = vector.shape_cast %732 : vector<1x8x8xf32> to vector<8x8xf32>
    %cst_396 = arith.constant dense<0.000000e+00> : vector<8x256xf32>
    %734 = tpu.matmul %733, %619, %cst_396 {dimension_numbers = #tpu.dot_dimension_numbers<[1], [0], [0], [1], [0, 0, 1, 1], [], []>} : vector<8x8xf32>, vector<8x256xf32>, vector<8x256xf32> -> vector<8x256xf32>
    %735 = arith.addf %731, %734 : vector<8x256xf32>
    %c0_397 = arith.constant 0 : index
    %c0_398 = arith.constant 0 : index
    %c0_399 = arith.constant 0 : index
    %736 = vector.load %arg16[%c0_397, %c0_398, %c0_399] : memref<9x8x8xf32, #tpu.memory_space<vmem>>, vector<1x8x8xf32>
    %737 = vector.shape_cast %736 : vector<1x8x8xf32> to vector<8x8xf32>
    %cst_400 = arith.constant dense<0.000000e+00> : vector<8x256xf32>
    %738 = tpu.matmul %737, %628, %cst_400 {dimension_numbers = #tpu.dot_dimension_numbers<[1], [0], [0], [1], [0, 0, 1, 1], [], []>} : vector<8x8xf32>, vector<8x256xf32>, vector<8x256xf32> -> vector<8x256xf32>
    %739 = arith.addf %735, %738 : vector<8x256xf32>
    %c1_401 = arith.constant 1 : index
    %c0_402 = arith.constant 0 : index
    %c0_403 = arith.constant 0 : index
    %740 = vector.load %arg15[%c1_401, %c0_402, %c0_403] : memref<9x8x8xf32, #tpu.memory_space<vmem>>, vector<1x8x8xf32>
    %741 = vector.shape_cast %740 : vector<1x8x8xf32> to vector<8x8xf32>
    %cst_404 = arith.constant dense<0.000000e+00> : vector<8x256xf32>
    %742 = tpu.matmul %741, %631, %cst_404 {dimension_numbers = #tpu.dot_dimension_numbers<[1], [0], [0], [1], [0, 0, 1, 1], [], []>} : vector<8x8xf32>, vector<8x256xf32>, vector<8x256xf32> -> vector<8x256xf32>
    %743 = arith.addf %739, %742 : vector<8x256xf32>
    %c1_405 = arith.constant 1 : index
    %c0_406 = arith.constant 0 : index
    %c0_407 = arith.constant 0 : index
    %744 = vector.load %arg16[%c1_405, %c0_406, %c0_407] : memref<9x8x8xf32, #tpu.memory_space<vmem>>, vector<1x8x8xf32>
    %745 = vector.shape_cast %744 : vector<1x8x8xf32> to vector<8x8xf32>
    %cst_408 = arith.constant dense<0.000000e+00> : vector<8x256xf32>
    %746 = tpu.matmul %745, %634, %cst_408 {dimension_numbers = #tpu.dot_dimension_numbers<[1], [0], [0], [1], [0, 0, 1, 1], [], []>} : vector<8x8xf32>, vector<8x256xf32>, vector<8x256xf32> -> vector<8x256xf32>
    %747 = arith.addf %743, %746 : vector<8x256xf32>
    %c2_409 = arith.constant 2 : index
    %c0_410 = arith.constant 0 : index
    %c0_411 = arith.constant 0 : index
    %748 = vector.load %arg15[%c2_409, %c0_410, %c0_411] : memref<9x8x8xf32, #tpu.memory_space<vmem>>, vector<1x8x8xf32>
    %749 = vector.shape_cast %748 : vector<1x8x8xf32> to vector<8x8xf32>
    %cst_412 = arith.constant dense<0.000000e+00> : vector<8x256xf32>
    %750 = tpu.matmul %749, %643, %cst_412 {dimension_numbers = #tpu.dot_dimension_numbers<[1], [0], [0], [1], [0, 0, 1, 1], [], []>} : vector<8x8xf32>, vector<8x256xf32>, vector<8x256xf32> -> vector<8x256xf32>
    %751 = arith.addf %747, %750 : vector<8x256xf32>
    %c2_413 = arith.constant 2 : index
    %c0_414 = arith.constant 0 : index
    %c0_415 = arith.constant 0 : index
    %752 = vector.load %arg16[%c2_413, %c0_414, %c0_415] : memref<9x8x8xf32, #tpu.memory_space<vmem>>, vector<1x8x8xf32>
    %753 = vector.shape_cast %752 : vector<1x8x8xf32> to vector<8x8xf32>
    %cst_416 = arith.constant dense<0.000000e+00> : vector<8x256xf32>
    %754 = tpu.matmul %753, %652, %cst_416 {dimension_numbers = #tpu.dot_dimension_numbers<[1], [0], [0], [1], [0, 0, 1, 1], [], []>} : vector<8x8xf32>, vector<8x256xf32>, vector<8x256xf32> -> vector<8x256xf32>
    %755 = arith.addf %751, %754 : vector<8x256xf32>
    %c3_417 = arith.constant 3 : index
    %c0_418 = arith.constant 0 : index
    %c0_419 = arith.constant 0 : index
    %756 = vector.load %arg15[%c3_417, %c0_418, %c0_419] : memref<9x8x8xf32, #tpu.memory_space<vmem>>, vector<1x8x8xf32>
    %757 = vector.shape_cast %756 : vector<1x8x8xf32> to vector<8x8xf32>
    %cst_420 = arith.constant dense<0.000000e+00> : vector<8x256xf32>
    %758 = tpu.matmul %757, %661, %cst_420 {dimension_numbers = #tpu.dot_dimension_numbers<[1], [0], [0], [1], [0, 0, 1, 1], [], []>} : vector<8x8xf32>, vector<8x256xf32>, vector<8x256xf32> -> vector<8x256xf32>
    %759 = arith.addf %755, %758 : vector<8x256xf32>
    %c3_421 = arith.constant 3 : index
    %c0_422 = arith.constant 0 : index
    %c0_423 = arith.constant 0 : index
    %760 = vector.load %arg16[%c3_421, %c0_422, %c0_423] : memref<9x8x8xf32, #tpu.memory_space<vmem>>, vector<1x8x8xf32>
    %761 = vector.shape_cast %760 : vector<1x8x8xf32> to vector<8x8xf32>
    %cst_424 = arith.constant dense<0.000000e+00> : vector<8x256xf32>
    %762 = tpu.matmul %761, %670, %cst_424 {dimension_numbers = #tpu.dot_dimension_numbers<[1], [0], [0], [1], [0, 0, 1, 1], [], []>} : vector<8x8xf32>, vector<8x256xf32>, vector<8x256xf32> -> vector<8x256xf32>
    %763 = arith.addf %759, %762 : vector<8x256xf32>
    %c4_425 = arith.constant 4 : index
    %c0_426 = arith.constant 0 : index
    %c0_427 = arith.constant 0 : index
    %764 = vector.load %arg15[%c4_425, %c0_426, %c0_427] : memref<9x8x8xf32, #tpu.memory_space<vmem>>, vector<1x8x8xf32>
    %765 = vector.shape_cast %764 : vector<1x8x8xf32> to vector<8x8xf32>
    %cst_428 = arith.constant dense<0.000000e+00> : vector<8x256xf32>
    %766 = tpu.matmul %765, %208, %cst_428 {dimension_numbers = #tpu.dot_dimension_numbers<[1], [0], [0], [1], [0, 0, 1, 1], [], []>} : vector<8x8xf32>, vector<8x256xf32>, vector<8x256xf32> -> vector<8x256xf32>
    %767 = arith.addf %763, %766 : vector<8x256xf32>
    %c4_429 = arith.constant 4 : index
    %c0_430 = arith.constant 0 : index
    %c0_431 = arith.constant 0 : index
    %768 = vector.load %arg16[%c4_429, %c0_430, %c0_431] : memref<9x8x8xf32, #tpu.memory_space<vmem>>, vector<1x8x8xf32>
    %769 = vector.shape_cast %768 : vector<1x8x8xf32> to vector<8x8xf32>
    %cst_432 = arith.constant dense<0.000000e+00> : vector<8x256xf32>
    %770 = tpu.matmul %769, %610, %cst_432 {dimension_numbers = #tpu.dot_dimension_numbers<[1], [0], [0], [1], [0, 0, 1, 1], [], []>} : vector<8x8xf32>, vector<8x256xf32>, vector<8x256xf32> -> vector<8x256xf32>
    %771 = arith.addf %767, %770 : vector<8x256xf32>
    %c5_433 = arith.constant 5 : index
    %c0_434 = arith.constant 0 : index
    %c0_435 = arith.constant 0 : index
    %772 = vector.load %arg15[%c5_433, %c0_434, %c0_435] : memref<9x8x8xf32, #tpu.memory_space<vmem>>, vector<1x8x8xf32>
    %773 = vector.shape_cast %772 : vector<1x8x8xf32> to vector<8x8xf32>
    %cst_436 = arith.constant dense<0.000000e+00> : vector<8x256xf32>
    %774 = tpu.matmul %773, %679, %cst_436 {dimension_numbers = #tpu.dot_dimension_numbers<[1], [0], [0], [1], [0, 0, 1, 1], [], []>} : vector<8x8xf32>, vector<8x256xf32>, vector<8x256xf32> -> vector<8x256xf32>
    %775 = arith.addf %771, %774 : vector<8x256xf32>
    %c5_437 = arith.constant 5 : index
    %c0_438 = arith.constant 0 : index
    %c0_439 = arith.constant 0 : index
    %776 = vector.load %arg16[%c5_437, %c0_438, %c0_439] : memref<9x8x8xf32, #tpu.memory_space<vmem>>, vector<1x8x8xf32>
    %777 = vector.shape_cast %776 : vector<1x8x8xf32> to vector<8x8xf32>
    %cst_440 = arith.constant dense<0.000000e+00> : vector<8x256xf32>
    %778 = tpu.matmul %777, %688, %cst_440 {dimension_numbers = #tpu.dot_dimension_numbers<[1], [0], [0], [1], [0, 0, 1, 1], [], []>} : vector<8x8xf32>, vector<8x256xf32>, vector<8x256xf32> -> vector<8x256xf32>
    %779 = arith.addf %775, %778 : vector<8x256xf32>
    %c6_441 = arith.constant 6 : index
    %c0_442 = arith.constant 0 : index
    %c0_443 = arith.constant 0 : index
    %780 = vector.load %arg15[%c6_441, %c0_442, %c0_443] : memref<9x8x8xf32, #tpu.memory_space<vmem>>, vector<1x8x8xf32>
    %781 = vector.shape_cast %780 : vector<1x8x8xf32> to vector<8x8xf32>
    %cst_444 = arith.constant dense<0.000000e+00> : vector<8x256xf32>
    %782 = tpu.matmul %781, %697, %cst_444 {dimension_numbers = #tpu.dot_dimension_numbers<[1], [0], [0], [1], [0, 0, 1, 1], [], []>} : vector<8x8xf32>, vector<8x256xf32>, vector<8x256xf32> -> vector<8x256xf32>
    %783 = arith.addf %779, %782 : vector<8x256xf32>
    %c6_445 = arith.constant 6 : index
    %c0_446 = arith.constant 0 : index
    %c0_447 = arith.constant 0 : index
    %784 = vector.load %arg16[%c6_445, %c0_446, %c0_447] : memref<9x8x8xf32, #tpu.memory_space<vmem>>, vector<1x8x8xf32>
    %785 = vector.shape_cast %784 : vector<1x8x8xf32> to vector<8x8xf32>
    %cst_448 = arith.constant dense<0.000000e+00> : vector<8x256xf32>
    %786 = tpu.matmul %785, %706, %cst_448 {dimension_numbers = #tpu.dot_dimension_numbers<[1], [0], [0], [1], [0, 0, 1, 1], [], []>} : vector<8x8xf32>, vector<8x256xf32>, vector<8x256xf32> -> vector<8x256xf32>
    %787 = arith.addf %783, %786 : vector<8x256xf32>
    %c7_449 = arith.constant 7 : index
    %c0_450 = arith.constant 0 : index
    %c0_451 = arith.constant 0 : index
    %788 = vector.load %arg15[%c7_449, %c0_450, %c0_451] : memref<9x8x8xf32, #tpu.memory_space<vmem>>, vector<1x8x8xf32>
    %789 = vector.shape_cast %788 : vector<1x8x8xf32> to vector<8x8xf32>
    %cst_452 = arith.constant dense<0.000000e+00> : vector<8x256xf32>
    %790 = tpu.matmul %789, %709, %cst_452 {dimension_numbers = #tpu.dot_dimension_numbers<[1], [0], [0], [1], [0, 0, 1, 1], [], []>} : vector<8x8xf32>, vector<8x256xf32>, vector<8x256xf32> -> vector<8x256xf32>
    %791 = arith.addf %787, %790 : vector<8x256xf32>
    %c7_453 = arith.constant 7 : index
    %c0_454 = arith.constant 0 : index
    %c0_455 = arith.constant 0 : index
    %792 = vector.load %arg16[%c7_453, %c0_454, %c0_455] : memref<9x8x8xf32, #tpu.memory_space<vmem>>, vector<1x8x8xf32>
    %793 = vector.shape_cast %792 : vector<1x8x8xf32> to vector<8x8xf32>
    %cst_456 = arith.constant dense<0.000000e+00> : vector<8x256xf32>
    %794 = tpu.matmul %793, %712, %cst_456 {dimension_numbers = #tpu.dot_dimension_numbers<[1], [0], [0], [1], [0, 0, 1, 1], [], []>} : vector<8x8xf32>, vector<8x256xf32>, vector<8x256xf32> -> vector<8x256xf32>
    %795 = arith.addf %791, %794 : vector<8x256xf32>
    %c8_457 = arith.constant 8 : index
    %c0_458 = arith.constant 0 : index
    %c0_459 = arith.constant 0 : index
    %796 = vector.load %arg15[%c8_457, %c0_458, %c0_459] : memref<9x8x8xf32, #tpu.memory_space<vmem>>, vector<1x8x8xf32>
    %797 = vector.shape_cast %796 : vector<1x8x8xf32> to vector<8x8xf32>
    %cst_460 = arith.constant dense<0.000000e+00> : vector<8x256xf32>
    %798 = tpu.matmul %797, %721, %cst_460 {dimension_numbers = #tpu.dot_dimension_numbers<[1], [0], [0], [1], [0, 0, 1, 1], [], []>} : vector<8x8xf32>, vector<8x256xf32>, vector<8x256xf32> -> vector<8x256xf32>
    %799 = arith.addf %795, %798 : vector<8x256xf32>
    %c8_461 = arith.constant 8 : index
    %c0_462 = arith.constant 0 : index
    %c0_463 = arith.constant 0 : index
    %800 = vector.load %arg16[%c8_461, %c0_462, %c0_463] : memref<9x8x8xf32, #tpu.memory_space<vmem>>, vector<1x8x8xf32>
    %801 = vector.shape_cast %800 : vector<1x8x8xf32> to vector<8x8xf32>
    %cst_464 = arith.constant dense<0.000000e+00> : vector<8x256xf32>
    %802 = tpu.matmul %801, %730, %cst_464 {dimension_numbers = #tpu.dot_dimension_numbers<[1], [0], [0], [1], [0, 0, 1, 1], [], []>} : vector<8x8xf32>, vector<8x256xf32>, vector<8x256xf32> -> vector<8x256xf32>
    %803 = arith.addf %799, %802 : vector<8x256xf32>
    %c0_465 = arith.constant 0 : index
    %c0_466 = arith.constant 0 : index
    %804 = vector.load %arg17[%c0_465, %c0_466] : memref<8x1xf32, #tpu.memory_space<vmem>>, vector<8x1xf32>
    %805 = vector.broadcast %804 : vector<8x1xf32> to vector<8x256xf32>
    %806 = arith.addf %803, %805 : vector<8x256xf32>
    %cst_467 = arith.constant 0.000000e+00 : f32
    %807 = vector.broadcast %cst_467 : f32 to vector<8x256xf32>
    %808 = arith.maximumf %806, %807 : vector<8x256xf32>
    %cst_468 = arith.constant 0.000000e+00 : f32
    %809 = vector.broadcast %cst_468 : f32 to vector<8x17xf32>
    %810 = vector.extract_strided_slice %106 {offsets = [0, 0], sizes = [8, 239], strides = [1, 1]} : vector<8x256xf32> to vector<8x239xf32>
    %811 = tpu.concatenate %809, %810 in 1 : vector<8x17xf32>, vector<8x239xf32> -> vector<8x256xf32>
    %c1_i32_469 = arith.constant 1 : i32
    %812 = vector.broadcast %c1_i32_469 : i32 to vector<1x256xi32>
    %813 = arith.cmpi sge, %0, %812 : vector<1x256xi32>
    %cst_470 = arith.constant 0.000000e+00 : f32
    %814 = vector.shape_cast %813 : vector<1x256xi1> to vector<1x256xi1>
    %815 = vector.broadcast %814 : vector<1x256xi1> to vector<8x256xi1>
    %816 = vector.broadcast %cst_470 : f32 to vector<8x256xf32>
    %817 = arith.select %815, %811, %816 : vector<8x256xi1>, vector<8x256xf32>
    %cst_471 = arith.constant 0.000000e+00 : f32
    %818 = vector.broadcast %cst_471 : f32 to vector<8x17xf32>
    %819 = vector.extract_strided_slice %808 {offsets = [0, 0], sizes = [8, 239], strides = [1, 1]} : vector<8x256xf32> to vector<8x239xf32>
    %820 = tpu.concatenate %818, %819 in 1 : vector<8x17xf32>, vector<8x239xf32> -> vector<8x256xf32>
    %c1_i32_472 = arith.constant 1 : i32
    %821 = vector.broadcast %c1_i32_472 : i32 to vector<1x256xi32>
    %822 = arith.cmpi sge, %0, %821 : vector<1x256xi32>
    %cst_473 = arith.constant 0.000000e+00 : f32
    %823 = vector.shape_cast %822 : vector<1x256xi1> to vector<1x256xi1>
    %824 = vector.broadcast %823 : vector<1x256xi1> to vector<8x256xi1>
    %825 = vector.broadcast %cst_473 : f32 to vector<8x256xf32>
    %826 = arith.select %824, %820, %825 : vector<8x256xi1>, vector<8x256xf32>
    %cst_474 = arith.constant 0.000000e+00 : f32
    %827 = vector.broadcast %cst_474 : f32 to vector<8x16xf32>
    %828 = vector.extract_strided_slice %106 {offsets = [0, 0], sizes = [8, 240], strides = [1, 1]} : vector<8x256xf32> to vector<8x240xf32>
    %829 = tpu.concatenate %827, %828 in 1 : vector<8x16xf32>, vector<8x240xf32> -> vector<8x256xf32>
    %cst_475 = arith.constant 0.000000e+00 : f32
    %830 = vector.broadcast %cst_475 : f32 to vector<8x16xf32>
    %831 = vector.extract_strided_slice %808 {offsets = [0, 0], sizes = [8, 240], strides = [1, 1]} : vector<8x256xf32> to vector<8x240xf32>
    %832 = tpu.concatenate %830, %831 in 1 : vector<8x16xf32>, vector<8x240xf32> -> vector<8x256xf32>
    %cst_476 = arith.constant 0.000000e+00 : f32
    %833 = vector.broadcast %cst_476 : f32 to vector<8x15xf32>
    %834 = vector.extract_strided_slice %106 {offsets = [0, 0], sizes = [8, 241], strides = [1, 1]} : vector<8x256xf32> to vector<8x241xf32>
    %835 = tpu.concatenate %833, %834 in 1 : vector<8x15xf32>, vector<8x241xf32> -> vector<8x256xf32>
    %c15_i32_477 = arith.constant 15 : i32
    %836 = vector.broadcast %c15_i32_477 : i32 to vector<1x256xi32>
    %837 = arith.cmpi slt, %0, %836 : vector<1x256xi32>
    %cst_478 = arith.constant 0.000000e+00 : f32
    %838 = vector.shape_cast %837 : vector<1x256xi1> to vector<1x256xi1>
    %839 = vector.broadcast %838 : vector<1x256xi1> to vector<8x256xi1>
    %840 = vector.broadcast %cst_478 : f32 to vector<8x256xf32>
    %841 = arith.select %839, %835, %840 : vector<8x256xi1>, vector<8x256xf32>
    %cst_479 = arith.constant 0.000000e+00 : f32
    %842 = vector.broadcast %cst_479 : f32 to vector<8x15xf32>
    %843 = vector.extract_strided_slice %808 {offsets = [0, 0], sizes = [8, 241], strides = [1, 1]} : vector<8x256xf32> to vector<8x241xf32>
    %844 = tpu.concatenate %842, %843 in 1 : vector<8x15xf32>, vector<8x241xf32> -> vector<8x256xf32>
    %c15_i32_480 = arith.constant 15 : i32
    %845 = vector.broadcast %c15_i32_480 : i32 to vector<1x256xi32>
    %846 = arith.cmpi slt, %0, %845 : vector<1x256xi32>
    %cst_481 = arith.constant 0.000000e+00 : f32
    %847 = vector.shape_cast %846 : vector<1x256xi1> to vector<1x256xi1>
    %848 = vector.broadcast %847 : vector<1x256xi1> to vector<8x256xi1>
    %849 = vector.broadcast %cst_481 : f32 to vector<8x256xf32>
    %850 = arith.select %848, %844, %849 : vector<8x256xi1>, vector<8x256xf32>
    %cst_482 = arith.constant 0.000000e+00 : f32
    %851 = vector.broadcast %cst_482 : f32 to vector<8x1xf32>
    %852 = vector.extract_strided_slice %106 {offsets = [0, 0], sizes = [8, 255], strides = [1, 1]} : vector<8x256xf32> to vector<8x255xf32>
    %853 = tpu.concatenate %851, %852 in 1 : vector<8x1xf32>, vector<8x255xf32> -> vector<8x256xf32>
    %c1_i32_483 = arith.constant 1 : i32
    %854 = vector.broadcast %c1_i32_483 : i32 to vector<1x256xi32>
    %855 = arith.cmpi sge, %0, %854 : vector<1x256xi32>
    %cst_484 = arith.constant 0.000000e+00 : f32
    %856 = vector.shape_cast %855 : vector<1x256xi1> to vector<1x256xi1>
    %857 = vector.broadcast %856 : vector<1x256xi1> to vector<8x256xi1>
    %858 = vector.broadcast %cst_484 : f32 to vector<8x256xf32>
    %859 = arith.select %857, %853, %858 : vector<8x256xi1>, vector<8x256xf32>
    %cst_485 = arith.constant 0.000000e+00 : f32
    %860 = vector.broadcast %cst_485 : f32 to vector<8x1xf32>
    %861 = vector.extract_strided_slice %808 {offsets = [0, 0], sizes = [8, 255], strides = [1, 1]} : vector<8x256xf32> to vector<8x255xf32>
    %862 = tpu.concatenate %860, %861 in 1 : vector<8x1xf32>, vector<8x255xf32> -> vector<8x256xf32>
    %c1_i32_486 = arith.constant 1 : i32
    %863 = vector.broadcast %c1_i32_486 : i32 to vector<1x256xi32>
    %864 = arith.cmpi sge, %0, %863 : vector<1x256xi32>
    %cst_487 = arith.constant 0.000000e+00 : f32
    %865 = vector.shape_cast %864 : vector<1x256xi1> to vector<1x256xi1>
    %866 = vector.broadcast %865 : vector<1x256xi1> to vector<8x256xi1>
    %867 = vector.broadcast %cst_487 : f32 to vector<8x256xf32>
    %868 = arith.select %866, %862, %867 : vector<8x256xi1>, vector<8x256xf32>
    %869 = vector.extract_strided_slice %106 {offsets = [0, 1], sizes = [8, 255], strides = [1, 1]} : vector<8x256xf32> to vector<8x255xf32>
    %cst_488 = arith.constant 0.000000e+00 : f32
    %870 = vector.broadcast %cst_488 : f32 to vector<8x1xf32>
    %871 = tpu.concatenate %869, %870 in 1 : vector<8x255xf32>, vector<8x1xf32> -> vector<8x256xf32>
    %c15_i32_489 = arith.constant 15 : i32
    %872 = vector.broadcast %c15_i32_489 : i32 to vector<1x256xi32>
    %873 = arith.cmpi slt, %0, %872 : vector<1x256xi32>
    %cst_490 = arith.constant 0.000000e+00 : f32
    %874 = vector.shape_cast %873 : vector<1x256xi1> to vector<1x256xi1>
    %875 = vector.broadcast %874 : vector<1x256xi1> to vector<8x256xi1>
    %876 = vector.broadcast %cst_490 : f32 to vector<8x256xf32>
    %877 = arith.select %875, %871, %876 : vector<8x256xi1>, vector<8x256xf32>
    %878 = vector.extract_strided_slice %808 {offsets = [0, 1], sizes = [8, 255], strides = [1, 1]} : vector<8x256xf32> to vector<8x255xf32>
    %cst_491 = arith.constant 0.000000e+00 : f32
    %879 = vector.broadcast %cst_491 : f32 to vector<8x1xf32>
    %880 = tpu.concatenate %878, %879 in 1 : vector<8x255xf32>, vector<8x1xf32> -> vector<8x256xf32>
    %c15_i32_492 = arith.constant 15 : i32
    %881 = vector.broadcast %c15_i32_492 : i32 to vector<1x256xi32>
    %882 = arith.cmpi slt, %0, %881 : vector<1x256xi32>
    %cst_493 = arith.constant 0.000000e+00 : f32
    %883 = vector.shape_cast %882 : vector<1x256xi1> to vector<1x256xi1>
    %884 = vector.broadcast %883 : vector<1x256xi1> to vector<8x256xi1>
    %885 = vector.broadcast %cst_493 : f32 to vector<8x256xf32>
    %886 = arith.select %884, %880, %885 : vector<8x256xi1>, vector<8x256xf32>
    %887 = vector.extract_strided_slice %106 {offsets = [0, 15], sizes = [8, 241], strides = [1, 1]} : vector<8x256xf32> to vector<8x241xf32>
    %cst_494 = arith.constant 0.000000e+00 : f32
    %888 = vector.broadcast %cst_494 : f32 to vector<8x15xf32>
    %889 = tpu.concatenate %887, %888 in 1 : vector<8x241xf32>, vector<8x15xf32> -> vector<8x256xf32>
    %c1_i32_495 = arith.constant 1 : i32
    %890 = vector.broadcast %c1_i32_495 : i32 to vector<1x256xi32>
    %891 = arith.cmpi sge, %0, %890 : vector<1x256xi32>
    %cst_496 = arith.constant 0.000000e+00 : f32
    %892 = vector.shape_cast %891 : vector<1x256xi1> to vector<1x256xi1>
    %893 = vector.broadcast %892 : vector<1x256xi1> to vector<8x256xi1>
    %894 = vector.broadcast %cst_496 : f32 to vector<8x256xf32>
    %895 = arith.select %893, %889, %894 : vector<8x256xi1>, vector<8x256xf32>
    %896 = vector.extract_strided_slice %808 {offsets = [0, 15], sizes = [8, 241], strides = [1, 1]} : vector<8x256xf32> to vector<8x241xf32>
    %cst_497 = arith.constant 0.000000e+00 : f32
    %897 = vector.broadcast %cst_497 : f32 to vector<8x15xf32>
    %898 = tpu.concatenate %896, %897 in 1 : vector<8x241xf32>, vector<8x15xf32> -> vector<8x256xf32>
    %c1_i32_498 = arith.constant 1 : i32
    %899 = vector.broadcast %c1_i32_498 : i32 to vector<1x256xi32>
    %900 = arith.cmpi sge, %0, %899 : vector<1x256xi32>
    %cst_499 = arith.constant 0.000000e+00 : f32
    %901 = vector.shape_cast %900 : vector<1x256xi1> to vector<1x256xi1>
    %902 = vector.broadcast %901 : vector<1x256xi1> to vector<8x256xi1>
    %903 = vector.broadcast %cst_499 : f32 to vector<8x256xf32>
    %904 = arith.select %902, %898, %903 : vector<8x256xi1>, vector<8x256xf32>
    %905 = vector.extract_strided_slice %106 {offsets = [0, 16], sizes = [8, 240], strides = [1, 1]} : vector<8x256xf32> to vector<8x240xf32>
    %cst_500 = arith.constant 0.000000e+00 : f32
    %906 = vector.broadcast %cst_500 : f32 to vector<8x16xf32>
    %907 = tpu.concatenate %905, %906 in 1 : vector<8x240xf32>, vector<8x16xf32> -> vector<8x256xf32>
    %908 = vector.extract_strided_slice %808 {offsets = [0, 16], sizes = [8, 240], strides = [1, 1]} : vector<8x256xf32> to vector<8x240xf32>
    %cst_501 = arith.constant 0.000000e+00 : f32
    %909 = vector.broadcast %cst_501 : f32 to vector<8x16xf32>
    %910 = tpu.concatenate %908, %909 in 1 : vector<8x240xf32>, vector<8x16xf32> -> vector<8x256xf32>
    %911 = vector.extract_strided_slice %106 {offsets = [0, 17], sizes = [8, 239], strides = [1, 1]} : vector<8x256xf32> to vector<8x239xf32>
    %cst_502 = arith.constant 0.000000e+00 : f32
    %912 = vector.broadcast %cst_502 : f32 to vector<8x17xf32>
    %913 = tpu.concatenate %911, %912 in 1 : vector<8x239xf32>, vector<8x17xf32> -> vector<8x256xf32>
    %c15_i32_503 = arith.constant 15 : i32
    %914 = vector.broadcast %c15_i32_503 : i32 to vector<1x256xi32>
    %915 = arith.cmpi slt, %0, %914 : vector<1x256xi32>
    %cst_504 = arith.constant 0.000000e+00 : f32
    %916 = vector.shape_cast %915 : vector<1x256xi1> to vector<1x256xi1>
    %917 = vector.broadcast %916 : vector<1x256xi1> to vector<8x256xi1>
    %918 = vector.broadcast %cst_504 : f32 to vector<8x256xf32>
    %919 = arith.select %917, %913, %918 : vector<8x256xi1>, vector<8x256xf32>
    %920 = vector.extract_strided_slice %808 {offsets = [0, 17], sizes = [8, 239], strides = [1, 1]} : vector<8x256xf32> to vector<8x239xf32>
    %cst_505 = arith.constant 0.000000e+00 : f32
    %921 = vector.broadcast %cst_505 : f32 to vector<8x17xf32>
    %922 = tpu.concatenate %920, %921 in 1 : vector<8x239xf32>, vector<8x17xf32> -> vector<8x256xf32>
    %c15_i32_506 = arith.constant 15 : i32
    %923 = vector.broadcast %c15_i32_506 : i32 to vector<1x256xi32>
    %924 = arith.cmpi slt, %0, %923 : vector<1x256xi32>
    %cst_507 = arith.constant 0.000000e+00 : f32
    %925 = vector.shape_cast %924 : vector<1x256xi1> to vector<1x256xi1>
    %926 = vector.broadcast %925 : vector<1x256xi1> to vector<8x256xi1>
    %927 = vector.broadcast %cst_507 : f32 to vector<8x256xf32>
    %928 = arith.select %926, %922, %927 : vector<8x256xi1>, vector<8x256xf32>
    %cst_508 = arith.constant 0.000000e+00 : f32
    %929 = vector.broadcast %cst_508 : f32 to vector<8x256xf32>
    %c0_509 = arith.constant 0 : index
    %c0_510 = arith.constant 0 : index
    %c0_511 = arith.constant 0 : index
    %c0_512 = arith.constant 0 : index
    %930 = vector.load %arg18[%c0_509, %c0_510, %c0_511, %c0_512] : memref<4x9x8x8xf32, #tpu.memory_space<vmem>>, vector<1x1x8x8xf32>
    %931 = vector.shape_cast %930 : vector<1x1x8x8xf32> to vector<8x8xf32>
    %cst_513 = arith.constant dense<0.000000e+00> : vector<8x256xf32>
    %932 = tpu.matmul %931, %817, %cst_513 {dimension_numbers = #tpu.dot_dimension_numbers<[1], [0], [0], [1], [0, 0, 1, 1], [], []>} : vector<8x8xf32>, vector<8x256xf32>, vector<8x256xf32> -> vector<8x256xf32>
    %933 = arith.addf %929, %932 : vector<8x256xf32>
    %c0_514 = arith.constant 0 : index
    %c0_515 = arith.constant 0 : index
    %c0_516 = arith.constant 0 : index
    %c0_517 = arith.constant 0 : index
    %934 = vector.load %arg19[%c0_514, %c0_515, %c0_516, %c0_517] : memref<4x9x8x8xf32, #tpu.memory_space<vmem>>, vector<1x1x8x8xf32>
    %935 = vector.shape_cast %934 : vector<1x1x8x8xf32> to vector<8x8xf32>
    %cst_518 = arith.constant dense<0.000000e+00> : vector<8x256xf32>
    %936 = tpu.matmul %935, %826, %cst_518 {dimension_numbers = #tpu.dot_dimension_numbers<[1], [0], [0], [1], [0, 0, 1, 1], [], []>} : vector<8x8xf32>, vector<8x256xf32>, vector<8x256xf32> -> vector<8x256xf32>
    %937 = arith.addf %933, %936 : vector<8x256xf32>
    %c0_519 = arith.constant 0 : index
    %c1_520 = arith.constant 1 : index
    %c0_521 = arith.constant 0 : index
    %c0_522 = arith.constant 0 : index
    %938 = vector.load %arg18[%c0_519, %c1_520, %c0_521, %c0_522] : memref<4x9x8x8xf32, #tpu.memory_space<vmem>>, vector<1x1x8x8xf32>
    %939 = vector.shape_cast %938 : vector<1x1x8x8xf32> to vector<8x8xf32>
    %cst_523 = arith.constant dense<0.000000e+00> : vector<8x256xf32>
    %940 = tpu.matmul %939, %829, %cst_523 {dimension_numbers = #tpu.dot_dimension_numbers<[1], [0], [0], [1], [0, 0, 1, 1], [], []>} : vector<8x8xf32>, vector<8x256xf32>, vector<8x256xf32> -> vector<8x256xf32>
    %941 = arith.addf %937, %940 : vector<8x256xf32>
    %c0_524 = arith.constant 0 : index
    %c1_525 = arith.constant 1 : index
    %c0_526 = arith.constant 0 : index
    %c0_527 = arith.constant 0 : index
    %942 = vector.load %arg19[%c0_524, %c1_525, %c0_526, %c0_527] : memref<4x9x8x8xf32, #tpu.memory_space<vmem>>, vector<1x1x8x8xf32>
    %943 = vector.shape_cast %942 : vector<1x1x8x8xf32> to vector<8x8xf32>
    %cst_528 = arith.constant dense<0.000000e+00> : vector<8x256xf32>
    %944 = tpu.matmul %943, %832, %cst_528 {dimension_numbers = #tpu.dot_dimension_numbers<[1], [0], [0], [1], [0, 0, 1, 1], [], []>} : vector<8x8xf32>, vector<8x256xf32>, vector<8x256xf32> -> vector<8x256xf32>
    %945 = arith.addf %941, %944 : vector<8x256xf32>
    %c0_529 = arith.constant 0 : index
    %c2_530 = arith.constant 2 : index
    %c0_531 = arith.constant 0 : index
    %c0_532 = arith.constant 0 : index
    %946 = vector.load %arg18[%c0_529, %c2_530, %c0_531, %c0_532] : memref<4x9x8x8xf32, #tpu.memory_space<vmem>>, vector<1x1x8x8xf32>
    %947 = vector.shape_cast %946 : vector<1x1x8x8xf32> to vector<8x8xf32>
    %cst_533 = arith.constant dense<0.000000e+00> : vector<8x256xf32>
    %948 = tpu.matmul %947, %841, %cst_533 {dimension_numbers = #tpu.dot_dimension_numbers<[1], [0], [0], [1], [0, 0, 1, 1], [], []>} : vector<8x8xf32>, vector<8x256xf32>, vector<8x256xf32> -> vector<8x256xf32>
    %949 = arith.addf %945, %948 : vector<8x256xf32>
    %c0_534 = arith.constant 0 : index
    %c2_535 = arith.constant 2 : index
    %c0_536 = arith.constant 0 : index
    %c0_537 = arith.constant 0 : index
    %950 = vector.load %arg19[%c0_534, %c2_535, %c0_536, %c0_537] : memref<4x9x8x8xf32, #tpu.memory_space<vmem>>, vector<1x1x8x8xf32>
    %951 = vector.shape_cast %950 : vector<1x1x8x8xf32> to vector<8x8xf32>
    %cst_538 = arith.constant dense<0.000000e+00> : vector<8x256xf32>
    %952 = tpu.matmul %951, %850, %cst_538 {dimension_numbers = #tpu.dot_dimension_numbers<[1], [0], [0], [1], [0, 0, 1, 1], [], []>} : vector<8x8xf32>, vector<8x256xf32>, vector<8x256xf32> -> vector<8x256xf32>
    %953 = arith.addf %949, %952 : vector<8x256xf32>
    %c0_539 = arith.constant 0 : index
    %c3_540 = arith.constant 3 : index
    %c0_541 = arith.constant 0 : index
    %c0_542 = arith.constant 0 : index
    %954 = vector.load %arg18[%c0_539, %c3_540, %c0_541, %c0_542] : memref<4x9x8x8xf32, #tpu.memory_space<vmem>>, vector<1x1x8x8xf32>
    %955 = vector.shape_cast %954 : vector<1x1x8x8xf32> to vector<8x8xf32>
    %cst_543 = arith.constant dense<0.000000e+00> : vector<8x256xf32>
    %956 = tpu.matmul %955, %859, %cst_543 {dimension_numbers = #tpu.dot_dimension_numbers<[1], [0], [0], [1], [0, 0, 1, 1], [], []>} : vector<8x8xf32>, vector<8x256xf32>, vector<8x256xf32> -> vector<8x256xf32>
    %957 = arith.addf %953, %956 : vector<8x256xf32>
    %c0_544 = arith.constant 0 : index
    %c3_545 = arith.constant 3 : index
    %c0_546 = arith.constant 0 : index
    %c0_547 = arith.constant 0 : index
    %958 = vector.load %arg19[%c0_544, %c3_545, %c0_546, %c0_547] : memref<4x9x8x8xf32, #tpu.memory_space<vmem>>, vector<1x1x8x8xf32>
    %959 = vector.shape_cast %958 : vector<1x1x8x8xf32> to vector<8x8xf32>
    %cst_548 = arith.constant dense<0.000000e+00> : vector<8x256xf32>
    %960 = tpu.matmul %959, %868, %cst_548 {dimension_numbers = #tpu.dot_dimension_numbers<[1], [0], [0], [1], [0, 0, 1, 1], [], []>} : vector<8x8xf32>, vector<8x256xf32>, vector<8x256xf32> -> vector<8x256xf32>
    %961 = arith.addf %957, %960 : vector<8x256xf32>
    %c0_549 = arith.constant 0 : index
    %c4_550 = arith.constant 4 : index
    %c0_551 = arith.constant 0 : index
    %c0_552 = arith.constant 0 : index
    %962 = vector.load %arg18[%c0_549, %c4_550, %c0_551, %c0_552] : memref<4x9x8x8xf32, #tpu.memory_space<vmem>>, vector<1x1x8x8xf32>
    %963 = vector.shape_cast %962 : vector<1x1x8x8xf32> to vector<8x8xf32>
    %cst_553 = arith.constant dense<0.000000e+00> : vector<8x256xf32>
    %964 = tpu.matmul %963, %106, %cst_553 {dimension_numbers = #tpu.dot_dimension_numbers<[1], [0], [0], [1], [0, 0, 1, 1], [], []>} : vector<8x8xf32>, vector<8x256xf32>, vector<8x256xf32> -> vector<8x256xf32>
    %965 = arith.addf %961, %964 : vector<8x256xf32>
    %c0_554 = arith.constant 0 : index
    %c4_555 = arith.constant 4 : index
    %c0_556 = arith.constant 0 : index
    %c0_557 = arith.constant 0 : index
    %966 = vector.load %arg19[%c0_554, %c4_555, %c0_556, %c0_557] : memref<4x9x8x8xf32, #tpu.memory_space<vmem>>, vector<1x1x8x8xf32>
    %967 = vector.shape_cast %966 : vector<1x1x8x8xf32> to vector<8x8xf32>
    %cst_558 = arith.constant dense<0.000000e+00> : vector<8x256xf32>
    %968 = tpu.matmul %967, %808, %cst_558 {dimension_numbers = #tpu.dot_dimension_numbers<[1], [0], [0], [1], [0, 0, 1, 1], [], []>} : vector<8x8xf32>, vector<8x256xf32>, vector<8x256xf32> -> vector<8x256xf32>
    %969 = arith.addf %965, %968 : vector<8x256xf32>
    %c0_559 = arith.constant 0 : index
    %c5_560 = arith.constant 5 : index
    %c0_561 = arith.constant 0 : index
    %c0_562 = arith.constant 0 : index
    %970 = vector.load %arg18[%c0_559, %c5_560, %c0_561, %c0_562] : memref<4x9x8x8xf32, #tpu.memory_space<vmem>>, vector<1x1x8x8xf32>
    %971 = vector.shape_cast %970 : vector<1x1x8x8xf32> to vector<8x8xf32>
    %cst_563 = arith.constant dense<0.000000e+00> : vector<8x256xf32>
    %972 = tpu.matmul %971, %877, %cst_563 {dimension_numbers = #tpu.dot_dimension_numbers<[1], [0], [0], [1], [0, 0, 1, 1], [], []>} : vector<8x8xf32>, vector<8x256xf32>, vector<8x256xf32> -> vector<8x256xf32>
    %973 = arith.addf %969, %972 : vector<8x256xf32>
    %c0_564 = arith.constant 0 : index
    %c5_565 = arith.constant 5 : index
    %c0_566 = arith.constant 0 : index
    %c0_567 = arith.constant 0 : index
    %974 = vector.load %arg19[%c0_564, %c5_565, %c0_566, %c0_567] : memref<4x9x8x8xf32, #tpu.memory_space<vmem>>, vector<1x1x8x8xf32>
    %975 = vector.shape_cast %974 : vector<1x1x8x8xf32> to vector<8x8xf32>
    %cst_568 = arith.constant dense<0.000000e+00> : vector<8x256xf32>
    %976 = tpu.matmul %975, %886, %cst_568 {dimension_numbers = #tpu.dot_dimension_numbers<[1], [0], [0], [1], [0, 0, 1, 1], [], []>} : vector<8x8xf32>, vector<8x256xf32>, vector<8x256xf32> -> vector<8x256xf32>
    %977 = arith.addf %973, %976 : vector<8x256xf32>
    %c0_569 = arith.constant 0 : index
    %c6_570 = arith.constant 6 : index
    %c0_571 = arith.constant 0 : index
    %c0_572 = arith.constant 0 : index
    %978 = vector.load %arg18[%c0_569, %c6_570, %c0_571, %c0_572] : memref<4x9x8x8xf32, #tpu.memory_space<vmem>>, vector<1x1x8x8xf32>
    %979 = vector.shape_cast %978 : vector<1x1x8x8xf32> to vector<8x8xf32>
    %cst_573 = arith.constant dense<0.000000e+00> : vector<8x256xf32>
    %980 = tpu.matmul %979, %895, %cst_573 {dimension_numbers = #tpu.dot_dimension_numbers<[1], [0], [0], [1], [0, 0, 1, 1], [], []>} : vector<8x8xf32>, vector<8x256xf32>, vector<8x256xf32> -> vector<8x256xf32>
    %981 = arith.addf %977, %980 : vector<8x256xf32>
    %c0_574 = arith.constant 0 : index
    %c6_575 = arith.constant 6 : index
    %c0_576 = arith.constant 0 : index
    %c0_577 = arith.constant 0 : index
    %982 = vector.load %arg19[%c0_574, %c6_575, %c0_576, %c0_577] : memref<4x9x8x8xf32, #tpu.memory_space<vmem>>, vector<1x1x8x8xf32>
    %983 = vector.shape_cast %982 : vector<1x1x8x8xf32> to vector<8x8xf32>
    %cst_578 = arith.constant dense<0.000000e+00> : vector<8x256xf32>
    %984 = tpu.matmul %983, %904, %cst_578 {dimension_numbers = #tpu.dot_dimension_numbers<[1], [0], [0], [1], [0, 0, 1, 1], [], []>} : vector<8x8xf32>, vector<8x256xf32>, vector<8x256xf32> -> vector<8x256xf32>
    %985 = arith.addf %981, %984 : vector<8x256xf32>
    %c0_579 = arith.constant 0 : index
    %c7_580 = arith.constant 7 : index
    %c0_581 = arith.constant 0 : index
    %c0_582 = arith.constant 0 : index
    %986 = vector.load %arg18[%c0_579, %c7_580, %c0_581, %c0_582] : memref<4x9x8x8xf32, #tpu.memory_space<vmem>>, vector<1x1x8x8xf32>
    %987 = vector.shape_cast %986 : vector<1x1x8x8xf32> to vector<8x8xf32>
    %cst_583 = arith.constant dense<0.000000e+00> : vector<8x256xf32>
    %988 = tpu.matmul %987, %907, %cst_583 {dimension_numbers = #tpu.dot_dimension_numbers<[1], [0], [0], [1], [0, 0, 1, 1], [], []>} : vector<8x8xf32>, vector<8x256xf32>, vector<8x256xf32> -> vector<8x256xf32>
    %989 = arith.addf %985, %988 : vector<8x256xf32>
    %c0_584 = arith.constant 0 : index
    %c7_585 = arith.constant 7 : index
    %c0_586 = arith.constant 0 : index
    %c0_587 = arith.constant 0 : index
    %990 = vector.load %arg19[%c0_584, %c7_585, %c0_586, %c0_587] : memref<4x9x8x8xf32, #tpu.memory_space<vmem>>, vector<1x1x8x8xf32>
    %991 = vector.shape_cast %990 : vector<1x1x8x8xf32> to vector<8x8xf32>
    %cst_588 = arith.constant dense<0.000000e+00> : vector<8x256xf32>
    %992 = tpu.matmul %991, %910, %cst_588 {dimension_numbers = #tpu.dot_dimension_numbers<[1], [0], [0], [1], [0, 0, 1, 1], [], []>} : vector<8x8xf32>, vector<8x256xf32>, vector<8x256xf32> -> vector<8x256xf32>
    %993 = arith.addf %989, %992 : vector<8x256xf32>
    %c0_589 = arith.constant 0 : index
    %c8_590 = arith.constant 8 : index
    %c0_591 = arith.constant 0 : index
    %c0_592 = arith.constant 0 : index
    %994 = vector.load %arg18[%c0_589, %c8_590, %c0_591, %c0_592] : memref<4x9x8x8xf32, #tpu.memory_space<vmem>>, vector<1x1x8x8xf32>
    %995 = vector.shape_cast %994 : vector<1x1x8x8xf32> to vector<8x8xf32>
    %cst_593 = arith.constant dense<0.000000e+00> : vector<8x256xf32>
    %996 = tpu.matmul %995, %919, %cst_593 {dimension_numbers = #tpu.dot_dimension_numbers<[1], [0], [0], [1], [0, 0, 1, 1], [], []>} : vector<8x8xf32>, vector<8x256xf32>, vector<8x256xf32> -> vector<8x256xf32>
    %997 = arith.addf %993, %996 : vector<8x256xf32>
    %c0_594 = arith.constant 0 : index
    %c8_595 = arith.constant 8 : index
    %c0_596 = arith.constant 0 : index
    %c0_597 = arith.constant 0 : index
    %998 = vector.load %arg19[%c0_594, %c8_595, %c0_596, %c0_597] : memref<4x9x8x8xf32, #tpu.memory_space<vmem>>, vector<1x1x8x8xf32>
    %999 = vector.shape_cast %998 : vector<1x1x8x8xf32> to vector<8x8xf32>
    %cst_598 = arith.constant dense<0.000000e+00> : vector<8x256xf32>
    %1000 = tpu.matmul %999, %928, %cst_598 {dimension_numbers = #tpu.dot_dimension_numbers<[1], [0], [0], [1], [0, 0, 1, 1], [], []>} : vector<8x8xf32>, vector<8x256xf32>, vector<8x256xf32> -> vector<8x256xf32>
    %1001 = arith.addf %997, %1000 : vector<8x256xf32>
    %c0_599 = arith.constant 0 : index
    %c0_600 = arith.constant 0 : index
    %c0_601 = arith.constant 0 : index
    %1002 = vector.load %arg20[%c0_599, %c0_600, %c0_601] : memref<4x8x1xf32, #tpu.memory_space<vmem>>, vector<1x8x1xf32>
    %1003 = vector.shape_cast %1002 : vector<1x8x1xf32> to vector<8x1xf32>
    %1004 = vector.broadcast %1003 : vector<8x1xf32> to vector<8x256xf32>
    %1005 = arith.addf %1001, %1004 : vector<8x256xf32>
    %1006 = math.tanh %1005 : vector<8x256xf32>
    %cst_602 = arith.constant 0.000000e+00 : f32
    %1007 = vector.broadcast %cst_602 : f32 to vector<8x256xf32>
    %c1_603 = arith.constant 1 : index
    %c0_604 = arith.constant 0 : index
    %c0_605 = arith.constant 0 : index
    %c0_606 = arith.constant 0 : index
    %1008 = vector.load %arg18[%c1_603, %c0_604, %c0_605, %c0_606] : memref<4x9x8x8xf32, #tpu.memory_space<vmem>>, vector<1x1x8x8xf32>
    %1009 = vector.shape_cast %1008 : vector<1x1x8x8xf32> to vector<8x8xf32>
    %cst_607 = arith.constant dense<0.000000e+00> : vector<8x256xf32>
    %1010 = tpu.matmul %1009, %817, %cst_607 {dimension_numbers = #tpu.dot_dimension_numbers<[1], [0], [0], [1], [0, 0, 1, 1], [], []>} : vector<8x8xf32>, vector<8x256xf32>, vector<8x256xf32> -> vector<8x256xf32>
    %1011 = arith.addf %1007, %1010 : vector<8x256xf32>
    %c1_608 = arith.constant 1 : index
    %c0_609 = arith.constant 0 : index
    %c0_610 = arith.constant 0 : index
    %c0_611 = arith.constant 0 : index
    %1012 = vector.load %arg19[%c1_608, %c0_609, %c0_610, %c0_611] : memref<4x9x8x8xf32, #tpu.memory_space<vmem>>, vector<1x1x8x8xf32>
    %1013 = vector.shape_cast %1012 : vector<1x1x8x8xf32> to vector<8x8xf32>
    %cst_612 = arith.constant dense<0.000000e+00> : vector<8x256xf32>
    %1014 = tpu.matmul %1013, %826, %cst_612 {dimension_numbers = #tpu.dot_dimension_numbers<[1], [0], [0], [1], [0, 0, 1, 1], [], []>} : vector<8x8xf32>, vector<8x256xf32>, vector<8x256xf32> -> vector<8x256xf32>
    %1015 = arith.addf %1011, %1014 : vector<8x256xf32>
    %c1_613 = arith.constant 1 : index
    %c1_614 = arith.constant 1 : index
    %c0_615 = arith.constant 0 : index
    %c0_616 = arith.constant 0 : index
    %1016 = vector.load %arg18[%c1_613, %c1_614, %c0_615, %c0_616] : memref<4x9x8x8xf32, #tpu.memory_space<vmem>>, vector<1x1x8x8xf32>
    %1017 = vector.shape_cast %1016 : vector<1x1x8x8xf32> to vector<8x8xf32>
    %cst_617 = arith.constant dense<0.000000e+00> : vector<8x256xf32>
    %1018 = tpu.matmul %1017, %829, %cst_617 {dimension_numbers = #tpu.dot_dimension_numbers<[1], [0], [0], [1], [0, 0, 1, 1], [], []>} : vector<8x8xf32>, vector<8x256xf32>, vector<8x256xf32> -> vector<8x256xf32>
    %1019 = arith.addf %1015, %1018 : vector<8x256xf32>
    %c1_618 = arith.constant 1 : index
    %c1_619 = arith.constant 1 : index
    %c0_620 = arith.constant 0 : index
    %c0_621 = arith.constant 0 : index
    %1020 = vector.load %arg19[%c1_618, %c1_619, %c0_620, %c0_621] : memref<4x9x8x8xf32, #tpu.memory_space<vmem>>, vector<1x1x8x8xf32>
    %1021 = vector.shape_cast %1020 : vector<1x1x8x8xf32> to vector<8x8xf32>
    %cst_622 = arith.constant dense<0.000000e+00> : vector<8x256xf32>
    %1022 = tpu.matmul %1021, %832, %cst_622 {dimension_numbers = #tpu.dot_dimension_numbers<[1], [0], [0], [1], [0, 0, 1, 1], [], []>} : vector<8x8xf32>, vector<8x256xf32>, vector<8x256xf32> -> vector<8x256xf32>
    %1023 = arith.addf %1019, %1022 : vector<8x256xf32>
    %c1_623 = arith.constant 1 : index
    %c2_624 = arith.constant 2 : index
    %c0_625 = arith.constant 0 : index
    %c0_626 = arith.constant 0 : index
    %1024 = vector.load %arg18[%c1_623, %c2_624, %c0_625, %c0_626] : memref<4x9x8x8xf32, #tpu.memory_space<vmem>>, vector<1x1x8x8xf32>
    %1025 = vector.shape_cast %1024 : vector<1x1x8x8xf32> to vector<8x8xf32>
    %cst_627 = arith.constant dense<0.000000e+00> : vector<8x256xf32>
    %1026 = tpu.matmul %1025, %841, %cst_627 {dimension_numbers = #tpu.dot_dimension_numbers<[1], [0], [0], [1], [0, 0, 1, 1], [], []>} : vector<8x8xf32>, vector<8x256xf32>, vector<8x256xf32> -> vector<8x256xf32>
    %1027 = arith.addf %1023, %1026 : vector<8x256xf32>
    %c1_628 = arith.constant 1 : index
    %c2_629 = arith.constant 2 : index
    %c0_630 = arith.constant 0 : index
    %c0_631 = arith.constant 0 : index
    %1028 = vector.load %arg19[%c1_628, %c2_629, %c0_630, %c0_631] : memref<4x9x8x8xf32, #tpu.memory_space<vmem>>, vector<1x1x8x8xf32>
    %1029 = vector.shape_cast %1028 : vector<1x1x8x8xf32> to vector<8x8xf32>
    %cst_632 = arith.constant dense<0.000000e+00> : vector<8x256xf32>
    %1030 = tpu.matmul %1029, %850, %cst_632 {dimension_numbers = #tpu.dot_dimension_numbers<[1], [0], [0], [1], [0, 0, 1, 1], [], []>} : vector<8x8xf32>, vector<8x256xf32>, vector<8x256xf32> -> vector<8x256xf32>
    %1031 = arith.addf %1027, %1030 : vector<8x256xf32>
    %c1_633 = arith.constant 1 : index
    %c3_634 = arith.constant 3 : index
    %c0_635 = arith.constant 0 : index
    %c0_636 = arith.constant 0 : index
    %1032 = vector.load %arg18[%c1_633, %c3_634, %c0_635, %c0_636] : memref<4x9x8x8xf32, #tpu.memory_space<vmem>>, vector<1x1x8x8xf32>
    %1033 = vector.shape_cast %1032 : vector<1x1x8x8xf32> to vector<8x8xf32>
    %cst_637 = arith.constant dense<0.000000e+00> : vector<8x256xf32>
    %1034 = tpu.matmul %1033, %859, %cst_637 {dimension_numbers = #tpu.dot_dimension_numbers<[1], [0], [0], [1], [0, 0, 1, 1], [], []>} : vector<8x8xf32>, vector<8x256xf32>, vector<8x256xf32> -> vector<8x256xf32>
    %1035 = arith.addf %1031, %1034 : vector<8x256xf32>
    %c1_638 = arith.constant 1 : index
    %c3_639 = arith.constant 3 : index
    %c0_640 = arith.constant 0 : index
    %c0_641 = arith.constant 0 : index
    %1036 = vector.load %arg19[%c1_638, %c3_639, %c0_640, %c0_641] : memref<4x9x8x8xf32, #tpu.memory_space<vmem>>, vector<1x1x8x8xf32>
    %1037 = vector.shape_cast %1036 : vector<1x1x8x8xf32> to vector<8x8xf32>
    %cst_642 = arith.constant dense<0.000000e+00> : vector<8x256xf32>
    %1038 = tpu.matmul %1037, %868, %cst_642 {dimension_numbers = #tpu.dot_dimension_numbers<[1], [0], [0], [1], [0, 0, 1, 1], [], []>} : vector<8x8xf32>, vector<8x256xf32>, vector<8x256xf32> -> vector<8x256xf32>
    %1039 = arith.addf %1035, %1038 : vector<8x256xf32>
    %c1_643 = arith.constant 1 : index
    %c4_644 = arith.constant 4 : index
    %c0_645 = arith.constant 0 : index
    %c0_646 = arith.constant 0 : index
    %1040 = vector.load %arg18[%c1_643, %c4_644, %c0_645, %c0_646] : memref<4x9x8x8xf32, #tpu.memory_space<vmem>>, vector<1x1x8x8xf32>
    %1041 = vector.shape_cast %1040 : vector<1x1x8x8xf32> to vector<8x8xf32>
    %cst_647 = arith.constant dense<0.000000e+00> : vector<8x256xf32>
    %1042 = tpu.matmul %1041, %106, %cst_647 {dimension_numbers = #tpu.dot_dimension_numbers<[1], [0], [0], [1], [0, 0, 1, 1], [], []>} : vector<8x8xf32>, vector<8x256xf32>, vector<8x256xf32> -> vector<8x256xf32>
    %1043 = arith.addf %1039, %1042 : vector<8x256xf32>
    %c1_648 = arith.constant 1 : index
    %c4_649 = arith.constant 4 : index
    %c0_650 = arith.constant 0 : index
    %c0_651 = arith.constant 0 : index
    %1044 = vector.load %arg19[%c1_648, %c4_649, %c0_650, %c0_651] : memref<4x9x8x8xf32, #tpu.memory_space<vmem>>, vector<1x1x8x8xf32>
    %1045 = vector.shape_cast %1044 : vector<1x1x8x8xf32> to vector<8x8xf32>
    %cst_652 = arith.constant dense<0.000000e+00> : vector<8x256xf32>
    %1046 = tpu.matmul %1045, %808, %cst_652 {dimension_numbers = #tpu.dot_dimension_numbers<[1], [0], [0], [1], [0, 0, 1, 1], [], []>} : vector<8x8xf32>, vector<8x256xf32>, vector<8x256xf32> -> vector<8x256xf32>
    %1047 = arith.addf %1043, %1046 : vector<8x256xf32>
    %c1_653 = arith.constant 1 : index
    %c5_654 = arith.constant 5 : index
    %c0_655 = arith.constant 0 : index
    %c0_656 = arith.constant 0 : index
    %1048 = vector.load %arg18[%c1_653, %c5_654, %c0_655, %c0_656] : memref<4x9x8x8xf32, #tpu.memory_space<vmem>>, vector<1x1x8x8xf32>
    %1049 = vector.shape_cast %1048 : vector<1x1x8x8xf32> to vector<8x8xf32>
    %cst_657 = arith.constant dense<0.000000e+00> : vector<8x256xf32>
    %1050 = tpu.matmul %1049, %877, %cst_657 {dimension_numbers = #tpu.dot_dimension_numbers<[1], [0], [0], [1], [0, 0, 1, 1], [], []>} : vector<8x8xf32>, vector<8x256xf32>, vector<8x256xf32> -> vector<8x256xf32>
    %1051 = arith.addf %1047, %1050 : vector<8x256xf32>
    %c1_658 = arith.constant 1 : index
    %c5_659 = arith.constant 5 : index
    %c0_660 = arith.constant 0 : index
    %c0_661 = arith.constant 0 : index
    %1052 = vector.load %arg19[%c1_658, %c5_659, %c0_660, %c0_661] : memref<4x9x8x8xf32, #tpu.memory_space<vmem>>, vector<1x1x8x8xf32>
    %1053 = vector.shape_cast %1052 : vector<1x1x8x8xf32> to vector<8x8xf32>
    %cst_662 = arith.constant dense<0.000000e+00> : vector<8x256xf32>
    %1054 = tpu.matmul %1053, %886, %cst_662 {dimension_numbers = #tpu.dot_dimension_numbers<[1], [0], [0], [1], [0, 0, 1, 1], [], []>} : vector<8x8xf32>, vector<8x256xf32>, vector<8x256xf32> -> vector<8x256xf32>
    %1055 = arith.addf %1051, %1054 : vector<8x256xf32>
    %c1_663 = arith.constant 1 : index
    %c6_664 = arith.constant 6 : index
    %c0_665 = arith.constant 0 : index
    %c0_666 = arith.constant 0 : index
    %1056 = vector.load %arg18[%c1_663, %c6_664, %c0_665, %c0_666] : memref<4x9x8x8xf32, #tpu.memory_space<vmem>>, vector<1x1x8x8xf32>
    %1057 = vector.shape_cast %1056 : vector<1x1x8x8xf32> to vector<8x8xf32>
    %cst_667 = arith.constant dense<0.000000e+00> : vector<8x256xf32>
    %1058 = tpu.matmul %1057, %895, %cst_667 {dimension_numbers = #tpu.dot_dimension_numbers<[1], [0], [0], [1], [0, 0, 1, 1], [], []>} : vector<8x8xf32>, vector<8x256xf32>, vector<8x256xf32> -> vector<8x256xf32>
    %1059 = arith.addf %1055, %1058 : vector<8x256xf32>
    %c1_668 = arith.constant 1 : index
    %c6_669 = arith.constant 6 : index
    %c0_670 = arith.constant 0 : index
    %c0_671 = arith.constant 0 : index
    %1060 = vector.load %arg19[%c1_668, %c6_669, %c0_670, %c0_671] : memref<4x9x8x8xf32, #tpu.memory_space<vmem>>, vector<1x1x8x8xf32>
    %1061 = vector.shape_cast %1060 : vector<1x1x8x8xf32> to vector<8x8xf32>
    %cst_672 = arith.constant dense<0.000000e+00> : vector<8x256xf32>
    %1062 = tpu.matmul %1061, %904, %cst_672 {dimension_numbers = #tpu.dot_dimension_numbers<[1], [0], [0], [1], [0, 0, 1, 1], [], []>} : vector<8x8xf32>, vector<8x256xf32>, vector<8x256xf32> -> vector<8x256xf32>
    %1063 = arith.addf %1059, %1062 : vector<8x256xf32>
    %c1_673 = arith.constant 1 : index
    %c7_674 = arith.constant 7 : index
    %c0_675 = arith.constant 0 : index
    %c0_676 = arith.constant 0 : index
    %1064 = vector.load %arg18[%c1_673, %c7_674, %c0_675, %c0_676] : memref<4x9x8x8xf32, #tpu.memory_space<vmem>>, vector<1x1x8x8xf32>
    %1065 = vector.shape_cast %1064 : vector<1x1x8x8xf32> to vector<8x8xf32>
    %cst_677 = arith.constant dense<0.000000e+00> : vector<8x256xf32>
    %1066 = tpu.matmul %1065, %907, %cst_677 {dimension_numbers = #tpu.dot_dimension_numbers<[1], [0], [0], [1], [0, 0, 1, 1], [], []>} : vector<8x8xf32>, vector<8x256xf32>, vector<8x256xf32> -> vector<8x256xf32>
    %1067 = arith.addf %1063, %1066 : vector<8x256xf32>
    %c1_678 = arith.constant 1 : index
    %c7_679 = arith.constant 7 : index
    %c0_680 = arith.constant 0 : index
    %c0_681 = arith.constant 0 : index
    %1068 = vector.load %arg19[%c1_678, %c7_679, %c0_680, %c0_681] : memref<4x9x8x8xf32, #tpu.memory_space<vmem>>, vector<1x1x8x8xf32>
    %1069 = vector.shape_cast %1068 : vector<1x1x8x8xf32> to vector<8x8xf32>
    %cst_682 = arith.constant dense<0.000000e+00> : vector<8x256xf32>
    %1070 = tpu.matmul %1069, %910, %cst_682 {dimension_numbers = #tpu.dot_dimension_numbers<[1], [0], [0], [1], [0, 0, 1, 1], [], []>} : vector<8x8xf32>, vector<8x256xf32>, vector<8x256xf32> -> vector<8x256xf32>
    %1071 = arith.addf %1067, %1070 : vector<8x256xf32>
    %c1_683 = arith.constant 1 : index
    %c8_684 = arith.constant 8 : index
    %c0_685 = arith.constant 0 : index
    %c0_686 = arith.constant 0 : index
    %1072 = vector.load %arg18[%c1_683, %c8_684, %c0_685, %c0_686] : memref<4x9x8x8xf32, #tpu.memory_space<vmem>>, vector<1x1x8x8xf32>
    %1073 = vector.shape_cast %1072 : vector<1x1x8x8xf32> to vector<8x8xf32>
    %cst_687 = arith.constant dense<0.000000e+00> : vector<8x256xf32>
    %1074 = tpu.matmul %1073, %919, %cst_687 {dimension_numbers = #tpu.dot_dimension_numbers<[1], [0], [0], [1], [0, 0, 1, 1], [], []>} : vector<8x8xf32>, vector<8x256xf32>, vector<8x256xf32> -> vector<8x256xf32>
    %1075 = arith.addf %1071, %1074 : vector<8x256xf32>
    %c1_688 = arith.constant 1 : index
    %c8_689 = arith.constant 8 : index
    %c0_690 = arith.constant 0 : index
    %c0_691 = arith.constant 0 : index
    %1076 = vector.load %arg19[%c1_688, %c8_689, %c0_690, %c0_691] : memref<4x9x8x8xf32, #tpu.memory_space<vmem>>, vector<1x1x8x8xf32>
    %1077 = vector.shape_cast %1076 : vector<1x1x8x8xf32> to vector<8x8xf32>
    %cst_692 = arith.constant dense<0.000000e+00> : vector<8x256xf32>
    %1078 = tpu.matmul %1077, %928, %cst_692 {dimension_numbers = #tpu.dot_dimension_numbers<[1], [0], [0], [1], [0, 0, 1, 1], [], []>} : vector<8x8xf32>, vector<8x256xf32>, vector<8x256xf32> -> vector<8x256xf32>
    %1079 = arith.addf %1075, %1078 : vector<8x256xf32>
    %c1_693 = arith.constant 1 : index
    %c0_694 = arith.constant 0 : index
    %c0_695 = arith.constant 0 : index
    %1080 = vector.load %arg20[%c1_693, %c0_694, %c0_695] : memref<4x8x1xf32, #tpu.memory_space<vmem>>, vector<1x8x1xf32>
    %1081 = vector.shape_cast %1080 : vector<1x8x1xf32> to vector<8x1xf32>
    %1082 = vector.broadcast %1081 : vector<8x1xf32> to vector<8x256xf32>
    %1083 = arith.addf %1079, %1082 : vector<8x256xf32>
    %1084 = math.tanh %1083 : vector<8x256xf32>
    %cst_696 = arith.constant 0.000000e+00 : f32
    %1085 = vector.broadcast %cst_696 : f32 to vector<8x256xf32>
    %c2_697 = arith.constant 2 : index
    %c0_698 = arith.constant 0 : index
    %c0_699 = arith.constant 0 : index
    %c0_700 = arith.constant 0 : index
    %1086 = vector.load %arg18[%c2_697, %c0_698, %c0_699, %c0_700] : memref<4x9x8x8xf32, #tpu.memory_space<vmem>>, vector<1x1x8x8xf32>
    %1087 = vector.shape_cast %1086 : vector<1x1x8x8xf32> to vector<8x8xf32>
    %cst_701 = arith.constant dense<0.000000e+00> : vector<8x256xf32>
    %1088 = tpu.matmul %1087, %817, %cst_701 {dimension_numbers = #tpu.dot_dimension_numbers<[1], [0], [0], [1], [0, 0, 1, 1], [], []>} : vector<8x8xf32>, vector<8x256xf32>, vector<8x256xf32> -> vector<8x256xf32>
    %1089 = arith.addf %1085, %1088 : vector<8x256xf32>
    %c2_702 = arith.constant 2 : index
    %c0_703 = arith.constant 0 : index
    %c0_704 = arith.constant 0 : index
    %c0_705 = arith.constant 0 : index
    %1090 = vector.load %arg19[%c2_702, %c0_703, %c0_704, %c0_705] : memref<4x9x8x8xf32, #tpu.memory_space<vmem>>, vector<1x1x8x8xf32>
    %1091 = vector.shape_cast %1090 : vector<1x1x8x8xf32> to vector<8x8xf32>
    %cst_706 = arith.constant dense<0.000000e+00> : vector<8x256xf32>
    %1092 = tpu.matmul %1091, %826, %cst_706 {dimension_numbers = #tpu.dot_dimension_numbers<[1], [0], [0], [1], [0, 0, 1, 1], [], []>} : vector<8x8xf32>, vector<8x256xf32>, vector<8x256xf32> -> vector<8x256xf32>
    %1093 = arith.addf %1089, %1092 : vector<8x256xf32>
    %c2_707 = arith.constant 2 : index
    %c1_708 = arith.constant 1 : index
    %c0_709 = arith.constant 0 : index
    %c0_710 = arith.constant 0 : index
    %1094 = vector.load %arg18[%c2_707, %c1_708, %c0_709, %c0_710] : memref<4x9x8x8xf32, #tpu.memory_space<vmem>>, vector<1x1x8x8xf32>
    %1095 = vector.shape_cast %1094 : vector<1x1x8x8xf32> to vector<8x8xf32>
    %cst_711 = arith.constant dense<0.000000e+00> : vector<8x256xf32>
    %1096 = tpu.matmul %1095, %829, %cst_711 {dimension_numbers = #tpu.dot_dimension_numbers<[1], [0], [0], [1], [0, 0, 1, 1], [], []>} : vector<8x8xf32>, vector<8x256xf32>, vector<8x256xf32> -> vector<8x256xf32>
    %1097 = arith.addf %1093, %1096 : vector<8x256xf32>
    %c2_712 = arith.constant 2 : index
    %c1_713 = arith.constant 1 : index
    %c0_714 = arith.constant 0 : index
    %c0_715 = arith.constant 0 : index
    %1098 = vector.load %arg19[%c2_712, %c1_713, %c0_714, %c0_715] : memref<4x9x8x8xf32, #tpu.memory_space<vmem>>, vector<1x1x8x8xf32>
    %1099 = vector.shape_cast %1098 : vector<1x1x8x8xf32> to vector<8x8xf32>
    %cst_716 = arith.constant dense<0.000000e+00> : vector<8x256xf32>
    %1100 = tpu.matmul %1099, %832, %cst_716 {dimension_numbers = #tpu.dot_dimension_numbers<[1], [0], [0], [1], [0, 0, 1, 1], [], []>} : vector<8x8xf32>, vector<8x256xf32>, vector<8x256xf32> -> vector<8x256xf32>
    %1101 = arith.addf %1097, %1100 : vector<8x256xf32>
    %c2_717 = arith.constant 2 : index
    %c2_718 = arith.constant 2 : index
    %c0_719 = arith.constant 0 : index
    %c0_720 = arith.constant 0 : index
    %1102 = vector.load %arg18[%c2_717, %c2_718, %c0_719, %c0_720] : memref<4x9x8x8xf32, #tpu.memory_space<vmem>>, vector<1x1x8x8xf32>
    %1103 = vector.shape_cast %1102 : vector<1x1x8x8xf32> to vector<8x8xf32>
    %cst_721 = arith.constant dense<0.000000e+00> : vector<8x256xf32>
    %1104 = tpu.matmul %1103, %841, %cst_721 {dimension_numbers = #tpu.dot_dimension_numbers<[1], [0], [0], [1], [0, 0, 1, 1], [], []>} : vector<8x8xf32>, vector<8x256xf32>, vector<8x256xf32> -> vector<8x256xf32>
    %1105 = arith.addf %1101, %1104 : vector<8x256xf32>
    %c2_722 = arith.constant 2 : index
    %c2_723 = arith.constant 2 : index
    %c0_724 = arith.constant 0 : index
    %c0_725 = arith.constant 0 : index
    %1106 = vector.load %arg19[%c2_722, %c2_723, %c0_724, %c0_725] : memref<4x9x8x8xf32, #tpu.memory_space<vmem>>, vector<1x1x8x8xf32>
    %1107 = vector.shape_cast %1106 : vector<1x1x8x8xf32> to vector<8x8xf32>
    %cst_726 = arith.constant dense<0.000000e+00> : vector<8x256xf32>
    %1108 = tpu.matmul %1107, %850, %cst_726 {dimension_numbers = #tpu.dot_dimension_numbers<[1], [0], [0], [1], [0, 0, 1, 1], [], []>} : vector<8x8xf32>, vector<8x256xf32>, vector<8x256xf32> -> vector<8x256xf32>
    %1109 = arith.addf %1105, %1108 : vector<8x256xf32>
    %c2_727 = arith.constant 2 : index
    %c3_728 = arith.constant 3 : index
    %c0_729 = arith.constant 0 : index
    %c0_730 = arith.constant 0 : index
    %1110 = vector.load %arg18[%c2_727, %c3_728, %c0_729, %c0_730] : memref<4x9x8x8xf32, #tpu.memory_space<vmem>>, vector<1x1x8x8xf32>
    %1111 = vector.shape_cast %1110 : vector<1x1x8x8xf32> to vector<8x8xf32>
    %cst_731 = arith.constant dense<0.000000e+00> : vector<8x256xf32>
    %1112 = tpu.matmul %1111, %859, %cst_731 {dimension_numbers = #tpu.dot_dimension_numbers<[1], [0], [0], [1], [0, 0, 1, 1], [], []>} : vector<8x8xf32>, vector<8x256xf32>, vector<8x256xf32> -> vector<8x256xf32>
    %1113 = arith.addf %1109, %1112 : vector<8x256xf32>
    %c2_732 = arith.constant 2 : index
    %c3_733 = arith.constant 3 : index
    %c0_734 = arith.constant 0 : index
    %c0_735 = arith.constant 0 : index
    %1114 = vector.load %arg19[%c2_732, %c3_733, %c0_734, %c0_735] : memref<4x9x8x8xf32, #tpu.memory_space<vmem>>, vector<1x1x8x8xf32>
    %1115 = vector.shape_cast %1114 : vector<1x1x8x8xf32> to vector<8x8xf32>
    %cst_736 = arith.constant dense<0.000000e+00> : vector<8x256xf32>
    %1116 = tpu.matmul %1115, %868, %cst_736 {dimension_numbers = #tpu.dot_dimension_numbers<[1], [0], [0], [1], [0, 0, 1, 1], [], []>} : vector<8x8xf32>, vector<8x256xf32>, vector<8x256xf32> -> vector<8x256xf32>
    %1117 = arith.addf %1113, %1116 : vector<8x256xf32>
    %c2_737 = arith.constant 2 : index
    %c4_738 = arith.constant 4 : index
    %c0_739 = arith.constant 0 : index
    %c0_740 = arith.constant 0 : index
    %1118 = vector.load %arg18[%c2_737, %c4_738, %c0_739, %c0_740] : memref<4x9x8x8xf32, #tpu.memory_space<vmem>>, vector<1x1x8x8xf32>
    %1119 = vector.shape_cast %1118 : vector<1x1x8x8xf32> to vector<8x8xf32>
    %cst_741 = arith.constant dense<0.000000e+00> : vector<8x256xf32>
    %1120 = tpu.matmul %1119, %106, %cst_741 {dimension_numbers = #tpu.dot_dimension_numbers<[1], [0], [0], [1], [0, 0, 1, 1], [], []>} : vector<8x8xf32>, vector<8x256xf32>, vector<8x256xf32> -> vector<8x256xf32>
    %1121 = arith.addf %1117, %1120 : vector<8x256xf32>
    %c2_742 = arith.constant 2 : index
    %c4_743 = arith.constant 4 : index
    %c0_744 = arith.constant 0 : index
    %c0_745 = arith.constant 0 : index
    %1122 = vector.load %arg19[%c2_742, %c4_743, %c0_744, %c0_745] : memref<4x9x8x8xf32, #tpu.memory_space<vmem>>, vector<1x1x8x8xf32>
    %1123 = vector.shape_cast %1122 : vector<1x1x8x8xf32> to vector<8x8xf32>
    %cst_746 = arith.constant dense<0.000000e+00> : vector<8x256xf32>
    %1124 = tpu.matmul %1123, %808, %cst_746 {dimension_numbers = #tpu.dot_dimension_numbers<[1], [0], [0], [1], [0, 0, 1, 1], [], []>} : vector<8x8xf32>, vector<8x256xf32>, vector<8x256xf32> -> vector<8x256xf32>
    %1125 = arith.addf %1121, %1124 : vector<8x256xf32>
    %c2_747 = arith.constant 2 : index
    %c5_748 = arith.constant 5 : index
    %c0_749 = arith.constant 0 : index
    %c0_750 = arith.constant 0 : index
    %1126 = vector.load %arg18[%c2_747, %c5_748, %c0_749, %c0_750] : memref<4x9x8x8xf32, #tpu.memory_space<vmem>>, vector<1x1x8x8xf32>
    %1127 = vector.shape_cast %1126 : vector<1x1x8x8xf32> to vector<8x8xf32>
    %cst_751 = arith.constant dense<0.000000e+00> : vector<8x256xf32>
    %1128 = tpu.matmul %1127, %877, %cst_751 {dimension_numbers = #tpu.dot_dimension_numbers<[1], [0], [0], [1], [0, 0, 1, 1], [], []>} : vector<8x8xf32>, vector<8x256xf32>, vector<8x256xf32> -> vector<8x256xf32>
    %1129 = arith.addf %1125, %1128 : vector<8x256xf32>
    %c2_752 = arith.constant 2 : index
    %c5_753 = arith.constant 5 : index
    %c0_754 = arith.constant 0 : index
    %c0_755 = arith.constant 0 : index
    %1130 = vector.load %arg19[%c2_752, %c5_753, %c0_754, %c0_755] : memref<4x9x8x8xf32, #tpu.memory_space<vmem>>, vector<1x1x8x8xf32>
    %1131 = vector.shape_cast %1130 : vector<1x1x8x8xf32> to vector<8x8xf32>
    %cst_756 = arith.constant dense<0.000000e+00> : vector<8x256xf32>
    %1132 = tpu.matmul %1131, %886, %cst_756 {dimension_numbers = #tpu.dot_dimension_numbers<[1], [0], [0], [1], [0, 0, 1, 1], [], []>} : vector<8x8xf32>, vector<8x256xf32>, vector<8x256xf32> -> vector<8x256xf32>
    %1133 = arith.addf %1129, %1132 : vector<8x256xf32>
    %c2_757 = arith.constant 2 : index
    %c6_758 = arith.constant 6 : index
    %c0_759 = arith.constant 0 : index
    %c0_760 = arith.constant 0 : index
    %1134 = vector.load %arg18[%c2_757, %c6_758, %c0_759, %c0_760] : memref<4x9x8x8xf32, #tpu.memory_space<vmem>>, vector<1x1x8x8xf32>
    %1135 = vector.shape_cast %1134 : vector<1x1x8x8xf32> to vector<8x8xf32>
    %cst_761 = arith.constant dense<0.000000e+00> : vector<8x256xf32>
    %1136 = tpu.matmul %1135, %895, %cst_761 {dimension_numbers = #tpu.dot_dimension_numbers<[1], [0], [0], [1], [0, 0, 1, 1], [], []>} : vector<8x8xf32>, vector<8x256xf32>, vector<8x256xf32> -> vector<8x256xf32>
    %1137 = arith.addf %1133, %1136 : vector<8x256xf32>
    %c2_762 = arith.constant 2 : index
    %c6_763 = arith.constant 6 : index
    %c0_764 = arith.constant 0 : index
    %c0_765 = arith.constant 0 : index
    %1138 = vector.load %arg19[%c2_762, %c6_763, %c0_764, %c0_765] : memref<4x9x8x8xf32, #tpu.memory_space<vmem>>, vector<1x1x8x8xf32>
    %1139 = vector.shape_cast %1138 : vector<1x1x8x8xf32> to vector<8x8xf32>
    %cst_766 = arith.constant dense<0.000000e+00> : vector<8x256xf32>
    %1140 = tpu.matmul %1139, %904, %cst_766 {dimension_numbers = #tpu.dot_dimension_numbers<[1], [0], [0], [1], [0, 0, 1, 1], [], []>} : vector<8x8xf32>, vector<8x256xf32>, vector<8x256xf32> -> vector<8x256xf32>
    %1141 = arith.addf %1137, %1140 : vector<8x256xf32>
    %c2_767 = arith.constant 2 : index
    %c7_768 = arith.constant 7 : index
    %c0_769 = arith.constant 0 : index
    %c0_770 = arith.constant 0 : index
    %1142 = vector.load %arg18[%c2_767, %c7_768, %c0_769, %c0_770] : memref<4x9x8x8xf32, #tpu.memory_space<vmem>>, vector<1x1x8x8xf32>
    %1143 = vector.shape_cast %1142 : vector<1x1x8x8xf32> to vector<8x8xf32>
    %cst_771 = arith.constant dense<0.000000e+00> : vector<8x256xf32>
    %1144 = tpu.matmul %1143, %907, %cst_771 {dimension_numbers = #tpu.dot_dimension_numbers<[1], [0], [0], [1], [0, 0, 1, 1], [], []>} : vector<8x8xf32>, vector<8x256xf32>, vector<8x256xf32> -> vector<8x256xf32>
    %1145 = arith.addf %1141, %1144 : vector<8x256xf32>
    %c2_772 = arith.constant 2 : index
    %c7_773 = arith.constant 7 : index
    %c0_774 = arith.constant 0 : index
    %c0_775 = arith.constant 0 : index
    %1146 = vector.load %arg19[%c2_772, %c7_773, %c0_774, %c0_775] : memref<4x9x8x8xf32, #tpu.memory_space<vmem>>, vector<1x1x8x8xf32>
    %1147 = vector.shape_cast %1146 : vector<1x1x8x8xf32> to vector<8x8xf32>
    %cst_776 = arith.constant dense<0.000000e+00> : vector<8x256xf32>
    %1148 = tpu.matmul %1147, %910, %cst_776 {dimension_numbers = #tpu.dot_dimension_numbers<[1], [0], [0], [1], [0, 0, 1, 1], [], []>} : vector<8x8xf32>, vector<8x256xf32>, vector<8x256xf32> -> vector<8x256xf32>
    %1149 = arith.addf %1145, %1148 : vector<8x256xf32>
    %c2_777 = arith.constant 2 : index
    %c8_778 = arith.constant 8 : index
    %c0_779 = arith.constant 0 : index
    %c0_780 = arith.constant 0 : index
    %1150 = vector.load %arg18[%c2_777, %c8_778, %c0_779, %c0_780] : memref<4x9x8x8xf32, #tpu.memory_space<vmem>>, vector<1x1x8x8xf32>
    %1151 = vector.shape_cast %1150 : vector<1x1x8x8xf32> to vector<8x8xf32>
    %cst_781 = arith.constant dense<0.000000e+00> : vector<8x256xf32>
    %1152 = tpu.matmul %1151, %919, %cst_781 {dimension_numbers = #tpu.dot_dimension_numbers<[1], [0], [0], [1], [0, 0, 1, 1], [], []>} : vector<8x8xf32>, vector<8x256xf32>, vector<8x256xf32> -> vector<8x256xf32>
    %1153 = arith.addf %1149, %1152 : vector<8x256xf32>
    %c2_782 = arith.constant 2 : index
    %c8_783 = arith.constant 8 : index
    %c0_784 = arith.constant 0 : index
    %c0_785 = arith.constant 0 : index
    %1154 = vector.load %arg19[%c2_782, %c8_783, %c0_784, %c0_785] : memref<4x9x8x8xf32, #tpu.memory_space<vmem>>, vector<1x1x8x8xf32>
    %1155 = vector.shape_cast %1154 : vector<1x1x8x8xf32> to vector<8x8xf32>
    %cst_786 = arith.constant dense<0.000000e+00> : vector<8x256xf32>
    %1156 = tpu.matmul %1155, %928, %cst_786 {dimension_numbers = #tpu.dot_dimension_numbers<[1], [0], [0], [1], [0, 0, 1, 1], [], []>} : vector<8x8xf32>, vector<8x256xf32>, vector<8x256xf32> -> vector<8x256xf32>
    %1157 = arith.addf %1153, %1156 : vector<8x256xf32>
    %c2_787 = arith.constant 2 : index
    %c0_788 = arith.constant 0 : index
    %c0_789 = arith.constant 0 : index
    %1158 = vector.load %arg20[%c2_787, %c0_788, %c0_789] : memref<4x8x1xf32, #tpu.memory_space<vmem>>, vector<1x8x1xf32>
    %1159 = vector.shape_cast %1158 : vector<1x8x1xf32> to vector<8x1xf32>
    %1160 = vector.broadcast %1159 : vector<8x1xf32> to vector<8x256xf32>
    %1161 = arith.addf %1157, %1160 : vector<8x256xf32>
    %1162 = math.tanh %1161 : vector<8x256xf32>
    %cst_790 = arith.constant 0.000000e+00 : f32
    %1163 = vector.broadcast %cst_790 : f32 to vector<8x256xf32>
    %c3_791 = arith.constant 3 : index
    %c0_792 = arith.constant 0 : index
    %c0_793 = arith.constant 0 : index
    %c0_794 = arith.constant 0 : index
    %1164 = vector.load %arg18[%c3_791, %c0_792, %c0_793, %c0_794] : memref<4x9x8x8xf32, #tpu.memory_space<vmem>>, vector<1x1x8x8xf32>
    %1165 = vector.shape_cast %1164 : vector<1x1x8x8xf32> to vector<8x8xf32>
    %cst_795 = arith.constant dense<0.000000e+00> : vector<8x256xf32>
    %1166 = tpu.matmul %1165, %817, %cst_795 {dimension_numbers = #tpu.dot_dimension_numbers<[1], [0], [0], [1], [0, 0, 1, 1], [], []>} : vector<8x8xf32>, vector<8x256xf32>, vector<8x256xf32> -> vector<8x256xf32>
    %1167 = arith.addf %1163, %1166 : vector<8x256xf32>
    %c3_796 = arith.constant 3 : index
    %c0_797 = arith.constant 0 : index
    %c0_798 = arith.constant 0 : index
    %c0_799 = arith.constant 0 : index
    %1168 = vector.load %arg19[%c3_796, %c0_797, %c0_798, %c0_799] : memref<4x9x8x8xf32, #tpu.memory_space<vmem>>, vector<1x1x8x8xf32>
    %1169 = vector.shape_cast %1168 : vector<1x1x8x8xf32> to vector<8x8xf32>
    %cst_800 = arith.constant dense<0.000000e+00> : vector<8x256xf32>
    %1170 = tpu.matmul %1169, %826, %cst_800 {dimension_numbers = #tpu.dot_dimension_numbers<[1], [0], [0], [1], [0, 0, 1, 1], [], []>} : vector<8x8xf32>, vector<8x256xf32>, vector<8x256xf32> -> vector<8x256xf32>
    %1171 = arith.addf %1167, %1170 : vector<8x256xf32>
    %c3_801 = arith.constant 3 : index
    %c1_802 = arith.constant 1 : index
    %c0_803 = arith.constant 0 : index
    %c0_804 = arith.constant 0 : index
    %1172 = vector.load %arg18[%c3_801, %c1_802, %c0_803, %c0_804] : memref<4x9x8x8xf32, #tpu.memory_space<vmem>>, vector<1x1x8x8xf32>
    %1173 = vector.shape_cast %1172 : vector<1x1x8x8xf32> to vector<8x8xf32>
    %cst_805 = arith.constant dense<0.000000e+00> : vector<8x256xf32>
    %1174 = tpu.matmul %1173, %829, %cst_805 {dimension_numbers = #tpu.dot_dimension_numbers<[1], [0], [0], [1], [0, 0, 1, 1], [], []>} : vector<8x8xf32>, vector<8x256xf32>, vector<8x256xf32> -> vector<8x256xf32>
    %1175 = arith.addf %1171, %1174 : vector<8x256xf32>
    %c3_806 = arith.constant 3 : index
    %c1_807 = arith.constant 1 : index
    %c0_808 = arith.constant 0 : index
    %c0_809 = arith.constant 0 : index
    %1176 = vector.load %arg19[%c3_806, %c1_807, %c0_808, %c0_809] : memref<4x9x8x8xf32, #tpu.memory_space<vmem>>, vector<1x1x8x8xf32>
    %1177 = vector.shape_cast %1176 : vector<1x1x8x8xf32> to vector<8x8xf32>
    %cst_810 = arith.constant dense<0.000000e+00> : vector<8x256xf32>
    %1178 = tpu.matmul %1177, %832, %cst_810 {dimension_numbers = #tpu.dot_dimension_numbers<[1], [0], [0], [1], [0, 0, 1, 1], [], []>} : vector<8x8xf32>, vector<8x256xf32>, vector<8x256xf32> -> vector<8x256xf32>
    %1179 = arith.addf %1175, %1178 : vector<8x256xf32>
    %c3_811 = arith.constant 3 : index
    %c2_812 = arith.constant 2 : index
    %c0_813 = arith.constant 0 : index
    %c0_814 = arith.constant 0 : index
    %1180 = vector.load %arg18[%c3_811, %c2_812, %c0_813, %c0_814] : memref<4x9x8x8xf32, #tpu.memory_space<vmem>>, vector<1x1x8x8xf32>
    %1181 = vector.shape_cast %1180 : vector<1x1x8x8xf32> to vector<8x8xf32>
    %cst_815 = arith.constant dense<0.000000e+00> : vector<8x256xf32>
    %1182 = tpu.matmul %1181, %841, %cst_815 {dimension_numbers = #tpu.dot_dimension_numbers<[1], [0], [0], [1], [0, 0, 1, 1], [], []>} : vector<8x8xf32>, vector<8x256xf32>, vector<8x256xf32> -> vector<8x256xf32>
    %1183 = arith.addf %1179, %1182 : vector<8x256xf32>
    %c3_816 = arith.constant 3 : index
    %c2_817 = arith.constant 2 : index
    %c0_818 = arith.constant 0 : index
    %c0_819 = arith.constant 0 : index
    %1184 = vector.load %arg19[%c3_816, %c2_817, %c0_818, %c0_819] : memref<4x9x8x8xf32, #tpu.memory_space<vmem>>, vector<1x1x8x8xf32>
    %1185 = vector.shape_cast %1184 : vector<1x1x8x8xf32> to vector<8x8xf32>
    %cst_820 = arith.constant dense<0.000000e+00> : vector<8x256xf32>
    %1186 = tpu.matmul %1185, %850, %cst_820 {dimension_numbers = #tpu.dot_dimension_numbers<[1], [0], [0], [1], [0, 0, 1, 1], [], []>} : vector<8x8xf32>, vector<8x256xf32>, vector<8x256xf32> -> vector<8x256xf32>
    %1187 = arith.addf %1183, %1186 : vector<8x256xf32>
    %c3_821 = arith.constant 3 : index
    %c3_822 = arith.constant 3 : index
    %c0_823 = arith.constant 0 : index
    %c0_824 = arith.constant 0 : index
    %1188 = vector.load %arg18[%c3_821, %c3_822, %c0_823, %c0_824] : memref<4x9x8x8xf32, #tpu.memory_space<vmem>>, vector<1x1x8x8xf32>
    %1189 = vector.shape_cast %1188 : vector<1x1x8x8xf32> to vector<8x8xf32>
    %cst_825 = arith.constant dense<0.000000e+00> : vector<8x256xf32>
    %1190 = tpu.matmul %1189, %859, %cst_825 {dimension_numbers = #tpu.dot_dimension_numbers<[1], [0], [0], [1], [0, 0, 1, 1], [], []>} : vector<8x8xf32>, vector<8x256xf32>, vector<8x256xf32> -> vector<8x256xf32>
    %1191 = arith.addf %1187, %1190 : vector<8x256xf32>
    %c3_826 = arith.constant 3 : index
    %c3_827 = arith.constant 3 : index
    %c0_828 = arith.constant 0 : index
    %c0_829 = arith.constant 0 : index
    %1192 = vector.load %arg19[%c3_826, %c3_827, %c0_828, %c0_829] : memref<4x9x8x8xf32, #tpu.memory_space<vmem>>, vector<1x1x8x8xf32>
    %1193 = vector.shape_cast %1192 : vector<1x1x8x8xf32> to vector<8x8xf32>
    %cst_830 = arith.constant dense<0.000000e+00> : vector<8x256xf32>
    %1194 = tpu.matmul %1193, %868, %cst_830 {dimension_numbers = #tpu.dot_dimension_numbers<[1], [0], [0], [1], [0, 0, 1, 1], [], []>} : vector<8x8xf32>, vector<8x256xf32>, vector<8x256xf32> -> vector<8x256xf32>
    %1195 = arith.addf %1191, %1194 : vector<8x256xf32>
    %c3_831 = arith.constant 3 : index
    %c4_832 = arith.constant 4 : index
    %c0_833 = arith.constant 0 : index
    %c0_834 = arith.constant 0 : index
    %1196 = vector.load %arg18[%c3_831, %c4_832, %c0_833, %c0_834] : memref<4x9x8x8xf32, #tpu.memory_space<vmem>>, vector<1x1x8x8xf32>
    %1197 = vector.shape_cast %1196 : vector<1x1x8x8xf32> to vector<8x8xf32>
    %cst_835 = arith.constant dense<0.000000e+00> : vector<8x256xf32>
    %1198 = tpu.matmul %1197, %106, %cst_835 {dimension_numbers = #tpu.dot_dimension_numbers<[1], [0], [0], [1], [0, 0, 1, 1], [], []>} : vector<8x8xf32>, vector<8x256xf32>, vector<8x256xf32> -> vector<8x256xf32>
    %1199 = arith.addf %1195, %1198 : vector<8x256xf32>
    %c3_836 = arith.constant 3 : index
    %c4_837 = arith.constant 4 : index
    %c0_838 = arith.constant 0 : index
    %c0_839 = arith.constant 0 : index
    %1200 = vector.load %arg19[%c3_836, %c4_837, %c0_838, %c0_839] : memref<4x9x8x8xf32, #tpu.memory_space<vmem>>, vector<1x1x8x8xf32>
    %1201 = vector.shape_cast %1200 : vector<1x1x8x8xf32> to vector<8x8xf32>
    %cst_840 = arith.constant dense<0.000000e+00> : vector<8x256xf32>
    %1202 = tpu.matmul %1201, %808, %cst_840 {dimension_numbers = #tpu.dot_dimension_numbers<[1], [0], [0], [1], [0, 0, 1, 1], [], []>} : vector<8x8xf32>, vector<8x256xf32>, vector<8x256xf32> -> vector<8x256xf32>
    %1203 = arith.addf %1199, %1202 : vector<8x256xf32>
    %c3_841 = arith.constant 3 : index
    %c5_842 = arith.constant 5 : index
    %c0_843 = arith.constant 0 : index
    %c0_844 = arith.constant 0 : index
    %1204 = vector.load %arg18[%c3_841, %c5_842, %c0_843, %c0_844] : memref<4x9x8x8xf32, #tpu.memory_space<vmem>>, vector<1x1x8x8xf32>
    %1205 = vector.shape_cast %1204 : vector<1x1x8x8xf32> to vector<8x8xf32>
    %cst_845 = arith.constant dense<0.000000e+00> : vector<8x256xf32>
    %1206 = tpu.matmul %1205, %877, %cst_845 {dimension_numbers = #tpu.dot_dimension_numbers<[1], [0], [0], [1], [0, 0, 1, 1], [], []>} : vector<8x8xf32>, vector<8x256xf32>, vector<8x256xf32> -> vector<8x256xf32>
    %1207 = arith.addf %1203, %1206 : vector<8x256xf32>
    %c3_846 = arith.constant 3 : index
    %c5_847 = arith.constant 5 : index
    %c0_848 = arith.constant 0 : index
    %c0_849 = arith.constant 0 : index
    %1208 = vector.load %arg19[%c3_846, %c5_847, %c0_848, %c0_849] : memref<4x9x8x8xf32, #tpu.memory_space<vmem>>, vector<1x1x8x8xf32>
    %1209 = vector.shape_cast %1208 : vector<1x1x8x8xf32> to vector<8x8xf32>
    %cst_850 = arith.constant dense<0.000000e+00> : vector<8x256xf32>
    %1210 = tpu.matmul %1209, %886, %cst_850 {dimension_numbers = #tpu.dot_dimension_numbers<[1], [0], [0], [1], [0, 0, 1, 1], [], []>} : vector<8x8xf32>, vector<8x256xf32>, vector<8x256xf32> -> vector<8x256xf32>
    %1211 = arith.addf %1207, %1210 : vector<8x256xf32>
    %c3_851 = arith.constant 3 : index
    %c6_852 = arith.constant 6 : index
    %c0_853 = arith.constant 0 : index
    %c0_854 = arith.constant 0 : index
    %1212 = vector.load %arg18[%c3_851, %c6_852, %c0_853, %c0_854] : memref<4x9x8x8xf32, #tpu.memory_space<vmem>>, vector<1x1x8x8xf32>
    %1213 = vector.shape_cast %1212 : vector<1x1x8x8xf32> to vector<8x8xf32>
    %cst_855 = arith.constant dense<0.000000e+00> : vector<8x256xf32>
    %1214 = tpu.matmul %1213, %895, %cst_855 {dimension_numbers = #tpu.dot_dimension_numbers<[1], [0], [0], [1], [0, 0, 1, 1], [], []>} : vector<8x8xf32>, vector<8x256xf32>, vector<8x256xf32> -> vector<8x256xf32>
    %1215 = arith.addf %1211, %1214 : vector<8x256xf32>
    %c3_856 = arith.constant 3 : index
    %c6_857 = arith.constant 6 : index
    %c0_858 = arith.constant 0 : index
    %c0_859 = arith.constant 0 : index
    %1216 = vector.load %arg19[%c3_856, %c6_857, %c0_858, %c0_859] : memref<4x9x8x8xf32, #tpu.memory_space<vmem>>, vector<1x1x8x8xf32>
    %1217 = vector.shape_cast %1216 : vector<1x1x8x8xf32> to vector<8x8xf32>
    %cst_860 = arith.constant dense<0.000000e+00> : vector<8x256xf32>
    %1218 = tpu.matmul %1217, %904, %cst_860 {dimension_numbers = #tpu.dot_dimension_numbers<[1], [0], [0], [1], [0, 0, 1, 1], [], []>} : vector<8x8xf32>, vector<8x256xf32>, vector<8x256xf32> -> vector<8x256xf32>
    %1219 = arith.addf %1215, %1218 : vector<8x256xf32>
    %c3_861 = arith.constant 3 : index
    %c7_862 = arith.constant 7 : index
    %c0_863 = arith.constant 0 : index
    %c0_864 = arith.constant 0 : index
    %1220 = vector.load %arg18[%c3_861, %c7_862, %c0_863, %c0_864] : memref<4x9x8x8xf32, #tpu.memory_space<vmem>>, vector<1x1x8x8xf32>
    %1221 = vector.shape_cast %1220 : vector<1x1x8x8xf32> to vector<8x8xf32>
    %cst_865 = arith.constant dense<0.000000e+00> : vector<8x256xf32>
    %1222 = tpu.matmul %1221, %907, %cst_865 {dimension_numbers = #tpu.dot_dimension_numbers<[1], [0], [0], [1], [0, 0, 1, 1], [], []>} : vector<8x8xf32>, vector<8x256xf32>, vector<8x256xf32> -> vector<8x256xf32>
    %1223 = arith.addf %1219, %1222 : vector<8x256xf32>
    %c3_866 = arith.constant 3 : index
    %c7_867 = arith.constant 7 : index
    %c0_868 = arith.constant 0 : index
    %c0_869 = arith.constant 0 : index
    %1224 = vector.load %arg19[%c3_866, %c7_867, %c0_868, %c0_869] : memref<4x9x8x8xf32, #tpu.memory_space<vmem>>, vector<1x1x8x8xf32>
    %1225 = vector.shape_cast %1224 : vector<1x1x8x8xf32> to vector<8x8xf32>
    %cst_870 = arith.constant dense<0.000000e+00> : vector<8x256xf32>
    %1226 = tpu.matmul %1225, %910, %cst_870 {dimension_numbers = #tpu.dot_dimension_numbers<[1], [0], [0], [1], [0, 0, 1, 1], [], []>} : vector<8x8xf32>, vector<8x256xf32>, vector<8x256xf32> -> vector<8x256xf32>
    %1227 = arith.addf %1223, %1226 : vector<8x256xf32>
    %c3_871 = arith.constant 3 : index
    %c8_872 = arith.constant 8 : index
    %c0_873 = arith.constant 0 : index
    %c0_874 = arith.constant 0 : index
    %1228 = vector.load %arg18[%c3_871, %c8_872, %c0_873, %c0_874] : memref<4x9x8x8xf32, #tpu.memory_space<vmem>>, vector<1x1x8x8xf32>
    %1229 = vector.shape_cast %1228 : vector<1x1x8x8xf32> to vector<8x8xf32>
    %cst_875 = arith.constant dense<0.000000e+00> : vector<8x256xf32>
    %1230 = tpu.matmul %1229, %919, %cst_875 {dimension_numbers = #tpu.dot_dimension_numbers<[1], [0], [0], [1], [0, 0, 1, 1], [], []>} : vector<8x8xf32>, vector<8x256xf32>, vector<8x256xf32> -> vector<8x256xf32>
    %1231 = arith.addf %1227, %1230 : vector<8x256xf32>
    %c3_876 = arith.constant 3 : index
    %c8_877 = arith.constant 8 : index
    %c0_878 = arith.constant 0 : index
    %c0_879 = arith.constant 0 : index
    %1232 = vector.load %arg19[%c3_876, %c8_877, %c0_878, %c0_879] : memref<4x9x8x8xf32, #tpu.memory_space<vmem>>, vector<1x1x8x8xf32>
    %1233 = vector.shape_cast %1232 : vector<1x1x8x8xf32> to vector<8x8xf32>
    %cst_880 = arith.constant dense<0.000000e+00> : vector<8x256xf32>
    %1234 = tpu.matmul %1233, %928, %cst_880 {dimension_numbers = #tpu.dot_dimension_numbers<[1], [0], [0], [1], [0, 0, 1, 1], [], []>} : vector<8x8xf32>, vector<8x256xf32>, vector<8x256xf32> -> vector<8x256xf32>
    %1235 = arith.addf %1231, %1234 : vector<8x256xf32>
    %c3_881 = arith.constant 3 : index
    %c0_882 = arith.constant 0 : index
    %c0_883 = arith.constant 0 : index
    %1236 = vector.load %arg20[%c3_881, %c0_882, %c0_883] : memref<4x8x1xf32, #tpu.memory_space<vmem>>, vector<1x8x1xf32>
    %1237 = vector.shape_cast %1236 : vector<1x8x1xf32> to vector<8x1xf32>
    %1238 = vector.broadcast %1237 : vector<8x1xf32> to vector<8x256xf32>
    %1239 = arith.addf %1235, %1238 : vector<8x256xf32>
    %1240 = math.tanh %1239 : vector<8x256xf32>
    %1241 = arith.mulf %4, %4 : vector<8x256xf32>
    %1242 = arith.subf %1241, %4 : vector<8x256xf32>
    %1243 = arith.mulf %1006, %1242 : vector<8x256xf32>
    %1244 = arith.addf %4, %1243 : vector<8x256xf32>
    %1245 = arith.mulf %1244, %1244 : vector<8x256xf32>
    %1246 = arith.subf %1245, %1244 : vector<8x256xf32>
    %1247 = arith.mulf %1084, %1246 : vector<8x256xf32>
    %1248 = arith.addf %1244, %1247 : vector<8x256xf32>
    %1249 = arith.mulf %1248, %1248 : vector<8x256xf32>
    %1250 = arith.subf %1249, %1248 : vector<8x256xf32>
    %1251 = arith.mulf %1162, %1250 : vector<8x256xf32>
    %1252 = arith.addf %1248, %1251 : vector<8x256xf32>
    %1253 = arith.mulf %1252, %1252 : vector<8x256xf32>
    %1254 = arith.subf %1253, %1252 : vector<8x256xf32>
    %1255 = arith.mulf %1240, %1254 : vector<8x256xf32>
    %1256 = arith.addf %1252, %1255 : vector<8x256xf32>
    %1257 = arith.mulf %1256, %1256 : vector<8x256xf32>
    %1258 = arith.subf %1257, %1256 : vector<8x256xf32>
    %1259 = arith.mulf %1006, %1258 : vector<8x256xf32>
    %1260 = arith.addf %1256, %1259 : vector<8x256xf32>
    %1261 = arith.mulf %1260, %1260 : vector<8x256xf32>
    %1262 = arith.subf %1261, %1260 : vector<8x256xf32>
    %1263 = arith.mulf %1084, %1262 : vector<8x256xf32>
    %1264 = arith.addf %1260, %1263 : vector<8x256xf32>
    %1265 = arith.mulf %1264, %1264 : vector<8x256xf32>
    %1266 = arith.subf %1265, %1264 : vector<8x256xf32>
    %1267 = arith.mulf %1162, %1266 : vector<8x256xf32>
    %1268 = arith.addf %1264, %1267 : vector<8x256xf32>
    %1269 = arith.mulf %1268, %1268 : vector<8x256xf32>
    %1270 = arith.subf %1269, %1268 : vector<8x256xf32>
    %1271 = arith.mulf %1240, %1270 : vector<8x256xf32>
    %1272 = arith.addf %1268, %1271 : vector<8x256xf32>
    %1273 = arith.mulf %1272, %1272 : vector<8x256xf32>
    %1274 = arith.subf %1273, %1272 : vector<8x256xf32>
    %1275 = arith.mulf %1006, %1274 : vector<8x256xf32>
    %1276 = arith.addf %1272, %1275 : vector<8x256xf32>
    %1277 = arith.mulf %1276, %1276 : vector<8x256xf32>
    %1278 = arith.subf %1277, %1276 : vector<8x256xf32>
    %1279 = arith.mulf %1084, %1278 : vector<8x256xf32>
    %1280 = arith.addf %1276, %1279 : vector<8x256xf32>
    %1281 = arith.mulf %1280, %1280 : vector<8x256xf32>
    %1282 = arith.subf %1281, %1280 : vector<8x256xf32>
    %1283 = arith.mulf %1162, %1282 : vector<8x256xf32>
    %1284 = arith.addf %1280, %1283 : vector<8x256xf32>
    %1285 = arith.mulf %1284, %1284 : vector<8x256xf32>
    %1286 = arith.subf %1285, %1284 : vector<8x256xf32>
    %1287 = arith.mulf %1240, %1286 : vector<8x256xf32>
    %1288 = arith.addf %1284, %1287 : vector<8x256xf32>
    %1289 = arith.mulf %1288, %1288 : vector<8x256xf32>
    %1290 = arith.subf %1289, %1288 : vector<8x256xf32>
    %1291 = arith.mulf %1006, %1290 : vector<8x256xf32>
    %1292 = arith.addf %1288, %1291 : vector<8x256xf32>
    %1293 = arith.mulf %1292, %1292 : vector<8x256xf32>
    %1294 = arith.subf %1293, %1292 : vector<8x256xf32>
    %1295 = arith.mulf %1084, %1294 : vector<8x256xf32>
    %1296 = arith.addf %1292, %1295 : vector<8x256xf32>
    %1297 = arith.mulf %1296, %1296 : vector<8x256xf32>
    %1298 = arith.subf %1297, %1296 : vector<8x256xf32>
    %1299 = arith.mulf %1162, %1298 : vector<8x256xf32>
    %1300 = arith.addf %1296, %1299 : vector<8x256xf32>
    %1301 = arith.mulf %1300, %1300 : vector<8x256xf32>
    %1302 = arith.subf %1301, %1300 : vector<8x256xf32>
    %1303 = arith.mulf %1240, %1302 : vector<8x256xf32>
    %1304 = arith.addf %1300, %1303 : vector<8x256xf32>
    %1305 = arith.mulf %1304, %1304 : vector<8x256xf32>
    %1306 = arith.subf %1305, %1304 : vector<8x256xf32>
    %1307 = arith.mulf %1006, %1306 : vector<8x256xf32>
    %1308 = arith.addf %1304, %1307 : vector<8x256xf32>
    %1309 = arith.mulf %1308, %1308 : vector<8x256xf32>
    %1310 = arith.subf %1309, %1308 : vector<8x256xf32>
    %1311 = arith.mulf %1084, %1310 : vector<8x256xf32>
    %1312 = arith.addf %1308, %1311 : vector<8x256xf32>
    %1313 = arith.mulf %1312, %1312 : vector<8x256xf32>
    %1314 = arith.subf %1313, %1312 : vector<8x256xf32>
    %1315 = arith.mulf %1162, %1314 : vector<8x256xf32>
    %1316 = arith.addf %1312, %1315 : vector<8x256xf32>
    %1317 = arith.mulf %1316, %1316 : vector<8x256xf32>
    %1318 = arith.subf %1317, %1316 : vector<8x256xf32>
    %1319 = arith.mulf %1240, %1318 : vector<8x256xf32>
    %1320 = arith.addf %1316, %1319 : vector<8x256xf32>
    %c0_884 = arith.constant 0 : index
    %c0_885 = arith.constant 0 : index
    %c0_886 = arith.constant 0 : index
    %1321 = vector.load %arg21[%c0_884, %c0_885, %c0_886] : memref<1x8x256xf32, #tpu.memory_space<vmem>>, vector<1x8x256xf32>
    %1322 = vector.shape_cast %1321 : vector<1x8x256xf32> to vector<8x256xf32>
    %1323 = vector.shape_cast %1320 : vector<8x256xf32> to vector<1x8x256xf32>
    tpu.vector_store %arg21[%c0_884, %c0_885, %c0_886], %1323 {strides = array<i32>} : memref<1x8x256xf32, #tpu.memory_space<vmem>>, vector<1x8x256xf32>,
    return
  }
  func.func @transform_0(%arg0: i32) -> (i32, i32) {
    %c0_i32 = arith.constant 0 : i32
    %c0_i32_0 = arith.constant 0 : i32
    %c0_i32_1 = arith.constant 0 : i32
    return %c0_i32, %c0_i32_0 : i32, i32
  }
  func.func @transform_1(%arg0: i32) -> (i32, i32, i32) {
    %c0_i32 = arith.constant 0 : i32
    %c0_i32_0 = arith.constant 0 : i32
    %c0_i32_1 = arith.constant 0 : i32
    return %arg0, %c0_i32, %c0_i32_0 : i32, i32, i32
  }
  func.func @transform_2(%arg0: i32) -> (i32, i32, i32) {
    %c0_i32 = arith.constant 0 : i32
    %c0_i32_0 = arith.constant 0 : i32
    %c0_i32_1 = arith.constant 0 : i32
    return %arg0, %c0_i32, %c0_i32_0 : i32, i32, i32
  }
  func.func @transform_3(%arg0: i32) -> (i32, i32, i32) {
    %c0_i32 = arith.constant 0 : i32
    %c0_i32_0 = arith.constant 0 : i32
    %c0_i32_1 = arith.constant 0 : i32
    %c0_i32_2 = arith.constant 0 : i32
    return %c0_i32, %c0_i32_0, %c0_i32_1 : i32, i32, i32
  }
  func.func @transform_4(%arg0: i32) -> (i32, i32) {
    %c0_i32 = arith.constant 0 : i32
    %c0_i32_0 = arith.constant 0 : i32
    %c0_i32_1 = arith.constant 0 : i32
    return %c0_i32, %c0_i32_0 : i32, i32
  }
  func.func @transform_5(%arg0: i32) -> (i32, i32, i32) {
    %c0_i32 = arith.constant 0 : i32
    %c0_i32_0 = arith.constant 0 : i32
    %c0_i32_1 = arith.constant 0 : i32
    %c0_i32_2 = arith.constant 0 : i32
    return %c0_i32, %c0_i32_0, %c0_i32_1 : i32, i32, i32
  }
  func.func @transform_6(%arg0: i32) -> (i32, i32) {
    %c0_i32 = arith.constant 0 : i32
    %c0_i32_0 = arith.constant 0 : i32
    %c0_i32_1 = arith.constant 0 : i32
    return %c0_i32, %c0_i32_0 : i32, i32
  }
  func.func @transform_7(%arg0: i32) -> (i32, i32, i32) {
    %c0_i32 = arith.constant 0 : i32
    %c0_i32_0 = arith.constant 0 : i32
    %c0_i32_1 = arith.constant 0 : i32
    %c0_i32_2 = arith.constant 0 : i32
    return %c0_i32, %c0_i32_0, %c0_i32_1 : i32, i32, i32
  }
  func.func @transform_8(%arg0: i32) -> (i32, i32) {
    %c0_i32 = arith.constant 0 : i32
    %c0_i32_0 = arith.constant 0 : i32
    %c0_i32_1 = arith.constant 0 : i32
    return %c0_i32, %c0_i32_0 : i32, i32
  }
  func.func @transform_9(%arg0: i32) -> (i32, i32, i32) {
    %c0_i32 = arith.constant 0 : i32
    %c0_i32_0 = arith.constant 0 : i32
    %c0_i32_1 = arith.constant 0 : i32
    %c0_i32_2 = arith.constant 0 : i32
    return %c0_i32, %c0_i32_0, %c0_i32_1 : i32, i32, i32
  }
  func.func @transform_10(%arg0: i32) -> (i32, i32) {
    %c0_i32 = arith.constant 0 : i32
    %c0_i32_0 = arith.constant 0 : i32
    %c0_i32_1 = arith.constant 0 : i32
    return %c0_i32, %c0_i32_0 : i32, i32
  }
  func.func @transform_11(%arg0: i32) -> (i32, i32, i32) {
    %c0_i32 = arith.constant 0 : i32
    %c0_i32_0 = arith.constant 0 : i32
    %c0_i32_1 = arith.constant 0 : i32
    %c0_i32_2 = arith.constant 0 : i32
    return %c0_i32, %c0_i32_0, %c0_i32_1 : i32, i32, i32
  }
  func.func @transform_12(%arg0: i32) -> (i32, i32, i32) {
    %c0_i32 = arith.constant 0 : i32
    %c0_i32_0 = arith.constant 0 : i32
    %c0_i32_1 = arith.constant 0 : i32
    %c0_i32_2 = arith.constant 0 : i32
    return %c0_i32, %c0_i32_0, %c0_i32_1 : i32, i32, i32
  }
  func.func @transform_13(%arg0: i32) -> (i32, i32) {
    %c0_i32 = arith.constant 0 : i32
    %c0_i32_0 = arith.constant 0 : i32
    %c0_i32_1 = arith.constant 0 : i32
    return %c0_i32, %c0_i32_0 : i32, i32
  }
  func.func @transform_14(%arg0: i32) -> (i32, i32, i32) {
    %c0_i32 = arith.constant 0 : i32
    %c0_i32_0 = arith.constant 0 : i32
    %c0_i32_1 = arith.constant 0 : i32
    %c0_i32_2 = arith.constant 0 : i32
    return %c0_i32, %c0_i32_0, %c0_i32_1 : i32, i32, i32
  }
  func.func @transform_15(%arg0: i32) -> (i32, i32, i32) {
    %c0_i32 = arith.constant 0 : i32
    %c0_i32_0 = arith.constant 0 : i32
    %c0_i32_1 = arith.constant 0 : i32
    %c0_i32_2 = arith.constant 0 : i32
    return %c0_i32, %c0_i32_0, %c0_i32_1 : i32, i32, i32
  }
  func.func @transform_16(%arg0: i32) -> (i32, i32) {
    %c0_i32 = arith.constant 0 : i32
    %c0_i32_0 = arith.constant 0 : i32
    %c0_i32_1 = arith.constant 0 : i32
    return %c0_i32, %c0_i32_0 : i32, i32
  }
  func.func @transform_17(%arg0: i32) -> (i32, i32, i32, i32) {
    %c0_i32 = arith.constant 0 : i32
    %c0_i32_0 = arith.constant 0 : i32
    %c0_i32_1 = arith.constant 0 : i32
    %c0_i32_2 = arith.constant 0 : i32
    %c0_i32_3 = arith.constant 0 : i32
    return %c0_i32, %c0_i32_0, %c0_i32_1, %c0_i32_2 : i32, i32, i32, i32
  }
  func.func @transform_18(%arg0: i32) -> (i32, i32, i32, i32) {
    %c0_i32 = arith.constant 0 : i32
    %c0_i32_0 = arith.constant 0 : i32
    %c0_i32_1 = arith.constant 0 : i32
    %c0_i32_2 = arith.constant 0 : i32
    %c0_i32_3 = arith.constant 0 : i32
    return %c0_i32, %c0_i32_0, %c0_i32_1, %c0_i32_2 : i32, i32, i32, i32
  }
  func.func @transform_19(%arg0: i32) -> (i32, i32, i32) {
    %c0_i32 = arith.constant 0 : i32
    %c0_i32_0 = arith.constant 0 : i32
    %c0_i32_1 = arith.constant 0 : i32
    %c0_i32_2 = arith.constant 0 : i32
    return %c0_i32, %c0_i32_0, %c0_i32_1 : i32, i32, i32
  }
  func.func @transform_20(%arg0: i32) -> (i32, i32, i32) {
    %c0_i32 = arith.constant 0 : i32
    %c0_i32_0 = arith.constant 0 : i32
    %c0_i32_1 = arith.constant 0 : i32
    return %arg0, %c0_i32, %c0_i32_0 : i32, i32, i32
  }
}

</mosaic_0001>

<bundles_post_ra>
// kernel: tpu_custom_call.1
= control target key start
LH: loop header
LB: loop body
LE: loop exit
PB: predicated region body
PF: predicated region fallthrough
CT: control target
= control target key end

     0   :  { %s15836_s0 = inlined_call_operand.vmem [shape: s32[1,256], index: 0, kind: input, shape index: {}]   ;;  %s15837_s1 = inlined_call_operand.vmem [shape: f32[2,16,256], index: 1, kind: input, shape index: {}]   ;;  %s15838_s2 = inlined_call_operand.vmem [shape: f32[2,8,256], index: 2, kind: input, shape index: {}]   ;;  %s15839_s3 = inlined_call_operand.vmem [shape: f32[9,8,16], index: 3, kind: input, shape index: {}]   ;;  %s15840_s4 = inlined_call_operand.vmem [shape: f32[8,1], index: 4, kind: input, shape index: {}]   ;;  %s15841_s5 = inlined_call_operand.vmem [shape: f32[9,8,8], index: 5, kind: input, shape index: {}]   ;;  %s15842_s6 = inlined_call_operand.vmem [shape: f32[8,1], index: 6, kind: input, shape index: {}]   ;;  %s15843_s7 = inlined_call_operand.vmem [shape: f32[9,8,8], index: 7, kind: input, shape index: {}]   ;;  %s15844_s8 = inlined_call_operand.vmem [shape: f32[8,1], index: 8, kind: input, shape index: {}]   ;;  %s15845_s9 = inlined_call_operand.vmem [shape: f32[9,8,8], index: 9, kind: input, shape index: {}]   ;;  %s15846_s10 = inlined_call_operand.vmem [shape: f32[8,1], index: 10, kind: input, shape index: {}]   ;;  %s15847_s11 = inlined_call_operand.vmem [shape: f32[9,8,8], index: 11, kind: input, shape index: {}]   ;;  %s15848_s12 = inlined_call_operand.vmem [shape: f32[9,8,8], index: 12, kind: input, shape index: {}]   ;;  %s15849_s13 = inlined_call_operand.vmem [shape: f32[8,1], index: 13, kind: input, shape index: {}]   ;;  %s15850_s14 = inlined_call_operand.vmem [shape: f32[9,8,8], index: 14, kind: input, shape index: {}]   ;;  %s15851_s15 = inlined_call_operand.vmem [shape: f32[9,8,8], index: 15, kind: input, shape index: {}]   ;;  %s15852_s16 = inlined_call_operand.vmem [shape: f32[8,1], index: 16, kind: input, shape index: {}]   ;;  %s15853_s17 = inlined_call_operand.vmem [shape: f32[4,9,8,8], index: 17, kind: input, shape index: {}]   ;;  %s15854_s18 = inlined_call_operand.vmem [shape: f32[4,9,8,8], index: 18, kind: input, shape index: {}]   ;;  %s15855_s19 = inlined_call_operand.vmem [shape: f32[4,8,1], index: 19, kind: input, shape index: {}]   ;;  %s15856_s20 = inlined_call_operand.hbm [shape: f32[2,8,256], index: 20, kind: output, shape index: {}]  }
   0x1   :  { %15919 = sst [smem:[#allocation29_spill]] %s15836_s0 }
   0x2   :  { %15920 = sst [smem:[#allocation30_spill]] %s15837_s1 }
   0x3   :  { %15921 = sst [smem:[#allocation31_spill]] %s15838_s2 }
   0x4   :  { %15922 = sst [smem:[#allocation32_spill]] %s15839_s3 }
   0x5   :  { %15923 = sst [smem:[#allocation33_spill]] %s15840_s4 }
   0x6   :  { %15924 = sst [smem:[#allocation34_spill]] %s15842_s6 }
   0x7   :  { %25 = vsyncpa [#allocation3], 0 }
   0x8   :  { %27 = vsyncpa [#allocation3 + $0x1], 0  ;;  %s13643_s1 = smov 0   ;;  %s13645_s22 = smov 0  }
   0x9   :  { %s13647_s23 = smov 0   ;;  %s13649_s24 = smov 0  }
   0xa LB: > { %15925 = sst [smem:[#allocation5_spill]] %s13513_s1  ;;  %s13664_s2 = sadd.s32 4294967295, %s13525_s24   ;;  %s13525_s24 = sphi %s13649_s24, %s15989_s24   ;;  %s13521_s23 = sphi %s13647_s23, %s15991_s23   ;;  %s13517_s22 = sphi %s13645_s22, %s15993_s22   ;;  %s13513_s1 = sphi %s13643_s1, %s15992_s1  }
   0xb   : > { %15926 = sst [smem:[#allocation6_spill]] %s13521_s23  ;;  %s12845_s25 = sadd.s32 4294967294, %s13525_s24  }
   0xc   : > { %15927 = sst [smem:[#allocation7_spill]] %s13525_s24  ;;  %s13668_s3 = sadd.s32 1, %s13525_s24  }
   0xd   : > { %15928 = sst [smem:[#allocation8_spill]] %s13668_s3  ;;  %s470_s26 = sadd.s32 1, %s13521_s23 }
   0xe   : > { %s467_s27 = ssub.s32 %s13525_s24, %s13668_s3  ;;  %p480_p0 = scmp.ne.s32.totalorder %s13521_s23, %s13517_s22 }
   0xf   : > { %p468_p1 = scmp.eq.s32.totalorder %s467_s27, 0  ;;  %p481_p2 = scmp.eq.s32.totalorder %s13664_s2, 1 }
  0x10   : > { %p486_p3 = scmp.ne.s32.totalorder %s13517_s22, %s13513_s1  ;;  %p487_p4 = scmp.eq.s32.totalorder %s12845_s25, 1 }
  0x11   : > { %s13679_s28 = scalar_select %p468_p1, %s13521_s23, %s470_s26  }
  0x12   : > { %p13681_p5 = por %p481_p2, %p480_p0  ;;  %p13685_p6 = por %p487_p4, %p486_p3 }
  0x13   : > { %15929 = sst [smem:[#allocation9_spill]] %s13679_s28  ;;  %p12848_p7 = scmp.ge.s32.totalorder %s13525_s24, 1 }
  0x14   : > { %s15931_s29 = scalar_select %p13685_p6, 1, 0 }
  0x15   : > { %p575_p8 = scmp.lt.s32.totalorder %s13525_s24, 3 }
  0x16   : > { %15932 = sst [smem:[#allocation10_spill]] %s15931_s29 }
  0x17   : > { %p576_p9 = pnand %p12848_p7, %p575_p8 }
  0x19   : > { %579 = sbr.rel (%p576_p9) target bundleno = 2779 (0xadb), region = 100 }
  0x1e   : > { %p638_p10 = scmp.lt.s32.totalorder %s13664_s2, 1  ;;  %v13527_v0 = vmov 0   ;;  %s15933_s26 = sld [smem:[#allocation30_spill]]  ;;  %v15881_v5 = vmov 0.0   ;;  %v678_v7 = vlaneseq  ;;  %vm700_vm1 = vcmask 130048   ;;  %v13339_v19 = vld [vmem:[%s15853_s17 + $0xe8] sm:$0xff] }
  0x1f   : > { %13447 = vset.pattern.permute.xlu0 %v13527_v0  ;;  %13448 = vset.pattern.permute.xlu1 %v13527_v0  ;;  %s15869_s28 = smov 17   ;;  %s15867_s23 = smov 16   ;;  %vm667_vm2 = vcmask 138240   ;;  %vm13788_vm4 = vmneg %vm700_vm1  ;;  %vm717_vm7 = vcmask 121856   ;;  %vm750_vm10 = vcmask 7168   ;;  %vm771_vm11 = vcmask 1039360  }
  0x20   : > { %s13693_s30 = scalar_select %p638_p10, %s13664_s2, 1  ;;  %913 = vmatprep.mubr.f32.mxu0 %v15881_v5  ;;  %987 = vmatprep.mubr.f32.mxu1 %v15881_v5  ;;  %v679_v9 = vshrl.u32 %v678_v7, 7  ;;  %vm792_vm12 = vcmask 924672   ;;  %vm813_vm13 = vcmask 916480   ;;  %vm830_vm14 = vcmask 908288  }
  0x21   : > { %s15859_s21 = smov 1   ;;  %s15863_s25 = smov 127   ;;  %vm1631_vm15 = vcmask 64512  }
  0x22   : > { %s13395_s0 = sshll.u32 %s13693_s30, 5  ;;  %s15935_s3 = sld [smem:[#allocation29_spill]]  ;;  %v684_v10 = vsub.s32 1, %v679_v9  ;;  %v680_v12 = vsub.s32 0, %v679_v9 }
  0x23   : > { %s15948_s6 = sld [smem:[#allocation34_spill]]  ;;  %s15949_s1 = smov 112  }
  0x24   : > { %s642_s27 = scalar_lea.vmem %s15933_s26, %s13395_s0  ;;  %s15865_s0 = smov 15  }
  0x25   : > { %v13701_v1 = vld [vmem:[%s642_s27 + $0x10] sm:$0xff]  ;;  %v13707_v2 = vld [vmem:[%s642_s27 + $0x18] sm:$0xff]  ;;  %v13713_v3 = vld [vmem:[%s642_s27 + $0x8] sm:$0xff]  ;;  %s15861_s26 = smov 113   ;;  %s15985_s24 = sld [smem:[#allocation31_spill]] }
  0x26   : > { %663 = vrot.lane.b32.xlu1 %v13701_v1, %s15869_s28  ;;  %696 = vrot.lane.b32.xlu0 %v13701_v1, %s15867_s23  ;;  %v13715_v4 = vld [vmem:[%s642_s27] sm:$0xff]  ;;  %s15876_s27 = smov 112  }
  0x28   : > { %v648_v8 = vld [vmem:[%s15935_s3] sm:$0x3]  ;;  %s15943_s3 = smov 127  }
  0x29   : > { %vm676_vm0 = vcmp.ge.s32.totalorder %v648_v8, 1  ;;  %vm726_vm6 = vcmp.lt.s32.totalorder %v648_v8, 15 }
  0x2a   : > { %665 = vrot.lane.b32.xlu1 %v13707_v2, %s15869_s28  ;;  %698 = vrot.lane.b32.xlu0 %v13707_v2, %s15867_s23  ;;  %v677_v11 = vsel %vm676_vm0, 1, %v13527_v0  ;;  %v727_v25 = vsel %vm726_vm6, 1, %v13527_v0 }
  0x2b   : > { %v13782_v13 = vrot.slane %v677_v11, %v684_v10  ;;  %v13784_v16 = vrot.slane %v677_v11, %v680_v12  ;;  %v13809_v28 = vrot.slane %v727_v25, %v684_v10  ;;  %v13812_v31 = vrot.slane %v727_v25, %v680_v12 }
  0x2d   : > { %vm687_vm3 = vcmp.eq.s32.totalorder %v13782_v13, 1  ;;  %vm686_vm5 = vcmp.eq.s32.totalorder %v13784_v16, 1  ;;  %vm737_vm8 = vcmp.eq.s32.totalorder %v13809_v28, 1  ;;  %vm736_vm9 = vcmp.eq.s32.totalorder %v13812_v31, 1  ;;  %v13371_v13 = vld [vmem:[%s15854_s18 + $0x108] sm:$0xff]  ;;  %v13375_v16 = vld [vmem:[%s15853_s17 + $0x110] sm:$0xff] }
  0x2e   : > { %694 = vrot.lane.b32.xlu1 %v13713_v3, %s15867_s23  ;;  %692 = vrot.lane.b32.xlu0 %v13715_v4, %s15867_s23  ;;  %s15942_s23 = smov 15   ;;  %v13385_v28 = vld [vmem:[%s15854_s18 + $0x118] sm:$0xff] }
  0x32   : > { %661 = vrot.lane.b32.xlu1 %v13713_v3, %s15869_s28  ;;  %659 = vrot.lane.b32.xlu0 %v13715_v4, %s15869_s28  ;;  %s15938_s28 = sld [smem:[#allocation32_spill]] }
  0x36   : > { %715 = vrot.lane.b32.xlu1 %v13707_v2, %s15865_s0  ;;  %713 = vrot.lane.b32.xlu0 %v13701_v1, %s15865_s0 }
  0x38   : > { %v12854_v27 = vld [vmem:[%s15938_s28 + $0x8] sm:$0xff]  ;;  %v843_v34 = vld [vmem:[%s15938_s28] sm:$0xff]  ;;  %v12865_v43 = vld [vmem:[%s15938_s28 + $0x10] sm:$0xff] }
  0x39   : > { %v12877_v48 = vld [vmem:[%s15938_s28 + $0x20] sm:$0xff]  ;;  %v12871_v53 = vld [vmem:[%s15938_s28 + $0x18] sm:$0xff]  ;;  %v12879_v0 = vld [vmem:[%s15938_s28 + $0x28] sm:$0xff] }
  0x3a   : > { %711 = vrot.lane.b32.xlu1 %v13713_v3, %s15865_s0  ;;  %709 = vrot.lane.b32.xlu0 %v13715_v4, %s15865_s0  ;;  %s15934_s0 = sld [smem:[#allocation33_spill]]  ;;  %v12885_v8 = vld [vmem:[%s15938_s28 + $0x30] sm:$0xff] }
  0x3e   : > { %748 = vrot.lane.b32.xlu1 %v13707_v2, %s15859_s21  ;;  %746 = vrot.lane.b32.xlu0 %v13701_v1, %s15859_s21 }
  0x40   : > { %v1540_v6 = vld [vmem:[%s15934_s0] sm:$0xff]  ;;  %s15945_s0 = smov 1  }
  0x42   : > { %744 = vrot.lane.b32.xlu1 %v13713_v3, %s15859_s21  ;;  %742 = vrot.lane.b32.xlu0 %v13715_v4, %s15859_s21  ;;  %s15873_s21 = smov 111  }
  0x46   : > { %767 = vrot.lane.b32.xlu1 %v13701_v1, %s15863_s25  ;;  %769 = vrot.lane.b32.xlu0 %v13707_v2, %s15863_s25 }
  0x4a   : > { %790 = vrot.lane.b32.xlu1 %v13707_v2, %s15861_s26  ;;  %765 = vrot.lane.b32.xlu0 %v13713_v3, %s15863_s25 }
  0x4e   : > { %788 = vrot.lane.b32.xlu1 %v13701_v1, %s15861_s26  ;;  %763 = vrot.lane.b32.xlu0 %v13715_v4, %s15863_s25  ;;  %s15940_s25 = smov 17  }
  0x52   : > { %784 = vrot.lane.b32.xlu1 %v13715_v4, %s15861_s26  ;;  %786 = vrot.lane.b32.xlu0 %v13713_v3, %s15861_s26  ;;  %s15941_s26 = smov 16  }
  0x56   : > { %811 = vrot.lane.b32.xlu1 %v13707_v2, %s15876_s27  ;;  %809 = vrot.lane.b32.xlu0 %v13701_v1, %s15876_s27 }
  0x5a   : > { %805 = vrot.lane.b32.xlu1 %v13715_v4, %s15876_s27  ;;  %828 = vrot.lane.b32.xlu0 %v13707_v2, %s15873_s21 }
  0x5e   : > { %826 = vrot.lane.b32.xlu1 %v13701_v1, %s15873_s21  ;;  %807 = vrot.lane.b32.xlu0 %v13713_v3, %s15876_s27 }
  0x62   : > { %822 = vrot.lane.b32.xlu1 %v13715_v4, %s15873_s21  ;;  %824 = vrot.lane.b32.xlu0 %v13713_v3, %s15873_s21  ;;  %s15946_s21 = smov 113  }
  0x66   : > { %1543 = vperm.xlu0 %13447, %v1540_v6  }
  0x98   : > { %v664_v14 = vpop.permute.xlu1 %663  ;;  %v697_v15 = vpop.permute.xlu0 %696 }
  0x99   : > { %v675_v22 = vsel %vm667_vm2, 0.0, %v664_v14 }
  0x9c   : > { %v666_v17 = vpop.permute.xlu1 %665  ;;  %v699_v18 = vpop.permute.xlu0 %698 }
  0x9d   : > { %v702_v20 = vsel %vm700_vm1, %v697_v15, %v699_v18  ;;  %v669_v21 = vsel %vm667_vm2, %v664_v14, %v666_v17 }
  0x9e   : > { %877 = vmatprep.subr.mxu0 %v702_v20  ;;  %12860 = vmatprep.subr.msk.mxu1 %vm687_vm3, %v669_v21  ;;  %v12891_v20 = vld [vmem:[%s15938_s28 + $0x38] sm:$0xff] }
  0x9f   : > { %12856 = vmatpush1.msk.msra.mxu0 %vm13788_vm4, %v697_v15  ;;  %12861 = vmatpush1.msk.msra.mxu1 %vm686_vm5, %v675_v22 }
  0xa0   : > { %v695_v23 = vpop.permute.xlu1 %694  ;;  %v693_v24 = vpop.permute.xlu0 %692 }
  0xa1   : > { %v701_v26 = vsel %vm700_vm1, %v693_v24, %v695_v23 }
  0xa2   : > { %879 = vmatprep.subr.mxu0 %v701_v26 }
  0xa3   : > { %12858 = vmatpush1.msk.msra.mxu0 %vm13788_vm4, %v693_v24 }
  0xa4   : > { %v662_v29 = vpop.permute.xlu1 %661  ;;  %v660_v30 = vpop.permute.xlu0 %659  ;;  %12859 = vmatmul.mubr.msk.f32.vlgmr.msra.gmra.mxu0 %vm700_vm1, %v12854_v27  ;;  %v12895_v27 = vld [vmem:[%s15938_s28 + $0x40] sm:$0xff]  ;;  %s15947_s28 = smov 111  }
  0xa5   : > { %v668_v32 = vsel %vm667_vm2, %v660_v30, %v662_v29  ;;  %v674_v33 = vsel %vm667_vm2, 0.0, %v660_v30  ;;  %1063 = vmatprep.mubr.f32.mxu0 %v15881_v5 }
  0xa6   : > { %12862 = vmatprep.subr.msk.mxu1 %vm687_vm3, %v668_v32 }
  0xa7   : > { %12863 = vmatpush1.msk.msra.mxu1 %vm686_vm5, %v674_v33 }
  0xa8   : > { %v716_v35 = vpop.permute.xlu1 %715  ;;  %v714_v36 = vpop.permute.xlu0 %713  ;;  %12864 = vmatmul.mubr.msk.f32.vlgmr.msra.gmra.mxu1 %vm700_vm1, %v843_v34 }
  0xa9   : > { %v725_v37 = vsel %vm717_vm7, 0.0, %v714_v36  ;;  %v719_v38 = vsel %vm717_vm7, %v714_v36, %v716_v35  ;;  %1141 = vmatprep.mubr.f32.mxu1 %v15881_v5 }
  0xaa   : > { %12866 = vmatprep.subr.msk.mxu0 %vm737_vm8, %v719_v38 }
  0xab   : > { %12867 = vmatpush1.msk.msra.mxu0 %vm736_vm9, %v725_v37 }
  0xac   : > { %v712_v39 = vpop.permute.xlu1 %711  ;;  %v710_v40 = vpop.permute.xlu0 %709 }
  0xad   : > { %v724_v41 = vsel %vm717_vm7, 0.0, %v710_v40  ;;  %v718_v42 = vsel %vm717_vm7, %v710_v40, %v712_v39 }
  0xae   : > { %12868 = vmatprep.subr.msk.mxu0 %vm737_vm8, %v718_v42 }
  0xaf   : > { %12869 = vmatpush1.msk.msra.mxu0 %vm736_vm9, %v724_v41 }
  0xb0   : > { %v749_v44 = vpop.permute.xlu1 %748  ;;  %v747_v45 = vpop.permute.xlu0 %746  ;;  %1183 = vmatprep.subr.mxu0 %v13707_v2  ;;  %12870 = vmatmul.mubr.msk.f32.vlgmr.msra.gmra.mxu0 %vm700_vm1, %v12865_v43 }
  0xb1   : > { %v758_v46 = vsel %vm750_vm10, 0.0, %v747_v45  ;;  %v752_v47 = vsel %vm750_vm10, %v747_v45, %v749_v44  ;;  %1184 = vmatpush1.msra.mxu0 %v13701_v1  ;;  %1219 = vmatprep.mubr.f32.mxu0 %v15881_v5 }
  0xb2   : > { %12872 = vmatprep.subr.msk.mxu1 %vm687_vm3, %v752_v47  ;;  %1185 = vmatprep.subr.mxu0 %v13713_v3 }
  0xb3   : > { %12873 = vmatpush1.msk.msra.mxu1 %vm686_vm5, %v758_v46  ;;  %1186 = vmatpush1.msra.mxu0 %v13715_v4 }
  0xb4   : > { %v745_v49 = vpop.permute.xlu1 %744  ;;  %v743_v50 = vpop.permute.xlu0 %742  ;;  %12878 = vmatmul.mubr.msk.f32.vlgmr.msra.gmra.mxu0 %vm700_vm1, %v12877_v48 }
  0xb5   : > { %v757_v51 = vsel %vm750_vm10, 0.0, %v743_v50  ;;  %v751_v52 = vsel %vm750_vm10, %v743_v50, %v745_v49  ;;  %1375 = vmatprep.mubr.f32.mxu0 %v15881_v5 }
  0xb6   : > { %12874 = vmatprep.subr.msk.mxu1 %vm687_vm3, %v751_v52 }
  0xb7   : > { %12875 = vmatpush1.msk.msra.mxu1 %vm686_vm5, %v757_v51 }
  0xb8   : > { %v768_v54 = vpop.permute.xlu1 %767  ;;  %v770_v55 = vpop.permute.xlu0 %769  ;;  %12876 = vmatmul.mubr.msk.f32.vlgmr.msra.gmra.mxu1 %vm700_vm1, %v12871_v53 }
  0xb9   : > { %v773_v56 = vsel %vm771_vm11, %v768_v54, %v770_v55  ;;  %v779_v57 = vsel %vm771_vm11, %v770_v55, 0.0  ;;  %1297 = vmatprep.mubr.f32.mxu1 %v15881_v5 }
  0xba   : > { %12880 = vmatprep.subr.msk.mxu1 %vm737_vm8, %v779_v57 }
  0xbb   : > { %12881 = vmatpush1.msk.msra.mxu1 %vm736_vm9, %v773_v56 }
  0xbc   : > { %v791_v58 = vpop.permute.xlu1 %790  ;;  %v766_v59 = vpop.permute.xlu0 %765 }
  0xbd   : > { %v778_v60 = vsel %vm771_vm11, %v766_v59, 0.0  ;;  %v800_v61 = vsel %vm792_vm12, %v791_v58, 0.0 }
  0xbe   : > { %12882 = vmatprep.subr.msk.mxu1 %vm737_vm8, %v778_v60  ;;  %12886 = vmatprep.subr.msk.mxu0 %vm687_vm3, %v800_v61 }
  0xc0   : > { %v789_v62 = vpop.permute.xlu1 %788  ;;  %v764_v63 = vpop.permute.xlu0 %763 }
  0xc1   : > { %v794_v1 = vsel %vm792_vm12, %v789_v62, %v791_v58  ;;  %v772_v2 = vsel %vm771_vm11, %v764_v63, %v766_v59 }
  0xc2   : > { %12883 = vmatpush1.msk.msra.mxu1 %vm736_vm9, %v772_v2  ;;  %12887 = vmatpush1.msk.msra.mxu0 %vm686_vm5, %v794_v1 }
  0xc3   : > { %12884 = vmatmul.mubr.msk.f32.vlgmr.msra.gmra.mxu1 %vm700_vm1, %v12879_v0 }
  0xc4   : > { %v785_v3 = vpop.permute.xlu1 %784  ;;  %v787_v4 = vpop.permute.xlu0 %786  ;;  %1453 = vmatprep.mubr.f32.mxu1 %v15881_v5 }
  0xc5   : > { %v793_v6 = vsel %vm792_vm12, %v785_v3, %v787_v4  ;;  %v799_v7 = vsel %vm792_vm12, %v787_v4, 0.0 }
  0xc6   : > { %12888 = vmatprep.subr.msk.mxu0 %vm687_vm3, %v799_v7 }
  0xc7   : > { %12889 = vmatpush1.msk.msra.mxu0 %vm686_vm5, %v793_v6  ;;  %v2326_v6 = vld [vmem:[%s15948_s6] sm:$0xff] }
  0xc8   : > { %v812_v9 = vpop.permute.xlu1 %811  ;;  %v810_v10 = vpop.permute.xlu0 %809  ;;  %12890 = vmatmul.mubr.msk.f32.vlgmr.msra.gmra.mxu0 %vm700_vm1, %v12885_v8 }
  0xc9   : > { %v815_v11 = vsel %vm813_vm13, %v810_v10, %v812_v9  ;;  %12892 = vmatprep.subr.msk.mxu1 %vm813_vm13, %v812_v9  ;;  %1531 = vmatprep.mubr.f32.mxu0 %v15881_v5 }
  0xca   : > { %1418 = vmatpush1.msra.mxu1 %v815_v11 }
  0xcc   : > { %v806_v12 = vpop.permute.xlu1 %805  ;;  %v829_v14 = vpop.permute.xlu0 %828 }
  0xcd   : > { %v838_v15 = vsel %vm830_vm14, %v829_v14, 0.0 }
  0xce   : > { %12896 = vmatprep.subr.msk.mxu0 %vm737_vm8, %v838_v15  ;;  %v12901_v15 = vld [vmem:[%s15841_s5 + $0x8] sm:$0xff] }
  0xd0   : > { %v827_v17 = vpop.permute.xlu1 %826  ;;  %v808_v18 = vpop.permute.xlu0 %807 }
  0xd1   : > { %v832_v21 = vsel %vm830_vm14, %v827_v17, %v829_v14  ;;  %12893 = vmatprep.subr.msk.mxu1 %vm813_vm13, %v808_v18  ;;  %v814_v22 = vsel %vm813_vm13, %v806_v12, %v808_v18 }
  0xd2   : > { %1420 = vmatpush1.msra.mxu1 %v814_v22  ;;  %12897 = vmatpush1.msk.msra.mxu0 %vm736_vm9, %v832_v21  ;;  %v1628_v21 = vld [vmem:[%s15841_s5] sm:$0xff] }
  0xd3   : > { %12894 = vmatmul.mubr.msk.f32.vlgmr.msra.gmra.mxu1 %vm700_vm1, %v12891_v20 }
  0xd4   : > { %v823_v23 = vpop.permute.xlu1 %822  ;;  %v825_v24 = vpop.permute.xlu0 %824  ;;  %1699 = vmatprep.mubr.f32.mxu1 %v15881_v5 }
  0xd5   : > { %v831_v25 = vsel %vm830_vm14, %v823_v23, %v825_v24  ;;  %v837_v26 = vsel %vm830_vm14, %v825_v24, 0.0 }
  0xd6   : > { %12898 = vmatprep.subr.msk.mxu0 %vm737_vm8, %v837_v26  ;;  %v12908_v26 = vld [vmem:[%s15841_s5 + $0x10] sm:$0xff] }
  0xd7   : > { %12899 = vmatpush1.msk.msra.mxu0 %vm736_vm9, %v831_v25 }
  0xd8   : > { %12900 = vmatmul.mubr.msk.f32.vlgmr.msra.gmra.mxu0 %vm700_vm1, %v12895_v27 }
  0xd9   : > { %1773 = vmatprep.mubr.f32.mxu0 %v15881_v5 }
  0xe1   : > { %v1544_v58 = vpop.permute.xlu0 %1543 }
 0x164   : > { %v915_v29 = vpop.f32.mrf.mxu0 }
 0x166   : > { %v917_v30 = vpop.f32.mrf.mxu0 }
 0x168   : > { %v989_v32 = vpop.f32.mrf.mxu1 }
 0x169   : > { %v990_v33 = vadd.f32 %v989_v32, %v915_v29 }
 0x16a   : > { %v991_v34 = vpop.f32.mrf.mxu1 }
 0x16b   : > { %v992_v36 = vadd.f32 %v991_v34, %v917_v30  ;;  %v12912_v34 = vld [vmem:[%s15841_s5 + $0x18] sm:$0xff] }
 0x170   : > { %v1065_v35 = vpop.f32.mrf.mxu0 }
 0x171   : > { %v1070_v37 = vadd.f32 %v1065_v35, %v990_v33 }
 0x172   : > { %v1067_v38 = vpop.f32.mrf.mxu0 }
 0x173   : > { %v1071_v40 = vadd.f32 %v1067_v38, %v992_v36  ;;  %v12916_v36 = vld [vmem:[%s15841_s5 + $0x20] sm:$0xff] }
 0x174   : > { %v1221_v43 = vpop.f32.mrf.mxu0 }
 0x176   : > { %v1223_v46 = vpop.f32.mrf.mxu0 }
 0x178   : > { %v1143_v39 = vpop.f32.mrf.mxu1 }
 0x179   : > { %v1148_v41 = vadd.f32 %v1143_v39, %v1070_v37 }
 0x17a   : > { %v1145_v42 = vpop.f32.mrf.mxu1 }
 0x17b   : > { %v1149_v44 = vadd.f32 %v1145_v42, %v1071_v40  ;;  %v1226_v45 = vadd.f32 %v1221_v43, %v1148_v41  ;;  %v12918_v43 = vld [vmem:[%s15841_s5 + $0x28] sm:$0xff] }
 0x17d   : > { %v1227_v48 = vadd.f32 %v1223_v46, %v1149_v44  ;;  %v12922_v44 = vld [vmem:[%s15841_s5 + $0x30] sm:$0xff] }
 0x183   : > { %v1299_v47 = vpop.f32.mrf.mxu1 }
 0x184   : > { %v1304_v49 = vadd.f32 %v1299_v47, %v1226_v45  ;;  %v12926_v47 = vld [vmem:[%s15841_s5 + $0x38] sm:$0xff] }
 0x185   : > { %v1301_v50 = vpop.f32.mrf.mxu1 }
 0x186   : > { %v1305_v52 = vadd.f32 %v1301_v50, %v1227_v48 }
 0x188   : > { %v1377_v51 = vpop.f32.mrf.mxu0 }
 0x189   : > { %v1382_v53 = vadd.f32 %v1377_v51, %v1304_v49  ;;  %v12929_v49 = vld [vmem:[%s15841_s5 + $0x40] sm:$0xff] }
 0x18a   : > { %v1379_v54 = vpop.f32.mrf.mxu0 }
 0x18b   : > { %v1383_v56 = vadd.f32 %v1379_v54, %v1305_v52 }
 0x193   : > { %v1455_v55 = vpop.f32.mrf.mxu1 }
 0x194   : > { %v1460_v57 = vadd.f32 %v1455_v55, %v1382_v53 }
 0x195   : > { %v1457_v59 = vpop.f32.mrf.mxu1 }
 0x196   : > { %v1461_v63 = vadd.f32 %v1457_v59, %v1383_v56 }
 0x198   : > { %v1533_v60 = vpop.f32.mrf.mxu0 }
 0x199   : > { %v1538_v61 = vadd.f32 %v1533_v60, %v1460_v57 }
 0x19a   : > { %v1535_v62 = vpop.f32.mrf.mxu0 }
 0x19b   : > { %v1546_v0 = vadd.f32 %v1544_v58, %v1538_v61  ;;  %v1539_v1 = vadd.f32 %v1535_v62, %v1461_v63 }
 0x19d   : > { %v13931_v2 = vmax.f32 %v1546_v0, 0.0  ;;  %v1547_v3 = vadd.f32 %v1544_v58, %v1539_v1 }
 0x19f   : > { %15939 = vst [vmem:[#allocation11_spill] sm:$0xff] %v13931_v2  ;;  %1552 = vrot.lane.b32.xlu0 %v13931_v2, %s15940_s25  ;;  %1562 = vrot.lane.b32.xlu1 %v13931_v2, %s15941_s26  ;;  %v13941_v4 = vmax.f32 %v1547_v3, 0.0 }
 0x1a1   : > { %15944 = vst [vmem:[#allocation12_spill] sm:$0xff] %v13941_v4 }
 0x1a3   : > { %1570 = vrot.lane.b32.xlu0 %v13931_v2, %s15942_s23  ;;  %1590 = vrot.lane.b32.xlu1 %v13931_v2, %s15943_s3 }
 0x1a7   : > { %1580 = vrot.lane.b32.xlu0 %v13931_v2, %s15945_s0  ;;  %1564 = vrot.lane.b32.xlu1 %v13941_v4, %s15941_s26 }
 0x1ab   : > { %1610 = vrot.lane.b32.xlu0 %v13931_v2, %s15876_s27  ;;  %1554 = vrot.lane.b32.xlu1 %v13941_v4, %s15940_s25 }
 0x1af   : > { %1592 = vrot.lane.b32.xlu0 %v13941_v4, %s15943_s3  ;;  %1572 = vrot.lane.b32.xlu1 %v13941_v4, %s15942_s23 }
 0x1b3   : > { %1602 = vrot.lane.b32.xlu0 %v13941_v4, %s15946_s21  ;;  %1582 = vrot.lane.b32.xlu1 %v13941_v4, %s15945_s0 }
 0x1b7   : > { %1620 = vrot.lane.b32.xlu0 %v13941_v4, %s15947_s28  ;;  %1600 = vrot.lane.b32.xlu1 %v13931_v2, %s15946_s21 }
 0x1bb   : > { %2329 = vperm.xlu0 %13447, %v2326_v6   ;;  %1612 = vrot.lane.b32.xlu1 %v13941_v4, %s15949_s1 }
 0x1bf   : > { %1618 = vrot.lane.b32.xlu1 %v13931_v2, %s15947_s28 }
 0x211   : > { %v1553_v7 = vpop.permute.xlu0 %1552  ;;  %v13970_v8 = vpop.permute.xlu1 %1562 }
 0x212   : > { %15950 = vst [vmem:[#allocation13_spill] sm:$0xff] %v13970_v8  ;;  %v13992_v22 = vsel %vm667_vm2, 0.0, %v1553_v7 }
 0x213   : > { %15953 = vst [vmem:[#allocation16_spill] sm:$0xff] %v13992_v22 }
 0x215   : > { %v1571_v9 = vpop.permute.xlu0 %1570  ;;  %v1591_v10 = vpop.permute.xlu1 %1590 }
 0x216   : > { %v14009_v27 = vsel %vm717_vm7, 0.0, %v1571_v9 }
 0x217   : > { %15955 = vst [vmem:[#allocation18_spill] sm:$0xff] %v14009_v27 }
 0x219   : > { %v1581_v11 = vpop.permute.xlu0 %1580  ;;  %v1565_v12 = vpop.permute.xlu1 %1564 }
 0x21a   : > { %v13974_v14 = vsel %vm700_vm1, %v13970_v8, %v1565_v12  ;;  %v14031_v35 = vsel %vm750_vm10, 0.0, %v1581_v11 }
 0x21b   : > { %15951 = vst [vmem:[#allocation14_spill] sm:$0xff] %v13974_v14  ;;  %1665 = vmatprep.subr.mxu1 %v13974_v14  ;;  %15958 = vst [vmem:[#allocation21_spill] sm:$0xff] %v14031_v35 }
 0x21c   : > { %12903 = vmatpush1.msk.msra.mxu1 %vm13788_vm4, %v13970_v8 }
 0x21d   : > { %v1611_v17 = vpop.permute.xlu0 %1610  ;;  %v1555_v18 = vpop.permute.xlu1 %1554  ;;  %12904 = vmatmul.mubr.msk.f32.vlgmr.msra.gmra.mxu1 %vm1631_vm15, %v12901_v15 }
 0x21e   : > { %v13985_v20 = vsel %vm667_vm2, %v1553_v7, %v1555_v18  ;;  %1849 = vmatprep.mubr.f32.mxu1 %v15881_v5 }
 0x21f   : > { %15952 = vst [vmem:[#allocation15_spill] sm:$0xff] %v13985_v20  ;;  %12905 = vmatprep.subr.msk.mxu0 %vm687_vm3, %v13985_v20 }
 0x220   : > { %12906 = vmatpush1.msk.msra.mxu0 %vm686_vm5, %v13992_v22 }
 0x221   : > { %v1593_v23 = vpop.permute.xlu0 %1592  ;;  %v1573_v24 = vpop.permute.xlu1 %1572  ;;  %12907 = vmatmul.mubr.msk.f32.vlgmr.msra.gmra.mxu0 %vm1631_vm15, %v1628_v21 }
 0x222   : > { %v14002_v25 = vsel %vm717_vm7, %v1571_v9, %v1573_v24  ;;  %1927 = vmatprep.mubr.f32.mxu0 %v15881_v5  ;;  %v14043_v37 = vsel %vm771_vm11, %v1593_v23, 0.0  ;;  %v14049_v38 = vsel %vm771_vm11, %v1591_v10, %v1593_v23 }
 0x223   : > { %15954 = vst [vmem:[#allocation17_spill] sm:$0xff] %v14002_v25  ;;  %12909 = vmatprep.subr.msk.mxu1 %vm737_vm8, %v14002_v25  ;;  %15959 = vst [vmem:[#allocation22_spill] sm:$0xff] %v14043_v37 }
 0x224   : > { %12910 = vmatpush1.msk.msra.mxu1 %vm736_vm9, %v14009_v27  ;;  %15960 = vst [vmem:[#allocation23_spill] sm:$0xff] %v14049_v38 }
 0x225   : > { %v1603_v29 = vpop.permute.xlu0 %1602  ;;  %12911 = vmatmul.mubr.msk.f32.vlgmr.msra.gmra.mxu1 %vm1631_vm15, %v12908_v26  ;;  %1971 = vmatprep.subr.mxu1 %v13941_v4  ;;  %v1583_v30 = vpop.permute.xlu1 %1582 }
 0x226   : > { %v14020_v32 = vsel %vm792_vm12, %v1603_v29, 0.0  ;;  %v14023_v33 = vsel %vm750_vm10, %v1581_v11, %v1583_v30  ;;  %1972 = vmatpush1.msra.mxu1 %v13931_v2  ;;  %2005 = vmatprep.mubr.f32.mxu1 %v15881_v5 }
 0x227   : > { %15956 = vst [vmem:[#allocation19_spill] sm:$0xff] %v14020_v32  ;;  %15957 = vst [vmem:[#allocation20_spill] sm:$0xff] %v14023_v33  ;;  %12913 = vmatprep.subr.msk.mxu0 %vm687_vm3, %v14023_v33  ;;  %12923 = vmatprep.subr.msk.mxu1 %vm687_vm3, %v14020_v32 }
 0x228   : > { %12914 = vmatpush1.msk.msra.mxu0 %vm686_vm5, %v14031_v35 }
 0x229   : > { %v1621_v39 = vpop.permute.xlu0 %1620  ;;  %12915 = vmatmul.mubr.msk.f32.vlgmr.msra.gmra.mxu0 %vm1631_vm15, %v12912_v34  ;;  %12919 = vmatprep.subr.msk.mxu0 %vm737_vm8, %v14043_v37  ;;  %v1601_v40 = vpop.permute.xlu1 %1600 }
 0x22a   : > { %v14056_v41 = vsel %vm830_vm14, %v1621_v39, 0.0  ;;  %v14059_v42 = vsel %vm792_vm12, %v1601_v40, %v1603_v29  ;;  %12917 = vmatmul.mubr.msk.f32.vlgmr.msra.gmra.mxu1 %vm1631_vm15, %v12916_v36  ;;  %12920 = vmatpush1.msk.msra.mxu0 %vm736_vm9, %v14049_v38 }
 0x22b   : > { %15961 = vst [vmem:[#allocation24_spill] sm:$0xff] %v14056_v41  ;;  %15962 = vst [vmem:[#allocation25_spill] sm:$0xff] %v14059_v42  ;;  %12924 = vmatpush1.msk.msra.mxu1 %vm686_vm5, %v14059_v42  ;;  %2083 = vmatprep.mubr.f32.mxu0 %v15881_v5 }
 0x22c   : > { %12930 = vmatprep.subr.msk.mxu1 %vm737_vm8, %v14056_v41  ;;  %2161 = vmatprep.mubr.f32.mxu1 %v15881_v5 }
 0x22d   : > { %12921 = vmatmul.mubr.msk.f32.vlgmr.msra.gmra.mxu0 %vm1631_vm15, %v12918_v43  ;;  %v14080_v45 = vpop.permute.xlu1 %1612 }
 0x22e   : > { %15963 = vst [vmem:[#allocation26_spill] sm:$0xff] %v14080_v45  ;;  %12925 = vmatmul.mubr.msk.f32.vlgmr.msra.gmra.mxu1 %vm1631_vm15, %v12922_v44  ;;  %12927 = vmatprep.subr.msk.mxu0 %vm813_vm13, %v14080_v45  ;;  %v14087_v46 = vsel %vm813_vm13, %v1611_v17, %v14080_v45 }
 0x22f   : > { %15964 = vst [vmem:[#allocation27_spill] sm:$0xff] %v14087_v46  ;;  %2206 = vmatpush1.msra.mxu0 %v14087_v46  ;;  %2239 = vmatprep.mubr.f32.mxu0 %v15881_v5 }
 0x230   : > { %2317 = vmatprep.mubr.f32.mxu1 %v15881_v5 }
 0x231   : > { %12928 = vmatmul.mubr.msk.f32.vlgmr.msra.gmra.mxu0 %vm1631_vm15, %v12926_v47  ;;  %v1619_v48 = vpop.permute.xlu1 %1618 }
 0x232   : > { %v14100_v50 = vsel %vm830_vm14, %v1619_v48, %v1621_v39  ;;  %2484 = vmatprep.mubr.f32.mxu0 %v15881_v5 }
 0x233   : > { %15965 = vst [vmem:[#allocation28_spill] sm:$0xff] %v14100_v50  ;;  %12931 = vmatpush1.msk.msra.mxu1 %vm736_vm9, %v14100_v50 }
 0x234   : > { %12932 = vmatmul.mubr.msk.f32.vlgmr.msra.gmra.mxu1 %vm1631_vm15, %v12929_v49  ;;  %v3111_v49 = vld [vmem:[%s15844_s8] sm:$0xff] }
 0x235   : > { %2558 = vmatprep.mubr.f32.mxu1 %v15881_v5 }
 0x236   : > { %v2330_v36 = vpop.permute.xlu0 %2329 }
 0x2dd   : > { %v1701_v51 = vpop.f32.mrf.mxu1 }
 0x2df   : > { %v1703_v53 = vpop.f32.mrf.mxu1 }
 0x2e1   : > { %v1775_v52 = vpop.f32.mrf.mxu0 }
 0x2e2   : > { %v1776_v54 = vadd.f32 %v1775_v52, %v1701_v51 }
 0x2e3   : > { %v1777_v55 = vpop.f32.mrf.mxu0 }
 0x2e4   : > { %v1778_v57 = vadd.f32 %v1777_v55, %v1703_v53 }
 0x2e5   : > { %v1851_v56 = vpop.f32.mrf.mxu1 }
 0x2e6   : > { %v1856_v58 = vadd.f32 %v1851_v56, %v1776_v54  ;;  %v12933_v56 = vld [vmem:[%s15843_s7 + $0x8] sm:$0xff] }
 0x2e7   : > { %v1853_v59 = vpop.f32.mrf.mxu1 }
 0x2e8   : > { %v1857_v61 = vadd.f32 %v1853_v59, %v1778_v57 }
 0x2e9   : > { %v1929_v60 = vpop.f32.mrf.mxu0 }
 0x2ea   : > { %v1934_v62 = vadd.f32 %v1929_v60, %v1856_v58  ;;  %v2007_v63 = vpop.f32.mrf.mxu1  ;;  %v2414_v60 = vld [vmem:[%s15843_s7] sm:$0xff] }
 0x2eb   : > { %v1931_v0 = vpop.f32.mrf.mxu0 }
 0x2ec   : > { %v2012_v1 = vadd.f32 %v2007_v63, %v1934_v62  ;;  %v1935_v3 = vadd.f32 %v1931_v0, %v1857_v61  ;;  %v2009_v6 = vpop.f32.mrf.mxu1 }
 0x2ed   : > { %v2085_v7 = vpop.f32.mrf.mxu0 }
 0x2ee   : > { %v2013_v9 = vadd.f32 %v2009_v6, %v1935_v3  ;;  %v2090_v10 = vadd.f32 %v2085_v7, %v2012_v1  ;;  %v2163_v11 = vpop.f32.mrf.mxu1  ;;  %v12940_v1 = vld [vmem:[%s15843_s7 + $0x10] sm:$0xff] }
 0x2ef   : > { %v2087_v12 = vpop.f32.mrf.mxu0 }
 0x2f0   : > { %v2168_v15 = vadd.f32 %v2163_v11, %v2090_v10  ;;  %v2091_v17 = vadd.f32 %v2087_v12, %v2013_v9  ;;  %v2165_v18 = vpop.f32.mrf.mxu1  ;;  %v12944_v10 = vld [vmem:[%s15843_s7 + $0x18] sm:$0xff]  ;;  %v12948_v11 = vld [vmem:[%s15843_s7 + $0x20] sm:$0xff] }
 0x2f1   : > { %v2241_v21 = vpop.f32.mrf.mxu0 }
 0x2f2   : > { %v2169_v23 = vadd.f32 %v2165_v18, %v2091_v17  ;;  %v2246_v24 = vadd.f32 %v2241_v21, %v2168_v15 }
 0x2f3   : > { %v2243_v26 = vpop.f32.mrf.mxu0 }
 0x2f4   : > { %v2247_v29 = vadd.f32 %v2243_v26, %v2169_v23  ;;  %v2319_v30 = vpop.f32.mrf.mxu1  ;;  %v12950_v23 = vld [vmem:[%s15843_s7 + $0x28] sm:$0xff] }
 0x2f5   : > { %v2324_v34 = vadd.f32 %v2319_v30, %v2246_v24 }
 0x2f6   : > { %v2321_v39 = vpop.f32.mrf.mxu1 }
 0x2f7   : > { %v2332_v40 = vadd.f32 %v2330_v36, %v2324_v34  ;;  %v2325_v43 = vadd.f32 %v2321_v39, %v2247_v29  ;;  %v12958_v39 = vld [vmem:[%s15843_s7 + $0x38] sm:$0xff] }
 0x2f9   : > { %v14108_v44 = vmax.f32 %v2332_v40, 0.0  ;;  %v2333_v47 = vadd.f32 %v2330_v36, %v2325_v43  ;;  %v12954_v36 = vld [vmem:[%s15843_s7 + $0x30] sm:$0xff] }
 0x2fb   : > { %2376 = vrot.lane.b32.xlu0 %v14108_v44, %s15943_s3  ;;  %2348 = vrot.lane.b32.xlu1 %v14108_v44, %s15941_s26  ;;  %v14114_v48 = vmax.f32 %v2333_v47, 0.0 }
 0x2ff   : > { %2338 = vrot.lane.b32.xlu1 %v14108_v44, %s15940_s25  ;;  %2350 = vrot.lane.b32.xlu0 %v14114_v48, %s15941_s26 }
 0x303   : > { %2356 = vrot.lane.b32.xlu1 %v14108_v44, %s15942_s23  ;;  %2340 = vrot.lane.b32.xlu0 %v14114_v48, %s15940_s25 }
 0x307   : > { %2366 = vrot.lane.b32.xlu1 %v14108_v44, %s15945_s0  ;;  %2358 = vrot.lane.b32.xlu0 %v14114_v48, %s15942_s23 }
 0x30b   : > { %2396 = vrot.lane.b32.xlu1 %v14108_v44, %s15949_s1  ;;  %2368 = vrot.lane.b32.xlu0 %v14114_v48, %s15945_s0 }
 0x30f   : > { %2378 = vrot.lane.b32.xlu1 %v14114_v48, %s15943_s3  ;;  %2386 = vrot.lane.b32.xlu0 %v14108_v44, %s15946_s21 }
 0x313   : > { %2388 = vrot.lane.b32.xlu1 %v14114_v48, %s15946_s21  ;;  %2398 = vrot.lane.b32.xlu0 %v14114_v48, %s15949_s1 }
 0x317   : > { %2406 = vrot.lane.b32.xlu1 %v14114_v48, %s15947_s28  ;;  %2404 = vrot.lane.b32.xlu0 %v14108_v44, %s15947_s28 }
 0x31b   : > { %3114 = vperm.xlu1 %13448, %v3111_v49  }
 0x36d   : > { %v2377_v51 = vpop.permute.xlu0 %2376  ;;  %v14147_v52 = vpop.permute.xlu1 %2348 }
 0x371   : > { %v2339_v53 = vpop.permute.xlu1 %2338  ;;  %v2351_v54 = vpop.permute.xlu0 %2350 }
 0x372   : > { %v14151_v55 = vsel %vm700_vm1, %v14147_v52, %v2351_v54  ;;  %v14169_v61 = vsel %vm667_vm2, 0.0, %v2339_v53 }
 0x373   : > { %2450 = vmatprep.subr.mxu0 %v14151_v55 }
 0x374   : > { %12935 = vmatpush1.msk.msra.mxu0 %vm13788_vm4, %v14147_v52 }
 0x375   : > { %v2357_v57 = vpop.permute.xlu1 %2356  ;;  %v2341_v58 = vpop.permute.xlu0 %2340  ;;  %12936 = vmatmul.mubr.msk.f32.vlgmr.msra.gmra.mxu0 %vm1631_vm15, %v12933_v56 }
 0x376   : > { %v14162_v59 = vsel %vm667_vm2, %v2339_v53, %v2341_v58  ;;  %2634 = vmatprep.mubr.f32.mxu0 %v15881_v5  ;;  %v14186_v3 = vsel %vm717_vm7, 0.0, %v2357_v57 }
 0x377   : > { %12937 = vmatprep.subr.msk.mxu1 %vm687_vm3, %v14162_v59 }
 0x378   : > { %12938 = vmatpush1.msk.msra.mxu1 %vm686_vm5, %v14169_v61 }
 0x379   : > { %v2367_v62 = vpop.permute.xlu1 %2366  ;;  %v2359_v63 = vpop.permute.xlu0 %2358  ;;  %12939 = vmatmul.mubr.msk.f32.vlgmr.msra.gmra.mxu1 %vm1631_vm15, %v2414_v60 }
 0x37a   : > { %v14179_v0 = vsel %vm717_vm7, %v2357_v57, %v2359_v63  ;;  %2712 = vmatprep.mubr.f32.mxu1 %v15881_v5  ;;  %v14208_v12 = vsel %vm750_vm10, 0.0, %v2367_v62 }
 0x37b   : > { %12941 = vmatprep.subr.msk.mxu0 %vm737_vm8, %v14179_v0 }
 0x37c   : > { %12942 = vmatpush1.msk.msra.mxu0 %vm736_vm9, %v14186_v3 }
 0x37d   : > { %v2397_v6 = vpop.permute.xlu1 %2396  ;;  %12943 = vmatmul.mubr.msk.f32.vlgmr.msra.gmra.mxu0 %vm1631_vm15, %v12940_v1  ;;  %2756 = vmatprep.subr.mxu0 %v14114_v48  ;;  %v2369_v7 = vpop.permute.xlu0 %2368 }
 0x37e   : > { %v14197_v9 = vsel %vm750_vm10, %v2367_v62, %v2369_v7  ;;  %2757 = vmatpush1.msra.mxu0 %v14108_v44  ;;  %2790 = vmatprep.mubr.f32.mxu0 %v15881_v5 }
 0x37f   : > { %12945 = vmatprep.subr.msk.mxu1 %vm687_vm3, %v14197_v9 }
 0x380   : > { %12946 = vmatpush1.msk.msra.mxu1 %vm686_vm5, %v14208_v12 }
 0x381   : > { %v2379_v15 = vpop.permute.xlu1 %2378  ;;  %12947 = vmatmul.mubr.msk.f32.vlgmr.msra.gmra.mxu1 %vm1631_vm15, %v12944_v10  ;;  %v2387_v17 = vpop.permute.xlu0 %2386  ;;  %12949 = vmatmul.mubr.msk.f32.vlgmr.msra.gmra.mxu0 %vm1631_vm15, %v12948_v11 }
 0x382   : > { %v14219_v18 = vsel %vm771_vm11, %v2377_v51, %v2379_v15  ;;  %v14222_v21 = vsel %vm771_vm11, %v2379_v15, 0.0  ;;  %2868 = vmatprep.mubr.f32.mxu1 %v15881_v5  ;;  %2946 = vmatprep.mubr.f32.mxu0 %v15881_v5  ;;  %v12961_v51 = vld [vmem:[%s15843_s7 + $0x40] sm:$0xff] }
 0x383   : > { %12951 = vmatprep.subr.msk.mxu1 %vm737_vm8, %v14222_v21 }
 0x384   : > { %12952 = vmatpush1.msk.msra.mxu1 %vm736_vm9, %v14219_v18 }
 0x385   : > { %v2389_v24 = vpop.permute.xlu1 %2388  ;;  %12953 = vmatmul.mubr.msk.f32.vlgmr.msra.gmra.mxu1 %vm1631_vm15, %v12950_v23  ;;  %v14236_v26 = vpop.permute.xlu0 %2398 }
 0x386   : > { %v14239_v29 = vsel %vm792_vm12, %v2387_v17, %v2389_v24  ;;  %v14242_v30 = vsel %vm792_vm12, %v2389_v24, 0.0  ;;  %12959 = vmatprep.subr.msk.mxu1 %vm813_vm13, %v14236_v26  ;;  %v14248_v34 = vsel %vm813_vm13, %v2397_v6, %v14236_v26  ;;  %3024 = vmatprep.mubr.f32.mxu1 %v15881_v5 }
 0x387   : > { %12955 = vmatprep.subr.msk.mxu0 %vm687_vm3, %v14242_v30  ;;  %2991 = vmatpush1.msra.mxu1 %v14248_v34 }
 0x388   : > { %12956 = vmatpush1.msk.msra.mxu0 %vm686_vm5, %v14239_v29 }
 0x389   : > { %v2407_v40 = vpop.permute.xlu1 %2406  ;;  %12957 = vmatmul.mubr.msk.f32.vlgmr.msra.gmra.mxu0 %vm1631_vm15, %v12954_v36  ;;  %12960 = vmatmul.mubr.msk.f32.vlgmr.msra.gmra.mxu1 %vm1631_vm15, %v12958_v39  ;;  %v2405_v43 = vpop.permute.xlu0 %2404 }
 0x38a   : > { %v14267_v47 = vsel %vm830_vm14, %v2407_v40, 0.0  ;;  %v14270_v49 = vsel %vm830_vm14, %v2405_v43, %v2407_v40  ;;  %3102 = vmatprep.mubr.f32.mxu0 %v15881_v5  ;;  %3269 = vmatprep.mubr.f32.mxu1 %v15881_v5 }
 0x38b   : > { %12962 = vmatprep.subr.msk.mxu0 %vm737_vm8, %v14267_v47 }
 0x38c   : > { %12963 = vmatpush1.msk.msra.mxu0 %vm736_vm9, %v14270_v49 }
 0x38d   : > { %12964 = vmatmul.mubr.msk.f32.vlgmr.msra.gmra.mxu0 %vm1631_vm15, %v12961_v51 }
 0x38e   : > { %3343 = vmatprep.mubr.f32.mxu0 %v15881_v5 }
 0x435   : > { %v2486_v53 = vpop.f32.mrf.mxu0 }
 0x437   : > { %v2488_v54 = vpop.f32.mrf.mxu0 }
 0x439   : > { %v2560_v56 = vpop.f32.mrf.mxu1 }
 0x43a   : > { %v2561_v57 = vadd.f32 %v2560_v56, %v2486_v53 }
 0x43b   : > { %v2562_v58 = vpop.f32.mrf.mxu1 }
 0x43c   : > { %v2563_v62 = vadd.f32 %v2562_v58, %v2488_v54  ;;  %v3115_v58 = vpop.permute.xlu1 %3114 }
 0x43d   : > { %v2636_v60 = vpop.f32.mrf.mxu0 }
 0x43e   : > { %v2641_v63 = vadd.f32 %v2636_v60, %v2561_v57 }
 0x43f   : > { %v2638_v1 = vpop.f32.mrf.mxu0 }
 0x440   : > { %v2642_v10 = vadd.f32 %v2638_v1, %v2563_v62 }
 0x441   : > { %v2714_v6 = vpop.f32.mrf.mxu1  ;;  %v2792_v7 = vpop.f32.mrf.mxu0 }
 0x442   : > { %v2719_v11 = vadd.f32 %v2714_v6, %v2641_v63 }
 0x443   : > { %v2716_v15 = vpop.f32.mrf.mxu1  ;;  %v2794_v17 = vpop.f32.mrf.mxu0 }
 0x444   : > { %v2720_v23 = vadd.f32 %v2716_v15, %v2642_v10  ;;  %v2797_v24 = vadd.f32 %v2792_v7, %v2719_v11 }
 0x445   : > { %v2870_v36 = vpop.f32.mrf.mxu1 }
 0x446   : > { %v2798_v39 = vadd.f32 %v2794_v17, %v2720_v23  ;;  %v2875_v43 = vadd.f32 %v2870_v36, %v2797_v24  ;;  %v12965_v36 = vld [vmem:[%s15845_s9 + $0x8] sm:$0xff] }
 0x447   : > { %v2872_v40 = vpop.f32.mrf.mxu1 }
 0x448   : > { %v2876_v53 = vadd.f32 %v2872_v40, %v2798_v39 }
 0x449   : > { %v2948_v51 = vpop.f32.mrf.mxu0  ;;  %v3026_v5 = vpop.f32.mrf.mxu1 }
 0x44a   : > { %v2953_v56 = vadd.f32 %v2948_v51, %v2875_v43  ;;  %v3199_v51 = vld [vmem:[%s15845_s9] sm:$0xff] }
 0x44b   : > { %v2950_v50 = vpop.f32.mrf.mxu0  ;;  %v3028_v60 = vpop.f32.mrf.mxu1 }
 0x44c   : > { %v3031_v54 = vadd.f32 %v3026_v5, %v2953_v56  ;;  %v2954_v57 = vadd.f32 %v2950_v50, %v2876_v53  ;;  %v3896_v5 = vld [vmem:[%s15846_s10] sm:$0xff]  ;;  %v15966_v53 = vmov 0.0  }
 0x44d   : > { %v3104_v41 = vpop.f32.mrf.mxu0 }
 0x44e   : > { %v3032_v62 = vadd.f32 %v3028_v60, %v2954_v57  ;;  %v3109_v63 = vadd.f32 %v3104_v41, %v3031_v54  ;;  %v12972_v60 = vld [vmem:[%s15845_s9 + $0x10] sm:$0xff] }
 0x44f   : > { %v3106_v1 = vpop.f32.mrf.mxu0 }
 0x450   : > { %v3117_v6 = vadd.f32 %v3115_v58, %v3109_v63  ;;  %v3110_v10 = vadd.f32 %v3106_v1, %v3032_v62 }
 0x452   : > { %v14285_v7 = vmax.f32 %v3117_v6, 0.0  ;;  %v3118_v11 = vadd.f32 %v3115_v58, %v3110_v10  ;;  %v12976_v10 = vld [vmem:[%s15845_s9 + $0x18] sm:$0xff] }
 0x454   : > { %3161 = vrot.lane.b32.xlu1 %v14285_v7, %s15943_s3  ;;  %3133 = vrot.lane.b32.xlu0 %v14285_v7, %s15941_s26  ;;  %v14291_v15 = vmax.f32 %v3118_v11, 0.0  ;;  %v12980_v11 = vld [vmem:[%s15845_s9 + $0x20] sm:$0xff] }
 0x458   : > { %3123 = vrot.lane.b32.xlu0 %v14285_v7, %s15940_s25  ;;  %3135 = vrot.lane.b32.xlu1 %v14291_v15, %s15941_s26 }
 0x45c   : > { %3141 = vrot.lane.b32.xlu0 %v14285_v7, %s15942_s23  ;;  %3125 = vrot.lane.b32.xlu1 %v14291_v15, %s15940_s25 }
 0x460   : > { %3151 = vrot.lane.b32.xlu0 %v14285_v7, %s15945_s0  ;;  %3143 = vrot.lane.b32.xlu1 %v14291_v15, %s15942_s23 }
 0x464   : > { %3181 = vrot.lane.b32.xlu0 %v14285_v7, %s15949_s1  ;;  %3153 = vrot.lane.b32.xlu1 %v14291_v15, %s15945_s0 }
 0x468   : > { %3163 = vrot.lane.b32.xlu0 %v14291_v15, %s15943_s3  ;;  %3171 = vrot.lane.b32.xlu1 %v14285_v7, %s15946_s21 }
 0x46c   : > { %3173 = vrot.lane.b32.xlu0 %v14291_v15, %s15946_s21  ;;  %3183 = vrot.lane.b32.xlu1 %v14291_v15, %s15949_s1 }
 0x470   : > { %3191 = vrot.lane.b32.xlu0 %v14291_v15, %s15947_s28  ;;  %3189 = vrot.lane.b32.xlu1 %v14285_v7, %s15947_s28 }
 0x474   : > { %3899 = vperm.xlu0 %13447, %v3896_v5  }
 0x4c6   : > { %v3162_v41 = vpop.permute.xlu1 %3161  ;;  %v14324_v50 = vpop.permute.xlu0 %3133 }
 0x4ca   : > { %v3124_v17 = vpop.permute.xlu0 %3123  ;;  %v3136_v23 = vpop.permute.xlu1 %3135 }
 0x4cb   : > { %v14328_v24 = vsel %vm700_vm1, %v14324_v50, %v3136_v23  ;;  %v3130_v56 = vsel %vm667_vm2, 0.0, %v3124_v17 }
 0x4cc   : > { %3235 = vmatprep.subr.mxu1 %v14328_v24 }
 0x4cd   : > { %12967 = vmatpush1.msk.msra.mxu1 %vm13788_vm4, %v14324_v50 }
 0x4ce   : > { %v3142_v39 = vpop.permute.xlu0 %3141  ;;  %v3126_v40 = vpop.permute.xlu1 %3125  ;;  %12968 = vmatmul.mubr.msk.f32.vlgmr.msra.gmra.mxu1 %vm1631_vm15, %v12965_v36 }
 0x4cf   : > { %v14339_v43 = vsel %vm667_vm2, %v3124_v17, %v3126_v40  ;;  %3419 = vmatprep.mubr.f32.mxu1 %v15966_v53  ;;  %v14360_v62 = vsel %vm717_vm7, 0.0, %v3142_v39  ;;  %v12982_v40 = vld [vmem:[%s15845_s9 + $0x28] sm:$0xff] }
 0x4d0   : > { %12969 = vmatprep.subr.msk.mxu0 %vm687_vm3, %v14339_v43 }
 0x4d1   : > { %12970 = vmatpush1.msk.msra.mxu0 %vm686_vm5, %v3130_v56 }
 0x4d2   : > { %v3152_v54 = vpop.permute.xlu0 %3151  ;;  %v3144_v57 = vpop.permute.xlu1 %3143  ;;  %12971 = vmatmul.mubr.msk.f32.vlgmr.msra.gmra.mxu0 %vm1631_vm15, %v3199_v51 }
 0x4d3   : > { %v14353_v58 = vsel %vm717_vm7, %v3142_v39, %v3144_v57  ;;  %3497 = vmatprep.mubr.f32.mxu0 %v15966_v53  ;;  %v14382_v5 = vsel %vm750_vm10, 0.0, %v3152_v54 }
 0x4d4   : > { %12973 = vmatprep.subr.msk.mxu1 %vm737_vm8, %v14353_v58 }
 0x4d5   : > { %12974 = vmatpush1.msk.msra.mxu1 %vm736_vm9, %v14360_v62 }
 0x4d6   : > { %v3182_v63 = vpop.permute.xlu0 %3181  ;;  %12975 = vmatmul.mubr.msk.f32.vlgmr.msra.gmra.mxu1 %vm1631_vm15, %v12972_v60  ;;  %3541 = vmatprep.subr.mxu1 %v14291_v15  ;;  %v3154_v1 = vpop.permute.xlu1 %3153 }
 0x4d7   : > { %v14371_v6 = vsel %vm750_vm10, %v3152_v54, %v3154_v1  ;;  %3542 = vmatpush1.msra.mxu1 %v14285_v7  ;;  %3575 = vmatprep.mubr.f32.mxu1 %v15966_v53  ;;  %v12986_v1 = vld [vmem:[%s15845_s9 + $0x30] sm:$0xff] }
 0x4d8   : > { %12977 = vmatprep.subr.msk.mxu0 %vm687_vm3, %v14371_v6 }
 0x4d9   : > { %12978 = vmatpush1.msk.msra.mxu0 %vm686_vm5, %v14382_v5 }
 0x4da   : > { %v3164_v17 = vpop.permute.xlu0 %3163  ;;  %12979 = vmatmul.mubr.msk.f32.vlgmr.msra.gmra.mxu0 %vm1631_vm15, %v12976_v10  ;;  %v3172_v23 = vpop.permute.xlu1 %3171  ;;  %12981 = vmatmul.mubr.msk.f32.vlgmr.msra.gmra.mxu1 %vm1631_vm15, %v12980_v11  ;;  %v12990_v10 = vld [vmem:[%s15845_s9 + $0x38] sm:$0xff] }
 0x4db   : > { %v14393_v36 = vsel %vm771_vm11, %v3162_v41, %v3164_v17  ;;  %v14396_v39 = vsel %vm771_vm11, %v3164_v17, 0.0  ;;  %3653 = vmatprep.mubr.f32.mxu0 %v15966_v53  ;;  %3731 = vmatprep.mubr.f32.mxu1 %v15966_v53 }
 0x4dc   : > { %12983 = vmatprep.subr.msk.mxu0 %vm737_vm8, %v14396_v39 }
 0x4dd   : > { %12984 = vmatpush1.msk.msra.mxu0 %vm736_vm9, %v14393_v36 }
 0x4de   : > { %v3174_v41 = vpop.permute.xlu0 %3173  ;;  %12985 = vmatmul.mubr.msk.f32.vlgmr.msra.gmra.mxu0 %vm1631_vm15, %v12982_v40  ;;  %v14410_v51 = vpop.permute.xlu1 %3183  ;;  %v12993_v40 = vld [vmem:[%s15845_s9 + $0x40] sm:$0xff] }
 0x4df   : > { %v14413_v54 = vsel %vm792_vm12, %v3172_v23, %v3174_v41  ;;  %v14416_v57 = vsel %vm792_vm12, %v3174_v41, 0.0  ;;  %12991 = vmatprep.subr.msk.mxu0 %vm813_vm13, %v14410_v51  ;;  %v14422_v60 = vsel %vm813_vm13, %v3182_v63, %v14410_v51  ;;  %3809 = vmatprep.mubr.f32.mxu0 %v15966_v53 }
 0x4e0   : > { %12987 = vmatprep.subr.msk.mxu1 %vm687_vm3, %v14416_v57  ;;  %3776 = vmatpush1.msra.mxu0 %v14422_v60 }
 0x4e1   : > { %12988 = vmatpush1.msk.msra.mxu1 %vm686_vm5, %v14413_v54 }
 0x4e2   : > { %v3192_v63 = vpop.permute.xlu0 %3191  ;;  %12989 = vmatmul.mubr.msk.f32.vlgmr.msra.gmra.mxu1 %vm1631_vm15, %v12986_v1  ;;  %12992 = vmatmul.mubr.msk.f32.vlgmr.msra.gmra.mxu0 %vm1631_vm15, %v12990_v10  ;;  %v3190_v11 = vpop.permute.xlu1 %3189 }
 0x4e3   : > { %v14441_v17 = vsel %vm830_vm14, %v3192_v63, 0.0  ;;  %v14444_v23 = vsel %vm830_vm14, %v3190_v11, %v3192_v63  ;;  %3887 = vmatprep.mubr.f32.mxu1 %v15966_v53  ;;  %4053 = vmatprep.mubr.f32.mxu0 %v15966_v53 }
 0x4e4   : > { %12994 = vmatprep.subr.msk.mxu1 %vm737_vm8, %v14441_v17 }
 0x4e5   : > { %12995 = vmatpush1.msk.msra.mxu1 %vm736_vm9, %v14444_v23 }
 0x4e6   : > { %12996 = vmatmul.mubr.msk.f32.vlgmr.msra.gmra.mxu1 %vm1631_vm15, %v12993_v40  ;;  %13000 = vmatprep.subr.msk.mxu1 %vm687_vm3, %v14339_v43 }
 0x4e7   : > { %13001 = vmatpush1.msk.msra.mxu1 %vm686_vm5, %v3130_v56  ;;  %4127 = vmatprep.mubr.f32.mxu1 %v15966_v53 }
 0x58e   : > { %v3271_v41 = vpop.f32.mrf.mxu1 }
 0x590   : > { %v3273_v1 = vpop.f32.mrf.mxu1 }
 0x592   : > { %v3345_v10 = vpop.f32.mrf.mxu0 }
 0x593   : > { %v3346_v63 = vadd.f32 %v3345_v10, %v3271_v41 }
 0x594   : > { %v3347_v11 = vpop.f32.mrf.mxu0 }
 0x595   : > { %v3348_v45 = vadd.f32 %v3347_v11, %v3273_v1  ;;  %v3985_v11 = vld [vmem:[%s15848_s12] sm:$0xff] }
 0x596   : > { %v3421_v46 = vpop.f32.mrf.mxu1 }
 0x597   : > { %v3426_v42 = vadd.f32 %v3421_v46, %v3346_v63  ;;  %v3984_v46 = vld [vmem:[%s15847_s11] sm:$0xff] }
 0x598   : > { %v3423_v32 = vpop.f32.mrf.mxu1  ;;  %13002 = vmatmul.mubr.msk.f32.vlgmr.msra.gmra.mxu1 %vm1631_vm15, %v3984_v46  ;;  %v13007_v46 = vld [vmem:[%s15848_s12 + $0x8] sm:$0xff] }
 0x599   : > { %v3427_v37 = vadd.f32 %v3423_v32, %v3348_v45  ;;  %4281 = vmatprep.mubr.f32.mxu1 %v15966_v53 }
 0x59a   : > { %v3499_v38 = vpop.f32.mrf.mxu0  ;;  %v3577_v40 = vpop.f32.mrf.mxu1 }
 0x59b   : > { %v3504_v2 = vadd.f32 %v3499_v38, %v3426_v42 }
 0x59c   : > { %v3501_v4 = vpop.f32.mrf.mxu0  ;;  %v3579_v43 = vpop.f32.mrf.mxu1 }
 0x59d   : > { %v3505_v35 = vadd.f32 %v3501_v4, %v3427_v37  ;;  %v3582_v33 = vadd.f32 %v3577_v40, %v3504_v2 }
 0x59e   : > { %v3655_v56 = vpop.f32.mrf.mxu0 }
 0x59f   : > { %v3583_v27 = vadd.f32 %v3579_v43, %v3505_v35  ;;  %v3660_v8 = vadd.f32 %v3655_v56, %v3582_v33  ;;  %v3900_v33 = vpop.permute.xlu0 %3899 }
 0x5a0   : > { %v3657_v25 = vpop.f32.mrf.mxu0 }
 0x5a1   : > { %v3661_v41 = vadd.f32 %v3657_v25, %v3583_v27 }
 0x5a2   : > { %v3733_v14 = vpop.f32.mrf.mxu1  ;;  %v3811_v22 = vpop.f32.mrf.mxu0 }
 0x5a3   : > { %v3738_v10 = vadd.f32 %v3733_v14, %v3660_v8 }
 0x5a4   : > { %v3735_v20 = vpop.f32.mrf.mxu1  ;;  %v3813_v38 = vpop.f32.mrf.mxu0 }
 0x5a5   : > { %v3816_v1 = vadd.f32 %v3811_v22, %v3738_v10  ;;  %v3739_v32 = vadd.f32 %v3735_v20, %v3661_v41  ;;  %v5382_v20 = vld [vmem:[%s15849_s13] sm:$0xff]  ;;  %v13003_v10 = vld [vmem:[%s15847_s11 + $0x8] sm:$0xff] }
 0x5a6   : > { %v3889_v4 = vpop.f32.mrf.mxu1 }
 0x5a7   : > { %v3817_v2 = vadd.f32 %v3813_v38, %v3739_v32  ;;  %v3894_v35 = vadd.f32 %v3889_v4, %v3816_v1  ;;  %v13015_v32 = vld [vmem:[%s15848_s12 + $0x10] sm:$0xff] }
 0x5a8   : > { %v3891_v37 = vpop.f32.mrf.mxu1 }
 0x5a9   : > { %v3902_v42 = vadd.f32 %v3900_v33, %v3894_v35  ;;  %v3895_v25 = vadd.f32 %v3891_v37, %v3817_v2  ;;  %v13019_v2 = vld [vmem:[%s15847_s11 + $0x18] sm:$0xff] }
 0x5aa   : > { %v13023_v35 = vld [vmem:[%s15848_s12 + $0x18] sm:$0xff] }
 0x5ab   : > { %v14469_v8 = vmax.f32 %v3902_v42, 0.0  ;;  %v3903_v14 = vadd.f32 %v3900_v33, %v3895_v25 }
 0x5ad   : > { %v14471_v27 = vmax.f32 %v3903_v14, 0.0  ;;  %3908 = vrot.lane.b32.xlu1 %v14469_v8, %s15940_s25  ;;  %v13029_v14 = vld [vmem:[%s15848_s12 + $0x20] sm:$0xff] }
 0x5af   : > { %3910 = vrot.lane.b32.xlu0 %v14471_v27, %s15940_s25 }
 0x5b1   : > { %3918 = vrot.lane.b32.xlu1 %v14469_v8, %s15941_s26 }
 0x5b3   : > { %3920 = vrot.lane.b32.xlu0 %v14471_v27, %s15941_s26 }
 0x5b5   : > { %3926 = vrot.lane.b32.xlu1 %v14469_v8, %s15942_s23 }
 0x5b7   : > { %3928 = vrot.lane.b32.xlu0 %v14471_v27, %s15942_s23 }
 0x5b9   : > { %3936 = vrot.lane.b32.xlu1 %v14469_v8, %s15945_s0 }
 0x5bb   : > { %3938 = vrot.lane.b32.xlu0 %v14471_v27, %s15945_s0 }
 0x5bd   : > { %3948 = vrot.lane.b32.xlu1 %v14471_v27, %s15943_s3 }
 0x5bf   : > { %3946 = vrot.lane.b32.xlu0 %v14469_v8, %s15943_s3 }
 0x5c1   : > { %3958 = vrot.lane.b32.xlu1 %v14471_v27, %s15946_s21 }
 0x5c3   : > { %3956 = vrot.lane.b32.xlu0 %v14469_v8, %s15946_s21 }
 0x5c5   : > { %3966 = vrot.lane.b32.xlu1 %v14469_v8, %s15949_s1 }
 0x5c7   : > { %3968 = vrot.lane.b32.xlu0 %v14471_v27, %s15949_s1 }
 0x5c9   : > { %3976 = vrot.lane.b32.xlu1 %v14471_v27, %s15947_s28 }
 0x5cb   : > { %3974 = vrot.lane.b32.xlu0 %v14469_v8, %s15947_s28 }
 0x5cd   : > { %5385 = vperm.xlu1 %13448, %v5382_v20  }
 0x61f   : > { %v3909_v22 = vpop.permute.xlu1 %3908 }
 0x620   : > { %v3915_v40 = vsel %vm667_vm2, 0.0, %v3909_v22 }
 0x621   : > { %v3911_v45 = vpop.permute.xlu0 %3910 }
 0x622   : > { %v3912_v63 = vsel %vm667_vm2, %v3909_v22, %v3911_v45  ;;  %v13035_v22 = vld [vmem:[%s15848_s12 + $0x28] sm:$0xff] }
 0x623   : > { %v3919_v43 = vpop.permute.xlu1 %3918  ;;  %12997 = vmatprep.subr.msk.mxu0 %vm687_vm3, %v3912_v63 }
 0x624   : > { %12998 = vmatpush1.msk.msra.mxu0 %vm686_vm5, %v3915_v40 }
 0x625   : > { %12999 = vmatmul.mubr.msk.f32.vlgmr.msra.gmra.mxu0 %vm1631_vm15, %v3985_v11  ;;  %4169 = vmatprep.subr.mxu0 %v14328_v24  ;;  %v3921_v56 = vpop.permute.xlu0 %3920  ;;  %v13043_v11 = vld [vmem:[%s15848_s12 + $0x30] sm:$0xff] }
 0x626   : > { %13005 = vmatpush1.msk.msra.mxu0 %vm13788_vm4, %v14324_v50  ;;  %v3922_v41 = vsel %vm700_vm1, %v3919_v43, %v3921_v56  ;;  %4203 = vmatprep.mubr.f32.mxu0 %v15966_v53  ;;  %v13050_v56 = vld [vmem:[%s15848_s12 + $0x38] sm:$0xff] }
 0x627   : > { %v3927_v1 = vpop.permute.xlu1 %3926  ;;  %4247 = vmatprep.subr.mxu1 %v3922_v41  ;;  %13012 = vmatprep.subr.msk.mxu0 %vm737_vm8, %v14353_v58  ;;  %v13011_v58 = vld [vmem:[%s15847_s11 + $0x10] sm:$0xff]  ;;  %v13057_v41 = vld [vmem:[%s15848_s12 + $0x40] sm:$0xff] }
 0x628   : > { %13009 = vmatpush1.msk.msra.mxu1 %vm13788_vm4, %v3919_v43  ;;  %v3933_v38 = vsel %vm717_vm7, 0.0, %v3927_v1 }
 0x629   : > { %13006 = vmatmul.mubr.msk.f32.vlgmr.msra.gmra.mxu0 %vm1631_vm15, %v13003_v10  ;;  %13010 = vmatmul.mubr.msk.f32.vlgmr.msra.gmra.mxu1 %vm1631_vm15, %v13007_v46  ;;  %v3929_v50 = vpop.permute.xlu0 %3928 }
 0x62a   : > { %13013 = vmatpush1.msk.msra.mxu0 %vm736_vm9, %v14360_v62  ;;  %v3930_v24 = vsel %vm717_vm7, %v3927_v1, %v3929_v50  ;;  %4359 = vmatprep.mubr.f32.mxu0 %v15966_v53 }
 0x62b   : > { %13020 = vmatprep.subr.msk.mxu0 %vm687_vm3, %v14371_v6  ;;  %v3937_v4 = vpop.permute.xlu1 %3936  ;;  %13016 = vmatprep.subr.msk.mxu1 %vm737_vm8, %v3930_v24 }
 0x62c   : > { %13017 = vmatpush1.msk.msra.mxu1 %vm736_vm9, %v3933_v38  ;;  %4437 = vmatprep.mubr.f32.mxu1 %v15966_v53  ;;  %v3943_v33 = vsel %vm750_vm10, 0.0, %v3937_v4 }
 0x62d   : > { %13014 = vmatmul.mubr.msk.f32.vlgmr.msra.gmra.mxu0 %vm1631_vm15, %v13011_v58  ;;  %13018 = vmatmul.mubr.msk.f32.vlgmr.msra.gmra.mxu1 %vm1631_vm15, %v13015_v32  ;;  %v3939_v62 = vpop.permute.xlu0 %3938 }
 0x62e   : > { %13021 = vmatpush1.msk.msra.mxu0 %vm686_vm5, %v14382_v5  ;;  %v3940_v6 = vsel %vm750_vm10, %v3937_v4, %v3939_v62  ;;  %4515 = vmatprep.mubr.f32.mxu0 %v15966_v53 }
 0x62f   : > { %4637 = vmatprep.subr.mxu0 %v14291_v15  ;;  %v3949_v37 = vpop.permute.xlu1 %3948  ;;  %13024 = vmatprep.subr.msk.mxu1 %vm687_vm3, %v3940_v6  ;;  %v13027_v15 = vld [vmem:[%s15847_s11 + $0x20] sm:$0xff] }
 0x630   : > { %13025 = vmatpush1.msk.msra.mxu1 %vm686_vm5, %v3943_v33  ;;  %4593 = vmatprep.mubr.f32.mxu1 %v15966_v53  ;;  %v3953_v42 = vsel %vm771_vm11, %v3949_v37, 0.0 }
 0x631   : > { %13022 = vmatmul.mubr.msk.f32.vlgmr.msra.gmra.mxu0 %vm1631_vm15, %v13019_v2  ;;  %13026 = vmatmul.mubr.msk.f32.vlgmr.msra.gmra.mxu1 %vm1631_vm15, %v13023_v35  ;;  %v3947_v5 = vpop.permute.xlu0 %3946 }
 0x632   : > { %4638 = vmatpush1.msra.mxu0 %v14285_v7  ;;  %4715 = vmatprep.subr.mxu1 %v14471_v27  ;;  %v3950_v27 = vsel %vm771_vm11, %v3947_v5, %v3949_v37 }
 0x633   : > { %4716 = vmatpush1.msra.mxu1 %v14469_v8  ;;  %13032 = vmatprep.subr.msk.mxu0 %vm737_vm8, %v14396_v39  ;;  %v3959_v25 = vpop.permute.xlu1 %3958  ;;  %v13031_v39 = vld [vmem:[%s15847_s11 + $0x28] sm:$0xff] }
 0x634   : > { %13036 = vmatprep.subr.msk.mxu1 %vm737_vm8, %v3953_v42  ;;  %4671 = vmatprep.mubr.f32.mxu0 %v15966_v53  ;;  %v3963_v7 = vsel %vm792_vm12, %v3959_v25, 0.0 }
 0x635   : > { %4749 = vmatprep.mubr.f32.mxu1 %v15966_v53  ;;  %13028 = vmatmul.mubr.msk.f32.vlgmr.msra.gmra.mxu0 %vm1631_vm15, %v13027_v15  ;;  %v3957_v8 = vpop.permute.xlu0 %3956 }
 0x636   : > { %13030 = vmatmul.mubr.msk.f32.vlgmr.msra.gmra.mxu1 %vm1631_vm15, %v13029_v14  ;;  %13033 = vmatpush1.msk.msra.mxu0 %vm736_vm9, %v14393_v36  ;;  %v3960_v45 = vsel %vm792_vm12, %v3957_v8, %v3959_v25 }
 0x637   : > { %13037 = vmatpush1.msk.msra.mxu1 %vm736_vm9, %v3950_v27  ;;  %13040 = vmatprep.subr.msk.mxu0 %vm687_vm3, %v14416_v57  ;;  %v3967_v20 = vpop.permute.xlu1 %3966  ;;  %v13039_v57 = vld [vmem:[%s15847_s11 + $0x30] sm:$0xff] }
 0x638   : > { %13044 = vmatprep.subr.msk.mxu1 %vm687_vm3, %v3963_v7  ;;  %4827 = vmatprep.mubr.f32.mxu0 %v15966_v53 }
 0x639   : > { %4905 = vmatprep.mubr.f32.mxu1 %v15966_v53  ;;  %13034 = vmatmul.mubr.msk.f32.vlgmr.msra.gmra.mxu0 %vm1631_vm15, %v13031_v39  ;;  %v3969_v36 = vpop.permute.xlu0 %3968 }
 0x63a   : > { %13038 = vmatmul.mubr.msk.f32.vlgmr.msra.gmra.mxu1 %vm1631_vm15, %v13035_v22  ;;  %13041 = vmatpush1.msk.msra.mxu0 %vm686_vm5, %v14413_v54  ;;  %v3970_v40 = vsel %vm813_vm13, %v3967_v20, %v3969_v36 }
 0x63b   : > { %13045 = vmatpush1.msk.msra.mxu1 %vm686_vm5, %v3960_v45  ;;  %13048 = vmatprep.subr.msk.mxu0 %vm813_vm13, %v14410_v51  ;;  %v3977_v63 = vpop.permute.xlu1 %3976  ;;  %v13047_v51 = vld [vmem:[%s15847_s11 + $0x38] sm:$0xff] }
 0x63c   : > { %13051 = vmatprep.subr.msk.mxu1 %vm813_vm13, %v3969_v36  ;;  %4983 = vmatprep.mubr.f32.mxu0 %v15966_v53  ;;  %v3981_v54 = vsel %vm830_vm14, %v3977_v63, 0.0 }
 0x63d   : > { %5061 = vmatprep.mubr.f32.mxu1 %v15966_v53  ;;  %13042 = vmatmul.mubr.msk.f32.vlgmr.msra.gmra.mxu0 %vm1631_vm15, %v13039_v57  ;;  %v3975_v43 = vpop.permute.xlu0 %3974 }
 0x63e   : > { %13046 = vmatmul.mubr.msk.f32.vlgmr.msra.gmra.mxu1 %vm1631_vm15, %v13043_v11  ;;  %5106 = vmatpush1.msra.mxu0 %v14422_v60  ;;  %v3978_v60 = vsel %vm830_vm14, %v3975_v43, %v3977_v63 }
 0x63f   : > { %5184 = vmatpush1.msra.mxu1 %v3970_v40  ;;  %13054 = vmatprep.subr.msk.mxu0 %vm737_vm8, %v14441_v17  ;;  %v13053_v17 = vld [vmem:[%s15847_s11 + $0x40] sm:$0xff] }
 0x640   : > { %13058 = vmatprep.subr.msk.mxu1 %vm737_vm8, %v3981_v54  ;;  %5139 = vmatprep.mubr.f32.mxu0 %v15966_v53 }
 0x641   : > { %5217 = vmatprep.mubr.f32.mxu1 %v15966_v53  ;;  %13049 = vmatmul.mubr.msk.f32.vlgmr.msra.gmra.mxu0 %vm1631_vm15, %v13047_v51 }
 0x642   : > { %13052 = vmatmul.mubr.msk.f32.vlgmr.msra.gmra.mxu1 %vm1631_vm15, %v13050_v56  ;;  %13055 = vmatpush1.msk.msra.mxu0 %vm736_vm9, %v14444_v23 }
 0x643   : > { %13059 = vmatpush1.msk.msra.mxu1 %vm736_vm9, %v3978_v60  ;;  %5295 = vmatprep.mubr.f32.mxu0 %v15966_v53 }
 0x644   : > { %13064 = vmatprep.subr.msk.mxu1 %vm687_vm3, %v14162_v59  ;;  %5373 = vmatprep.mubr.f32.mxu1 %v15966_v53 }
 0x645   : > { %13056 = vmatmul.mubr.msk.f32.vlgmr.msra.gmra.mxu0 %vm1631_vm15, %v13053_v17 }
 0x646   : > { %13060 = vmatmul.mubr.msk.f32.vlgmr.msra.gmra.mxu1 %vm1631_vm15, %v13057_v41  ;;  %5539 = vmatprep.mubr.f32.mxu0 %v15966_v53 }
 0x647   : > { %13065 = vmatpush1.msk.msra.mxu1 %vm686_vm5, %v14169_v61  ;;  %5613 = vmatprep.mubr.f32.mxu1 %v15966_v53 }
 0x658   : > { %v4129_v23 = vpop.f32.mrf.mxu1 }
 0x65a   : > { %v4131_v46 = vpop.f32.mrf.mxu1 }
 0x6e5   : > { %v4055_v10 = vpop.f32.mrf.mxu0 }
 0x6e6   : > { %v4130_v50 = vadd.f32 %v4129_v23, %v4055_v10 }
 0x6e7   : > { %v4057_v1 = vpop.f32.mrf.mxu0 }
 0x6e8   : > { %v4132_v58 = vadd.f32 %v4131_v46, %v4057_v1 }
 0x6e9   : > { %v4205_v59 = vpop.f32.mrf.mxu0  ;;  %v4283_v24 = vpop.f32.mrf.mxu1 }
 0x6ea   : > { %v4210_v32 = vadd.f32 %v4205_v59, %v4130_v50 }
 0x6eb   : > { %v4207_v38 = vpop.f32.mrf.mxu0  ;;  %v4285_v4 = vpop.f32.mrf.mxu1 }
 0x6ec   : > { %v4288_v62 = vadd.f32 %v4283_v24, %v4210_v32  ;;  %v4211_v6 = vadd.f32 %v4207_v38, %v4132_v58 }
 0x6ed   : > { %v4361_v2 = vpop.f32.mrf.mxu0  ;;  %v4439_v35 = vpop.f32.mrf.mxu1 }
 0x6ee   : > { %v4289_v33 = vadd.f32 %v4285_v4, %v4211_v6  ;;  %v4366_v37 = vadd.f32 %v4361_v2, %v4288_v62 }
 0x6ef   : > { %v4363_v61 = vpop.f32.mrf.mxu0  ;;  %v4441_v5 = vpop.f32.mrf.mxu1 }
 0x6f0   : > { %v4444_v15 = vadd.f32 %v4439_v35, %v4366_v37  ;;  %v4367_v42 = vadd.f32 %v4363_v61, %v4289_v33 }
 0x6f1   : > { %v4517_v25 = vpop.f32.mrf.mxu0  ;;  %v4595_v14 = vpop.f32.mrf.mxu1 }
 0x6f2   : > { %v4445_v7 = vadd.f32 %v4441_v5, %v4367_v42  ;;  %v4522_v8 = vadd.f32 %v4517_v25, %v4444_v15 }
 0x6f3   : > { %v4519_v27 = vpop.f32.mrf.mxu0  ;;  %v4597_v39 = vpop.f32.mrf.mxu1 }
 0x6f4   : > { %v4600_v20 = vadd.f32 %v4595_v14, %v4522_v8  ;;  %v4523_v22 = vadd.f32 %v4519_v27, %v4445_v7  ;;  %v5470_v7 = vld [vmem:[%s15850_s14] sm:$0xff] }
 0x6f5   : > { %v4673_v36 = vpop.f32.mrf.mxu0  ;;  %13066 = vmatmul.mubr.msk.f32.vlgmr.msra.gmra.mxu1 %vm1631_vm15, %v5470_v7  ;;  %v13114_v7 = vld [vmem:[%s15851_s15 + $0x38] sm:$0xff] }
 0x6f6   : > { %v4601_v45 = vadd.f32 %v4597_v39, %v4523_v22  ;;  %v4678_v57 = vadd.f32 %v4673_v36, %v4600_v20  ;;  %v4751_v63 = vpop.f32.mrf.mxu1  ;;  %5767 = vmatprep.mubr.f32.mxu1 %v15966_v53  ;;  %v5386_v20 = vpop.permute.xlu1 %5385 }
 0x6f7   : > { %v4675_v11 = vpop.f32.mrf.mxu0 }
 0x6f8   : > { %v4756_v54 = vadd.f32 %v4751_v63, %v4678_v57  ;;  %v4679_v40 = vadd.f32 %v4675_v11, %v4601_v45  ;;  %v4753_v51 = vpop.f32.mrf.mxu1 }
 0x6f9   : > { %v4829_v43 = vpop.f32.mrf.mxu0 }
 0x6fa   : > { %v4757_v56 = vadd.f32 %v4753_v51, %v4679_v40  ;;  %v4834_v60 = vadd.f32 %v4829_v43, %v4756_v54  ;;  %v4907_v17 = vpop.f32.mrf.mxu1  ;;  %v6868_v54 = vld [vmem:[%s15852_s16] sm:$0xff] }
 0x6fb   : > { %v4831_v41 = vpop.f32.mrf.mxu0 }
 0x6fc   : > { %v4912_v23 = vadd.f32 %v4907_v17, %v4834_v60  ;;  %v4835_v10 = vadd.f32 %v4831_v41, %v4757_v56  ;;  %v4909_v46 = vpop.f32.mrf.mxu1  ;;  %v5471_v56 = vld [vmem:[%s15851_s15] sm:$0xff] }
 0x6fd   : > { %v4985_v1 = vpop.f32.mrf.mxu0 }
 0x6fe   : > { %v4913_v50 = vadd.f32 %v4909_v46, %v4835_v10  ;;  %v4990_v59 = vadd.f32 %v4985_v1, %v4912_v23  ;;  %v5063_v24 = vpop.f32.mrf.mxu1  ;;  %v13067_v10 = vld [vmem:[%s15850_s14 + $0x8] sm:$0xff] }
 0x6ff   : > { %v4987_v58 = vpop.f32.mrf.mxu0  ;;  %v13071_v46 = vld [vmem:[%s15851_s15 + $0x8] sm:$0xff] }
 0x700   : > { %v5068_v32 = vadd.f32 %v5063_v24, %v4990_v59  ;;  %v4991_v38 = vadd.f32 %v4987_v58, %v4913_v50  ;;  %v5065_v4 = vpop.f32.mrf.mxu1  ;;  %v13079_v50 = vld [vmem:[%s15851_s15 + $0x10] sm:$0xff]  ;;  %v13083_v58 = vld [vmem:[%s15850_s14 + $0x18] sm:$0xff] }
 0x701   : > { %v5141_v62 = vpop.f32.mrf.mxu0 }
 0x702   : > { %v5069_v6 = vadd.f32 %v5065_v4, %v4991_v38  ;;  %v5146_v2 = vadd.f32 %v5141_v62, %v5068_v32  ;;  %v5219_v35 = vpop.f32.mrf.mxu1  ;;  %v13087_v32 = vld [vmem:[%s15851_s15 + $0x18] sm:$0xff] }
 0x703   : > { %v5143_v33 = vpop.f32.mrf.mxu0 }
 0x704   : > { %v5224_v37 = vadd.f32 %v5219_v35, %v5146_v2  ;;  %v5147_v61 = vadd.f32 %v5143_v33, %v5069_v6  ;;  %v5221_v5 = vpop.f32.mrf.mxu1  ;;  %v13093_v2 = vld [vmem:[%s15851_s15 + $0x20] sm:$0xff] }
 0x705   : > { %v5297_v15 = vpop.f32.mrf.mxu0 }
 0x706   : > { %v5225_v42 = vadd.f32 %v5221_v5, %v5147_v61  ;;  %v5302_v25 = vadd.f32 %v5297_v15, %v5224_v37  ;;  %v5375_v14 = vpop.f32.mrf.mxu1  ;;  %v13099_v61 = vld [vmem:[%s15851_s15 + $0x28] sm:$0xff] }
 0x707   : > { %v5299_v8 = vpop.f32.mrf.mxu0 }
 0x708   : > { %v5380_v27 = vadd.f32 %v5375_v14, %v5302_v25  ;;  %v5303_v39 = vadd.f32 %v5299_v8, %v5225_v42  ;;  %v5377_v22 = vpop.f32.mrf.mxu1  ;;  %v13107_v42 = vld [vmem:[%s15851_s15 + $0x30] sm:$0xff]  ;;  %v13121_v8 = vld [vmem:[%s15851_s15 + $0x40] sm:$0xff] }
 0x70a   : > { %v5388_v36 = vadd.f32 %v5386_v20, %v5380_v27  ;;  %v5381_v45 = vadd.f32 %v5377_v22, %v5303_v39  ;;  %v15967_v27 = vld [vmem:[#allocation15_spill] sm:$0xff] }
 0x70c   : > { %v14686_v57 = vmax.f32 %v5388_v36, 0.0  ;;  %v5389_v63 = vadd.f32 %v5386_v20, %v5381_v45 }
 0x70e   : > { %v14688_v11 = vmax.f32 %v5389_v63, 0.0  ;;  %5394 = vrot.lane.b32.xlu0 %v14686_v57, %s15940_s25 }
 0x710   : > { %5396 = vrot.lane.b32.xlu1 %v14688_v11, %s15940_s25 }
 0x712   : > { %5404 = vrot.lane.b32.xlu0 %v14686_v57, %s15941_s26 }
 0x714   : > { %5406 = vrot.lane.b32.xlu1 %v14688_v11, %s15941_s26 }
 0x716   : > { %5412 = vrot.lane.b32.xlu0 %v14686_v57, %s15942_s23 }
 0x718   : > { %5414 = vrot.lane.b32.xlu1 %v14688_v11, %s15942_s23 }
 0x71a   : > { %5422 = vrot.lane.b32.xlu0 %v14686_v57, %s15945_s0 }
 0x71c   : > { %5424 = vrot.lane.b32.xlu1 %v14688_v11, %s15945_s0 }
 0x71e   : > { %5434 = vrot.lane.b32.xlu0 %v14688_v11, %s15943_s3 }
 0x720   : > { %5432 = vrot.lane.b32.xlu1 %v14686_v57, %s15943_s3 }
 0x722   : > { %5444 = vrot.lane.b32.xlu0 %v14688_v11, %s15946_s21 }
 0x724   : > { %5442 = vrot.lane.b32.xlu1 %v14686_v57, %s15946_s21 }
 0x726   : > { %5452 = vrot.lane.b32.xlu0 %v14686_v57, %s15949_s1 }
 0x728   : > { %5454 = vrot.lane.b32.xlu1 %v14688_v11, %s15949_s1 }
 0x72a   : > { %5462 = vrot.lane.b32.xlu0 %v14688_v11, %s15947_s28 }
 0x72c   : > { %5460 = vrot.lane.b32.xlu1 %v14686_v57, %s15947_s28 }
 0x72e   : > { %6871 = vperm.xlu0 %13447, %v6868_v54  }
 0x780   : > { %v5395_v40 = vpop.permute.xlu0 %5394 }
 0x781   : > { %v5401_v60 = vsel %vm667_vm2, 0.0, %v5395_v40 }
 0x782   : > { %v5397_v51 = vpop.permute.xlu1 %5396 }
 0x783   : > { %v5398_v43 = vsel %vm667_vm2, %v5395_v40, %v5397_v51 }
 0x784   : > { %v5405_v17 = vpop.permute.xlu0 %5404  ;;  %13061 = vmatprep.subr.msk.mxu0 %vm687_vm3, %v5398_v43 }
 0x785   : > { %13062 = vmatpush1.msk.msra.mxu0 %vm686_vm5, %v5401_v60 }
 0x786   : > { %13063 = vmatmul.mubr.msk.f32.vlgmr.msra.gmra.mxu0 %vm1631_vm15, %v5471_v56  ;;  %5655 = vmatprep.subr.mxu0 %v14151_v55  ;;  %v5407_v41 = vpop.permute.xlu1 %5406 }
 0x787   : > { %13069 = vmatpush1.msk.msra.mxu0 %vm13788_vm4, %v14147_v52  ;;  %v5408_v23 = vsel %vm700_vm1, %v5405_v17, %v5407_v41  ;;  %5689 = vmatprep.mubr.f32.mxu0 %v15966_v53 }
 0x788   : > { %v5413_v1 = vpop.permute.xlu0 %5412  ;;  %5733 = vmatprep.subr.mxu1 %v5408_v23  ;;  %13076 = vmatprep.subr.msk.mxu0 %vm737_vm8, %v14179_v0  ;;  %v13075_v0 = vld [vmem:[%s15850_s14 + $0x10] sm:$0xff] }
 0x789   : > { %13073 = vmatpush1.msk.msra.mxu1 %vm13788_vm4, %v5405_v17  ;;  %v5419_v59 = vsel %vm717_vm7, 0.0, %v5413_v1 }
 0x78a   : > { %13070 = vmatmul.mubr.msk.f32.vlgmr.msra.gmra.mxu0 %vm1631_vm15, %v13067_v10  ;;  %13074 = vmatmul.mubr.msk.f32.vlgmr.msra.gmra.mxu1 %vm1631_vm15, %v13071_v46  ;;  %v5415_v52 = vpop.permute.xlu1 %5414 }
 0x78b   : > { %13077 = vmatpush1.msk.msra.mxu0 %vm736_vm9, %v14186_v3  ;;  %v5416_v55 = vsel %vm717_vm7, %v5413_v1, %v5415_v52  ;;  %5845 = vmatprep.mubr.f32.mxu0 %v15966_v53 }
 0x78c   : > { %13084 = vmatprep.subr.msk.mxu0 %vm687_vm3, %v14197_v9  ;;  %v5423_v24 = vpop.permute.xlu0 %5422  ;;  %13080 = vmatprep.subr.msk.mxu1 %vm737_vm8, %v5416_v55 }
 0x78d   : > { %13081 = vmatpush1.msk.msra.mxu1 %vm736_vm9, %v5419_v59  ;;  %5923 = vmatprep.mubr.f32.mxu1 %v15966_v53  ;;  %v5429_v38 = vsel %vm750_vm10, 0.0, %v5423_v24 }
 0x78e   : > { %13078 = vmatmul.mubr.msk.f32.vlgmr.msra.gmra.mxu0 %vm1631_vm15, %v13075_v0  ;;  %13082 = vmatmul.mubr.msk.f32.vlgmr.msra.gmra.mxu1 %vm1631_vm15, %v13079_v50  ;;  %v5425_v3 = vpop.permute.xlu1 %5424 }
 0x78f   : > { %13085 = vmatpush1.msk.msra.mxu0 %vm686_vm5, %v14208_v12  ;;  %v5426_v9 = vsel %vm750_vm10, %v5423_v24, %v5425_v3  ;;  %6001 = vmatprep.mubr.f32.mxu0 %v15966_v53 }
 0x790   : > { %6123 = vmatprep.subr.mxu0 %v14114_v48  ;;  %v5435_v4 = vpop.permute.xlu0 %5434  ;;  %13088 = vmatprep.subr.msk.mxu1 %vm687_vm3, %v5426_v9  ;;  %v13091_v48 = vld [vmem:[%s15850_s14 + $0x20] sm:$0xff] }
 0x791   : > { %13089 = vmatpush1.msk.msra.mxu1 %vm686_vm5, %v5429_v38  ;;  %6079 = vmatprep.mubr.f32.mxu1 %v15966_v53  ;;  %v5439_v62 = vsel %vm771_vm11, %v5435_v4, 0.0 }
 0x792   : > { %13086 = vmatmul.mubr.msk.f32.vlgmr.msra.gmra.mxu0 %vm1631_vm15, %v13083_v58  ;;  %13090 = vmatmul.mubr.msk.f32.vlgmr.msra.gmra.mxu1 %vm1631_vm15, %v13087_v32  ;;  %v5433_v12 = vpop.permute.xlu1 %5432 }
 0x793   : > { %6124 = vmatpush1.msra.mxu0 %v14108_v44  ;;  %6201 = vmatprep.subr.mxu1 %v14688_v11  ;;  %v5436_v33 = vsel %vm771_vm11, %v5433_v12, %v5435_v4 }
 0x794   : > { %6202 = vmatpush1.msra.mxu1 %v14686_v57  ;;  %13096 = vmatprep.subr.msk.mxu0 %vm737_vm8, %v14222_v21  ;;  %v5445_v6 = vpop.permute.xlu0 %5444  ;;  %v13095_v21 = vld [vmem:[%s15850_s14 + $0x28] sm:$0xff] }
 0x795   : > { %13100 = vmatprep.subr.msk.mxu1 %vm737_vm8, %v5439_v62  ;;  %6157 = vmatprep.mubr.f32.mxu0 %v15966_v53  ;;  %v5449_v44 = vsel %vm792_vm12, %v5445_v6, 0.0 }
 0x796   : > { %6235 = vmatprep.mubr.f32.mxu1 %v15966_v53  ;;  %13092 = vmatmul.mubr.msk.f32.vlgmr.msra.gmra.mxu0 %vm1631_vm15, %v13091_v48  ;;  %v5443_v35 = vpop.permute.xlu1 %5442 }
 0x797   : > { %13094 = vmatmul.mubr.msk.f32.vlgmr.msra.gmra.mxu1 %vm1631_vm15, %v13093_v2  ;;  %13097 = vmatpush1.msk.msra.mxu0 %vm736_vm9, %v14219_v18  ;;  %v5446_v5 = vsel %vm792_vm12, %v5443_v35, %v5445_v6 }
 0x798   : > { %13101 = vmatpush1.msk.msra.mxu1 %vm736_vm9, %v5436_v33  ;;  %13104 = vmatprep.subr.msk.mxu0 %vm687_vm3, %v14242_v30  ;;  %v5453_v37 = vpop.permute.xlu0 %5452  ;;  %v13103_v30 = vld [vmem:[%s15850_s14 + $0x30] sm:$0xff] }
 0x799   : > { %13108 = vmatprep.subr.msk.mxu1 %vm687_vm3, %v5449_v44  ;;  %6313 = vmatprep.mubr.f32.mxu0 %v15966_v53 }
 0x79a   : > { %6391 = vmatprep.mubr.f32.mxu1 %v15966_v53  ;;  %13098 = vmatmul.mubr.msk.f32.vlgmr.msra.gmra.mxu0 %vm1631_vm15, %v13095_v21  ;;  %v5455_v18 = vpop.permute.xlu1 %5454 }
 0x79b   : > { %13102 = vmatmul.mubr.msk.f32.vlgmr.msra.gmra.mxu1 %vm1631_vm15, %v13099_v61  ;;  %13105 = vmatpush1.msk.msra.mxu0 %vm686_vm5, %v14239_v29  ;;  %v5456_v25 = vsel %vm813_vm13, %v5453_v37, %v5455_v18 }
 0x79c   : > { %13109 = vmatpush1.msk.msra.mxu1 %vm686_vm5, %v5446_v5  ;;  %13112 = vmatprep.subr.msk.mxu0 %vm813_vm13, %v14236_v26  ;;  %v5463_v15 = vpop.permute.xlu0 %5462  ;;  %v13111_v26 = vld [vmem:[%s15850_s14 + $0x38] sm:$0xff] }
 0x79d   : > { %13115 = vmatprep.subr.msk.mxu1 %vm813_vm13, %v5455_v18  ;;  %6469 = vmatprep.mubr.f32.mxu0 %v15966_v53  ;;  %v5467_v29 = vsel %vm830_vm14, %v5463_v15, 0.0 }
 0x79e   : > { %6547 = vmatprep.mubr.f32.mxu1 %v15966_v53  ;;  %13106 = vmatmul.mubr.msk.f32.vlgmr.msra.gmra.mxu0 %vm1631_vm15, %v13103_v30  ;;  %v5461_v14 = vpop.permute.xlu1 %5460 }
 0x79f   : > { %13110 = vmatmul.mubr.msk.f32.vlgmr.msra.gmra.mxu1 %vm1631_vm15, %v13107_v42  ;;  %6592 = vmatpush1.msra.mxu0 %v14248_v34  ;;  %v5464_v34 = vsel %vm830_vm14, %v5461_v14, %v5463_v15 }
 0x7a0   : > { %6670 = vmatpush1.msra.mxu1 %v5456_v25  ;;  %13118 = vmatprep.subr.msk.mxu0 %vm737_vm8, %v14267_v47  ;;  %v13117_v47 = vld [vmem:[%s15850_s14 + $0x40] sm:$0xff] }
 0x7a1   : > { %13122 = vmatprep.subr.msk.mxu1 %vm737_vm8, %v5467_v29  ;;  %6625 = vmatprep.mubr.f32.mxu0 %v15966_v53 }
 0x7a2   : > { %6703 = vmatprep.mubr.f32.mxu1 %v15966_v53  ;;  %13113 = vmatmul.mubr.msk.f32.vlgmr.msra.gmra.mxu0 %vm1631_vm15, %v13111_v26 }
 0x7a3   : > { %13116 = vmatmul.mubr.msk.f32.vlgmr.msra.gmra.mxu1 %vm1631_vm15, %v13114_v7  ;;  %13119 = vmatpush1.msk.msra.mxu0 %vm736_vm9, %v14270_v49  ;;  %v15968_v49 = vld [vmem:[#allocation16_spill] sm:$0xff] }
 0x7a4   : > { %13123 = vmatpush1.msk.msra.mxu1 %vm736_vm9, %v5464_v34  ;;  %6781 = vmatprep.mubr.f32.mxu0 %v15966_v53 }
 0x7a5   : > { %13128 = vmatprep.subr.msk.mxu1 %vm687_vm3, %v15967_v27  ;;  %6859 = vmatprep.mubr.f32.mxu1 %v15966_v53 }
 0x7a6   : > { %13120 = vmatmul.mubr.msk.f32.vlgmr.msra.gmra.mxu0 %vm1631_vm15, %v13117_v47 }
 0x7a7   : > { %13124 = vmatmul.mubr.msk.f32.vlgmr.msra.gmra.mxu1 %vm1631_vm15, %v13121_v8  ;;  %7025 = vmatprep.mubr.f32.mxu0 %v15966_v53 }
 0x7a8   : > { %13129 = vmatpush1.msk.msra.mxu1 %vm686_vm5, %v15968_v49  ;;  %7099 = vmatprep.mubr.f32.mxu1 %v15966_v53 }
 0x7b5   : > { %v5615_v39 = vpop.f32.mrf.mxu1 }
 0x7b7   : > { %v5617_v22 = vpop.f32.mrf.mxu1 }
 0x846   : > { %v5541_v20 = vpop.f32.mrf.mxu0 }
 0x847   : > { %v5616_v45 = vadd.f32 %v5615_v39, %v5541_v20 }
 0x848   : > { %v5543_v36 = vpop.f32.mrf.mxu0 }
 0x849   : > { %v5618_v11 = vadd.f32 %v5617_v22, %v5543_v36 }
 0x84a   : > { %v5691_v57 = vpop.f32.mrf.mxu0  ;;  %v5769_v63 = vpop.f32.mrf.mxu1 }
 0x84b   : > { %v5696_v54 = vadd.f32 %v5691_v57, %v5616_v45 }
 0x84c   : > { %v5693_v40 = vpop.f32.mrf.mxu0  ;;  %v5771_v51 = vpop.f32.mrf.mxu1 }
 0x84d   : > { %v5774_v43 = vadd.f32 %v5769_v63, %v5696_v54  ;;  %v5697_v56 = vadd.f32 %v5693_v40, %v5618_v11  ;;  %v6956_v40 = vld [vmem:[%s15853_s17] sm:$0xff] }
 0x84e   : > { %v5847_v60 = vpop.f32.mrf.mxu0  ;;  %v5925_v17 = vpop.f32.mrf.mxu1  ;;  %13130 = vmatmul.mubr.msk.f32.vlgmr.msra.gmra.mxu1 %vm1631_vm15, %v6956_v40  ;;  %v13159_v40 = vld [vmem:[%s15853_s17 + $0x28] sm:$0xff] }
 0x84f   : > { %v5775_v41 = vadd.f32 %v5771_v51, %v5697_v56  ;;  %v5852_v23 = vadd.f32 %v5847_v60, %v5774_v43  ;;  %7253 = vmatprep.mubr.f32.mxu1 %v15966_v53  ;;  %v6872_v60 = vpop.permute.xlu0 %6871 }
 0x850   : > { %v5849_v10 = vpop.f32.mrf.mxu0  ;;  %v5927_v46 = vpop.f32.mrf.mxu1 }
 0x851   : > { %v5930_v1 = vadd.f32 %v5925_v17, %v5852_v23  ;;  %v5853_v52 = vadd.f32 %v5849_v10, %v5775_v41 }
 0x852   : > { %v6003_v55 = vpop.f32.mrf.mxu0  ;;  %v6081_v0 = vpop.f32.mrf.mxu1 }
 0x853   : > { %v5931_v50 = vadd.f32 %v5927_v46, %v5853_v52  ;;  %v6008_v59 = vadd.f32 %v6003_v55, %v5930_v1  ;;  %v8354_v52 = vld [vmem:[%s15855_s19] sm:$0xff]  ;;  %v13255_v55 = vld [vmem:[%s15855_s19 + $0x8] sm:$0xff] }
 0x854   : > { %v6005_v24 = vpop.f32.mrf.mxu0  ;;  %v6083_v3 = vpop.f32.mrf.mxu1 }
 0x855   : > { %v6086_v9 = vadd.f32 %v6081_v0, %v6008_v59  ;;  %v6009_v58 = vadd.f32 %v6005_v24, %v5931_v50  ;;  %v13322_v0 = vld [vmem:[%s15855_s19 + $0x10] sm:$0xff]  ;;  %v13389_v50 = vld [vmem:[%s15855_s19 + $0x18] sm:$0xff] }
 0x856   : > { %v6159_v32 = vpop.f32.mrf.mxu0 }
 0x857   : > { %v6087_v38 = vadd.f32 %v6083_v3, %v6009_v58  ;;  %v6164_v4 = vadd.f32 %v6159_v32, %v6086_v9  ;;  %v6237_v12 = vpop.f32.mrf.mxu1  ;;  %v6957_v9 = vld [vmem:[%s15854_s18] sm:$0xff] }
 0x858   : > { %v6161_v48 = vpop.f32.mrf.mxu0 }
 0x859   : > { %v6242_v62 = vadd.f32 %v6237_v12, %v6164_v4  ;;  %v6165_v6 = vadd.f32 %v6161_v48, %v6087_v38  ;;  %v6239_v2 = vpop.f32.mrf.mxu1  ;;  %v15969_v38 = vld [vmem:[#allocation14_spill] sm:$0xff]  ;;  %v15970_v48 = vld [vmem:[#allocation13_spill] sm:$0xff] }
 0x85a   : > { %v6315_v44 = vpop.f32.mrf.mxu0 }
 0x85b   : > { %v6243_v35 = vadd.f32 %v6239_v2, %v6165_v6  ;;  %v6320_v33 = vadd.f32 %v6315_v44, %v6242_v62  ;;  %v6393_v21 = vpop.f32.mrf.mxu1  ;;  %v13131_v62 = vld [vmem:[%s15853_s17 + $0x8] sm:$0xff]  ;;  %v15971_v44 = vld [vmem:[#allocation17_spill] sm:$0xff] }
 0x85c   : > { %v6317_v37 = vpop.f32.mrf.mxu0  ;;  %v13135_v6 = vld [vmem:[%s15854_s18 + $0x8] sm:$0xff] }
 0x85d   : > { %v6398_v61 = vadd.f32 %v6393_v21, %v6320_v33  ;;  %v6321_v18 = vadd.f32 %v6317_v37, %v6243_v35  ;;  %v6395_v5 = vpop.f32.mrf.mxu1  ;;  %v15972_v33 = vld [vmem:[#allocation18_spill] sm:$0xff]  ;;  %v13139_v37 = vld [vmem:[%s15853_s17 + $0x10] sm:$0xff] }
 0x85e   : > { %v6471_v30 = vpop.f32.mrf.mxu0 }
 0x85f   : > { %v6399_v15 = vadd.f32 %v6395_v5, %v6321_v18  ;;  %v6476_v42 = vadd.f32 %v6471_v30, %v6398_v61  ;;  %v6549_v29 = vpop.f32.mrf.mxu1  ;;  %v13143_v61 = vld [vmem:[%s15854_s18 + $0x10] sm:$0xff]  ;;  %v15973_v5 = vld [vmem:[#allocation20_spill] sm:$0xff] }
 0x860   : > { %v6473_v25 = vpop.f32.mrf.mxu0 }
 0x861   : > { %v6554_v26 = vadd.f32 %v6549_v29, %v6476_v42  ;;  %v6477_v14 = vadd.f32 %v6473_v25, %v6399_v15  ;;  %v6551_v7 = vpop.f32.mrf.mxu1  ;;  %v15974_v42 = vld [vmem:[#allocation21_spill] sm:$0xff]  ;;  %v13147_v25 = vld [vmem:[%s15853_s17 + $0x18] sm:$0xff] }
 0x862   : > { %v6627_v34 = vpop.f32.mrf.mxu0 }
 0x863   : > { %v6555_v47 = vadd.f32 %v6551_v7, %v6477_v14  ;;  %v6632_v8 = vadd.f32 %v6627_v34, %v6554_v26  ;;  %v6705_v39 = vpop.f32.mrf.mxu1  ;;  %v13151_v26 = vld [vmem:[%s15854_s18 + $0x18] sm:$0xff]  ;;  %v15975_v7 = vld [vmem:[#allocation12_spill] sm:$0xff] }
 0x864   : > { %v6629_v20 = vpop.f32.mrf.mxu0 }
 0x865   : > { %v6710_v22 = vadd.f32 %v6705_v39, %v6632_v8  ;;  %v6633_v36 = vadd.f32 %v6629_v20, %v6555_v47  ;;  %v6707_v45 = vpop.f32.mrf.mxu1  ;;  %v15976_v8 = vld [vmem:[#allocation11_spill] sm:$0xff] }
 0x866   : > { %v6783_v57 = vpop.f32.mrf.mxu0  ;;  %v13155_v39 = vld [vmem:[%s15853_s17 + $0x20] sm:$0xff] }
 0x867   : > { %v6711_v63 = vadd.f32 %v6707_v45, %v6633_v36  ;;  %v6788_v11 = vadd.f32 %v6783_v57, %v6710_v22  ;;  %v6861_v54 = vpop.f32.mrf.mxu1  ;;  %v15977_v22 = vld [vmem:[#allocation22_spill] sm:$0xff]  ;;  %v13157_v45 = vld [vmem:[%s15854_s18 + $0x20] sm:$0xff] }
 0x868   : > { %v6785_v51 = vpop.f32.mrf.mxu0 }
 0x869   : > { %v6866_v43 = vadd.f32 %v6861_v54, %v6788_v11  ;;  %v6789_v56 = vadd.f32 %v6785_v51, %v6711_v63  ;;  %v6863_v17 = vpop.f32.mrf.mxu1  ;;  %v15978_v54 = vld [vmem:[#allocation23_spill] sm:$0xff] }
 0x86a   : > { %v15979_v51 = vld [vmem:[#allocation19_spill] sm:$0xff] }
 0x86b   : > { %v6874_v41 = vadd.f32 %v6872_v60, %v6866_v43  ;;  %v6867_v23 = vadd.f32 %v6863_v17, %v6789_v56  ;;  %v13163_v56 = vld [vmem:[%s15854_s18 + $0x28] sm:$0xff] }
 0x86d   : > { %v14903_v10 = vmax.f32 %v6874_v41, 0.0  ;;  %v6875_v46 = vadd.f32 %v6872_v60, %v6867_v23  ;;  %v15980_v41 = vld [vmem:[#allocation25_spill] sm:$0xff] }
 0x86e   : > { %v13167_v23 = vld [vmem:[%s15853_s17 + $0x30] sm:$0xff] }
 0x86f   : > { %v14905_v1 = vmax.f32 %v6875_v46, 0.0  ;;  %6880 = vrot.lane.b32.xlu1 %v14903_v10, %s15940_s25  ;;  %v15981_v46 = vld [vmem:[#allocation26_spill] sm:$0xff] }
 0x871   : > { %6882 = vrot.lane.b32.xlu0 %v14905_v1, %s15940_s25  ;;  %s13397_s25 = sshll.u32 %s13664_s2, 8  ;;  %s13537_s2 = smov [#allocation2]  }
 0x873   : > { %6890 = vrot.lane.b32.xlu1 %v14903_v10, %s15941_s26 }
 0x875   : > { %6892 = vrot.lane.b32.xlu0 %v14905_v1, %s15941_s26 }
 0x877   : > { %6898 = vrot.lane.b32.xlu1 %v14903_v10, %s15942_s23 }
 0x879   : > { %6900 = vrot.lane.b32.xlu0 %v14905_v1, %s15942_s23 }
 0x87b   : > { %6908 = vrot.lane.b32.xlu1 %v14903_v10, %s15945_s0 }
 0x87d   : > { %6910 = vrot.lane.b32.xlu0 %v14905_v1, %s15945_s0  ;;  %s12772_s0 = scalar_lea.hbm %s15856_s20, %s13397_s25 }
 0x87f   : > { %6920 = vrot.lane.b32.xlu1 %v14905_v1, %s15943_s3 }
 0x881   : > { %6918 = vrot.lane.b32.xlu0 %v14903_v10, %s15943_s3 }
 0x883   : > { %6930 = vrot.lane.b32.xlu1 %v14905_v1, %s15946_s21 }
 0x885   : > { %6928 = vrot.lane.b32.xlu0 %v14903_v10, %s15946_s21 }
 0x887   : > { %6938 = vrot.lane.b32.xlu1 %v14903_v10, %s15949_s1 }
 0x889   : > { %6940 = vrot.lane.b32.xlu0 %v14905_v1, %s15949_s1  ;;  %s13396_s1 = sshll.u32 %s13693_s30, 4  ;;  %s635_s30 = sand.u32 1, %s13517_s22  }
 0x88a   : > { %s647_s29 = scalar_lea.vmem %s15985_s24, %s13396_s1  ;;  %s12849_s27 = sshll.u32 %s635_s30, 4 }
 0x88b   : > { %6948 = vrot.lane.b32.xlu1 %v14905_v1, %s15947_s28  ;;  %s637_s26 = scalar_lea.vmem [#allocation2], %s12849_s27  ;;  %s12760_s1 = scalar_lea.sflag [#allocation3], %s635_s30 }
 0x88c   : > { %s12774_s23 = sshll.u32 %s637_s26, 4  ;;  %s12775_s23 = int_to_ptr.vmem [resolvable:$true] %s12774_s23 }
 0x88d   : > { %6946 = vrot.lane.b32.xlu0 %v14903_v10, %s15947_s28  ;;  %s13465_s6 = scalar_lea.vmem %s12775_s23, 256  ;;  %s13469_s28 = sshll.u32 %s13537_s2, 4  ;;  %s13470_s28 = int_to_ptr.vmem [resolvable:$false] %s13469_s28 }
 0x88e   : > { %p13466_p11 = scmp.ne.s32.totalorder %s12775_s23, %s13465_s6  ;;  %s13471_s24 = scalar_lea.vmem %s13470_s28, 512 }
 0x88f   : > { %8357 = vperm.xlu1 %13448, %v8354_v52   ;;  %p13472_p0 = scmp.lt.s32.totalorder %s12775_s23, %s13470_s28  ;;  %p13473_p1 = scmp.lt.s32.totalorder %s13471_s24, %s13465_s6 }
 0x890   : > { %p13467_p12 = pnand %p13466_p11, %p13681_p5 }
 0x891   : > { %9768 = vperm.xlu0 %13447, %v13255_v55   ;;  %v13171_v55 = vld [vmem:[%s15854_s18 + $0x30] sm:$0xff]  ;;  %p13474_p2 = por %p13473_p1, %p13472_p0 }
 0x892   : > { %p13468_p13 = pneg %p13467_p12 }
 0x893   : > { %11179 = vperm.xlu1 %13448, %v13322_v0  }
 0x894   : > { %p13475_p3 = pnand %p13474_p2, %p13468_p13 }
 0x895   : > { %12590 = vperm.xlu0 %13447, %v13389_v50   ;;  %v15982_v50 = vld [vmem:[#allocation27_spill] sm:$0xff] }
 0x8e1   : > { %v6881_v59 = vpop.permute.xlu1 %6880 }
 0x8e2   : > { %v14958_v58 = vsel %vm667_vm2, 0.0, %v6881_v59 }
 0x8e3   : > { %v6883_v24 = vpop.permute.xlu0 %6882 }
 0x8e4   : > { %v14952_v3 = vsel %vm667_vm2, %v6881_v59, %v6883_v24  ;;  %v13175_v24 = vld [vmem:[%s15853_s17 + $0x38] sm:$0xff] }
 0x8e5   : > { %v14960_v32 = vpop.permute.xlu1 %6890  ;;  %13125 = vmatprep.subr.msk.mxu0 %vm687_vm3, %v14952_v3 }
 0x8e6   : > { %13126 = vmatpush1.msk.msra.mxu0 %vm686_vm5, %v14958_v58 }
 0x8e7   : > { %13127 = vmatmul.mubr.msk.f32.vlgmr.msra.gmra.mxu0 %vm1631_vm15, %v6957_v9  ;;  %7141 = vmatprep.subr.mxu0 %v15969_v38  ;;  %v6893_v4 = vpop.permute.xlu0 %6892 }
 0x8e8   : > { %v14972_v12 = vsel %vm700_vm1, %v14960_v32, %v6893_v4  ;;  %13133 = vmatpush1.msk.msra.mxu0 %vm13788_vm4, %v15970_v48  ;;  %7175 = vmatprep.mubr.f32.mxu0 %v15966_v53  ;;  %v15983_v4 = vld [vmem:[#allocation24_spill] sm:$0xff] }
 0x8e9   : > { %v6899_v2 = vpop.permute.xlu1 %6898  ;;  %7219 = vmatprep.subr.mxu1 %v14972_v12  ;;  %13140 = vmatprep.subr.msk.mxu0 %vm737_vm8, %v15971_v44 }
 0x8ea   : > { %13137 = vmatpush1.msk.msra.mxu1 %vm13788_vm4, %v14960_v32  ;;  %v15007_v18 = vsel %vm717_vm7, 0.0, %v6899_v2 }
 0x8eb   : > { %13134 = vmatmul.mubr.msk.f32.vlgmr.msra.gmra.mxu0 %vm1631_vm15, %v13131_v62  ;;  %13138 = vmatmul.mubr.msk.f32.vlgmr.msra.gmra.mxu1 %vm1631_vm15, %v13135_v6  ;;  %v6901_v35 = vpop.permute.xlu0 %6900  ;;  %v13178_v62 = vld [vmem:[%s15854_s18 + $0x38] sm:$0xff] }
 0x8ec   : > { %13141 = vmatpush1.msk.msra.mxu0 %vm736_vm9, %v15972_v33  ;;  %v14997_v21 = vsel %vm717_vm7, %v6899_v2, %v6901_v35  ;;  %7331 = vmatprep.mubr.f32.mxu0 %v15966_v53  ;;  %v15984_v2 = vld [vmem:[#allocation28_spill] sm:$0xff]  ;;  %v13181_v35 = vld [vmem:[%s15853_s17 + $0x40] sm:$0xff] }
 0x8ed   : > { %13148 = vmatprep.subr.msk.mxu0 %vm687_vm3, %v15973_v5  ;;  %v6909_v30 = vpop.permute.xlu1 %6908  ;;  %13144 = vmatprep.subr.msk.mxu1 %vm737_vm8, %v14997_v21 }
 0x8ee   : > { %13145 = vmatpush1.msk.msra.mxu1 %vm736_vm9, %v15007_v18  ;;  %7409 = vmatprep.mubr.f32.mxu1 %v15966_v53  ;;  %v15035_v14 = vsel %vm750_vm10, 0.0, %v6909_v30 }
 0x8ef   : > { %13142 = vmatmul.mubr.msk.f32.vlgmr.msra.gmra.mxu0 %vm1631_vm15, %v13139_v37  ;;  %13146 = vmatmul.mubr.msk.f32.vlgmr.msra.gmra.mxu1 %vm1631_vm15, %v13143_v61  ;;  %v6911_v15 = vpop.permute.xlu0 %6910  ;;  %v13185_v37 = vld [vmem:[%s15854_s18 + $0x40] sm:$0xff]  ;;  %v13190_v61 = vld [vmem:[%s15854_s18 + $0x48] sm:$0xff] }
 0x8f0   : > { %13149 = vmatpush1.msk.msra.mxu0 %vm686_vm5, %v15974_v42  ;;  %v15025_v29 = vsel %vm750_vm10, %v6909_v30, %v6911_v15  ;;  %7487 = vmatprep.mubr.f32.mxu0 %v15966_v53  ;;  %v13189_v30 = vld [vmem:[%s15853_s17 + $0x48] sm:$0xff]  ;;  %v13197_v15 = vld [vmem:[%s15853_s17 + $0x50] sm:$0xff] }
 0x8f1   : > { %7609 = vmatprep.subr.mxu0 %v15975_v7  ;;  %v6921_v34 = vpop.permute.xlu1 %6920  ;;  %13152 = vmatprep.subr.msk.mxu1 %vm687_vm3, %v15025_v29 }
 0x8f2   : > { %13153 = vmatpush1.msk.msra.mxu1 %vm686_vm5, %v15035_v14  ;;  %7565 = vmatprep.mubr.f32.mxu1 %v15966_v53  ;;  %v15053_v20 = vsel %vm771_vm11, %v6921_v34, 0.0 }
 0x8f3   : > { %13150 = vmatmul.mubr.msk.f32.vlgmr.msra.gmra.mxu0 %vm1631_vm15, %v13147_v25  ;;  %13154 = vmatmul.mubr.msk.f32.vlgmr.msra.gmra.mxu1 %vm1631_vm15, %v13151_v26  ;;  %v6919_v47 = vpop.permute.xlu0 %6918  ;;  %v13201_v25 = vld [vmem:[%s15854_s18 + $0x50] sm:$0xff]  ;;  %v13205_v26 = vld [vmem:[%s15853_s17 + $0x58] sm:$0xff] }
 0x8f4   : > { %7610 = vmatpush1.msra.mxu0 %v15976_v8  ;;  %7687 = vmatprep.subr.mxu1 %v14905_v1  ;;  %v15072_v11 = vsel %vm771_vm11, %v6919_v47, %v6921_v34  ;;  %v13209_v34 = vld [vmem:[%s15854_s18 + $0x58] sm:$0xff]  ;;  %v13213_v47 = vld [vmem:[%s15853_s17 + $0x60] sm:$0xff] }
 0x8f5   : > { %7688 = vmatpush1.msra.mxu1 %v14903_v10  ;;  %13160 = vmatprep.subr.msk.mxu0 %vm737_vm8, %v15977_v22  ;;  %v6931_v36 = vpop.permute.xlu1 %6930 }
 0x8f6   : > { %13164 = vmatprep.subr.msk.mxu1 %vm737_vm8, %v15053_v20  ;;  %7643 = vmatprep.mubr.f32.mxu0 %v15966_v53  ;;  %v15067_v57 = vsel %vm792_vm12, %v6931_v36, 0.0 }
 0x8f7   : > { %7721 = vmatprep.mubr.f32.mxu1 %v15966_v53  ;;  %13156 = vmatmul.mubr.msk.f32.vlgmr.msra.gmra.mxu0 %vm1631_vm15, %v13155_v39  ;;  %v6929_v63 = vpop.permute.xlu0 %6928  ;;  %v13217_v39 = vld [vmem:[%s15854_s18 + $0x60] sm:$0xff] }
 0x8f8   : > { %13158 = vmatmul.mubr.msk.f32.vlgmr.msra.gmra.mxu1 %vm1631_vm15, %v13157_v45  ;;  %13161 = vmatpush1.msk.msra.mxu0 %vm736_vm9, %v15978_v54  ;;  %v15099_v17 = vsel %vm792_vm12, %v6929_v63, %v6931_v36  ;;  %v13221_v36 = vld [vmem:[%s15853_s17 + $0x68] sm:$0xff]  ;;  %v13225_v63 = vld [vmem:[%s15853_s17 + $0x70] sm:$0xff] }
 0x8f9   : > { %13165 = vmatpush1.msk.msra.mxu1 %vm736_vm9, %v15072_v11  ;;  %13168 = vmatprep.subr.msk.mxu0 %vm687_vm3, %v15979_v51  ;;  %v6939_v43 = vpop.permute.xlu1 %6938  ;;  %v13223_v45 = vld [vmem:[%s15854_s18 + $0x68] sm:$0xff] }
 0x8fa   : > { %13172 = vmatprep.subr.msk.mxu1 %vm687_vm3, %v15067_v57  ;;  %7799 = vmatprep.mubr.f32.mxu0 %v15966_v53 }
 0x8fb   : > { %7877 = vmatprep.mubr.f32.mxu1 %v15966_v53  ;;  %13162 = vmatmul.mubr.msk.f32.vlgmr.msra.gmra.mxu0 %vm1631_vm15, %v13159_v40  ;;  %v15096_v60 = vpop.permute.xlu0 %6940  ;;  %v13229_v40 = vld [vmem:[%s15854_s18 + $0x70] sm:$0xff] }
 0x8fc   : > { %13166 = vmatmul.mubr.msk.f32.vlgmr.msra.gmra.mxu1 %vm1631_vm15, %v13163_v56  ;;  %13169 = vmatpush1.msk.msra.mxu0 %vm686_vm5, %v15980_v41  ;;  %v15128_v59 = vsel %vm813_vm13, %v6939_v43, %v15096_v60  ;;  %v13233_v43 = vld [vmem:[%s15853_s17 + $0x78] sm:$0xff] }
 0x8fd   : > { %13173 = vmatpush1.msk.msra.mxu1 %vm686_vm5, %v15099_v17  ;;  %13176 = vmatprep.subr.msk.mxu0 %vm813_vm13, %v15981_v46  ;;  %v6949_v52 = vpop.permute.xlu1 %6948  ;;  %v13237_v56 = vld [vmem:[%s15854_s18 + $0x78] sm:$0xff] }
 0x8fe   : > { %13179 = vmatprep.subr.msk.mxu1 %vm813_vm13, %v15096_v60  ;;  %7955 = vmatprep.mubr.f32.mxu0 %v15966_v53  ;;  %v15120_v0 = vsel %vm830_vm14, %v6949_v52, 0.0 }
 0x8ff   : > { %8033 = vmatprep.mubr.f32.mxu1 %v15966_v53  ;;  %13170 = vmatmul.mubr.msk.f32.vlgmr.msra.gmra.mxu0 %vm1631_vm15, %v13167_v23  ;;  %v6947_v9 = vpop.permute.xlu0 %6946  ;;  %v13241_v23 = vld [vmem:[%s15853_s17 + $0x80] sm:$0xff] }
 0x900   : > { %13174 = vmatmul.mubr.msk.f32.vlgmr.msra.gmra.mxu1 %vm1631_vm15, %v13171_v55  ;;  %8078 = vmatpush1.msra.mxu0 %v15982_v50  ;;  %v15147_v6 = vsel %vm830_vm14, %v6947_v9, %v6949_v52  ;;  %v13244_v52 = vld [vmem:[%s15854_s18 + $0x80] sm:$0xff]  ;;  %v13247_v55 = vld [vmem:[%s15853_s17 + $0x88] sm:$0xff]  ;;  %v13257_v9 = vld [vmem:[%s15854_s18 + $0x90] sm:$0xff] }
 0x901   : > { %8156 = vmatpush1.msra.mxu1 %v15128_v59  ;;  %13182 = vmatprep.subr.msk.mxu0 %vm737_vm8, %v15983_v4 }
 0x902   : > { %13186 = vmatprep.subr.msk.mxu1 %vm737_vm8, %v15120_v0  ;;  %8111 = vmatprep.mubr.f32.mxu0 %v15966_v53 }
 0x903   : > { %8189 = vmatprep.mubr.f32.mxu1 %v15966_v53  ;;  %13177 = vmatmul.mubr.msk.f32.vlgmr.msra.gmra.mxu0 %vm1631_vm15, %v13175_v24  ;;  %v13251_v24 = vld [vmem:[%s15854_s18 + $0x88] sm:$0xff] }
 0x904   : > { %13180 = vmatmul.mubr.msk.f32.vlgmr.msra.gmra.mxu1 %vm1631_vm15, %v13178_v62  ;;  %13183 = vmatpush1.msk.msra.mxu0 %vm736_vm9, %v15984_v2  ;;  %v13256_v62 = vld [vmem:[%s15853_s17 + $0x90] sm:$0xff] }
 0x905   : > { %13187 = vmatpush1.msk.msra.mxu1 %vm736_vm9, %v15147_v6  ;;  %13191 = vmatprep.subr.msk.mxu0 %vm687_vm3, %v14952_v3 }
 0x906   : > { %13194 = vmatprep.subr.msk.mxu1 %vm687_vm3, %v15967_v27  ;;  %8267 = vmatprep.mubr.f32.mxu0 %v15966_v53 }
 0x907   : > { %8345 = vmatprep.mubr.f32.mxu1 %v15966_v53  ;;  %13184 = vmatmul.mubr.msk.f32.vlgmr.msra.gmra.mxu0 %vm1631_vm15, %v13181_v35  ;;  %v13264_v35 = vld [vmem:[%s15853_s17 + $0x98] sm:$0xff] }
 0x908   : > { %13188 = vmatmul.mubr.msk.f32.vlgmr.msra.gmra.mxu1 %vm1631_vm15, %v13185_v37  ;;  %13192 = vmatpush1.msk.msra.mxu0 %vm686_vm5, %v14958_v58  ;;  %v13268_v37 = vld [vmem:[%s15854_s18 + $0x98] sm:$0xff] }
 0x909   : > { %13195 = vmatpush1.msk.msra.mxu1 %vm686_vm5, %v15968_v49  ;;  %8551 = vmatprep.subr.mxu0 %v15969_v38 }
 0x90a   : > { %8629 = vmatprep.subr.mxu1 %v14972_v12  ;;  %8435 = vmatprep.mubr.f32.mxu0 %v15966_v53 }
 0x90b   : > { %8509 = vmatprep.mubr.f32.mxu1 %v15966_v53  ;;  %13193 = vmatmul.mubr.msk.f32.vlgmr.msra.gmra.mxu0 %vm1631_vm15, %v13190_v61  ;;  %v13272_v61 = vld [vmem:[%s15853_s17 + $0xa0] sm:$0xff] }
 0x90c   : > { %13196 = vmatmul.mubr.msk.f32.vlgmr.msra.gmra.mxu1 %vm1631_vm15, %v13189_v30  ;;  %13199 = vmatpush1.msk.msra.mxu0 %vm13788_vm4, %v15970_v48  ;;  %v13276_v30 = vld [vmem:[%s15854_s18 + $0xa0] sm:$0xff] }
 0x90d   : > { %13203 = vmatpush1.msk.msra.mxu1 %vm13788_vm4, %v14960_v32  ;;  %13206 = vmatprep.subr.msk.mxu0 %vm737_vm8, %v15971_v44 }
 0x90e   : > { %13210 = vmatprep.subr.msk.mxu1 %vm737_vm8, %v14997_v21  ;;  %8585 = vmatprep.mubr.f32.mxu0 %v15966_v53 }
 0x90f   : > { %8663 = vmatprep.mubr.f32.mxu1 %v15966_v53  ;;  %13200 = vmatmul.mubr.msk.f32.vlgmr.msra.gmra.mxu0 %vm1631_vm15, %v13197_v15  ;;  %v13280_v15 = vld [vmem:[%s15853_s17 + $0xa8] sm:$0xff] }
 0x910   : > { %13204 = vmatmul.mubr.msk.f32.vlgmr.msra.gmra.mxu1 %vm1631_vm15, %v13201_v25  ;;  %13207 = vmatpush1.msk.msra.mxu0 %vm736_vm9, %v15972_v33  ;;  %v13284_v25 = vld [vmem:[%s15854_s18 + $0xa8] sm:$0xff] }
 0x911   : > { %13211 = vmatpush1.msk.msra.mxu1 %vm736_vm9, %v15007_v18  ;;  %13214 = vmatprep.subr.msk.mxu0 %vm687_vm3, %v15973_v5 }
 0x912   : > { %13218 = vmatprep.subr.msk.mxu1 %vm687_vm3, %v15025_v29  ;;  %8741 = vmatprep.mubr.f32.mxu0 %v15966_v53 }
 0x913   : > { %8819 = vmatprep.mubr.f32.mxu1 %v15966_v53  ;;  %13208 = vmatmul.mubr.msk.f32.vlgmr.msra.gmra.mxu0 %vm1631_vm15, %v13205_v26  ;;  %v13288_v26 = vld [vmem:[%s15853_s17 + $0xb0] sm:$0xff] }
 0x914   : > { %13212 = vmatmul.mubr.msk.f32.vlgmr.msra.gmra.mxu1 %vm1631_vm15, %v13209_v34  ;;  %13215 = vmatpush1.msk.msra.mxu0 %vm686_vm5, %v15974_v42  ;;  %v13290_v34 = vld [vmem:[%s15854_s18 + $0xb0] sm:$0xff] }
 0x915   : > { %13219 = vmatpush1.msk.msra.mxu1 %vm686_vm5, %v15035_v14  ;;  %9019 = vmatprep.subr.mxu0 %v15975_v7 }
 0x916   : > { %9097 = vmatprep.subr.mxu1 %v14905_v1  ;;  %8897 = vmatprep.mubr.f32.mxu0 %v15966_v53 }
 0x917   : > { %8975 = vmatprep.mubr.f32.mxu1 %v15966_v53  ;;  %13216 = vmatmul.mubr.msk.f32.vlgmr.msra.gmra.mxu0 %vm1631_vm15, %v13213_v47  ;;  %v13292_v47 = vld [vmem:[%s15853_s17 + $0xb8] sm:$0xff] }
 0x918   : > { %13220 = vmatmul.mubr.msk.f32.vlgmr.msra.gmra.mxu1 %vm1631_vm15, %v13217_v39  ;;  %9020 = vmatpush1.msra.mxu0 %v15976_v8  ;;  %v13296_v39 = vld [vmem:[%s15854_s18 + $0xb8] sm:$0xff] }
 0x919   : > { %9098 = vmatpush1.msra.mxu1 %v14903_v10  ;;  %13226 = vmatprep.subr.msk.mxu0 %vm737_vm8, %v15977_v22 }
 0x91a   : > { %13230 = vmatprep.subr.msk.mxu1 %vm737_vm8, %v15053_v20  ;;  %9053 = vmatprep.mubr.f32.mxu0 %v15966_v53 }
 0x91b   : > { %9131 = vmatprep.mubr.f32.mxu1 %v15966_v53  ;;  %13222 = vmatmul.mubr.msk.f32.vlgmr.msra.gmra.mxu0 %vm1631_vm15, %v13221_v36  ;;  %v13300_v36 = vld [vmem:[%s15853_s17 + $0xc0] sm:$0xff] }
 0x91c   : > { %13224 = vmatmul.mubr.msk.f32.vlgmr.msra.gmra.mxu1 %vm1631_vm15, %v13223_v45  ;;  %13227 = vmatpush1.msk.msra.mxu0 %vm736_vm9, %v15978_v54  ;;  %v13304_v45 = vld [vmem:[%s15854_s18 + $0xc0] sm:$0xff] }
 0x91d   : > { %13231 = vmatpush1.msk.msra.mxu1 %vm736_vm9, %v15072_v11  ;;  %13234 = vmatprep.subr.msk.mxu0 %vm687_vm3, %v15979_v51 }
 0x91e   : > { %13238 = vmatprep.subr.msk.mxu1 %vm687_vm3, %v15067_v57  ;;  %9209 = vmatprep.mubr.f32.mxu0 %v15966_v53 }
 0x91f   : > { %9287 = vmatprep.mubr.f32.mxu1 %v15966_v53  ;;  %13228 = vmatmul.mubr.msk.f32.vlgmr.msra.gmra.mxu0 %vm1631_vm15, %v13225_v63  ;;  %v13308_v63 = vld [vmem:[%s15853_s17 + $0xc8] sm:$0xff] }
 0x920   : > { %13232 = vmatmul.mubr.msk.f32.vlgmr.msra.gmra.mxu1 %vm1631_vm15, %v13229_v40  ;;  %13235 = vmatpush1.msk.msra.mxu0 %vm686_vm5, %v15980_v41  ;;  %v13311_v40 = vld [vmem:[%s15854_s18 + $0xc8] sm:$0xff] }
 0x921   : > { %13239 = vmatpush1.msk.msra.mxu1 %vm686_vm5, %v15099_v17  ;;  %13242 = vmatprep.subr.msk.mxu0 %vm813_vm13, %v15981_v46 }
 0x922   : > { %13245 = vmatprep.subr.msk.mxu1 %vm813_vm13, %v15096_v60  ;;  %9365 = vmatprep.mubr.f32.mxu0 %v15966_v53 }
 0x923   : > { %9443 = vmatprep.mubr.f32.mxu1 %v15966_v53  ;;  %13236 = vmatmul.mubr.msk.f32.vlgmr.msra.gmra.mxu0 %vm1631_vm15, %v13233_v43  ;;  %v13314_v43 = vld [vmem:[%s15853_s17 + $0xd0] sm:$0xff] }
 0x924   : > { %13240 = vmatmul.mubr.msk.f32.vlgmr.msra.gmra.mxu1 %vm1631_vm15, %v13237_v56  ;;  %9488 = vmatpush1.msra.mxu0 %v15982_v50  ;;  %v13318_v56 = vld [vmem:[%s15854_s18 + $0xd0] sm:$0xff] }
 0x925   : > { %9566 = vmatpush1.msra.mxu1 %v15128_v59  ;;  %13248 = vmatprep.subr.msk.mxu0 %vm737_vm8, %v15983_v4 }
 0x926   : > { %13252 = vmatprep.subr.msk.mxu1 %vm737_vm8, %v15120_v0  ;;  %9521 = vmatprep.mubr.f32.mxu0 %v15966_v53 }
 0x927   : > { %9599 = vmatprep.mubr.f32.mxu1 %v15966_v53  ;;  %13243 = vmatmul.mubr.msk.f32.vlgmr.msra.gmra.mxu0 %vm1631_vm15, %v13241_v23 }
 0x928   : > { %13246 = vmatmul.mubr.msk.f32.vlgmr.msra.gmra.mxu1 %vm1631_vm15, %v13244_v52  ;;  %13249 = vmatpush1.msk.msra.mxu0 %vm736_vm9, %v15984_v2 }
 0x929   : > { %13253 = vmatpush1.msk.msra.mxu1 %vm736_vm9, %v15147_v6  ;;  %13258 = vmatprep.subr.msk.mxu0 %vm687_vm3, %v14952_v3 }
 0x92a   : > { %13261 = vmatprep.subr.msk.mxu1 %vm687_vm3, %v15967_v27  ;;  %9677 = vmatprep.mubr.f32.mxu0 %v15966_v53 }
 0x92b   : > { %9755 = vmatprep.mubr.f32.mxu1 %v15966_v53  ;;  %13250 = vmatmul.mubr.msk.f32.vlgmr.msra.gmra.mxu0 %vm1631_vm15, %v13247_v55 }
 0x92c   : > { %13254 = vmatmul.mubr.msk.f32.vlgmr.msra.gmra.mxu1 %vm1631_vm15, %v13251_v24  ;;  %13259 = vmatpush1.msk.msra.mxu0 %vm686_vm5, %v14958_v58 }
 0x92d   : > { %13262 = vmatpush1.msk.msra.mxu1 %vm686_vm5, %v15968_v49  ;;  %9962 = vmatprep.subr.mxu0 %v15969_v38 }
 0x92e   : > { %10040 = vmatprep.subr.mxu1 %v14972_v12  ;;  %9846 = vmatprep.mubr.f32.mxu0 %v15966_v53 }
 0x92f   : > { %9920 = vmatprep.mubr.f32.mxu1 %v15966_v53  ;;  %13260 = vmatmul.mubr.msk.f32.vlgmr.msra.gmra.mxu0 %vm1631_vm15, %v13257_v9 }
 0x930   : > { %13263 = vmatmul.mubr.msk.f32.vlgmr.msra.gmra.mxu1 %vm1631_vm15, %v13256_v62  ;;  %13266 = vmatpush1.msk.msra.mxu0 %vm13788_vm4, %v15970_v48 }
 0x931   : > { %13270 = vmatpush1.msk.msra.mxu1 %vm13788_vm4, %v14960_v32  ;;  %13273 = vmatprep.subr.msk.mxu0 %vm737_vm8, %v15971_v44 }
 0x932   : > { %13277 = vmatprep.subr.msk.mxu1 %vm737_vm8, %v14997_v21  ;;  %9996 = vmatprep.mubr.f32.mxu0 %v15966_v53 }
 0x933   : > { %10074 = vmatprep.mubr.f32.mxu1 %v15966_v53  ;;  %13267 = vmatmul.mubr.msk.f32.vlgmr.msra.gmra.mxu0 %vm1631_vm15, %v13264_v35 }
 0x934   : > { %13271 = vmatmul.mubr.msk.f32.vlgmr.msra.gmra.mxu1 %vm1631_vm15, %v13268_v37  ;;  %13274 = vmatpush1.msk.msra.mxu0 %vm736_vm9, %v15972_v33 }
 0x935   : > { %13278 = vmatpush1.msk.msra.mxu1 %vm736_vm9, %v15007_v18  ;;  %13281 = vmatprep.subr.msk.mxu0 %vm687_vm3, %v15973_v5 }
 0x936   : > { %13285 = vmatprep.subr.msk.mxu1 %vm687_vm3, %v15025_v29  ;;  %10152 = vmatprep.mubr.f32.mxu0 %v15966_v53 }
 0x937   : > { %10230 = vmatprep.mubr.f32.mxu1 %v15966_v53  ;;  %13275 = vmatmul.mubr.msk.f32.vlgmr.msra.gmra.mxu0 %vm1631_vm15, %v13272_v61 }
 0x938   : > { %13279 = vmatmul.mubr.msk.f32.vlgmr.msra.gmra.mxu1 %vm1631_vm15, %v13276_v30  ;;  %13282 = vmatpush1.msk.msra.mxu0 %vm686_vm5, %v15974_v42 }
 0x939   : > { %13286 = vmatpush1.msk.msra.mxu1 %vm686_vm5, %v15035_v14  ;;  %10430 = vmatprep.subr.mxu0 %v15975_v7 }
 0x93a   : > { %10508 = vmatprep.subr.mxu1 %v14905_v1  ;;  %10308 = vmatprep.mubr.f32.mxu0 %v15966_v53 }
 0x93b   : > { %10386 = vmatprep.mubr.f32.mxu1 %v15966_v53  ;;  %13283 = vmatmul.mubr.msk.f32.vlgmr.msra.gmra.mxu0 %vm1631_vm15, %v13280_v15 }
 0x93c   : > { %13287 = vmatmul.mubr.msk.f32.vlgmr.msra.gmra.mxu1 %vm1631_vm15, %v13284_v25  ;;  %10431 = vmatpush1.msra.mxu0 %v15976_v8 }
 0x93d   : > { %10509 = vmatpush1.msra.mxu1 %v14903_v10  ;;  %13293 = vmatprep.subr.msk.mxu0 %vm737_vm8, %v15977_v22 }
 0x93e   : > { %13297 = vmatprep.subr.msk.mxu1 %vm737_vm8, %v15053_v20  ;;  %10464 = vmatprep.mubr.f32.mxu0 %v15966_v53 }
 0x93f   : > { %10542 = vmatprep.mubr.f32.mxu1 %v15966_v53  ;;  %13289 = vmatmul.mubr.msk.f32.vlgmr.msra.gmra.mxu0 %vm1631_vm15, %v13288_v26 }
 0x940   : > { %13291 = vmatmul.mubr.msk.f32.vlgmr.msra.gmra.mxu1 %vm1631_vm15, %v13290_v34  ;;  %13294 = vmatpush1.msk.msra.mxu0 %vm736_vm9, %v15978_v54 }
 0x941   : > { %13298 = vmatpush1.msk.msra.mxu1 %vm736_vm9, %v15072_v11  ;;  %13301 = vmatprep.subr.msk.mxu0 %vm687_vm3, %v15979_v51 }
 0x942   : > { %13305 = vmatprep.subr.msk.mxu1 %vm687_vm3, %v15067_v57  ;;  %10620 = vmatprep.mubr.f32.mxu0 %v15966_v53 }
 0x943   : > { %10698 = vmatprep.mubr.f32.mxu1 %v15966_v53  ;;  %13295 = vmatmul.mubr.msk.f32.vlgmr.msra.gmra.mxu0 %vm1631_vm15, %v13292_v47 }
 0x944   : > { %13299 = vmatmul.mubr.msk.f32.vlgmr.msra.gmra.mxu1 %vm1631_vm15, %v13296_v39  ;;  %13302 = vmatpush1.msk.msra.mxu0 %vm686_vm5, %v15980_v41 }
 0x945   : > { %13306 = vmatpush1.msk.msra.mxu1 %vm686_vm5, %v15099_v17  ;;  %13309 = vmatprep.subr.msk.mxu0 %vm813_vm13, %v15981_v46 }
 0x946   : > { %13312 = vmatprep.subr.msk.mxu1 %vm813_vm13, %v15096_v60  ;;  %10776 = vmatprep.mubr.f32.mxu0 %v15966_v53 }
 0x947   : > { %10854 = vmatprep.mubr.f32.mxu1 %v15966_v53  ;;  %13303 = vmatmul.mubr.msk.f32.vlgmr.msra.gmra.mxu0 %vm1631_vm15, %v13300_v36 }
 0x948   : > { %13307 = vmatmul.mubr.msk.f32.vlgmr.msra.gmra.mxu1 %vm1631_vm15, %v13304_v45  ;;  %10899 = vmatpush1.msra.mxu0 %v15982_v50 }
 0x949   : > { %10977 = vmatpush1.msra.mxu1 %v15128_v59  ;;  %13315 = vmatprep.subr.msk.mxu0 %vm737_vm8, %v15983_v4 }
 0x94a   : > { %13319 = vmatprep.subr.msk.mxu1 %vm737_vm8, %v15120_v0  ;;  %10932 = vmatprep.mubr.f32.mxu0 %v15966_v53 }
 0x94b   : > { %11010 = vmatprep.mubr.f32.mxu1 %v15966_v53  ;;  %13310 = vmatmul.mubr.msk.f32.vlgmr.msra.gmra.mxu0 %vm1631_vm15, %v13308_v63 }
 0x94c   : > { %13313 = vmatmul.mubr.msk.f32.vlgmr.msra.gmra.mxu1 %vm1631_vm15, %v13311_v40  ;;  %13316 = vmatpush1.msk.msra.mxu0 %vm736_vm9, %v15984_v2 }
 0x94d   : > { %13320 = vmatpush1.msk.msra.mxu1 %vm736_vm9, %v15147_v6  ;;  %13325 = vmatprep.subr.msk.mxu0 %vm687_vm3, %v14952_v3  ;;  %v13324_v3 = vld [vmem:[%s15854_s18 + $0xd8] sm:$0xff] }
 0x94e   : > { %13328 = vmatprep.subr.msk.mxu1 %vm687_vm3, %v15967_v27  ;;  %11088 = vmatprep.mubr.f32.mxu0 %v15966_v53  ;;  %v13323_v27 = vld [vmem:[%s15853_s17 + $0xd8] sm:$0xff] }
 0x94f   : > { %11166 = vmatprep.mubr.f32.mxu1 %v15966_v53  ;;  %13317 = vmatmul.mubr.msk.f32.vlgmr.msra.gmra.mxu0 %vm1631_vm15, %v13314_v43 }
 0x950   : > { %13321 = vmatmul.mubr.msk.f32.vlgmr.msra.gmra.mxu1 %vm1631_vm15, %v13318_v56  ;;  %13326 = vmatpush1.msk.msra.mxu0 %vm686_vm5, %v14958_v58  ;;  %v13335_v58 = vld [vmem:[%s15854_s18 + $0xe0] sm:$0xff] }
 0x951   : > { %13329 = vmatpush1.msk.msra.mxu1 %vm686_vm5, %v15968_v49  ;;  %11373 = vmatprep.subr.mxu0 %v15969_v38  ;;  %v13331_v49 = vld [vmem:[%s15853_s17 + $0xe0] sm:$0xff]  ;;  %v13347_v38 = vld [vmem:[%s15853_s17 + $0xf0] sm:$0xff] }
 0x952   : > { %11451 = vmatprep.subr.mxu1 %v14972_v12  ;;  %11257 = vmatprep.mubr.f32.mxu0 %v15966_v53  ;;  %v13351_v12 = vld [vmem:[%s15854_s18 + $0xf0] sm:$0xff] }
 0x953   : > { %11331 = vmatprep.mubr.f32.mxu1 %v15966_v53  ;;  %13327 = vmatmul.mubr.msk.f32.vlgmr.msra.gmra.mxu0 %vm1631_vm15, %v13324_v3 }
 0x954   : > { %13330 = vmatmul.mubr.msk.f32.vlgmr.msra.gmra.mxu1 %vm1631_vm15, %v13323_v27  ;;  %13333 = vmatpush1.msk.msra.mxu0 %vm13788_vm4, %v15970_v48  ;;  %v13355_v48 = vld [vmem:[%s15853_s17 + $0xf8] sm:$0xff] }
 0x955   : > { %13337 = vmatpush1.msk.msra.mxu1 %vm13788_vm4, %v14960_v32  ;;  %13340 = vmatprep.subr.msk.mxu0 %vm737_vm8, %v15971_v44  ;;  %v13343_v32 = vld [vmem:[%s15854_s18 + $0xe8] sm:$0xff]  ;;  %v13363_v44 = vld [vmem:[%s15854_s18 + $0x100] sm:$0xff] }
 0x956   : > { %13344 = vmatprep.subr.msk.mxu1 %vm737_vm8, %v14997_v21  ;;  %11407 = vmatprep.mubr.f32.mxu0 %v15966_v53  ;;  %v13378_v21 = vld [vmem:[%s15854_s18 + $0x110] sm:$0xff] }
 0x957   : > { %11485 = vmatprep.mubr.f32.mxu1 %v15966_v53  ;;  %13334 = vmatmul.mubr.msk.f32.vlgmr.msra.gmra.mxu0 %vm1631_vm15, %v13331_v49 }
 0x958   : > { %13338 = vmatmul.mubr.msk.f32.vlgmr.msra.gmra.mxu1 %vm1631_vm15, %v13335_v58  ;;  %13341 = vmatpush1.msk.msra.mxu0 %vm736_vm9, %v15972_v33  ;;  %v13367_v33 = vld [vmem:[%s15853_s17 + $0x108] sm:$0xff] }
 0x959   : > { %13345 = vmatpush1.msk.msra.mxu1 %vm736_vm9, %v15007_v18  ;;  %13348 = vmatprep.subr.msk.mxu0 %vm687_vm3, %v15973_v5  ;;  %v13381_v18 = vld [vmem:[%s15853_s17 + $0x118] sm:$0xff]  ;;  %v7101_v5 = vpop.f32.mrf.mxu1 }
 0x95a   : > { %13352 = vmatprep.subr.msk.mxu1 %vm687_vm3, %v15025_v29  ;;  %11563 = vmatprep.mubr.f32.mxu0 %v15966_v53 }
 0x95b   : > { %11641 = vmatprep.mubr.f32.mxu1 %v15966_v53  ;;  %13342 = vmatmul.mubr.msk.f32.vlgmr.msra.gmra.mxu0 %vm1631_vm15, %v13339_v19  ;;  %v7103_v29 = vpop.f32.mrf.mxu1 }
 0x95c   : > { %13346 = vmatmul.mubr.msk.f32.vlgmr.msra.gmra.mxu1 %vm1631_vm15, %v13343_v32  ;;  %13349 = vmatpush1.msk.msra.mxu0 %vm686_vm5, %v15974_v42 }
 0x95d   : > { %13353 = vmatpush1.msk.msra.mxu1 %vm686_vm5, %v15035_v14  ;;  %11841 = vmatprep.subr.mxu0 %v15975_v7 }
 0x95e   : > { %11919 = vmatprep.subr.mxu1 %v14905_v1  ;;  %11719 = vmatprep.mubr.f32.mxu0 %v15966_v53  ;;  %v13357_v1 = vld [vmem:[%s15854_s18 + $0xf8] sm:$0xff] }
 0x95f   : > { %11797 = vmatprep.mubr.f32.mxu1 %v15966_v53  ;;  %13350 = vmatmul.mubr.msk.f32.vlgmr.msra.gmra.mxu0 %vm1631_vm15, %v13347_v38 }
 0x960   : > { %13354 = vmatmul.mubr.msk.f32.vlgmr.msra.gmra.mxu1 %vm1631_vm15, %v13351_v12  ;;  %11842 = vmatpush1.msra.mxu0 %v15976_v8 }
 0x961   : > { %11920 = vmatpush1.msra.mxu1 %v14903_v10  ;;  %13360 = vmatprep.subr.msk.mxu0 %vm737_vm8, %v15977_v22  ;;  %v13359_v10 = vld [vmem:[%s15853_s17 + $0x100] sm:$0xff] }
 0x962   : > { %13364 = vmatprep.subr.msk.mxu1 %vm737_vm8, %v15053_v20  ;;  %11875 = vmatprep.mubr.f32.mxu0 %v15966_v53 }
 0x963   : > { %11953 = vmatprep.mubr.f32.mxu1 %v15966_v53  ;;  %13356 = vmatmul.mubr.msk.f32.vlgmr.msra.gmra.mxu0 %vm1631_vm15, %v13355_v48 }
 0x964   : > { %13358 = vmatmul.mubr.msk.f32.vlgmr.msra.gmra.mxu1 %vm1631_vm15, %v13357_v1  ;;  %13361 = vmatpush1.msk.msra.mxu0 %vm736_vm9, %v15978_v54 }
 0x965   : > { %13365 = vmatpush1.msk.msra.mxu1 %vm736_vm9, %v15072_v11  ;;  %13368 = vmatprep.subr.msk.mxu0 %vm687_vm3, %v15979_v51 }
 0x966   : > { %13372 = vmatprep.subr.msk.mxu1 %vm687_vm3, %v15067_v57  ;;  %12031 = vmatprep.mubr.f32.mxu0 %v15966_v53 }
 0x967   : > { %12109 = vmatprep.mubr.f32.mxu1 %v15966_v53  ;;  %13362 = vmatmul.mubr.msk.f32.vlgmr.msra.gmra.mxu0 %vm1631_vm15, %v13359_v10 }
 0x968   : > { %13366 = vmatmul.mubr.msk.f32.vlgmr.msra.gmra.mxu1 %vm1631_vm15, %v13363_v44  ;;  %13369 = vmatpush1.msk.msra.mxu0 %vm686_vm5, %v15980_v41 }
 0x969   : > { %13373 = vmatpush1.msk.msra.mxu1 %vm686_vm5, %v15099_v17  ;;  %13376 = vmatprep.subr.msk.mxu0 %vm813_vm13, %v15981_v46 }
 0x96a   : > { %13379 = vmatprep.subr.msk.mxu1 %vm813_vm13, %v15096_v60  ;;  %12187 = vmatprep.mubr.f32.mxu0 %v15966_v53 }
 0x96b   : > { %12265 = vmatprep.mubr.f32.mxu1 %v15966_v53  ;;  %13370 = vmatmul.mubr.msk.f32.vlgmr.msra.gmra.mxu0 %vm1631_vm15, %v13367_v33 }
 0x96c   : > { %13374 = vmatmul.mubr.msk.f32.vlgmr.msra.gmra.mxu1 %vm1631_vm15, %v13371_v13  ;;  %12310 = vmatpush1.msra.mxu0 %v15982_v50 }
 0x96d   : > { %12388 = vmatpush1.msra.mxu1 %v15128_v59  ;;  %13382 = vmatprep.subr.msk.mxu0 %vm737_vm8, %v15983_v4 }
 0x96e   : > { %13386 = vmatprep.subr.msk.mxu1 %vm737_vm8, %v15120_v0  ;;  %12343 = vmatprep.mubr.f32.mxu0 %v15966_v53 }
 0x96f   : > { %12421 = vmatprep.mubr.f32.mxu1 %v15966_v53  ;;  %13377 = vmatmul.mubr.msk.f32.vlgmr.msra.gmra.mxu0 %vm1631_vm15, %v13375_v16 }
 0x970   : > { %13380 = vmatmul.mubr.msk.f32.vlgmr.msra.gmra.mxu1 %vm1631_vm15, %v13378_v21  ;;  %13383 = vmatpush1.msk.msra.mxu0 %vm736_vm9, %v15984_v2 }
 0x971   : > { %13387 = vmatpush1.msk.msra.mxu1 %vm736_vm9, %v15147_v6  ;;  %12499 = vmatprep.mubr.f32.mxu0 %v15966_v53 }
 0x972   : > { %12577 = vmatprep.mubr.f32.mxu1 %v15966_v53 }
 0x973   : > { %13384 = vmatmul.mubr.msk.f32.vlgmr.msra.gmra.mxu0 %vm1631_vm15, %v13381_v18 }
 0x974   : > { %13388 = vmatmul.mubr.msk.f32.vlgmr.msra.gmra.mxu1 %vm1631_vm15, %v13385_v28 }
 0x9a7   : > { %v7027_v42 = vpop.f32.mrf.mxu0 }
 0x9a8   : > { %v7102_v7 = vadd.f32 %v7101_v5, %v7027_v42 }
 0x9a9   : > { %v7029_v14 = vpop.f32.mrf.mxu0 }
 0x9aa   : > { %v7104_v8 = vadd.f32 %v7103_v29, %v7029_v14 }
 0x9ab   : > { %v7177_v31 = vpop.f32.mrf.mxu0  ;;  %v7255_v20 = vpop.f32.mrf.mxu1 }
 0x9ac   : > { %v7182_v22 = vadd.f32 %v7177_v31, %v7102_v7 }
 0x9ad   : > { %v7179_v57 = vpop.f32.mrf.mxu0  ;;  %v7257_v11 = vpop.f32.mrf.mxu1 }
 0x9ae   : > { %v7260_v54 = vadd.f32 %v7255_v20, %v7182_v22  ;;  %v7183_v51 = vadd.f32 %v7179_v57, %v7104_v8 }
 0x9af   : > { %v7333_v60 = vpop.f32.mrf.mxu0  ;;  %v7411_v17 = vpop.f32.mrf.mxu1 }
 0x9b0   : > { %v7261_v53 = vadd.f32 %v7257_v11, %v7183_v51  ;;  %v7338_v41 = vadd.f32 %v7333_v60, %v7260_v54 }
 0x9b1   : > { %v7335_v46 = vpop.f32.mrf.mxu0  ;;  %v7413_v0 = vpop.f32.mrf.mxu1 }
 0x9b2   : > { %v7416_v50 = vadd.f32 %v7411_v17, %v7338_v41  ;;  %v7339_v59 = vadd.f32 %v7335_v46, %v7261_v53 }
 0x9b3   : > { %v7489_v4 = vpop.f32.mrf.mxu0  ;;  %v7567_v6 = vpop.f32.mrf.mxu1 }
 0x9b4   : > { %v7417_v2 = vadd.f32 %v7413_v0, %v7339_v59  ;;  %v7494_v23 = vadd.f32 %v7489_v4, %v7416_v50 }
 0x9b5   : > { %v7491_v52 = vpop.f32.mrf.mxu0  ;;  %v7569_v55 = vpop.f32.mrf.mxu1 }
 0x9b6   : > { %v7572_v24 = vadd.f32 %v7567_v6, %v7494_v23  ;;  %v7495_v9 = vadd.f32 %v7491_v52, %v7417_v2 }
 0x9b7   : > { %v7645_v62 = vpop.f32.mrf.mxu0 }
 0x9b8   : > { %v7573_v35 = vadd.f32 %v7569_v55, %v7495_v9  ;;  %v7650_v37 = vadd.f32 %v7645_v62, %v7572_v24  ;;  %v7723_v61 = vpop.f32.mrf.mxu1 }
 0x9b9   : > { %v7647_v30 = vpop.f32.mrf.mxu0 }
 0x9ba   : > { %v7728_v15 = vadd.f32 %v7723_v61, %v7650_v37  ;;  %v7651_v25 = vadd.f32 %v7647_v30, %v7573_v35  ;;  %v7725_v26 = vpop.f32.mrf.mxu1 }
 0x9bb   : > { %v7801_v34 = vpop.f32.mrf.mxu0 }
 0x9bc   : > { %v7729_v47 = vadd.f32 %v7725_v26, %v7651_v25  ;;  %v7806_v39 = vadd.f32 %v7801_v34, %v7728_v15  ;;  %v7879_v36 = vpop.f32.mrf.mxu1 }
 0x9bd   : > { %v7803_v45 = vpop.f32.mrf.mxu0 }
 0x9be   : > { %v7884_v63 = vadd.f32 %v7879_v36, %v7806_v39  ;;  %v7807_v40 = vadd.f32 %v7803_v45, %v7729_v47  ;;  %v7881_v43 = vpop.f32.mrf.mxu1 }
 0x9bf   : > { %v7957_v56 = vpop.f32.mrf.mxu0 }
 0x9c0   : > { %v7885_v3 = vadd.f32 %v7881_v43, %v7807_v40  ;;  %v7962_v27 = vadd.f32 %v7957_v56, %v7884_v63  ;;  %v8035_v49 = vpop.f32.mrf.mxu1 }
 0x9c1   : > { %v7959_v58 = vpop.f32.mrf.mxu0 }
 0x9c2   : > { %v8040_v19 = vadd.f32 %v8035_v49, %v7962_v27  ;;  %v7963_v32 = vadd.f32 %v7959_v58, %v7885_v3  ;;  %v8037_v38 = vpop.f32.mrf.mxu1 }
 0x9c3   : > { %v8113_v12 = vpop.f32.mrf.mxu0 }
 0x9c4   : > { %v8041_v48 = vadd.f32 %v8037_v38, %v7963_v32  ;;  %v8118_v1 = vadd.f32 %v8113_v12, %v8040_v19  ;;  %v8191_v10 = vpop.f32.mrf.mxu1 }
 0x9c5   : > { %v8115_v44 = vpop.f32.mrf.mxu0 }
 0x9c6   : > { %v8196_v33 = vadd.f32 %v8191_v10, %v8118_v1  ;;  %v8119_v13 = vadd.f32 %v8115_v44, %v8041_v48  ;;  %v8193_v16 = vpop.f32.mrf.mxu1 }
 0x9c7   : > { %v8269_v21 = vpop.f32.mrf.mxu0 }
 0x9c8   : > { %v8197_v18 = vadd.f32 %v8193_v16, %v8119_v13  ;;  %v8274_v28 = vadd.f32 %v8269_v21, %v8196_v33  ;;  %v8347_v5 = vpop.f32.mrf.mxu1 }
 0x9c9   : > { %v8271_v42 = vpop.f32.mrf.mxu0 }
 0x9ca   : > { %v15706_v29 = vadd.f32 %v8347_v5, %v8274_v28  ;;  %v8275_v14 = vadd.f32 %v8271_v42, %v8197_v18  ;;  %v8349_v7 = vpop.f32.mrf.mxu1 }
 0x9cb   : > { %v8437_v8 = vpop.f32.mrf.mxu0 }
 0x9cc   : > { %v15708_v31 = vadd.f32 %v8349_v7, %v8275_v14  ;;  %v8511_v20 = vpop.f32.mrf.mxu1 }
 0x9cd   : > { %v8439_v22 = vpop.f32.mrf.mxu0  ;;  %v8512_v46 = vadd.f32 %v8511_v20, %v8437_v8 }
 0x9ce   : > { %v8513_v57 = vpop.f32.mrf.mxu1 }
 0x9cf   : > { %v8587_v11 = vpop.f32.mrf.mxu0  ;;  %v8514_v59 = vadd.f32 %v8513_v57, %v8439_v22 }
 0x9d0   : > { %v8665_v54 = vpop.f32.mrf.mxu1  ;;  %v8592_v4 = vadd.f32 %v8587_v11, %v8512_v46 }
 0x9d1   : > { %v8589_v51 = vpop.f32.mrf.mxu0 }
 0x9d2   : > { %v8667_v60 = vpop.f32.mrf.mxu1  ;;  %v8593_v23 = vadd.f32 %v8589_v51, %v8514_v59  ;;  %v8670_v24 = vadd.f32 %v8665_v54, %v8592_v4 }
 0x9d3   : > { %v8743_v17 = vpop.f32.mrf.mxu0 }
 0x9d4   : > { %v8821_v53 = vpop.f32.mrf.mxu1  ;;  %v8671_v35 = vadd.f32 %v8667_v60, %v8593_v23  ;;  %v8748_v30 = vadd.f32 %v8743_v17, %v8670_v24 }
 0x9d5   : > { %v8745_v41 = vpop.f32.mrf.mxu0 }
 0x9d6   : > { %v8823_v0 = vpop.f32.mrf.mxu1  ;;  %v8749_v26 = vadd.f32 %v8745_v41, %v8671_v35  ;;  %v8826_v39 = vadd.f32 %v8821_v53, %v8748_v30 }
 0x9d7   : > { %v8899_v50 = vpop.f32.mrf.mxu0 }
 0x9d8   : > { %v8977_v6 = vpop.f32.mrf.mxu1  ;;  %v8827_v63 = vadd.f32 %v8823_v0, %v8749_v26  ;;  %v8904_v56 = vadd.f32 %v8899_v50, %v8826_v39 }
 0x9d9   : > { %v8901_v2 = vpop.f32.mrf.mxu0 }
 0x9da   : > { %v8979_v52 = vpop.f32.mrf.mxu1  ;;  %v8905_v49 = vadd.f32 %v8901_v2, %v8827_v63  ;;  %v8982_v32 = vadd.f32 %v8977_v6, %v8904_v56 }
 0x9db   : > { %v9055_v55 = vpop.f32.mrf.mxu0 }
 0x9dc   : > { %v9133_v9 = vpop.f32.mrf.mxu1  ;;  %v8983_v48 = vadd.f32 %v8979_v52, %v8905_v49  ;;  %v9060_v44 = vadd.f32 %v9055_v55, %v8982_v32 }
 0x9dd   : > { %v9057_v62 = vpop.f32.mrf.mxu0 }
 0x9de   : > { %v9135_v37 = vpop.f32.mrf.mxu1  ;;  %v9061_v16 = vadd.f32 %v9057_v62, %v8983_v48  ;;  %v9138_v5 = vadd.f32 %v9133_v9, %v9060_v44 }
 0x9df   : > { %v9211_v61 = vpop.f32.mrf.mxu0 }
 0x9e0   : > { %v9289_v15 = vpop.f32.mrf.mxu1  ;;  %v9139_v20 = vadd.f32 %v9135_v37, %v9061_v16  ;;  %v9216_v51 = vadd.f32 %v9211_v61, %v9138_v5 }
 0x9e1   : > { %v9213_v25 = vpop.f32.mrf.mxu0 }
 0x9e2   : > { %v9291_v34 = vpop.f32.mrf.mxu1  ;;  %v9217_v46 = vadd.f32 %v9213_v25, %v9139_v20  ;;  %v9294_v6 = vadd.f32 %v9289_v15, %v9216_v51 }
 0x9e3   : > { %v9367_v47 = vpop.f32.mrf.mxu0 }
 0x9e4   : > { %v15710_v36 = vpop.f32.mrf.mxu1  ;;  %v9295_v24 = vadd.f32 %v9291_v34, %v9217_v46  ;;  %v9372_v61 = vadd.f32 %v9367_v47, %v9294_v6 }
 0x9e5   : > { %v9369_v45 = vpop.f32.mrf.mxu0 }
 0x9e6   : > { %v15712_v40 = vpop.f32.mrf.mxu1  ;;  %v9373_v25 = vadd.f32 %v9369_v45, %v9295_v24  ;;  %v9450_v15 = vadd.f32 %v15710_v36, %v9372_v61 }
 0x9e7   : > { %v15714_v43 = vpop.f32.mrf.mxu0 }
 0x9e8   : > { %v15716_v3 = vpop.f32.mrf.mxu1  ;;  %v9451_v34 = vadd.f32 %v15712_v40, %v9373_v25 }
 0x9e9   : > { %v15718_v27 = vpop.f32.mrf.mxu0 }
 0x9ea   : > { %v15720_v58 = vpop.f32.mrf.mxu1 }
 0x9eb   : > { %v15722_v19 = vpop.f32.mrf.mxu0 }
 0x9ec   : > { %v15724_v38 = vpop.f32.mrf.mxu1 }
 0x9ed   : > { %v15726_v12 = vpop.f32.mrf.mxu0 }
 0x9ee   : > { %v15728_v1 = vpop.f32.mrf.mxu1 }
 0x9ef   : > { %v9848_v10 = vpop.f32.mrf.mxu0 }
 0x9f0   : > { %v9922_v33 = vpop.f32.mrf.mxu1 }
 0x9f1   : > { %v9850_v13 = vpop.f32.mrf.mxu0  ;;  %v9923_v21 = vadd.f32 %v9922_v33, %v9848_v10 }
 0x9f2   : > { %v9924_v18 = vpop.f32.mrf.mxu1 }
 0x9f3   : > { %v9998_v28 = vpop.f32.mrf.mxu0  ;;  %v9925_v42 = vadd.f32 %v9924_v18, %v9850_v13  ;;  %v9528_v18 = vadd.f32 %v15714_v43, %v9450_v15 }
 0x9f4   : > { %v10003_v14 = vadd.f32 %v9998_v28, %v9923_v21  ;;  %v10076_v7 = vpop.f32.mrf.mxu1  ;;  %v8358_v21 = vpop.permute.xlu1 %8357 }
 0x9f5   : > { %v10000_v8 = vpop.f32.mrf.mxu0  ;;  %v8360_v5 = vadd.f32 %v8358_v21, %v15706_v29  ;;  %v9606_v40 = vadd.f32 %v15716_v3, %v9528_v18  ;;  %v653_v3 = vld [vmem:[%s647_s29] sm:$0xff] }
 0x9f6   : > { %v10081_v22 = vadd.f32 %v10076_v7, %v10003_v14  ;;  %v10004_v57 = vadd.f32 %v10000_v8, %v9925_v42  ;;  %v10078_v11 = vpop.f32.mrf.mxu1  ;;  %v9529_v14 = vadd.f32 %v15718_v27, %v9451_v34  ;;  %v8361_v8 = vadd.f32 %v8358_v21, %v15708_v31 }
 0x9f7   : > { %v10154_v54 = vpop.f32.mrf.mxu0  ;;  %13449 = vtanh.f32 %v8360_v5  ;;  %v9684_v31 = vadd.f32 %v15722_v19, %v9606_v40  ;;  %v12597_v6 = vmul.f32 %v653_v3, %v653_v3 }
 0x9f8   : > { %v10082_v60 = vadd.f32 %v10078_v11, %v10004_v57  ;;  %v10159_v17 = vadd.f32 %v10154_v54, %v10081_v22  ;;  %v10232_v53 = vpop.f32.mrf.mxu1  ;;  %v9607_v43 = vadd.f32 %v15720_v58, %v9529_v14  ;;  %13451 = vtanh.f32 %v8361_v8  ;;  %v654_v58 = vld [vmem:[%s647_s29 + $0x8] sm:$0xff] }
 0x9f9   : > { %v10156_v41 = vpop.f32.mrf.mxu0  ;;  %v12598_v24 = vmul.f32 %v654_v58, %v654_v58 }
 0x9fa   : > { %v10237_v0 = vadd.f32 %v10232_v53, %v10159_v17  ;;  %v10160_v50 = vadd.f32 %v10156_v41, %v10082_v60  ;;  %v10234_v59 = vpop.f32.mrf.mxu1  ;;  %v9685_v53 = vadd.f32 %v15726_v12, %v9607_v43 }
 0x9fb   : > { %v10310_v4 = vpop.f32.mrf.mxu0 }
 0x9fc   : > { %v10238_v2 = vadd.f32 %v10234_v59, %v10160_v50  ;;  %v10315_v23 = vadd.f32 %v10310_v4, %v10237_v0  ;;  %v10388_v52 = vpop.f32.mrf.mxu1  ;;  %v9762_v50 = vadd.f32 %v15724_v38, %v9684_v31 }
 0x9fd   : > { %v10312_v55 = vpop.f32.mrf.mxu0 }
 0x9fe   : > { %v10393_v9 = vadd.f32 %v10388_v52, %v10315_v23  ;;  %v10316_v62 = vadd.f32 %v10312_v55, %v10238_v2  ;;  %v10390_v35 = vpop.f32.mrf.mxu1  ;;  %v9763_v23 = vadd.f32 %v15728_v1, %v9685_v53  ;;  %v11180_v53 = vpop.permute.xlu1 %11179 }
 0x9ff   : > { %v10466_v37 = vpop.f32.mrf.mxu0 }
 0xa00   : > { %v10394_v30 = vadd.f32 %v10390_v35, %v10316_v62  ;;  %v10471_v26 = vadd.f32 %v10466_v37, %v10393_v9  ;;  %v10544_v39 = vpop.f32.mrf.mxu1  ;;  %v9769_v9 = vpop.permute.xlu0 %9768 }
 0xa01   : > { %v10468_v63 = vpop.f32.mrf.mxu0  ;;  %v9771_v35 = vadd.f32 %v9769_v9, %v9762_v50 }
 0xa02   : > { %v10549_v56 = vadd.f32 %v10544_v39, %v10471_v26  ;;  %v10472_v49 = vadd.f32 %v10468_v63, %v10394_v30  ;;  %v10546_v32 = vpop.f32.mrf.mxu1  ;;  %v12599_v26 = vsub.f32 %v12597_v6, %v653_v3  ;;  %v9772_v63 = vadd.f32 %v9769_v9, %v9763_v23 }
 0xa03   : > { %v10622_v48 = vpop.f32.mrf.mxu0  ;;  %13453 = vtanh.f32 %v9771_v35 }
 0xa04   : > { %v10550_v10 = vadd.f32 %v10546_v32, %v10472_v49  ;;  %v10700_v44 = vpop.f32.mrf.mxu1  ;;  %v10627_v13 = vadd.f32 %v10622_v48, %v10549_v56  ;;  %v15746_v38 = vpop.eup %13449  ;;  %v12600_v32 = vsub.f32 %v12598_v24, %v654_v58  ;;  %13455 = vtanh.f32 %v9772_v63 }
 0xa05   : > { %v10624_v33 = vpop.f32.mrf.mxu0  ;;  %v15748_v15 = vpop.eup %13451 }
 0xa06   : > { %v10702_v16 = vpop.f32.mrf.mxu1  ;;  %v10628_v28 = vadd.f32 %v10624_v33, %v10550_v10  ;;  %v10705_v36 = vadd.f32 %v10700_v44, %v10627_v13  ;;  %v12601_v13 = vmul.f32 %v15746_v38, %v12599_v26 }
 0xa07   : > { %v10778_v47 = vpop.f32.mrf.mxu0 }
 0xa08   : > { %v10856_v45 = vpop.f32.mrf.mxu1  ;;  %v10706_v22 = vadd.f32 %v10702_v16, %v10628_v28  ;;  %v10783_v54 = vadd.f32 %v10778_v47, %v10705_v36 }
 0xa09   : > { %v10780_v42 = vpop.f32.mrf.mxu0 }
 0xa0a   : > { %v10858_v7 = vpop.f32.mrf.mxu1  ;;  %v10784_v27 = vadd.f32 %v10780_v42, %v10706_v22  ;;  %v10861_v41 = vadd.f32 %v10856_v45, %v10783_v54  ;;  %v12602_v45 = vmul.f32 %v15748_v15, %v12600_v32 }
 0xa0b   : > { %v10934_v20 = vpop.f32.mrf.mxu0 }
 0xa0c   : > { %v11012_v57 = vpop.f32.mrf.mxu1  ;;  %v10862_v59 = vadd.f32 %v10858_v7, %v10784_v27  ;;  %v10939_v52 = vadd.f32 %v10934_v20, %v10861_v41  ;;  %v12603_v20 = vadd.f32 %v12601_v13, %v653_v3  ;;  %v12604_v43 = vadd.f32 %v12602_v45, %v654_v58 }
 0xa0d   : > { %v10936_v11 = vpop.f32.mrf.mxu0 }
 0xa0e   : > { %v11014_v51 = vpop.f32.mrf.mxu1  ;;  %v10940_v12 = vadd.f32 %v10936_v11, %v10862_v59  ;;  %v11017_v25 = vadd.f32 %v11012_v57, %v10939_v52  ;;  %v12606_v6 = vmul.f32 %v12604_v43, %v12604_v43 }
 0xa0f   : > { %v11090_v29 = vpop.f32.mrf.mxu0 }
 0xa10   : > { %v11168_v60 = vpop.f32.mrf.mxu1  ;;  %v11018_v10 = vadd.f32 %v11014_v51, %v10940_v12  ;;  %v11095_v47 = vadd.f32 %v11090_v29, %v11017_v25  ;;  %v12608_v35 = vsub.f32 %v12606_v6, %v12604_v43 }
 0xa11   : > { %v11092_v17 = vpop.f32.mrf.mxu0 }
 0xa12   : > { %v11170_v46 = vpop.f32.mrf.mxu1  ;;  %v11096_v42 = vadd.f32 %v11092_v17, %v11018_v10  ;;  %v11173_v40 = vadd.f32 %v11168_v60, %v11095_v47 }
 0xa13   : > { %v11259_v0 = vpop.f32.mrf.mxu0 }
 0xa14   : > { %v11333_v4 = vpop.f32.mrf.mxu1  ;;  %v11174_v51 = vadd.f32 %v11170_v46, %v11096_v42  ;;  %v11182_v50 = vadd.f32 %v11180_v53, %v11173_v40  ;;  %v12591_v40 = vpop.permute.xlu0 %12590 }
 0xa15   : > { %v11261_v2 = vpop.f32.mrf.mxu0  ;;  %v11334_v19 = vadd.f32 %v11333_v4, %v11259_v0  ;;  %v12605_v0 = vmul.f32 %v12603_v20, %v12603_v20 }
 0xa16   : > { %v11335_v55 = vpop.f32.mrf.mxu1  ;;  %v11183_v3 = vadd.f32 %v11180_v53, %v11174_v51  ;;  %13457 = vtanh.f32 %v11182_v50 }
 0xa17   : > { %v11409_v62 = vpop.f32.mrf.mxu0  ;;  %v11336_v37 = vadd.f32 %v11335_v55, %v11261_v2  ;;  %v12607_v46 = vsub.f32 %v12605_v0, %v12603_v20 }
 0xa18   : > { %v11414_v61 = vadd.f32 %v11409_v62, %v11334_v19  ;;  %v11487_v30 = vpop.f32.mrf.mxu1  ;;  %v15752_v19 = vpop.eup %13453  ;;  %13459 = vtanh.f32 %v11183_v3 }
 0xa19   : > { %v11411_v39 = vpop.f32.mrf.mxu0  ;;  %v15754_v62 = vpop.eup %13455 }
 0xa1a   : > { %v11415_v56 = vadd.f32 %v11411_v39, %v11336_v37  ;;  %v11492_v49 = vadd.f32 %v11487_v30, %v11414_v61  ;;  %v11489_v1 = vpop.f32.mrf.mxu1  ;;  %v12609_v37 = vmul.f32 %v15752_v19, %v12607_v46  ;;  %v12610_v63 = vmul.f32 %v15754_v62, %v12608_v35 }
 0xa1b   : > { %v11565_v48 = vpop.f32.mrf.mxu0 }
 0xa1c   : > { %v11493_v44 = vadd.f32 %v11489_v1, %v11415_v56  ;;  %v11570_v33 = vadd.f32 %v11565_v48, %v11492_v49  ;;  %v11643_v34 = vpop.f32.mrf.mxu1  ;;  %v12612_v47 = vadd.f32 %v12610_v63, %v12604_v43 }
 0xa1d   : > { %v11567_v16 = vpop.f32.mrf.mxu0 }
 0xa1e   : > { %v11571_v21 = vadd.f32 %v11567_v16, %v11493_v44  ;;  %v11648_v18 = vadd.f32 %v11643_v34, %v11570_v33  ;;  %v11645_v28 = vpop.f32.mrf.mxu1  ;;  %v12611_v44 = vadd.f32 %v12609_v37, %v12603_v20 }
 0xa1f   : > { %v11721_v5 = vpop.f32.mrf.mxu0 }
 0xa20   : > { %v11649_v14 = vadd.f32 %v11645_v28, %v11571_v21  ;;  %v11726_v36 = vadd.f32 %v11721_v5, %v11648_v18  ;;  %v11799_v7 = vpop.f32.mrf.mxu1  ;;  %v12613_v5 = vmul.f32 %v12611_v44, %v12611_v44 }
 0xa21   : > { %v11723_v8 = vpop.f32.mrf.mxu0 }
 0xa22   : > { %v11727_v22 = vadd.f32 %v11723_v8, %v11649_v14  ;;  %v11804_v57 = vadd.f32 %v11799_v7, %v11726_v36  ;;  %v11801_v11 = vpop.f32.mrf.mxu1  ;;  %v12614_v7 = vmul.f32 %v12612_v47, %v12612_v47 }
 0xa23   : > { %v11877_v54 = vpop.f32.mrf.mxu0  ;;  %v15758_v8 = vpop.eup %13457 }
 0xa24   : > { %v11805_v29 = vadd.f32 %v11801_v11, %v11727_v22  ;;  %v11882_v31 = vadd.f32 %v11877_v54, %v11804_v57  ;;  %v11955_v27 = vpop.f32.mrf.mxu1  ;;  %v12615_v11 = vsub.f32 %v12613_v5, %v12611_v44  ;;  %v12616_v51 = vsub.f32 %v12614_v7, %v12612_v47 }
 0xa25   : > { %v11879_v41 = vpop.f32.mrf.mxu0  ;;  %v15760_v54 = vpop.eup %13459 }
 0xa26   : > { %v11883_v17 = vadd.f32 %v11879_v41, %v11805_v29  ;;  %v11960_v59 = vadd.f32 %v11955_v27, %v11882_v31  ;;  %v11957_v4 = vpop.f32.mrf.mxu1  ;;  %v12617_v29 = vmul.f32 %v15758_v8, %v12615_v11  ;;  %v12618_v31 = vmul.f32 %v15760_v54, %v12616_v51 }
 0xa27   : > { %v12033_v2 = vpop.f32.mrf.mxu0 }
 0xa28   : > { %v11961_v60 = vadd.f32 %v11957_v4, %v11883_v17  ;;  %v12038_v23 = vadd.f32 %v12033_v2, %v11960_v59  ;;  %v12111_v52 = vpop.f32.mrf.mxu1  ;;  %v12619_v27 = vadd.f32 %v12617_v29, %v12611_v44  ;;  %v12620_v53 = vadd.f32 %v12618_v31, %v12612_v47 }
 0xa29   : > { %v12035_v58 = vpop.f32.mrf.mxu0 }
 0xa2a   : > { %v12039_v55 = vadd.f32 %v12035_v58, %v11961_v60  ;;  %v12116_v24 = vadd.f32 %v12111_v52, %v12038_v23  ;;  %v12113_v9 = vpop.f32.mrf.mxu1  ;;  %v12621_v41 = vmul.f32 %v12619_v27, %v12619_v27  ;;  %v12622_v0 = vmul.f32 %v12620_v53, %v12620_v53 }
 0xa2b   : > { %v12189_v12 = vpop.f32.mrf.mxu0 }
 0xa2c   : > { %v12117_v61 = vadd.f32 %v12113_v9, %v12039_v55  ;;  %v12194_v30 = vadd.f32 %v12189_v12, %v12116_v24  ;;  %v12267_v26 = vpop.f32.mrf.mxu1  ;;  %v12623_v50 = vsub.f32 %v12621_v41, %v12619_v27  ;;  %v12624_v59 = vsub.f32 %v12622_v0, %v12620_v53 }
 0xa2d   : > { %v12191_v39 = vpop.f32.mrf.mxu0 }
 0xa2e   : > { %v12195_v25 = vadd.f32 %v12191_v39, %v12117_v61  ;;  %v12272_v56 = vadd.f32 %v12267_v26, %v12194_v30  ;;  %v12269_v49 = vpop.f32.mrf.mxu1 }
 0xa2f   : > { %v12345_v1 = vpop.f32.mrf.mxu0 }
 0xa30   : > { %v12273_v32 = vadd.f32 %v12269_v49, %v12195_v25  ;;  %v12350_v48 = vadd.f32 %v12345_v1, %v12272_v56  ;;  %v12423_v10 = vpop.f32.mrf.mxu1 }
 0xa31   : > { %v12347_v33 = vpop.f32.mrf.mxu0 }
 0xa32   : > { %v12351_v34 = vadd.f32 %v12347_v33, %v12273_v32  ;;  %v12428_v13 = vadd.f32 %v12423_v10, %v12350_v48  ;;  %v12425_v16 = vpop.f32.mrf.mxu1 }
 0xa33   : > { %v12501_v21 = vpop.f32.mrf.mxu0 }
 0xa34   : > { %v12429_v18 = vadd.f32 %v12425_v16, %v12351_v34  ;;  %v12506_v28 = vadd.f32 %v12501_v21, %v12428_v13  ;;  %v12579_v45 = vpop.f32.mrf.mxu1 }
 0xa35   : > { %v12503_v42 = vpop.f32.mrf.mxu0 }
 0xa36   : > { %v12507_v14 = vadd.f32 %v12503_v42, %v12429_v18  ;;  %v12584_v36 = vadd.f32 %v12579_v45, %v12506_v28  ;;  %v12581_v22 = vpop.f32.mrf.mxu1 }
 0xa38   : > { %v12593_v57 = vadd.f32 %v12591_v40, %v12584_v36  ;;  %v12585_v20 = vadd.f32 %v12581_v22, %v12507_v14 }
 0xa3a   : > { %13461 = vtanh.f32 %v12593_v57  ;;  %v12594_v43 = vadd.f32 %v12591_v40, %v12585_v20 }
 0xa3c   : > { %13463 = vtanh.f32 %v12594_v43 }
 0xa47   : > { %v15764_v17 = vpop.eup %13461 }
 0xa48   : > { %v12625_v4 = vmul.f32 %v15764_v17, %v12623_v50 }
 0xa49   : > { %v15767_v6 = vpop.eup %13463 }
 0xa4a   : > { %v12626_v2 = vmul.f32 %v15767_v6, %v12624_v59  ;;  %v12627_v3 = vadd.f32 %v12625_v4, %v12619_v27 }
 0xa4c   : > { %v12628_v60 = vadd.f32 %v12626_v2, %v12620_v53  ;;  %v12629_v23 = vmul.f32 %v12627_v3, %v12627_v3 }
 0xa4e   : > { %v12630_v52 = vmul.f32 %v12628_v60, %v12628_v60  ;;  %v12631_v58 = vsub.f32 %v12629_v23, %v12627_v3 }
 0xa50   : > { %v12632_v46 = vsub.f32 %v12630_v52, %v12628_v60  ;;  %v12633_v55 = vmul.f32 %v15746_v38, %v12631_v58 }
 0xa52   : > { %v12634_v24 = vmul.f32 %v15748_v15, %v12632_v46  ;;  %v12635_v9 = vadd.f32 %v12633_v55, %v12627_v3 }
 0xa54   : > { %v12636_v35 = vadd.f32 %v12634_v24, %v12628_v60  ;;  %v12637_v12 = vmul.f32 %v12635_v9, %v12635_v9 }
 0xa56   : > { %v12638_v37 = vmul.f32 %v12636_v35, %v12636_v35  ;;  %v12639_v61 = vsub.f32 %v12637_v12, %v12635_v9 }
 0xa58   : > { %v12640_v30 = vsub.f32 %v12638_v37, %v12636_v35  ;;  %v12641_v26 = vmul.f32 %v15752_v19, %v12639_v61 }
 0xa5a   : > { %v12642_v39 = vmul.f32 %v15754_v62, %v12640_v30  ;;  %v12643_v63 = vadd.f32 %v12641_v26, %v12635_v9 }
 0xa5c   : > { %v12644_v25 = vadd.f32 %v12642_v39, %v12636_v35  ;;  %v12645_v56 = vmul.f32 %v12643_v63, %v12643_v63 }
 0xa5e   : > { %v12646_v49 = vmul.f32 %v12644_v25, %v12644_v25  ;;  %v12647_v1 = vsub.f32 %v12645_v56, %v12643_v63 }
 0xa60   : > { %v12648_v32 = vsub.f32 %v12646_v49, %v12644_v25  ;;  %v12649_v48 = vmul.f32 %v15758_v8, %v12647_v1 }
 0xa62   : > { %v12650_v10 = vmul.f32 %v15760_v54, %v12648_v32  ;;  %v12651_v44 = vadd.f32 %v12649_v48, %v12643_v63 }
 0xa64   : > { %v12652_v33 = vadd.f32 %v12650_v10, %v12644_v25  ;;  %v12653_v34 = vmul.f32 %v12651_v44, %v12651_v44 }
 0xa66   : > { %v12654_v13 = vmul.f32 %v12652_v33, %v12652_v33  ;;  %v12655_v16 = vsub.f32 %v12653_v34, %v12651_v44 }
 0xa68   : > { %v12656_v47 = vsub.f32 %v12654_v13, %v12652_v33  ;;  %v12657_v21 = vmul.f32 %v15764_v17, %v12655_v16 }
 0xa6a   : > { %v12658_v18 = vmul.f32 %v15767_v6, %v12656_v47  ;;  %v12659_v28 = vadd.f32 %v12657_v21, %v12651_v44 }
 0xa6c   : > { %v12660_v45 = vadd.f32 %v12658_v18, %v12652_v33  ;;  %v12661_v5 = vmul.f32 %v12659_v28, %v12659_v28 }
 0xa6e   : > { %v12662_v42 = vmul.f32 %v12660_v45, %v12660_v45  ;;  %v12663_v14 = vsub.f32 %v12661_v5, %v12659_v28 }
 0xa70   : > { %v12664_v36 = vsub.f32 %v12662_v42, %v12660_v45  ;;  %v12665_v7 = vmul.f32 %v15746_v38, %v12663_v14 }
 0xa72   : > { %v12666_v40 = vmul.f32 %v15748_v15, %v12664_v36  ;;  %v12667_v22 = vadd.f32 %v12665_v7, %v12659_v28 }
 0xa74   : > { %v12668_v57 = vadd.f32 %v12666_v40, %v12660_v45  ;;  %v12669_v20 = vmul.f32 %v12667_v22, %v12667_v22 }
 0xa76   : > { %v12670_v11 = vmul.f32 %v12668_v57, %v12668_v57  ;;  %v12671_v43 = vsub.f32 %v12669_v20, %v12667_v22 }
 0xa78   : > { %v12672_v51 = vsub.f32 %v12670_v11, %v12668_v57  ;;  %v12673_v29 = vmul.f32 %v15752_v19, %v12671_v43 }
 0xa7a   : > { %v12674_v31 = vmul.f32 %v15754_v62, %v12672_v51  ;;  %v12675_v27 = vadd.f32 %v12673_v29, %v12667_v22 }
 0xa7c   : > { %v12676_v53 = vadd.f32 %v12674_v31, %v12668_v57  ;;  %v12677_v41 = vmul.f32 %v12675_v27, %v12675_v27 }
 0xa7e   : > { %v12678_v0 = vmul.f32 %v12676_v53, %v12676_v53  ;;  %v12679_v50 = vsub.f32 %v12677_v41, %v12675_v27 }
 0xa80   : > { %v12680_v59 = vsub.f32 %v12678_v0, %v12676_v53  ;;  %v12681_v4 = vmul.f32 %v15758_v8, %v12679_v50 }
 0xa82   : > { %v12682_v2 = vmul.f32 %v15760_v54, %v12680_v59  ;;  %v12683_v3 = vadd.f32 %v12681_v4, %v12675_v27 }
 0xa84   : > { %v12684_v60 = vadd.f32 %v12682_v2, %v12676_v53  ;;  %v12685_v23 = vmul.f32 %v12683_v3, %v12683_v3 }
 0xa86   : > { %v12686_v52 = vmul.f32 %v12684_v60, %v12684_v60  ;;  %v12687_v58 = vsub.f32 %v12685_v23, %v12683_v3 }
 0xa88   : > { %v12688_v46 = vsub.f32 %v12686_v52, %v12684_v60  ;;  %v12689_v55 = vmul.f32 %v15764_v17, %v12687_v58 }
 0xa8a   : > { %v12690_v24 = vmul.f32 %v15767_v6, %v12688_v46  ;;  %v12691_v9 = vadd.f32 %v12689_v55, %v12683_v3 }
 0xa8c   : > { %v12692_v35 = vadd.f32 %v12690_v24, %v12684_v60  ;;  %v12693_v12 = vmul.f32 %v12691_v9, %v12691_v9 }
 0xa8e   : > { %v12694_v37 = vmul.f32 %v12692_v35, %v12692_v35  ;;  %v12695_v61 = vsub.f32 %v12693_v12, %v12691_v9 }
 0xa90   : > { %v12696_v30 = vsub.f32 %v12694_v37, %v12692_v35  ;;  %v12697_v26 = vmul.f32 %v15746_v38, %v12695_v61 }
 0xa92   : > { %v12698_v39 = vmul.f32 %v15748_v15, %v12696_v30  ;;  %v12699_v63 = vadd.f32 %v12697_v26, %v12691_v9 }
 0xa94   : > { %v12700_v25 = vadd.f32 %v12698_v39, %v12692_v35  ;;  %v12701_v56 = vmul.f32 %v12699_v63, %v12699_v63 }
 0xa96   : > { %v12702_v49 = vmul.f32 %v12700_v25, %v12700_v25  ;;  %v12703_v1 = vsub.f32 %v12701_v56, %v12699_v63 }
 0xa98   : > { %v12704_v32 = vsub.f32 %v12702_v49, %v12700_v25  ;;  %v12705_v48 = vmul.f32 %v15752_v19, %v12703_v1 }
 0xa9a   : > { %v12706_v10 = vmul.f32 %v15754_v62, %v12704_v32  ;;  %v12707_v44 = vadd.f32 %v12705_v48, %v12699_v63 }
 0xa9c   : > { %v12708_v33 = vadd.f32 %v12706_v10, %v12700_v25  ;;  %v12709_v34 = vmul.f32 %v12707_v44, %v12707_v44 }
 0xa9e   : > { %v12710_v13 = vmul.f32 %v12708_v33, %v12708_v33  ;;  %v12711_v16 = vsub.f32 %v12709_v34, %v12707_v44 }
 0xaa0   : > { %v12712_v47 = vsub.f32 %v12710_v13, %v12708_v33  ;;  %v12713_v21 = vmul.f32 %v15758_v8, %v12711_v16 }
 0xaa2   : > { %v12714_v18 = vmul.f32 %v15760_v54, %v12712_v47  ;;  %v12715_v28 = vadd.f32 %v12713_v21, %v12707_v44 }
 0xaa4   : > { %v12716_v45 = vadd.f32 %v12714_v18, %v12708_v33  ;;  %v12717_v5 = vmul.f32 %v12715_v28, %v12715_v28 }
 0xaa6   : > { %v12718_v42 = vmul.f32 %v12716_v45, %v12716_v45  ;;  %v12719_v14 = vsub.f32 %v12717_v5, %v12715_v28 }
 0xaa8   : > { %v12720_v36 = vsub.f32 %v12718_v42, %v12716_v45  ;;  %v12721_v7 = vmul.f32 %v15764_v17, %v12719_v14 }
 0xaaa   : > { %v12722_v40 = vmul.f32 %v15767_v6, %v12720_v36  ;;  %v12723_v22 = vadd.f32 %v12721_v7, %v12715_v28 }
 0xaac   : > { %v12724_v57 = vadd.f32 %v12722_v40, %v12716_v45  ;;  %v12725_v20 = vmul.f32 %v12723_v22, %v12723_v22 }
 0xaae   : > { %v12726_v11 = vmul.f32 %v12724_v57, %v12724_v57  ;;  %v12727_v43 = vsub.f32 %v12725_v20, %v12723_v22 }
 0xab0   : > { %v12728_v51 = vsub.f32 %v12726_v11, %v12724_v57  ;;  %v12729_v29 = vmul.f32 %v15746_v38, %v12727_v43 }
 0xab2   : > { %v12730_v31 = vmul.f32 %v15748_v15, %v12728_v51  ;;  %v12731_v27 = vadd.f32 %v12729_v29, %v12723_v22 }
 0xab4   : > { %v12732_v53 = vadd.f32 %v12730_v31, %v12724_v57  ;;  %v12733_v41 = vmul.f32 %v12731_v27, %v12731_v27 }
 0xab6   : > { %v12734_v0 = vmul.f32 %v12732_v53, %v12732_v53  ;;  %v12735_v50 = vsub.f32 %v12733_v41, %v12731_v27 }
 0xab8   : > { %v12736_v59 = vsub.f32 %v12734_v0, %v12732_v53  ;;  %v12737_v4 = vmul.f32 %v15752_v19, %v12735_v50 }
 0xaba   : > { %v12738_v2 = vmul.f32 %v15754_v62, %v12736_v59  ;;  %v12739_v3 = vadd.f32 %v12737_v4, %v12731_v27 }
 0xabc   : > { %v12740_v60 = vadd.f32 %v12738_v2, %v12732_v53  ;;  %v12741_v23 = vmul.f32 %v12739_v3, %v12739_v3 }
 0xabe   : > { %v12742_v52 = vmul.f32 %v12740_v60, %v12740_v60  ;;  %v12743_v58 = vsub.f32 %v12741_v23, %v12739_v3 }
 0xac0   : > { %v12744_v38 = vsub.f32 %v12742_v52, %v12740_v60  ;;  %v12745_v15 = vmul.f32 %v15758_v8, %v12743_v58 }
 0xac2   : > { %v12746_v46 = vmul.f32 %v15760_v54, %v12744_v38  ;;  %v12747_v55 = vadd.f32 %v12745_v15, %v12739_v3 }
 0xac4   : > { %v12748_v24 = vadd.f32 %v12746_v46, %v12740_v60  ;;  %v12749_v9 = vmul.f32 %v12747_v55, %v12747_v55 }
 0xac6   : > { %v12750_v35 = vmul.f32 %v12748_v24, %v12748_v24  ;;  %v12751_v19 = vsub.f32 %v12749_v9, %v12747_v55 }
 0xac8   : > { %v12752_v62 = vsub.f32 %v12750_v35, %v12748_v24  ;;  %v12753_v12 = vmul.f32 %v15764_v17, %v12751_v19 }
 0xaca   : > { %v12754_v37 = vmul.f32 %v15767_v6, %v12752_v62  ;;  %v12755_v61 = vadd.f32 %v12753_v12, %v12747_v55 }
 0xacc   : > { %v12756_v30 = vadd.f32 %v12754_v37, %v12748_v24  ;;  %12757 = vst [vmem:[%s637_s26] sm:$0xff] %v12755_v61 }
 0xace   : > { %12758 = vst [vmem:[%s637_s26 + $0x8] sm:$0xff] %v12756_v30 }
 0xacf   : > { %13478 = shalt.err (!%p13475_p3)
}
 0xad0   : > { %s13479_s29 = scalar_lea.hbm %s12772_s0, 256  ;;  %s13483_s25 = scalar_lea.hbm %s15856_s20, 512 }
 0xad1   : > { %p13480_p4 = scmp.ne.s32.totalorder %s12772_s0, %s13479_s29  ;;  %p13484_p9 = scmp.lt.s32.totalorder %s12772_s0, %s15856_s20 }
 0xad2   : > { %p13485_p10 = scmp.lt.s32.totalorder %s13483_s25, %s13479_s29 }
 0xad3   : > { %p13481_p7 = pnand %p13480_p4, %p13681_p5 }
 0xad4   : > { %p13486_p11 = por %p13485_p10, %p13484_p9 }
 0xad5   : > { %p13482_p8 = pneg %p13481_p7 }
 0xad7   : > { %p13487_p12 = pnand %p13486_p11, %p13482_p8 }
 0xad9   : > { %13490 = shalt.err (!%p13487_p12)
}
 0xada   : > { %13398 = dma.vmem_to_hbm [thread:$0]  (%p13681_p5), %s12775_s23, 256, %s12772_s0, %s12760_s1  }
 0xadb PF: > { %s15986_s21 = sld [smem:[#allocation7_spill]] }
 0xadc   : > { %s15987_s6 = sld [smem:[#allocation5_spill]] }
 0xae1   : > { %p13404_p13 = scmp.ge.s32.totalorder %s15986_s21, 2 }
 0xae2   : > { %s12786_s28 = sand.u32 1, %s15987_s6  }
 0xae3   : > { %p13401_p0 = pnand %p13404_p13, %p13685_p6  ;;  %s12787_s24 = scalar_lea.sflag [#allocation3], %s12786_s28 }
 0xae5   : > { %p13402_p1 = pneg %p13401_p0 }
 0xae7   : > { %13508 = dma.done.wait (%p13402_p1), %s12787_s24, 256  }
 0xae8   : > { %13510 = vsyncadd (%p13402_p1), %s12787_s24, 4294967040  ;;  %s15989_s24 = sld [smem:[#allocation8_spill]]  ;;  %s15992_s1 = smov %s13517_s22 }
 0xae9   : > { %s15990_s29 = sld [smem:[#allocation6_spill]] }
 0xaea   : > { %s15991_s23 = sld [smem:[#allocation9_spill]] }
 0xaee   : > { %p30_p2 = scmp.ge.s32.totalorder %s15989_s24, 4  }
 0xaef   : > { %s15993_s22 = smov %s15990_s29 }
 0xaf0   :  { %32 = sbr.rel (!%p30_p2) target bundleno = 10 (0xa), region = 275 }
 0xaf5   :  { %12792 = vsyncpa [#allocation3], 1 }
 0xaf6   :  { %12794 = vsyncpa [#allocation3 + $0x1], 1 }

</bundles_post_ra>
